<compile_context>
chip_gen: v7x
topology: tpu7x:2x2x1
jax: 0.10.0
libtpu: 0.0.40
codegen_flags: <defaults>
</compile_context>

<pallas_src>
import functools

import jax
import jax.numpy as jnp
from jax.experimental import pallas as pl
from jax.experimental.pallas import tpu as pltpu


_LANE = 128        # minimum output-channel tile (lane-dense stores)
_EPS = 1e-5
_SLOPE = 0.2


def _round_up(x, m):
    return ((x + m - 1) // m) * m


# ------------------------------ Pallas kernel ------------------------------ #

def _conv_kernel(*refs, offs, m, norm, act, has_bias, has_res, has_mask,
                 inv_cnt):
    """Implicit-GEMM conv + optional bias / InstanceNorm / residual / LeakyReLU.

    refs (in order):
      x_ref    (Ls, K)        flattened padded source plane, bf16
      w_ref    (T, K, ct)     per-tap weights, bf16
     [mask_ref (m, 1)         validity mask, f32]            (has_mask)
     [b_ref    (1, ct)        bias, f32]                     (has_bias)
     [r_ref    (m, ct)        residual, bf16]                (has_res)
      o_ref    (m, ct)        output

    Garbage rows/columns (padding of the pseudo-output layout) are excluded
    from the norm statistics via `mask` and sliced off on the host.
    """
    it = iter(refs)
    x_ref = next(it)
    w_ref = next(it)
    mask_ref = next(it) if has_mask else None
    b_ref = next(it) if has_bias else None
    r_ref = next(it) if has_res else None
    o_ref = next(it)

    # Tap loop: static flat offsets into the source plane -> MXU matmuls.
    y = jnp.dot(x_ref[pl.ds(offs[0], m), :], w_ref[0],
                preferred_element_type=jnp.float32)
    for t in range(1, len(offs)):
        y = y + jnp.dot(x_ref[pl.ds(offs[t], m), :], w_ref[t],
                        preferred_element_type=jnp.float32)

    if has_bias:
        y = y + b_ref[...]

    if norm:  # InstanceNorm2d(affine=False), fused single-sweep statistics.
        if has_mask:
            msk = mask_ref[...]                       # (m, 1) f32 0/1
            ym = y * msk
            s1 = jnp.sum(ym, axis=0, keepdims=True)
            s2 = jnp.sum(ym * y, axis=0, keepdims=True)
        else:
            s1 = jnp.sum(y, axis=0, keepdims=True)
            s2 = jnp.sum(y * y, axis=0, keepdims=True)
        mean = s1 * inv_cnt
        var = jnp.maximum(s2 * inv_cnt - mean * mean, 0.0)
        y = (y - mean) * jax.lax.rsqrt(var + _EPS)

    if has_res:
        y = y + r_ref[...].astype(jnp.float32)

    if act:  # LeakyReLU(0.2)
        y = jnp.maximum(y, _SLOPE * y)

    o_ref[...] = y.astype(o_ref.dtype)


def _pallas_conv(src, w_taps, offs, m, valid_cnt, *, norm, act, mask=None,
                 bias=None, residual=None, out_dtype=jnp.bfloat16):
    """src: [N, Ls, K] bf16; w_taps: [T, K, Cpad] bf16 -> [N, m, Cpad]."""
    n, ls, k = src.shape
    t, _, cp = w_taps.shape
    assert cp % _LANE == 0
    # Wider channel tile fills the 256-wide v6e/v7x MXU on the big layers.
    ct = 256 if cp % 256 == 0 else _LANE
    n_ct = cp // ct

    # Pick grid ordering by HBM traffic: keep the larger operand resident.
    src_bytes = ls * k * 2
    wt_bytes = t * k * ct * 2
    traffic_b_outer = n * src_bytes + n * n_ct * wt_bytes
    traffic_c_outer = n_ct * wt_bytes + n * n_ct * src_bytes
    chan_outer = traffic_c_outer < traffic_b_outer

    if chan_outer:
        grid = (n_ct, n)
        gix = lambda i, j: (j, i)          # -> (batch, channel-tile)
    else:
        grid = (n, n_ct)
        gix = lambda i, j: (i, j)

    src_map = lambda i, j: (gix(i, j)[0], 0, 0)
    w_map = lambda i, j: (0, 0, gix(i, j)[1])
    out_map = lambda i, j: (gix(i, j)[0], 0, gix(i, j)[1])
    mask_map = lambda i, j: (0, 0)
    bias_map = lambda i, j: (0, gix(i, j)[1])

    in_specs = [
        pl.BlockSpec((None, ls, k), src_map),
        pl.BlockSpec((t, k, ct), w_map),
    ]
    args = [src, w_taps]
    if mask is not None:
        in_specs.append(pl.BlockSpec((m, 1), mask_map))
        args.append(mask)
    if bias is not None:
        in_specs.append(pl.BlockSpec((1, ct), bias_map))
        args.append(bias.reshape(1, cp).astype(jnp.float32))
    if residual is not None:
        in_specs.append(pl.BlockSpec((None, m, ct), out_map))
        args.append(residual)

    # Architecture-aware VMEM budget from the actual block sizes.
    out_bytes = m * ct * jnp.dtype(out_dtype).itemsize
    res_bytes = m * ct * 2 if residual is not None else 0
    mask_bytes = m * 4 if mask is not None else 0
    need = (2 * (src_bytes + wt_bytes + out_bytes + res_bytes + mask_bytes)
            + 4 * m * ct * 4 + (8 << 20))
    cap = 100 << 20
    try:
        cap = int(pltpu.get_tpu_info().vmem_capacity_bytes * 9 // 10)
    except Exception:
        pass
    vmem_limit = int(min(max(need, 32 << 20), cap))

    kernel = functools.partial(
        _conv_kernel, offs=tuple(int(o) for o in offs), m=m, norm=norm,
        act=act, has_bias=bias is not None, has_res=residual is not None,
        has_mask=mask is not None, inv_cnt=1.0 / float(valid_cnt))

    return pl.pallas_call(
        kernel,
        out_shape=jax.ShapeDtypeStruct((n, m, cp), out_dtype),
        grid=grid,
        in_specs=in_specs,
        out_specs=pl.BlockSpec((None, m, ct), out_map),
        compiler_params=pltpu.CompilerParams(
            dimension_semantics=("parallel", "parallel"),
            vmem_limit_bytes=vmem_limit),
    )(*args)


# ------------------------ host-side layout prep (XLA) ----------------------- #

def _prep_stride1(x, w, pad, co_pad):
    """Stride-1 kxk conv: pad + flatten; taps are static flat row offsets."""
    co, ci, k, _ = w.shape
    x = x[..., :ci]                                   # drop zero channel pad
    n, h, wd, _ = x.shape
    hs, ws = h + 2 * pad, wd + 2 * pad
    ho, wo = hs - k + 1, ws - k + 1
    wsp = _round_up(ws, 8)                            # sublane-aligned rows
    xp = jnp.pad(x, ((0, 0), (pad, pad + 1), (pad, pad + wsp - ws), (0, 0)))
    src = xp.reshape(n, (hs + 1) * wsp, ci)
    w_hwio = jnp.transpose(w, (2, 3, 1, 0))           # (k,k,ci,co)
    w_hwio = jnp.pad(w_hwio, ((0, 0), (0, 0), (0, 0), (0, co_pad - co)))
    w_taps = w_hwio.reshape(k * k, ci, co_pad)
    offs = [ky * wsp + kx for ky in range(k) for kx in range(k)]
    m = ho * wsp
    return src, w_taps, offs, ho, wo, wsp, m


def _prep_stride2(x, w, pad, co_pad):
    """Stride-2 4x4 conv -> space-to-depth (factor 2) + stride-1 2x2 conv."""
    co, ci, k, _ = w.shape                            # k == 4
    x = x[..., :ci]
    n, h, wd, _ = x.shape
    hp, wp = h + 2 * pad, wd + 2 * pad
    ho = (hp - k) // 2 + 1
    wo = (wp - k) // 2 + 1
    eh, ew = hp % 2, wp % 2                           # pad to even for s2d
    xp = jnp.pad(x, ((0, 0), (pad, pad + eh), (pad, pad + ew), (0, 0)))
    hph, wph = (hp + eh) // 2, (wp + ew) // 2
    xs = xp.reshape(n, hph, 2, wph, 2, ci)
    xs = xs.transpose(0, 1, 3, 2, 4, 5).reshape(n, hph, wph, 4 * ci)
    wsp = _round_up(wph, 8)
    xs = jnp.pad(xs, ((0, 0), (0, 2), (0, wsp - wph), (0, 0)))  # safety rows
    src = xs.reshape(n, (hph + 2) * wsp, 4 * ci)
    w_hwio = jnp.transpose(w, (2, 3, 1, 0))           # (4,4,ci,co)
    w_hwio = jnp.pad(w_hwio, ((0, 0), (0, 0), (0, 0), (0, co_pad - co)))
    w_taps = w_hwio.reshape(2, 2, 2, 2, ci, co_pad)   # (a,py,b,px,ci,co)
    w_taps = w_taps.transpose(0, 2, 1, 3, 4, 5).reshape(4, 4 * ci, co_pad)
    offs = [a * wsp + b for a in range(2) for b in range(2)]
    m = ho * wsp
    return src, w_taps, offs, ho, wo, wsp, m


def _prep_im2col_s2(x, w, pad, co_pad):
    """First stride-2 layer (tiny C_in): full im2col, single tap, K = 16*ci."""
    co, ci, k, _ = w.shape                            # k == 4
    x = x[..., :ci]
    n, h, wd, _ = x.shape
    hp, wp = h + 2 * pad, wd + 2 * pad
    ho = (hp - k) // 2 + 1
    wo = (wp - k) // 2 + 1
    xp = jnp.pad(x, ((0, 0), (pad, pad), (pad, pad), (0, 0)))
    cols = []
    for ky in range(k):
        for kx in range(k):
            cols.append(jax.lax.slice(
                xp, (0, ky, kx, 0),
                (n, ky + 2 * (ho - 1) + 1, kx + 2 * (wo - 1) + 1, ci),
                (1, 2, 2, 1)))
    patches = jnp.concatenate(cols, axis=-1)          # (n, ho, wo, k*k*ci)
    valid = ho * wo
    m = _round_up(valid, 8)
    src = patches.reshape(n, valid, k * k * ci)
    src = jnp.pad(src, ((0, 0), (0, m - valid), (0, 0)))
    w_hwio = jnp.transpose(w, (2, 3, 1, 0)).reshape(k * k * ci, co)
    w_taps = jnp.pad(w_hwio, ((0, 0), (0, co_pad - co)))
    w_taps = w_taps.reshape(1, k * k * ci, co_pad)
    return src, w_taps, [0], ho, wo, m


def conv_layer(x_nhwc, w, b, *, stride, pad, norm, act, residual=None,
               out_dtype=jnp.bfloat16):
    """x_nhwc: [N,H,W,C] (channels possibly zero-padded); w: [Cout,Cin,k,k].
    Returns valid [N,Ho,Wo,Cout_pad] with Cout zero-padded to 128*j."""
    n = x_nhwc.shape[0]
    co, ci = int(w.shape[0]), int(w.shape[1])
    co_pad = _round_up(co, _LANE)

    flat = False
    if stride == 2:
        if 4 * ci <= 32:                              # first layer: im2col
            src, w_taps, offs, ho, wo, m = _prep_im2col_s2(x_nhwc, w, pad,
                                                           co_pad)
            w_stride, flat = wo, True
        else:
            src, w_taps, offs, ho, wo, w_stride, m = _prep_stride2(
                x_nhwc, w, pad, co_pad)
    else:
        src, w_taps, offs, ho, wo, w_stride, m = _prep_stride1(
            x_nhwc, w, pad, co_pad)

    valid = ho * wo
    mask = None
    if norm and valid != m:                           # exclude garbage rows/cols
        if flat:
            msk = jnp.arange(m) < valid
        else:
            msk = (jnp.arange(m) % w_stride) < wo
        mask = msk.astype(jnp.float32).reshape(m, 1)

    bias = None
    if not norm:      # bias is exactly cancelled by InstanceNorm's mean-sub
        bias = jnp.pad(b, (0, co_pad - co))

    res = None
    if residual is not None:
        assert not flat and residual.shape[-1] == co_pad
        res = jnp.pad(residual, ((0, 0), (0, 0), (0, w_stride - wo), (0, 0)))
        res = res.reshape(n, m, co_pad).astype(jnp.bfloat16)

    y = _pallas_conv(src.astype(jnp.bfloat16), w_taps.astype(jnp.bfloat16),
                     offs, m, valid, norm=norm, act=act, mask=mask,
                     bias=bias, residual=res, out_dtype=out_dtype)
    if flat:
        return y[:, :valid, :].reshape(n, ho, wo, co_pad)
    return y.reshape(n, ho, w_stride, co_pad)[:, :, :wo, :]


# ----------------------------- Parameter init ------------------------------- #

def init_params(key, input_nc, ndf=64, n_layers=3, num_resnetblocks=1):
    keys = jax.random.split(key, 128)
    kidx = iter(range(128))

    def conv_p(c_in, c_out, k):
        w = 0.02 * jax.random.normal(keys[next(kidx)], (c_out, c_in, k, k),
                                     jnp.float32)
        b = jnp.zeros((c_out,), jnp.float32)
        return w, b

    channels = [(input_nc, ndf)]
    nf = ndf
    for _ in range(1, n_layers):
        nf_prev, nf = nf, min(nf * 2, 512)
        channels.append((nf_prev, nf))

    blocks = []
    for (ci, co) in channels:
        dw, db = conv_p(ci, co, 4)
        res = []
        for _ in range(num_resnetblocks):
            w1, b1 = conv_p(co, co, 3)
            w2, b2 = conv_p(co, co, 3)
            res.append(dict(w1=w1, b1=b1, w2=w2, b2=b2))
        blocks.append(dict(down_w=dw, down_b=db, res=res))

    nf_prev, nf = nf, min(nf * 2, 512)
    pen_w, pen_b = conv_p(nf_prev, nf, 4)   # stride-1 conv + norm + LeakyReLU
    fin_w, fin_b = conv_p(nf, 1, 4)         # final stride-1 conv -> 1 channel
    return dict(blocks=blocks, pen_w=pen_w, pen_b=pen_b,
                fin_w=fin_w, fin_b=fin_b)


# -------------------------------- Forward ----------------------------------- #

def nlayer_res_discriminator_forward(params, x_nchw, cond_nchw):
    # forward: input = torch.cat((input, cond), 1); return self.model(input)
    h = jnp.concatenate([x_nchw, cond_nchw], axis=1)          # NCHW concat
    h = jnp.transpose(h, (0, 2, 3, 1)).astype(jnp.bfloat16)   # -> NHWC, bf16

    for blk in params['blocks']:
        # strided 4x4 conv + InstanceNorm + LeakyReLU(0.2)
        h = conv_layer(h, blk['down_w'], blk['down_b'],
                       stride=2, pad=2, norm=True, act=True)
        # residual 3x3 blocks: conv-norm-act-conv-norm + skip
        # TODO(synk): fuse the two convs of each resnet block into one
        #             pallas_call to avoid one HBM round-trip of `r`.
        for rb in blk['res']:
            r = conv_layer(h, rb['w1'], rb['b1'],
                           stride=1, pad=1, norm=True, act=True)
            h = conv_layer(r, rb['w2'], rb['b2'],
                           stride=1, pad=1, norm=True, act=False, residual=h)

    # penultimate: Conv2d(nf_prev, nf, 4, stride=1, pad=2) + norm + LeakyReLU
    h = conv_layer(h, params['pen_w'], params['pen_b'],
                   stride=1, pad=2, norm=True, act=True)
    # final: Conv2d(nf, 1, 4, stride=1, pad=2), no sigmoid (use_sigmoid=False)
    h = conv_layer(h, params['fin_w'], params['fin_b'],
                   stride=1, pad=2, norm=False, act=False,
                   out_dtype=jnp.float32)
    h = h[..., :1]                                            # drop channel pad
    return jnp.transpose(h, (0, 3, 1, 2))                     # -> NCHW


# ---------------------------------- main ------------------------------------ #

if __name__ == "__main__":
    key = jax.random.PRNGKey(0)
    k_x, k_c, k_p = jax.random.split(key, 3)

    # small shapes: batch=2, image 3ch + condition 1ch, 16x16 spatial, ndf=16
    x = jax.random.normal(k_x, (2, 3, 16, 16), jnp.float32)
    cond = jax.random.normal(k_c, (2, 1, 16, 16), jnp.float32)

    input_nc = x.shape[1] + cond.shape[1]   # 4
    params = init_params(k_p, input_nc=input_nc, ndf=16,
                         n_layers=3, num_resnetblocks=1)

    fwd = jax.jit(nlayer_res_discriminator_forward)
    out = jax.block_until_ready(fwd(params, x, cond))

    # 16 -> 9 -> 5 -> 3 (stride-2 blocks) -> 4 -> 5 (stride-1 convs), 1 channel
    assert out.shape == (2, 1, 5, 5), out.shape
    assert bool(jnp.all(jnp.isfinite(out)))
    print("KERNEL_OK")
</pallas_src>

<mosaic_0001>
module attributes {stable_mosaic.version = 11 : i64} {
  func.func @_conv_kernel(%arg0: i32, %arg1: i32, %arg2: memref<1x88x64xbf16, #tpu.memory_space<vmem>>, %arg3: memref<1x64x128xbf16, #tpu.memory_space<vmem>>, %arg4: memref<88x1xf32, #tpu.memory_space<vmem>>, %arg5: memref<1x88x128xbf16, #tpu.memory_space<vmem>>) attributes {dimension_semantics = [#tpu.dimension_semantics<parallel>, #tpu.dimension_semantics<parallel>], iteration_bounds = array<i64: 1, 2>, scalar_prefetch = 0 : i64, scratch_operands = 0 : i64, tpu.core_type = #tpu.core_type<tc>, window_params = [{transform_indices = @transform_0, window_bounds = array<i64: 1, 88, 64>}, {transform_indices = @transform_1, window_bounds = array<i64: 1, 64, 128>}, {pipeline_mode = #tpu.pipeline_mode<synchronous>, transform_indices = @transform_2, window_bounds = array<i64: 88, 1>}, {transform_indices = @transform_3, window_bounds = array<i64: 1, 88, 128>}]} {
    %c0 = arith.constant 0 : index
    %c0_0 = arith.constant 0 : index
    %c0_1 = arith.constant 0 : index
    %0 = vector.load %arg2[%c0, %c0_0, %c0_1] : memref<1x88x64xbf16, #tpu.memory_space<vmem>>, vector<1x88x64xbf16>
    %1 = vector.shape_cast %0 : vector<1x88x64xbf16> to vector<88x64xbf16>
    %c0_2 = arith.constant 0 : index
    %c0_3 = arith.constant 0 : index
    %c0_4 = arith.constant 0 : index
    %2 = vector.load %arg3[%c0_2, %c0_3, %c0_4] : memref<1x64x128xbf16, #tpu.memory_space<vmem>>, vector<1x64x128xbf16>
    %3 = vector.shape_cast %2 : vector<1x64x128xbf16> to vector<64x128xbf16>
    %cst = arith.constant dense<0.000000e+00> : vector<88x128xf32>
    %4 = tpu.matmul %1, %3, %cst {dimension_numbers = #tpu.dot_dimension_numbers<[1], [0], [0], [1], [0, 0, 1, 1], [], []>} : vector<88x64xbf16>, vector<64x128xbf16>, vector<88x128xf32> -> vector<88x128xf32>
    %c0_5 = arith.constant 0 : index
    %c0_6 = arith.constant 0 : index
    %5 = vector.load %arg4[%c0_5, %c0_6] : memref<88x1xf32, #tpu.memory_space<vmem>>, vector<88x1xf32>
    %6 = vector.broadcast %5 : vector<88x1xf32> to vector<88x128xf32>
    %7 = arith.mulf %4, %6 : vector<88x128xf32>
    %cst_7 = arith.constant dense<0.000000e+00> : vector<128xf32>
    %8 = vector.multi_reduction <add>, %7, %cst_7 [0] : vector<88x128xf32> to vector<128xf32>
    %9 = vector.shape_cast %8 : vector<128xf32> to vector<1x128xf32>
    %10 = arith.mulf %7, %4 : vector<88x128xf32>
    %cst_8 = arith.constant dense<0.000000e+00> : vector<128xf32>
    %11 = vector.multi_reduction <add>, %10, %cst_8 [0] : vector<88x128xf32> to vector<128xf32>
    %12 = vector.shape_cast %11 : vector<128xf32> to vector<1x128xf32>
    %cst_9 = arith.constant 0.0123456791 : f32
    %13 = vector.broadcast %cst_9 : f32 to vector<1x128xf32>
    %14 = arith.mulf %9, %13 : vector<1x128xf32>
    %cst_10 = arith.constant 0.0123456791 : f32
    %15 = vector.broadcast %cst_10 : f32 to vector<1x128xf32>
    %16 = arith.mulf %12, %15 : vector<1x128xf32>
    %17 = arith.mulf %14, %14 : vector<1x128xf32>
    %18 = arith.subf %16, %17 : vector<1x128xf32>
    %cst_11 = arith.constant 0.000000e+00 : f32
    %19 = vector.broadcast %cst_11 : f32 to vector<1x128xf32>
    %20 = arith.maximumf %18, %19 : vector<1x128xf32>
    %21 = vector.broadcast %14 : vector<1x128xf32> to vector<88x128xf32>
    %22 = arith.subf %4, %21 : vector<88x128xf32>
    %cst_12 = arith.constant 9.99999974E-6 : f32
    %23 = vector.broadcast %cst_12 : f32 to vector<1x128xf32>
    %24 = arith.addf %20, %23 : vector<1x128xf32>
    %25 = math.rsqrt %24 : vector<1x128xf32>
    %26 = vector.broadcast %25 : vector<1x128xf32> to vector<88x128xf32>
    %27 = arith.mulf %22, %26 : vector<88x128xf32>
    %cst_13 = arith.constant 2.000000e-01 : f32
    %28 = vector.broadcast %cst_13 : f32 to vector<88x128xf32>
    %29 = arith.mulf %28, %27 : vector<88x128xf32>
    %30 = arith.maximumf %27, %29 : vector<88x128xf32>
    %31 = arith.truncf %30 : vector<88x128xf32> to vector<88x128xbf16>
    %c0_14 = arith.constant 0 : index
    %c0_15 = arith.constant 0 : index
    %c0_16 = arith.constant 0 : index
    %32 = vector.load %arg5[%c0_14, %c0_15, %c0_16] : memref<1x88x128xbf16, #tpu.memory_space<vmem>>, vector<1x88x128xbf16>
    %33 = vector.shape_cast %32 : vector<1x88x128xbf16> to vector<88x128xbf16>
    %34 = vector.shape_cast %31 : vector<88x128xbf16> to vector<1x88x128xbf16>
    tpu.vector_store %arg5[%c0_14, %c0_15, %c0_16], %34 {strides = array<i32>} : memref<1x88x128xbf16, #tpu.memory_space<vmem>>, vector<1x88x128xbf16>,
    return
  }
  func.func @transform_0(%arg0: i32, %arg1: i32) -> (i32, i32, i32) {
    %c0_i32 = arith.constant 0 : i32
    %c0_i32_0 = arith.constant 0 : i32
    %c0_i32_1 = arith.constant 0 : i32
    return %arg1, %c0_i32, %c0_i32_0 : i32, i32, i32
  }
  func.func @transform_1(%arg0: i32, %arg1: i32) -> (i32, i32, i32) {
    %c0_i32 = arith.constant 0 : i32
    %c0_i32_0 = arith.constant 0 : i32
    %c0_i32_1 = arith.constant 0 : i32
    return %c0_i32, %c0_i32_0, %arg0 : i32, i32, i32
  }
  func.func @transform_2(%arg0: i32, %arg1: i32) -> (i32, i32) {
    %c0_i32 = arith.constant 0 : i32
    %c0_i32_0 = arith.constant 0 : i32
    %c0_i32_1 = arith.constant 0 : i32
    return %c0_i32, %c0_i32_0 : i32, i32
  }
  func.func @transform_3(%arg0: i32, %arg1: i32) -> (i32, i32, i32) {
    %c0_i32 = arith.constant 0 : i32
    %c0_i32_0 = arith.constant 0 : i32
    return %arg1, %c0_i32, %arg0 : i32, i32, i32
  }
}

module attributes {stable_mosaic.version = 11 : i64} {
  func.func @_conv_kernel(%arg0: i32, %arg1: i32, %arg2: memref<1x192x16xbf16, #tpu.memory_space<vmem>>, %arg3: memref<9x16x128xbf16, #tpu.memory_space<vmem>>, %arg4: memref<144x1xf32, #tpu.memory_space<vmem>>, %arg5: memref<1x144x128xbf16, #tpu.memory_space<vmem>>) attributes {dimension_semantics = [#tpu.dimension_semantics<parallel>, #tpu.dimension_semantics<parallel>], iteration_bounds = array<i64: 1, 2>, scalar_prefetch = 0 : i64, scratch_operands = 0 : i64, tpu.core_type = #tpu.core_type<tc>, window_params = [{transform_indices = @transform_0, window_bounds = array<i64: 1, 192, 16>}, {transform_indices = @transform_1, window_bounds = array<i64: 9, 16, 128>}, {pipeline_mode = #tpu.pipeline_mode<synchronous>, transform_indices = @transform_2, window_bounds = array<i64: 144, 1>}, {transform_indices = @transform_3, window_bounds = array<i64: 1, 144, 128>}]} {
    %c0 = arith.constant 0 : index
    %c0_0 = arith.constant 0 : index
    %c0_1 = arith.constant 0 : index
    %0 = vector.load %arg2[%c0, %c0_0, %c0_1] : memref<1x192x16xbf16, #tpu.memory_space<vmem>>, vector<1x144x16xbf16>
    %1 = vector.shape_cast %0 : vector<1x144x16xbf16> to vector<144x16xbf16>
    %c0_2 = arith.constant 0 : index
    %c0_3 = arith.constant 0 : index
    %c0_4 = arith.constant 0 : index
    %2 = vector.load %arg3[%c0_2, %c0_3, %c0_4] : memref<9x16x128xbf16, #tpu.memory_space<vmem>>, vector<1x16x128xbf16>
    %3 = vector.shape_cast %2 : vector<1x16x128xbf16> to vector<16x128xbf16>
    %cst = arith.constant dense<0.000000e+00> : vector<144x128xf32>
    %4 = tpu.matmul %1, %3, %cst {dimension_numbers = #tpu.dot_dimension_numbers<[1], [0], [0], [1], [0, 0, 1, 1], [], []>} : vector<144x16xbf16>, vector<16x128xbf16>, vector<144x128xf32> -> vector<144x128xf32>
    %c0_5 = arith.constant 0 : index
    %c1 = arith.constant 1 : index
    %c0_6 = arith.constant 0 : index
    %5 = vector.load %arg2[%c0_5, %c1, %c0_6] : memref<1x192x16xbf16, #tpu.memory_space<vmem>>, vector<1x144x16xbf16>
    %6 = vector.shape_cast %5 : vector<1x144x16xbf16> to vector<144x16xbf16>
    %c1_7 = arith.constant 1 : index
    %c0_8 = arith.constant 0 : index
    %c0_9 = arith.constant 0 : index
    %7 = vector.load %arg3[%c1_7, %c0_8, %c0_9] : memref<9x16x128xbf16, #tpu.memory_space<vmem>>, vector<1x16x128xbf16>
    %8 = vector.shape_cast %7 : vector<1x16x128xbf16> to vector<16x128xbf16>
    %cst_10 = arith.constant dense<0.000000e+00> : vector<144x128xf32>
    %9 = tpu.matmul %6, %8, %cst_10 {dimension_numbers = #tpu.dot_dimension_numbers<[1], [0], [0], [1], [0, 0, 1, 1], [], []>} : vector<144x16xbf16>, vector<16x128xbf16>, vector<144x128xf32> -> vector<144x128xf32>
    %10 = arith.addf %4, %9 : vector<144x128xf32>
    %c0_11 = arith.constant 0 : index
    %c2 = arith.constant 2 : index
    %c0_12 = arith.constant 0 : index
    %11 = vector.load %arg2[%c0_11, %c2, %c0_12] : memref<1x192x16xbf16, #tpu.memory_space<vmem>>, vector<1x144x16xbf16>
    %12 = vector.shape_cast %11 : vector<1x144x16xbf16> to vector<144x16xbf16>
    %c2_13 = arith.constant 2 : index
    %c0_14 = arith.constant 0 : index
    %c0_15 = arith.constant 0 : index
    %13 = vector.load %arg3[%c2_13, %c0_14, %c0_15] : memref<9x16x128xbf16, #tpu.memory_space<vmem>>, vector<1x16x128xbf16>
    %14 = vector.shape_cast %13 : vector<1x16x128xbf16> to vector<16x128xbf16>
    %cst_16 = arith.constant dense<0.000000e+00> : vector<144x128xf32>
    %15 = tpu.matmul %12, %14, %cst_16 {dimension_numbers = #tpu.dot_dimension_numbers<[1], [0], [0], [1], [0, 0, 1, 1], [], []>} : vector<144x16xbf16>, vector<16x128xbf16>, vector<144x128xf32> -> vector<144x128xf32>
    %16 = arith.addf %10, %15 : vector<144x128xf32>
    %c0_17 = arith.constant 0 : index
    %c16 = arith.constant 16 : index
    %c0_18 = arith.constant 0 : index
    %17 = vector.load %arg2[%c0_17, %c16, %c0_18] : memref<1x192x16xbf16, #tpu.memory_space<vmem>>, vector<1x144x16xbf16>
    %18 = vector.shape_cast %17 : vector<1x144x16xbf16> to vector<144x16xbf16>
    %c3 = arith.constant 3 : index
    %c0_19 = arith.constant 0 : index
    %c0_20 = arith.constant 0 : index
    %19 = vector.load %arg3[%c3, %c0_19, %c0_20] : memref<9x16x128xbf16, #tpu.memory_space<vmem>>, vector<1x16x128xbf16>
    %20 = vector.shape_cast %19 : vector<1x16x128xbf16> to vector<16x128xbf16>
    %cst_21 = arith.constant dense<0.000000e+00> : vector<144x128xf32>
    %21 = tpu.matmul %18, %20, %cst_21 {dimension_numbers = #tpu.dot_dimension_numbers<[1], [0], [0], [1], [0, 0, 1, 1], [], []>} : vector<144x16xbf16>, vector<16x128xbf16>, vector<144x128xf32> -> vector<144x128xf32>
    %22 = arith.addf %16, %21 : vector<144x128xf32>
    %c0_22 = arith.constant 0 : index
    %c17 = arith.constant 17 : index
    %c0_23 = arith.constant 0 : index
    %23 = vector.load %arg2[%c0_22, %c17, %c0_23] : memref<1x192x16xbf16, #tpu.memory_space<vmem>>, vector<1x144x16xbf16>
    %24 = vector.shape_cast %23 : vector<1x144x16xbf16> to vector<144x16xbf16>
    %c4 = arith.constant 4 : index
    %c0_24 = arith.constant 0 : index
    %c0_25 = arith.constant 0 : index
    %25 = vector.load %arg3[%c4, %c0_24, %c0_25] : memref<9x16x128xbf16, #tpu.memory_space<vmem>>, vector<1x16x128xbf16>
    %26 = vector.shape_cast %25 : vector<1x16x128xbf16> to vector<16x128xbf16>
    %cst_26 = arith.constant dense<0.000000e+00> : vector<144x128xf32>
    %27 = tpu.matmul %24, %26, %cst_26 {dimension_numbers = #tpu.dot_dimension_numbers<[1], [0], [0], [1], [0, 0, 1, 1], [], []>} : vector<144x16xbf16>, vector<16x128xbf16>, vector<144x128xf32> -> vector<144x128xf32>
    %28 = arith.addf %22, %27 : vector<144x128xf32>
    %c0_27 = arith.constant 0 : index
    %c18 = arith.constant 18 : index
    %c0_28 = arith.constant 0 : index
    %29 = vector.load %arg2[%c0_27, %c18, %c0_28] : memref<1x192x16xbf16, #tpu.memory_space<vmem>>, vector<1x144x16xbf16>
    %30 = vector.shape_cast %29 : vector<1x144x16xbf16> to vector<144x16xbf16>
    %c5 = arith.constant 5 : index
    %c0_29 = arith.constant 0 : index
    %c0_30 = arith.constant 0 : index
    %31 = vector.load %arg3[%c5, %c0_29, %c0_30] : memref<9x16x128xbf16, #tpu.memory_space<vmem>>, vector<1x16x128xbf16>
    %32 = vector.shape_cast %31 : vector<1x16x128xbf16> to vector<16x128xbf16>
    %cst_31 = arith.constant dense<0.000000e+00> : vector<144x128xf32>
    %33 = tpu.matmul %30, %32, %cst_31 {dimension_numbers = #tpu.dot_dimension_numbers<[1], [0], [0], [1], [0, 0, 1, 1], [], []>} : vector<144x16xbf16>, vector<16x128xbf16>, vector<144x128xf32> -> vector<144x128xf32>
    %34 = arith.addf %28, %33 : vector<144x128xf32>
    %c0_32 = arith.constant 0 : index
    %c32 = arith.constant 32 : index
    %c0_33 = arith.constant 0 : index
    %35 = vector.load %arg2[%c0_32, %c32, %c0_33] : memref<1x192x16xbf16, #tpu.memory_space<vmem>>, vector<1x144x16xbf16>
    %36 = vector.shape_cast %35 : vector<1x144x16xbf16> to vector<144x16xbf16>
    %c6 = arith.constant 6 : index
    %c0_34 = arith.constant 0 : index
    %c0_35 = arith.constant 0 : index
    %37 = vector.load %arg3[%c6, %c0_34, %c0_35] : memref<9x16x128xbf16, #tpu.memory_space<vmem>>, vector<1x16x128xbf16>
    %38 = vector.shape_cast %37 : vector<1x16x128xbf16> to vector<16x128xbf16>
    %cst_36 = arith.constant dense<0.000000e+00> : vector<144x128xf32>
    %39 = tpu.matmul %36, %38, %cst_36 {dimension_numbers = #tpu.dot_dimension_numbers<[1], [0], [0], [1], [0, 0, 1, 1], [], []>} : vector<144x16xbf16>, vector<16x128xbf16>, vector<144x128xf32> -> vector<144x128xf32>
    %40 = arith.addf %34, %39 : vector<144x128xf32>
    %c0_37 = arith.constant 0 : index
    %c33 = arith.constant 33 : index
    %c0_38 = arith.constant 0 : index
    %41 = vector.load %arg2[%c0_37, %c33, %c0_38] : memref<1x192x16xbf16, #tpu.memory_space<vmem>>, vector<1x144x16xbf16>
    %42 = vector.shape_cast %41 : vector<1x144x16xbf16> to vector<144x16xbf16>
    %c7 = arith.constant 7 : index
    %c0_39 = arith.constant 0 : index
    %c0_40 = arith.constant 0 : index
    %43 = vector.load %arg3[%c7, %c0_39, %c0_40] : memref<9x16x128xbf16, #tpu.memory_space<vmem>>, vector<1x16x128xbf16>
    %44 = vector.shape_cast %43 : vector<1x16x128xbf16> to vector<16x128xbf16>
    %cst_41 = arith.constant dense<0.000000e+00> : vector<144x128xf32>
    %45 = tpu.matmul %42, %44, %cst_41 {dimension_numbers = #tpu.dot_dimension_numbers<[1], [0], [0], [1], [0, 0, 1, 1], [], []>} : vector<144x16xbf16>, vector<16x128xbf16>, vector<144x128xf32> -> vector<144x128xf32>
    %46 = arith.addf %40, %45 : vector<144x128xf32>
    %c0_42 = arith.constant 0 : index
    %c34 = arith.constant 34 : index
    %c0_43 = arith.constant 0 : index
    %47 = vector.load %arg2[%c0_42, %c34, %c0_43] : memref<1x192x16xbf16, #tpu.memory_space<vmem>>, vector<1x144x16xbf16>
    %48 = vector.shape_cast %47 : vector<1x144x16xbf16> to vector<144x16xbf16>
    %c8 = arith.constant 8 : index
    %c0_44 = arith.constant 0 : index
    %c0_45 = arith.constant 0 : index
    %49 = vector.load %arg3[%c8, %c0_44, %c0_45] : memref<9x16x128xbf16, #tpu.memory_space<vmem>>, vector<1x16x128xbf16>
    %50 = vector.shape_cast %49 : vector<1x16x128xbf16> to vector<16x128xbf16>
    %cst_46 = arith.constant dense<0.000000e+00> : vector<144x128xf32>
    %51 = tpu.matmul %48, %50, %cst_46 {dimension_numbers = #tpu.dot_dimension_numbers<[1], [0], [0], [1], [0, 0, 1, 1], [], []>} : vector<144x16xbf16>, vector<16x128xbf16>, vector<144x128xf32> -> vector<144x128xf32>
    %52 = arith.addf %46, %51 : vector<144x128xf32>
    %c0_47 = arith.constant 0 : index
    %c0_48 = arith.constant 0 : index
    %53 = vector.load %arg4[%c0_47, %c0_48] : memref<144x1xf32, #tpu.memory_space<vmem>>, vector<144x1xf32>
    %54 = vector.broadcast %53 : vector<144x1xf32> to vector<144x128xf32>
    %55 = arith.mulf %52, %54 : vector<144x128xf32>
    %cst_49 = arith.constant dense<0.000000e+00> : vector<128xf32>
    %56 = vector.multi_reduction <add>, %55, %cst_49 [0] : vector<144x128xf32> to vector<128xf32>
    %57 = vector.shape_cast %56 : vector<128xf32> to vector<1x128xf32>
    %58 = arith.mulf %55, %52 : vector<144x128xf32>
    %cst_50 = arith.constant dense<0.000000e+00> : vector<128xf32>
    %59 = vector.multi_reduction <add>, %58, %cst_50 [0] : vector<144x128xf32> to vector<128xf32>
    %60 = vector.shape_cast %59 : vector<128xf32> to vector<1x128xf32>
    %cst_51 = arith.constant 0.0123456791 : f32
    %61 = vector.broadcast %cst_51 : f32 to vector<1x128xf32>
    %62 = arith.mulf %57, %61 : vector<1x128xf32>
    %cst_52 = arith.constant 0.0123456791 : f32
    %63 = vector.broadcast %cst_52 : f32 to vector<1x128xf32>
    %64 = arith.mulf %60, %63 : vector<1x128xf32>
    %65 = arith.mulf %62, %62 : vector<1x128xf32>
    %66 = arith.subf %64, %65 : vector<1x128xf32>
    %cst_53 = arith.constant 0.000000e+00 : f32
    %67 = vector.broadcast %cst_53 : f32 to vector<1x128xf32>
    %68 = arith.maximumf %66, %67 : vector<1x128xf32>
    %69 = vector.broadcast %62 : vector<1x128xf32> to vector<144x128xf32>
    %70 = arith.subf %52, %69 : vector<144x128xf32>
    %cst_54 = arith.constant 9.99999974E-6 : f32
    %71 = vector.broadcast %cst_54 : f32 to vector<1x128xf32>
    %72 = arith.addf %68, %71 : vector<1x128xf32>
    %73 = math.rsqrt %72 : vector<1x128xf32>
    %74 = vector.broadcast %73 : vector<1x128xf32> to vector<144x128xf32>
    %75 = arith.mulf %70, %74 : vector<144x128xf32>
    %cst_55 = arith.constant 2.000000e-01 : f32
    %76 = vector.broadcast %cst_55 : f32 to vector<144x128xf32>
    %77 = arith.mulf %76, %75 : vector<144x128xf32>
    %78 = arith.maximumf %75, %77 : vector<144x128xf32>
    %79 = arith.truncf %78 : vector<144x128xf32> to vector<144x128xbf16>
    %c0_56 = arith.constant 0 : index
    %c0_57 = arith.constant 0 : index
    %c0_58 = arith.constant 0 : index
    %80 = vector.load %arg5[%c0_56, %c0_57, %c0_58] : memref<1x144x128xbf16, #tpu.memory_space<vmem>>, vector<1x144x128xbf16>
    %81 = vector.shape_cast %80 : vector<1x144x128xbf16> to vector<144x128xbf16>
    %82 = vector.shape_cast %79 : vector<144x128xbf16> to vector<1x144x128xbf16>
    tpu.vector_store %arg5[%c0_56, %c0_57, %c0_58], %82 {strides = array<i32>} : memref<1x144x128xbf16, #tpu.memory_space<vmem>>, vector<1x144x128xbf16>,
    return
  }
  func.func @transform_0(%arg0: i32, %arg1: i32) -> (i32, i32, i32) {
    %c0_i32 = arith.constant 0 : i32
    %c0_i32_0 = arith.constant 0 : i32
    %c0_i32_1 = arith.constant 0 : i32
    return %arg1, %c0_i32, %c0_i32_0 : i32, i32, i32
  }
  func.func @transform_1(%arg0: i32, %arg1: i32) -> (i32, i32, i32) {
    %c0_i32 = arith.constant 0 : i32
    %c0_i32_0 = arith.constant 0 : i32
    %c0_i32_1 = arith.constant 0 : i32
    return %c0_i32, %c0_i32_0, %arg0 : i32, i32, i32
  }
  func.func @transform_2(%arg0: i32, %arg1: i32) -> (i32, i32) {
    %c0_i32 = arith.constant 0 : i32
    %c0_i32_0 = arith.constant 0 : i32
    %c0_i32_1 = arith.constant 0 : i32
    return %c0_i32, %c0_i32_0 : i32, i32
  }
  func.func @transform_3(%arg0: i32, %arg1: i32) -> (i32, i32, i32) {
    %c0_i32 = arith.constant 0 : i32
    %c0_i32_0 = arith.constant 0 : i32
    return %arg1, %c0_i32, %arg0 : i32, i32, i32
  }
}

module attributes {stable_mosaic.version = 11 : i64} {
  func.func @_conv_kernel(%arg0: i32, %arg1: i32, %arg2: memref<1x192x16xbf16, #tpu.memory_space<vmem>>, %arg3: memref<9x16x128xbf16, #tpu.memory_space<vmem>>, %arg4: memref<144x1xf32, #tpu.memory_space<vmem>>, %arg5: memref<1x144x128xbf16, #tpu.memory_space<vmem>>, %arg6: memref<1x144x128xbf16, #tpu.memory_space<vmem>>) attributes {dimension_semantics = [#tpu.dimension_semantics<parallel>, #tpu.dimension_semantics<parallel>], iteration_bounds = array<i64: 1, 2>, scalar_prefetch = 0 : i64, scratch_operands = 0 : i64, tpu.core_type = #tpu.core_type<tc>, window_params = [{transform_indices = @transform_0, window_bounds = array<i64: 1, 192, 16>}, {transform_indices = @transform_1, window_bounds = array<i64: 9, 16, 128>}, {pipeline_mode = #tpu.pipeline_mode<synchronous>, transform_indices = @transform_2, window_bounds = array<i64: 144, 1>}, {transform_indices = @transform_3, window_bounds = array<i64: 1, 144, 128>}, {transform_indices = @transform_4, window_bounds = array<i64: 1, 144, 128>}]} {
    %c0 = arith.constant 0 : index
    %c0_0 = arith.constant 0 : index
    %c0_1 = arith.constant 0 : index
    %0 = vector.load %arg2[%c0, %c0_0, %c0_1] : memref<1x192x16xbf16, #tpu.memory_space<vmem>>, vector<1x144x16xbf16>
    %1 = vector.shape_cast %0 : vector<1x144x16xbf16> to vector<144x16xbf16>
    %c0_2 = arith.constant 0 : index
    %c0_3 = arith.constant 0 : index
    %c0_4 = arith.constant 0 : index
    %2 = vector.load %arg3[%c0_2, %c0_3, %c0_4] : memref<9x16x128xbf16, #tpu.memory_space<vmem>>, vector<1x16x128xbf16>
    %3 = vector.shape_cast %2 : vector<1x16x128xbf16> to vector<16x128xbf16>
    %cst = arith.constant dense<0.000000e+00> : vector<144x128xf32>
    %4 = tpu.matmul %1, %3, %cst {dimension_numbers = #tpu.dot_dimension_numbers<[1], [0], [0], [1], [0, 0, 1, 1], [], []>} : vector<144x16xbf16>, vector<16x128xbf16>, vector<144x128xf32> -> vector<144x128xf32>
    %c0_5 = arith.constant 0 : index
    %c1 = arith.constant 1 : index
    %c0_6 = arith.constant 0 : index
    %5 = vector.load %arg2[%c0_5, %c1, %c0_6] : memref<1x192x16xbf16, #tpu.memory_space<vmem>>, vector<1x144x16xbf16>
    %6 = vector.shape_cast %5 : vector<1x144x16xbf16> to vector<144x16xbf16>
    %c1_7 = arith.constant 1 : index
    %c0_8 = arith.constant 0 : index
    %c0_9 = arith.constant 0 : index
    %7 = vector.load %arg3[%c1_7, %c0_8, %c0_9] : memref<9x16x128xbf16, #tpu.memory_space<vmem>>, vector<1x16x128xbf16>
    %8 = vector.shape_cast %7 : vector<1x16x128xbf16> to vector<16x128xbf16>
    %cst_10 = arith.constant dense<0.000000e+00> : vector<144x128xf32>
    %9 = tpu.matmul %6, %8, %cst_10 {dimension_numbers = #tpu.dot_dimension_numbers<[1], [0], [0], [1], [0, 0, 1, 1], [], []>} : vector<144x16xbf16>, vector<16x128xbf16>, vector<144x128xf32> -> vector<144x128xf32>
    %10 = arith.addf %4, %9 : vector<144x128xf32>
    %c0_11 = arith.constant 0 : index
    %c2 = arith.constant 2 : index
    %c0_12 = arith.constant 0 : index
    %11 = vector.load %arg2[%c0_11, %c2, %c0_12] : memref<1x192x16xbf16, #tpu.memory_space<vmem>>, vector<1x144x16xbf16>
    %12 = vector.shape_cast %11 : vector<1x144x16xbf16> to vector<144x16xbf16>
    %c2_13 = arith.constant 2 : index
    %c0_14 = arith.constant 0 : index
    %c0_15 = arith.constant 0 : index
    %13 = vector.load %arg3[%c2_13, %c0_14, %c0_15] : memref<9x16x128xbf16, #tpu.memory_space<vmem>>, vector<1x16x128xbf16>
    %14 = vector.shape_cast %13 : vector<1x16x128xbf16> to vector<16x128xbf16>
    %cst_16 = arith.constant dense<0.000000e+00> : vector<144x128xf32>
    %15 = tpu.matmul %12, %14, %cst_16 {dimension_numbers = #tpu.dot_dimension_numbers<[1], [0], [0], [1], [0, 0, 1, 1], [], []>} : vector<144x16xbf16>, vector<16x128xbf16>, vector<144x128xf32> -> vector<144x128xf32>
    %16 = arith.addf %10, %15 : vector<144x128xf32>
    %c0_17 = arith.constant 0 : index
    %c16 = arith.constant 16 : index
    %c0_18 = arith.constant 0 : index
    %17 = vector.load %arg2[%c0_17, %c16, %c0_18] : memref<1x192x16xbf16, #tpu.memory_space<vmem>>, vector<1x144x16xbf16>
    %18 = vector.shape_cast %17 : vector<1x144x16xbf16> to vector<144x16xbf16>
    %c3 = arith.constant 3 : index
    %c0_19 = arith.constant 0 : index
    %c0_20 = arith.constant 0 : index
    %19 = vector.load %arg3[%c3, %c0_19, %c0_20] : memref<9x16x128xbf16, #tpu.memory_space<vmem>>, vector<1x16x128xbf16>
    %20 = vector.shape_cast %19 : vector<1x16x128xbf16> to vector<16x128xbf16>
    %cst_21 = arith.constant dense<0.000000e+00> : vector<144x128xf32>
    %21 = tpu.matmul %18, %20, %cst_21 {dimension_numbers = #tpu.dot_dimension_numbers<[1], [0], [0], [1], [0, 0, 1, 1], [], []>} : vector<144x16xbf16>, vector<16x128xbf16>, vector<144x128xf32> -> vector<144x128xf32>
    %22 = arith.addf %16, %21 : vector<144x128xf32>
    %c0_22 = arith.constant 0 : index
    %c17 = arith.constant 17 : index
    %c0_23 = arith.constant 0 : index
    %23 = vector.load %arg2[%c0_22, %c17, %c0_23] : memref<1x192x16xbf16, #tpu.memory_space<vmem>>, vector<1x144x16xbf16>
    %24 = vector.shape_cast %23 : vector<1x144x16xbf16> to vector<144x16xbf16>
    %c4 = arith.constant 4 : index
    %c0_24 = arith.constant 0 : index
    %c0_25 = arith.constant 0 : index
    %25 = vector.load %arg3[%c4, %c0_24, %c0_25] : memref<9x16x128xbf16, #tpu.memory_space<vmem>>, vector<1x16x128xbf16>
    %26 = vector.shape_cast %25 : vector<1x16x128xbf16> to vector<16x128xbf16>
    %cst_26 = arith.constant dense<0.000000e+00> : vector<144x128xf32>
    %27 = tpu.matmul %24, %26, %cst_26 {dimension_numbers = #tpu.dot_dimension_numbers<[1], [0], [0], [1], [0, 0, 1, 1], [], []>} : vector<144x16xbf16>, vector<16x128xbf16>, vector<144x128xf32> -> vector<144x128xf32>
    %28 = arith.addf %22, %27 : vector<144x128xf32>
    %c0_27 = arith.constant 0 : index
    %c18 = arith.constant 18 : index
    %c0_28 = arith.constant 0 : index
    %29 = vector.load %arg2[%c0_27, %c18, %c0_28] : memref<1x192x16xbf16, #tpu.memory_space<vmem>>, vector<1x144x16xbf16>
    %30 = vector.shape_cast %29 : vector<1x144x16xbf16> to vector<144x16xbf16>
    %c5 = arith.constant 5 : index
    %c0_29 = arith.constant 0 : index
    %c0_30 = arith.constant 0 : index
    %31 = vector.load %arg3[%c5, %c0_29, %c0_30] : memref<9x16x128xbf16, #tpu.memory_space<vmem>>, vector<1x16x128xbf16>
    %32 = vector.shape_cast %31 : vector<1x16x128xbf16> to vector<16x128xbf16>
    %cst_31 = arith.constant dense<0.000000e+00> : vector<144x128xf32>
    %33 = tpu.matmul %30, %32, %cst_31 {dimension_numbers = #tpu.dot_dimension_numbers<[1], [0], [0], [1], [0, 0, 1, 1], [], []>} : vector<144x16xbf16>, vector<16x128xbf16>, vector<144x128xf32> -> vector<144x128xf32>
    %34 = arith.addf %28, %33 : vector<144x128xf32>
    %c0_32 = arith.constant 0 : index
    %c32 = arith.constant 32 : index
    %c0_33 = arith.constant 0 : index
    %35 = vector.load %arg2[%c0_32, %c32, %c0_33] : memref<1x192x16xbf16, #tpu.memory_space<vmem>>, vector<1x144x16xbf16>
    %36 = vector.shape_cast %35 : vector<1x144x16xbf16> to vector<144x16xbf16>
    %c6 = arith.constant 6 : index
    %c0_34 = arith.constant 0 : index
    %c0_35 = arith.constant 0 : index
    %37 = vector.load %arg3[%c6, %c0_34, %c0_35] : memref<9x16x128xbf16, #tpu.memory_space<vmem>>, vector<1x16x128xbf16>
    %38 = vector.shape_cast %37 : vector<1x16x128xbf16> to vector<16x128xbf16>
    %cst_36 = arith.constant dense<0.000000e+00> : vector<144x128xf32>
    %39 = tpu.matmul %36, %38, %cst_36 {dimension_numbers = #tpu.dot_dimension_numbers<[1], [0], [0], [1], [0, 0, 1, 1], [], []>} : vector<144x16xbf16>, vector<16x128xbf16>, vector<144x128xf32> -> vector<144x128xf32>
    %40 = arith.addf %34, %39 : vector<144x128xf32>
    %c0_37 = arith.constant 0 : index
    %c33 = arith.constant 33 : index
    %c0_38 = arith.constant 0 : index
    %41 = vector.load %arg2[%c0_37, %c33, %c0_38] : memref<1x192x16xbf16, #tpu.memory_space<vmem>>, vector<1x144x16xbf16>
    %42 = vector.shape_cast %41 : vector<1x144x16xbf16> to vector<144x16xbf16>
    %c7 = arith.constant 7 : index
    %c0_39 = arith.constant 0 : index
    %c0_40 = arith.constant 0 : index
    %43 = vector.load %arg3[%c7, %c0_39, %c0_40] : memref<9x16x128xbf16, #tpu.memory_space<vmem>>, vector<1x16x128xbf16>
    %44 = vector.shape_cast %43 : vector<1x16x128xbf16> to vector<16x128xbf16>
    %cst_41 = arith.constant dense<0.000000e+00> : vector<144x128xf32>
    %45 = tpu.matmul %42, %44, %cst_41 {dimension_numbers = #tpu.dot_dimension_numbers<[1], [0], [0], [1], [0, 0, 1, 1], [], []>} : vector<144x16xbf16>, vector<16x128xbf16>, vector<144x128xf32> -> vector<144x128xf32>
    %46 = arith.addf %40, %45 : vector<144x128xf32>
    %c0_42 = arith.constant 0 : index
    %c34 = arith.constant 34 : index
    %c0_43 = arith.constant 0 : index
    %47 = vector.load %arg2[%c0_42, %c34, %c0_43] : memref<1x192x16xbf16, #tpu.memory_space<vmem>>, vector<1x144x16xbf16>
    %48 = vector.shape_cast %47 : vector<1x144x16xbf16> to vector<144x16xbf16>
    %c8 = arith.constant 8 : index
    %c0_44 = arith.constant 0 : index
    %c0_45 = arith.constant 0 : index
    %49 = vector.load %arg3[%c8, %c0_44, %c0_45] : memref<9x16x128xbf16, #tpu.memory_space<vmem>>, vector<1x16x128xbf16>
    %50 = vector.shape_cast %49 : vector<1x16x128xbf16> to vector<16x128xbf16>
    %cst_46 = arith.constant dense<0.000000e+00> : vector<144x128xf32>
    %51 = tpu.matmul %48, %50, %cst_46 {dimension_numbers = #tpu.dot_dimension_numbers<[1], [0], [0], [1], [0, 0, 1, 1], [], []>} : vector<144x16xbf16>, vector<16x128xbf16>, vector<144x128xf32> -> vector<144x128xf32>
    %52 = arith.addf %46, %51 : vector<144x128xf32>
    %c0_47 = arith.constant 0 : index
    %c0_48 = arith.constant 0 : index
    %53 = vector.load %arg4[%c0_47, %c0_48] : memref<144x1xf32, #tpu.memory_space<vmem>>, vector<144x1xf32>
    %54 = vector.broadcast %53 : vector<144x1xf32> to vector<144x128xf32>
    %55 = arith.mulf %52, %54 : vector<144x128xf32>
    %cst_49 = arith.constant dense<0.000000e+00> : vector<128xf32>
    %56 = vector.multi_reduction <add>, %55, %cst_49 [0] : vector<144x128xf32> to vector<128xf32>
    %57 = vector.shape_cast %56 : vector<128xf32> to vector<1x128xf32>
    %58 = arith.mulf %55, %52 : vector<144x128xf32>
    %cst_50 = arith.constant dense<0.000000e+00> : vector<128xf32>
    %59 = vector.multi_reduction <add>, %58, %cst_50 [0] : vector<144x128xf32> to vector<128xf32>
    %60 = vector.shape_cast %59 : vector<128xf32> to vector<1x128xf32>
    %cst_51 = arith.constant 0.0123456791 : f32
    %61 = vector.broadcast %cst_51 : f32 to vector<1x128xf32>
    %62 = arith.mulf %57, %61 : vector<1x128xf32>
    %cst_52 = arith.constant 0.0123456791 : f32
    %63 = vector.broadcast %cst_52 : f32 to vector<1x128xf32>
    %64 = arith.mulf %60, %63 : vector<1x128xf32>
    %65 = arith.mulf %62, %62 : vector<1x128xf32>
    %66 = arith.subf %64, %65 : vector<1x128xf32>
    %cst_53 = arith.constant 0.000000e+00 : f32
    %67 = vector.broadcast %cst_53 : f32 to vector<1x128xf32>
    %68 = arith.maximumf %66, %67 : vector<1x128xf32>
    %69 = vector.broadcast %62 : vector<1x128xf32> to vector<144x128xf32>
    %70 = arith.subf %52, %69 : vector<144x128xf32>
    %cst_54 = arith.constant 9.99999974E-6 : f32
    %71 = vector.broadcast %cst_54 : f32 to vector<1x128xf32>
    %72 = arith.addf %68, %71 : vector<1x128xf32>
    %73 = math.rsqrt %72 : vector<1x128xf32>
    %74 = vector.broadcast %73 : vector<1x128xf32> to vector<144x128xf32>
    %75 = arith.mulf %70, %74 : vector<144x128xf32>
    %c0_55 = arith.constant 0 : index
    %c0_56 = arith.constant 0 : index
    %c0_57 = arith.constant 0 : index
    %76 = vector.load %arg5[%c0_55, %c0_56, %c0_57] : memref<1x144x128xbf16, #tpu.memory_space<vmem>>, vector<1x144x128xbf16>
    %77 = vector.shape_cast %76 : vector<1x144x128xbf16> to vector<144x128xbf16>
    %78 = arith.extf %77 : vector<144x128xbf16> to vector<144x128xf32>
    %79 = arith.addf %75, %78 : vector<144x128xf32>
    %80 = arith.truncf %79 : vector<144x128xf32> to vector<144x128xbf16>
    %c0_58 = arith.constant 0 : index
    %c0_59 = arith.constant 0 : index
    %c0_60 = arith.constant 0 : index
    %81 = vector.load %arg6[%c0_58, %c0_59, %c0_60] : memref<1x144x128xbf16, #tpu.memory_space<vmem>>, vector<1x144x128xbf16>
    %82 = vector.shape_cast %81 : vector<1x144x128xbf16> to vector<144x128xbf16>
    %83 = vector.shape_cast %80 : vector<144x128xbf16> to vector<1x144x128xbf16>
    tpu.vector_store %arg6[%c0_58, %c0_59, %c0_60], %83 {strides = array<i32>} : memref<1x144x128xbf16, #tpu.memory_space<vmem>>, vector<1x144x128xbf16>,
    return
  }
  func.func @transform_0(%arg0: i32, %arg1: i32) -> (i32, i32, i32) {
    %c0_i32 = arith.constant 0 : i32
    %c0_i32_0 = arith.constant 0 : i32
    %c0_i32_1 = arith.constant 0 : i32
    return %arg1, %c0_i32, %c0_i32_0 : i32, i32, i32
  }
  func.func @transform_1(%arg0: i32, %arg1: i32) -> (i32, i32, i32) {
    %c0_i32 = arith.constant 0 : i32
    %c0_i32_0 = arith.constant 0 : i32
    %c0_i32_1 = arith.constant 0 : i32
    return %c0_i32, %c0_i32_0, %arg0 : i32, i32, i32
  }
  func.func @transform_2(%arg0: i32, %arg1: i32) -> (i32, i32) {
    %c0_i32 = arith.constant 0 : i32
    %c0_i32_0 = arith.constant 0 : i32
    %c0_i32_1 = arith.constant 0 : i32
    return %c0_i32, %c0_i32_0 : i32, i32
  }
  func.func @transform_3(%arg0: i32, %arg1: i32) -> (i32, i32, i32) {
    %c0_i32 = arith.constant 0 : i32
    %c0_i32_0 = arith.constant 0 : i32
    return %arg1, %c0_i32, %arg0 : i32, i32, i32
  }
  func.func @transform_4(%arg0: i32, %arg1: i32) -> (i32, i32, i32) {
    %c0_i32 = arith.constant 0 : i32
    %c0_i32_0 = arith.constant 0 : i32
    return %arg1, %c0_i32, %arg0 : i32, i32, i32
  }
}

module attributes {stable_mosaic.version = 11 : i64} {
  func.func @_conv_kernel(%arg0: i32, %arg1: i32, %arg2: memref<1x72x64xbf16, #tpu.memory_space<vmem>>, %arg3: memref<4x64x128xbf16, #tpu.memory_space<vmem>>, %arg4: memref<40x1xf32, #tpu.memory_space<vmem>>, %arg5: memref<1x40x128xbf16, #tpu.memory_space<vmem>>) attributes {dimension_semantics = [#tpu.dimension_semantics<parallel>, #tpu.dimension_semantics<parallel>], iteration_bounds = array<i64: 1, 2>, scalar_prefetch = 0 : i64, scratch_operands = 0 : i64, tpu.core_type = #tpu.core_type<tc>, window_params = [{transform_indices = @transform_0, window_bounds = array<i64: 1, 72, 64>}, {transform_indices = @transform_1, window_bounds = array<i64: 4, 64, 128>}, {pipeline_mode = #tpu.pipeline_mode<synchronous>, transform_indices = @transform_2, window_bounds = array<i64: 40, 1>}, {transform_indices = @transform_3, window_bounds = array<i64: 1, 40, 128>}]} {
    %c0 = arith.constant 0 : index
    %c0_0 = arith.constant 0 : index
    %c0_1 = arith.constant 0 : index
    %0 = vector.load %arg2[%c0, %c0_0, %c0_1] : memref<1x72x64xbf16, #tpu.memory_space<vmem>>, vector<1x40x64xbf16>
    %1 = vector.shape_cast %0 : vector<1x40x64xbf16> to vector<40x64xbf16>
    %c0_2 = arith.constant 0 : index
    %c0_3 = arith.constant 0 : index
    %c0_4 = arith.constant 0 : index
    %2 = vector.load %arg3[%c0_2, %c0_3, %c0_4] : memref<4x64x128xbf16, #tpu.memory_space<vmem>>, vector<1x64x128xbf16>
    %3 = vector.shape_cast %2 : vector<1x64x128xbf16> to vector<64x128xbf16>
    %cst = arith.constant dense<0.000000e+00> : vector<40x128xf32>
    %4 = tpu.matmul %1, %3, %cst {dimension_numbers = #tpu.dot_dimension_numbers<[1], [0], [0], [1], [0, 0, 1, 1], [], []>} : vector<40x64xbf16>, vector<64x128xbf16>, vector<40x128xf32> -> vector<40x128xf32>
    %c0_5 = arith.constant 0 : index
    %c1 = arith.constant 1 : index
    %c0_6 = arith.constant 0 : index
    %5 = vector.load %arg2[%c0_5, %c1, %c0_6] : memref<1x72x64xbf16, #tpu.memory_space<vmem>>, vector<1x40x64xbf16>
    %6 = vector.shape_cast %5 : vector<1x40x64xbf16> to vector<40x64xbf16>
    %c1_7 = arith.constant 1 : index
    %c0_8 = arith.constant 0 : index
    %c0_9 = arith.constant 0 : index
    %7 = vector.load %arg3[%c1_7, %c0_8, %c0_9] : memref<4x64x128xbf16, #tpu.memory_space<vmem>>, vector<1x64x128xbf16>
    %8 = vector.shape_cast %7 : vector<1x64x128xbf16> to vector<64x128xbf16>
    %cst_10 = arith.constant dense<0.000000e+00> : vector<40x128xf32>
    %9 = tpu.matmul %6, %8, %cst_10 {dimension_numbers = #tpu.dot_dimension_numbers<[1], [0], [0], [1], [0, 0, 1, 1], [], []>} : vector<40x64xbf16>, vector<64x128xbf16>, vector<40x128xf32> -> vector<40x128xf32>
    %10 = arith.addf %4, %9 : vector<40x128xf32>
    %c0_11 = arith.constant 0 : index
    %c8 = arith.constant 8 : index
    %c0_12 = arith.constant 0 : index
    %11 = vector.load %arg2[%c0_11, %c8, %c0_12] : memref<1x72x64xbf16, #tpu.memory_space<vmem>>, vector<1x40x64xbf16>
    %12 = vector.shape_cast %11 : vector<1x40x64xbf16> to vector<40x64xbf16>
    %c2 = arith.constant 2 : index
    %c0_13 = arith.constant 0 : index
    %c0_14 = arith.constant 0 : index
    %13 = vector.load %arg3[%c2, %c0_13, %c0_14] : memref<4x64x128xbf16, #tpu.memory_space<vmem>>, vector<1x64x128xbf16>
    %14 = vector.shape_cast %13 : vector<1x64x128xbf16> to vector<64x128xbf16>
    %cst_15 = arith.constant dense<0.000000e+00> : vector<40x128xf32>
    %15 = tpu.matmul %12, %14, %cst_15 {dimension_numbers = #tpu.dot_dimension_numbers<[1], [0], [0], [1], [0, 0, 1, 1], [], []>} : vector<40x64xbf16>, vector<64x128xbf16>, vector<40x128xf32> -> vector<40x128xf32>
    %16 = arith.addf %10, %15 : vector<40x128xf32>
    %c0_16 = arith.constant 0 : index
    %c9 = arith.constant 9 : index
    %c0_17 = arith.constant 0 : index
    %17 = vector.load %arg2[%c0_16, %c9, %c0_17] : memref<1x72x64xbf16, #tpu.memory_space<vmem>>, vector<1x40x64xbf16>
    %18 = vector.shape_cast %17 : vector<1x40x64xbf16> to vector<40x64xbf16>
    %c3 = arith.constant 3 : index
    %c0_18 = arith.constant 0 : index
    %c0_19 = arith.constant 0 : index
    %19 = vector.load %arg3[%c3, %c0_18, %c0_19] : memref<4x64x128xbf16, #tpu.memory_space<vmem>>, vector<1x64x128xbf16>
    %20 = vector.shape_cast %19 : vector<1x64x128xbf16> to vector<64x128xbf16>
    %cst_20 = arith.constant dense<0.000000e+00> : vector<40x128xf32>
    %21 = tpu.matmul %18, %20, %cst_20 {dimension_numbers = #tpu.dot_dimension_numbers<[1], [0], [0], [1], [0, 0, 1, 1], [], []>} : vector<40x64xbf16>, vector<64x128xbf16>, vector<40x128xf32> -> vector<40x128xf32>
    %22 = arith.addf %16, %21 : vector<40x128xf32>
    %c0_21 = arith.constant 0 : index
    %c0_22 = arith.constant 0 : index
    %23 = vector.load %arg4[%c0_21, %c0_22] : memref<40x1xf32, #tpu.memory_space<vmem>>, vector<40x1xf32>
    %24 = vector.broadcast %23 : vector<40x1xf32> to vector<40x128xf32>
    %25 = arith.mulf %22, %24 : vector<40x128xf32>
    %cst_23 = arith.constant dense<0.000000e+00> : vector<128xf32>
    %26 = vector.multi_reduction <add>, %25, %cst_23 [0] : vector<40x128xf32> to vector<128xf32>
    %27 = vector.shape_cast %26 : vector<128xf32> to vector<1x128xf32>
    %28 = arith.mulf %25, %22 : vector<40x128xf32>
    %cst_24 = arith.constant dense<0.000000e+00> : vector<128xf32>
    %29 = vector.multi_reduction <add>, %28, %cst_24 [0] : vector<40x128xf32> to vector<128xf32>
    %30 = vector.shape_cast %29 : vector<128xf32> to vector<1x128xf32>
    %cst_25 = arith.constant 4.000000e-02 : f32
    %31 = vector.broadcast %cst_25 : f32 to vector<1x128xf32>
    %32 = arith.mulf %27, %31 : vector<1x128xf32>
    %cst_26 = arith.constant 4.000000e-02 : f32
    %33 = vector.broadcast %cst_26 : f32 to vector<1x128xf32>
    %34 = arith.mulf %30, %33 : vector<1x128xf32>
    %35 = arith.mulf %32, %32 : vector<1x128xf32>
    %36 = arith.subf %34, %35 : vector<1x128xf32>
    %cst_27 = arith.constant 0.000000e+00 : f32
    %37 = vector.broadcast %cst_27 : f32 to vector<1x128xf32>
    %38 = arith.maximumf %36, %37 : vector<1x128xf32>
    %39 = vector.broadcast %32 : vector<1x128xf32> to vector<40x128xf32>
    %40 = arith.subf %22, %39 : vector<40x128xf32>
    %cst_28 = arith.constant 9.99999974E-6 : f32
    %41 = vector.broadcast %cst_28 : f32 to vector<1x128xf32>
    %42 = arith.addf %38, %41 : vector<1x128xf32>
    %43 = math.rsqrt %42 : vector<1x128xf32>
    %44 = vector.broadcast %43 : vector<1x128xf32> to vector<40x128xf32>
    %45 = arith.mulf %40, %44 : vector<40x128xf32>
    %cst_29 = arith.constant 2.000000e-01 : f32
    %46 = vector.broadcast %cst_29 : f32 to vector<40x128xf32>
    %47 = arith.mulf %46, %45 : vector<40x128xf32>
    %48 = arith.maximumf %45, %47 : vector<40x128xf32>
    %49 = arith.truncf %48 : vector<40x128xf32> to vector<40x128xbf16>
    %c0_30 = arith.constant 0 : index
    %c0_31 = arith.constant 0 : index
    %c0_32 = arith.constant 0 : index
    %50 = vector.load %arg5[%c0_30, %c0_31, %c0_32] : memref<1x40x128xbf16, #tpu.memory_space<vmem>>, vector<1x40x128xbf16>
    %51 = vector.shape_cast %50 : vector<1x40x128xbf16> to vector<40x128xbf16>
    %52 = vector.shape_cast %49 : vector<40x128xbf16> to vector<1x40x128xbf16>
    tpu.vector_store %arg5[%c0_30, %c0_31, %c0_32], %52 {strides = array<i32>} : memref<1x40x128xbf16, #tpu.memory_space<vmem>>, vector<1x40x128xbf16>,
    return
  }
  func.func @transform_0(%arg0: i32, %arg1: i32) -> (i32, i32, i32) {
    %c0_i32 = arith.constant 0 : i32
    %c0_i32_0 = arith.constant 0 : i32
    %c0_i32_1 = arith.constant 0 : i32
    return %arg1, %c0_i32, %c0_i32_0 : i32, i32, i32
  }
  func.func @transform_1(%arg0: i32, %arg1: i32) -> (i32, i32, i32) {
    %c0_i32 = arith.constant 0 : i32
    %c0_i32_0 = arith.constant 0 : i32
    %c0_i32_1 = arith.constant 0 : i32
    return %c0_i32, %c0_i32_0, %arg0 : i32, i32, i32
  }
  func.func @transform_2(%arg0: i32, %arg1: i32) -> (i32, i32) {
    %c0_i32 = arith.constant 0 : i32
    %c0_i32_0 = arith.constant 0 : i32
    %c0_i32_1 = arith.constant 0 : i32
    return %c0_i32, %c0_i32_0 : i32, i32
  }
  func.func @transform_3(%arg0: i32, %arg1: i32) -> (i32, i32, i32) {
    %c0_i32 = arith.constant 0 : i32
    %c0_i32_0 = arith.constant 0 : i32
    return %arg1, %c0_i32, %arg0 : i32, i32, i32
  }
}

module attributes {stable_mosaic.version = 11 : i64} {
  func.func @_conv_kernel(%arg0: i32, %arg1: i32, %arg2: memref<1x64x32xbf16, #tpu.memory_space<vmem>>, %arg3: memref<9x32x128xbf16, #tpu.memory_space<vmem>>, %arg4: memref<40x1xf32, #tpu.memory_space<vmem>>, %arg5: memref<1x40x128xbf16, #tpu.memory_space<vmem>>) attributes {dimension_semantics = [#tpu.dimension_semantics<parallel>, #tpu.dimension_semantics<parallel>], iteration_bounds = array<i64: 1, 2>, scalar_prefetch = 0 : i64, scratch_operands = 0 : i64, tpu.core_type = #tpu.core_type<tc>, window_params = [{transform_indices = @transform_0, window_bounds = array<i64: 1, 64, 32>}, {transform_indices = @transform_1, window_bounds = array<i64: 9, 32, 128>}, {pipeline_mode = #tpu.pipeline_mode<synchronous>, transform_indices = @transform_2, window_bounds = array<i64: 40, 1>}, {transform_indices = @transform_3, window_bounds = array<i64: 1, 40, 128>}]} {
    %c0 = arith.constant 0 : index
    %c0_0 = arith.constant 0 : index
    %c0_1 = arith.constant 0 : index
    %0 = vector.load %arg2[%c0, %c0_0, %c0_1] : memref<1x64x32xbf16, #tpu.memory_space<vmem>>, vector<1x40x32xbf16>
    %1 = vector.shape_cast %0 : vector<1x40x32xbf16> to vector<40x32xbf16>
    %c0_2 = arith.constant 0 : index
    %c0_3 = arith.constant 0 : index
    %c0_4 = arith.constant 0 : index
    %2 = vector.load %arg3[%c0_2, %c0_3, %c0_4] : memref<9x32x128xbf16, #tpu.memory_space<vmem>>, vector<1x32x128xbf16>
    %3 = vector.shape_cast %2 : vector<1x32x128xbf16> to vector<32x128xbf16>
    %cst = arith.constant dense<0.000000e+00> : vector<40x128xf32>
    %4 = tpu.matmul %1, %3, %cst {dimension_numbers = #tpu.dot_dimension_numbers<[1], [0], [0], [1], [0, 0, 1, 1], [], []>} : vector<40x32xbf16>, vector<32x128xbf16>, vector<40x128xf32> -> vector<40x128xf32>
    %c0_5 = arith.constant 0 : index
    %c1 = arith.constant 1 : index
    %c0_6 = arith.constant 0 : index
    %5 = vector.load %arg2[%c0_5, %c1, %c0_6] : memref<1x64x32xbf16, #tpu.memory_space<vmem>>, vector<1x40x32xbf16>
    %6 = vector.shape_cast %5 : vector<1x40x32xbf16> to vector<40x32xbf16>
    %c1_7 = arith.constant 1 : index
    %c0_8 = arith.constant 0 : index
    %c0_9 = arith.constant 0 : index
    %7 = vector.load %arg3[%c1_7, %c0_8, %c0_9] : memref<9x32x128xbf16, #tpu.memory_space<vmem>>, vector<1x32x128xbf16>
    %8 = vector.shape_cast %7 : vector<1x32x128xbf16> to vector<32x128xbf16>
    %cst_10 = arith.constant dense<0.000000e+00> : vector<40x128xf32>
    %9 = tpu.matmul %6, %8, %cst_10 {dimension_numbers = #tpu.dot_dimension_numbers<[1], [0], [0], [1], [0, 0, 1, 1], [], []>} : vector<40x32xbf16>, vector<32x128xbf16>, vector<40x128xf32> -> vector<40x128xf32>
    %10 = arith.addf %4, %9 : vector<40x128xf32>
    %c0_11 = arith.constant 0 : index
    %c2 = arith.constant 2 : index
    %c0_12 = arith.constant 0 : index
    %11 = vector.load %arg2[%c0_11, %c2, %c0_12] : memref<1x64x32xbf16, #tpu.memory_space<vmem>>, vector<1x40x32xbf16>
    %12 = vector.shape_cast %11 : vector<1x40x32xbf16> to vector<40x32xbf16>
    %c2_13 = arith.constant 2 : index
    %c0_14 = arith.constant 0 : index
    %c0_15 = arith.constant 0 : index
    %13 = vector.load %arg3[%c2_13, %c0_14, %c0_15] : memref<9x32x128xbf16, #tpu.memory_space<vmem>>, vector<1x32x128xbf16>
    %14 = vector.shape_cast %13 : vector<1x32x128xbf16> to vector<32x128xbf16>
    %cst_16 = arith.constant dense<0.000000e+00> : vector<40x128xf32>
    %15 = tpu.matmul %12, %14, %cst_16 {dimension_numbers = #tpu.dot_dimension_numbers<[1], [0], [0], [1], [0, 0, 1, 1], [], []>} : vector<40x32xbf16>, vector<32x128xbf16>, vector<40x128xf32> -> vector<40x128xf32>
    %16 = arith.addf %10, %15 : vector<40x128xf32>
    %c0_17 = arith.constant 0 : index
    %c8 = arith.constant 8 : index
    %c0_18 = arith.constant 0 : index
    %17 = vector.load %arg2[%c0_17, %c8, %c0_18] : memref<1x64x32xbf16, #tpu.memory_space<vmem>>, vector<1x40x32xbf16>
    %18 = vector.shape_cast %17 : vector<1x40x32xbf16> to vector<40x32xbf16>
    %c3 = arith.constant 3 : index
    %c0_19 = arith.constant 0 : index
    %c0_20 = arith.constant 0 : index
    %19 = vector.load %arg3[%c3, %c0_19, %c0_20] : memref<9x32x128xbf16, #tpu.memory_space<vmem>>, vector<1x32x128xbf16>
    %20 = vector.shape_cast %19 : vector<1x32x128xbf16> to vector<32x128xbf16>
    %cst_21 = arith.constant dense<0.000000e+00> : vector<40x128xf32>
    %21 = tpu.matmul %18, %20, %cst_21 {dimension_numbers = #tpu.dot_dimension_numbers<[1], [0], [0], [1], [0, 0, 1, 1], [], []>} : vector<40x32xbf16>, vector<32x128xbf16>, vector<40x128xf32> -> vector<40x128xf32>
    %22 = arith.addf %16, %21 : vector<40x128xf32>
    %c0_22 = arith.constant 0 : index
    %c9 = arith.constant 9 : index
    %c0_23 = arith.constant 0 : index
    %23 = vector.load %arg2[%c0_22, %c9, %c0_23] : memref<1x64x32xbf16, #tpu.memory_space<vmem>>, vector<1x40x32xbf16>
    %24 = vector.shape_cast %23 : vector<1x40x32xbf16> to vector<40x32xbf16>
    %c4 = arith.constant 4 : index
    %c0_24 = arith.constant 0 : index
    %c0_25 = arith.constant 0 : index
    %25 = vector.load %arg3[%c4, %c0_24, %c0_25] : memref<9x32x128xbf16, #tpu.memory_space<vmem>>, vector<1x32x128xbf16>
    %26 = vector.shape_cast %25 : vector<1x32x128xbf16> to vector<32x128xbf16>
    %cst_26 = arith.constant dense<0.000000e+00> : vector<40x128xf32>
    %27 = tpu.matmul %24, %26, %cst_26 {dimension_numbers = #tpu.dot_dimension_numbers<[1], [0], [0], [1], [0, 0, 1, 1], [], []>} : vector<40x32xbf16>, vector<32x128xbf16>, vector<40x128xf32> -> vector<40x128xf32>
    %28 = arith.addf %22, %27 : vector<40x128xf32>
    %c0_27 = arith.constant 0 : index
    %c10 = arith.constant 10 : index
    %c0_28 = arith.constant 0 : index
    %29 = vector.load %arg2[%c0_27, %c10, %c0_28] : memref<1x64x32xbf16, #tpu.memory_space<vmem>>, vector<1x40x32xbf16>
    %30 = vector.shape_cast %29 : vector<1x40x32xbf16> to vector<40x32xbf16>
    %c5 = arith.constant 5 : index
    %c0_29 = arith.constant 0 : index
    %c0_30 = arith.constant 0 : index
    %31 = vector.load %arg3[%c5, %c0_29, %c0_30] : memref<9x32x128xbf16, #tpu.memory_space<vmem>>, vector<1x32x128xbf16>
    %32 = vector.shape_cast %31 : vector<1x32x128xbf16> to vector<32x128xbf16>
    %cst_31 = arith.constant dense<0.000000e+00> : vector<40x128xf32>
    %33 = tpu.matmul %30, %32, %cst_31 {dimension_numbers = #tpu.dot_dimension_numbers<[1], [0], [0], [1], [0, 0, 1, 1], [], []>} : vector<40x32xbf16>, vector<32x128xbf16>, vector<40x128xf32> -> vector<40x128xf32>
    %34 = arith.addf %28, %33 : vector<40x128xf32>
    %c0_32 = arith.constant 0 : index
    %c16 = arith.constant 16 : index
    %c0_33 = arith.constant 0 : index
    %35 = vector.load %arg2[%c0_32, %c16, %c0_33] : memref<1x64x32xbf16, #tpu.memory_space<vmem>>, vector<1x40x32xbf16>
    %36 = vector.shape_cast %35 : vector<1x40x32xbf16> to vector<40x32xbf16>
    %c6 = arith.constant 6 : index
    %c0_34 = arith.constant 0 : index
    %c0_35 = arith.constant 0 : index
    %37 = vector.load %arg3[%c6, %c0_34, %c0_35] : memref<9x32x128xbf16, #tpu.memory_space<vmem>>, vector<1x32x128xbf16>
    %38 = vector.shape_cast %37 : vector<1x32x128xbf16> to vector<32x128xbf16>
    %cst_36 = arith.constant dense<0.000000e+00> : vector<40x128xf32>
    %39 = tpu.matmul %36, %38, %cst_36 {dimension_numbers = #tpu.dot_dimension_numbers<[1], [0], [0], [1], [0, 0, 1, 1], [], []>} : vector<40x32xbf16>, vector<32x128xbf16>, vector<40x128xf32> -> vector<40x128xf32>
    %40 = arith.addf %34, %39 : vector<40x128xf32>
    %c0_37 = arith.constant 0 : index
    %c17 = arith.constant 17 : index
    %c0_38 = arith.constant 0 : index
    %41 = vector.load %arg2[%c0_37, %c17, %c0_38] : memref<1x64x32xbf16, #tpu.memory_space<vmem>>, vector<1x40x32xbf16>
    %42 = vector.shape_cast %41 : vector<1x40x32xbf16> to vector<40x32xbf16>
    %c7 = arith.constant 7 : index
    %c0_39 = arith.constant 0 : index
    %c0_40 = arith.constant 0 : index
    %43 = vector.load %arg3[%c7, %c0_39, %c0_40] : memref<9x32x128xbf16, #tpu.memory_space<vmem>>, vector<1x32x128xbf16>
    %44 = vector.shape_cast %43 : vector<1x32x128xbf16> to vector<32x128xbf16>
    %cst_41 = arith.constant dense<0.000000e+00> : vector<40x128xf32>
    %45 = tpu.matmul %42, %44, %cst_41 {dimension_numbers = #tpu.dot_dimension_numbers<[1], [0], [0], [1], [0, 0, 1, 1], [], []>} : vector<40x32xbf16>, vector<32x128xbf16>, vector<40x128xf32> -> vector<40x128xf32>
    %46 = arith.addf %40, %45 : vector<40x128xf32>
    %c0_42 = arith.constant 0 : index
    %c18 = arith.constant 18 : index
    %c0_43 = arith.constant 0 : index
    %47 = vector.load %arg2[%c0_42, %c18, %c0_43] : memref<1x64x32xbf16, #tpu.memory_space<vmem>>, vector<1x40x32xbf16>
    %48 = vector.shape_cast %47 : vector<1x40x32xbf16> to vector<40x32xbf16>
    %c8_44 = arith.constant 8 : index
    %c0_45 = arith.constant 0 : index
    %c0_46 = arith.constant 0 : index
    %49 = vector.load %arg3[%c8_44, %c0_45, %c0_46] : memref<9x32x128xbf16, #tpu.memory_space<vmem>>, vector<1x32x128xbf16>
    %50 = vector.shape_cast %49 : vector<1x32x128xbf16> to vector<32x128xbf16>
    %cst_47 = arith.constant dense<0.000000e+00> : vector<40x128xf32>
    %51 = tpu.matmul %48, %50, %cst_47 {dimension_numbers = #tpu.dot_dimension_numbers<[1], [0], [0], [1], [0, 0, 1, 1], [], []>} : vector<40x32xbf16>, vector<32x128xbf16>, vector<40x128xf32> -> vector<40x128xf32>
    %52 = arith.addf %46, %51 : vector<40x128xf32>
    %c0_48 = arith.constant 0 : index
    %c0_49 = arith.constant 0 : index
    %53 = vector.load %arg4[%c0_48, %c0_49] : memref<40x1xf32, #tpu.memory_space<vmem>>, vector<40x1xf32>
    %54 = vector.broadcast %53 : vector<40x1xf32> to vector<40x128xf32>
    %55 = arith.mulf %52, %54 : vector<40x128xf32>
    %cst_50 = arith.constant dense<0.000000e+00> : vector<128xf32>
    %56 = vector.multi_reduction <add>, %55, %cst_50 [0] : vector<40x128xf32> to vector<128xf32>
    %57 = vector.shape_cast %56 : vector<128xf32> to vector<1x128xf32>
    %58 = arith.mulf %55, %52 : vector<40x128xf32>
    %cst_51 = arith.constant dense<0.000000e+00> : vector<128xf32>
    %59 = vector.multi_reduction <add>, %58, %cst_51 [0] : vector<40x128xf32> to vector<128xf32>
    %60 = vector.shape_cast %59 : vector<128xf32> to vector<1x128xf32>
    %cst_52 = arith.constant 4.000000e-02 : f32
    %61 = vector.broadcast %cst_52 : f32 to vector<1x128xf32>
    %62 = arith.mulf %57, %61 : vector<1x128xf32>
    %cst_53 = arith.constant 4.000000e-02 : f32
    %63 = vector.broadcast %cst_53 : f32 to vector<1x128xf32>
    %64 = arith.mulf %60, %63 : vector<1x128xf32>
    %65 = arith.mulf %62, %62 : vector<1x128xf32>
    %66 = arith.subf %64, %65 : vector<1x128xf32>
    %cst_54 = arith.constant 0.000000e+00 : f32
    %67 = vector.broadcast %cst_54 : f32 to vector<1x128xf32>
    %68 = arith.maximumf %66, %67 : vector<1x128xf32>
    %69 = vector.broadcast %62 : vector<1x128xf32> to vector<40x128xf32>
    %70 = arith.subf %52, %69 : vector<40x128xf32>
    %cst_55 = arith.constant 9.99999974E-6 : f32
    %71 = vector.broadcast %cst_55 : f32 to vector<1x128xf32>
    %72 = arith.addf %68, %71 : vector<1x128xf32>
    %73 = math.rsqrt %72 : vector<1x128xf32>
    %74 = vector.broadcast %73 : vector<1x128xf32> to vector<40x128xf32>
    %75 = arith.mulf %70, %74 : vector<40x128xf32>
    %cst_56 = arith.constant 2.000000e-01 : f32
    %76 = vector.broadcast %cst_56 : f32 to vector<40x128xf32>
    %77 = arith.mulf %76, %75 : vector<40x128xf32>
    %78 = arith.maximumf %75, %77 : vector<40x128xf32>
    %79 = arith.truncf %78 : vector<40x128xf32> to vector<40x128xbf16>
    %c0_57 = arith.constant 0 : index
    %c0_58 = arith.constant 0 : index
    %c0_59 = arith.constant 0 : index
    %80 = vector.load %arg5[%c0_57, %c0_58, %c0_59] : memref<1x40x128xbf16, #tpu.memory_space<vmem>>, vector<1x40x128xbf16>
    %81 = vector.shape_cast %80 : vector<1x40x128xbf16> to vector<40x128xbf16>
    %82 = vector.shape_cast %79 : vector<40x128xbf16> to vector<1x40x128xbf16>
    tpu.vector_store %arg5[%c0_57, %c0_58, %c0_59], %82 {strides = array<i32>} : memref<1x40x128xbf16, #tpu.memory_space<vmem>>, vector<1x40x128xbf16>,
    return
  }
  func.func @transform_0(%arg0: i32, %arg1: i32) -> (i32, i32, i32) {
    %c0_i32 = arith.constant 0 : i32
    %c0_i32_0 = arith.constant 0 : i32
    %c0_i32_1 = arith.constant 0 : i32
    return %arg1, %c0_i32, %c0_i32_0 : i32, i32, i32
  }
  func.func @transform_1(%arg0: i32, %arg1: i32) -> (i32, i32, i32) {
    %c0_i32 = arith.constant 0 : i32
    %c0_i32_0 = arith.constant 0 : i32
    %c0_i32_1 = arith.constant 0 : i32
    return %c0_i32, %c0_i32_0, %arg0 : i32, i32, i32
  }
  func.func @transform_2(%arg0: i32, %arg1: i32) -> (i32, i32) {
    %c0_i32 = arith.constant 0 : i32
    %c0_i32_0 = arith.constant 0 : i32
    %c0_i32_1 = arith.constant 0 : i32
    return %c0_i32, %c0_i32_0 : i32, i32
  }
  func.func @transform_3(%arg0: i32, %arg1: i32) -> (i32, i32, i32) {
    %c0_i32 = arith.constant 0 : i32
    %c0_i32_0 = arith.constant 0 : i32
    return %arg1, %c0_i32, %arg0 : i32, i32, i32
  }
}

module attributes {stable_mosaic.version = 11 : i64} {
  func.func @_conv_kernel(%arg0: i32, %arg1: i32, %arg2: memref<1x64x32xbf16, #tpu.memory_space<vmem>>, %arg3: memref<9x32x128xbf16, #tpu.memory_space<vmem>>, %arg4: memref<40x1xf32, #tpu.memory_space<vmem>>, %arg5: memref<1x40x128xbf16, #tpu.memory_space<vmem>>, %arg6: memref<1x40x128xbf16, #tpu.memory_space<vmem>>) attributes {dimension_semantics = [#tpu.dimension_semantics<parallel>, #tpu.dimension_semantics<parallel>], iteration_bounds = array<i64: 1, 2>, scalar_prefetch = 0 : i64, scratch_operands = 0 : i64, tpu.core_type = #tpu.core_type<tc>, window_params = [{transform_indices = @transform_0, window_bounds = array<i64: 1, 64, 32>}, {transform_indices = @transform_1, window_bounds = array<i64: 9, 32, 128>}, {pipeline_mode = #tpu.pipeline_mode<synchronous>, transform_indices = @transform_2, window_bounds = array<i64: 40, 1>}, {transform_indices = @transform_3, window_bounds = array<i64: 1, 40, 128>}, {transform_indices = @transform_4, window_bounds = array<i64: 1, 40, 128>}]} {
    %c0 = arith.constant 0 : index
    %c0_0 = arith.constant 0 : index
    %c0_1 = arith.constant 0 : index
    %0 = vector.load %arg2[%c0, %c0_0, %c0_1] : memref<1x64x32xbf16, #tpu.memory_space<vmem>>, vector<1x40x32xbf16>
    %1 = vector.shape_cast %0 : vector<1x40x32xbf16> to vector<40x32xbf16>
    %c0_2 = arith.constant 0 : index
    %c0_3 = arith.constant 0 : index
    %c0_4 = arith.constant 0 : index
    %2 = vector.load %arg3[%c0_2, %c0_3, %c0_4] : memref<9x32x128xbf16, #tpu.memory_space<vmem>>, vector<1x32x128xbf16>
    %3 = vector.shape_cast %2 : vector<1x32x128xbf16> to vector<32x128xbf16>
    %cst = arith.constant dense<0.000000e+00> : vector<40x128xf32>
    %4 = tpu.matmul %1, %3, %cst {dimension_numbers = #tpu.dot_dimension_numbers<[1], [0], [0], [1], [0, 0, 1, 1], [], []>} : vector<40x32xbf16>, vector<32x128xbf16>, vector<40x128xf32> -> vector<40x128xf32>
    %c0_5 = arith.constant 0 : index
    %c1 = arith.constant 1 : index
    %c0_6 = arith.constant 0 : index
    %5 = vector.load %arg2[%c0_5, %c1, %c0_6] : memref<1x64x32xbf16, #tpu.memory_space<vmem>>, vector<1x40x32xbf16>
    %6 = vector.shape_cast %5 : vector<1x40x32xbf16> to vector<40x32xbf16>
    %c1_7 = arith.constant 1 : index
    %c0_8 = arith.constant 0 : index
    %c0_9 = arith.constant 0 : index
    %7 = vector.load %arg3[%c1_7, %c0_8, %c0_9] : memref<9x32x128xbf16, #tpu.memory_space<vmem>>, vector<1x32x128xbf16>
    %8 = vector.shape_cast %7 : vector<1x32x128xbf16> to vector<32x128xbf16>
    %cst_10 = arith.constant dense<0.000000e+00> : vector<40x128xf32>
    %9 = tpu.matmul %6, %8, %cst_10 {dimension_numbers = #tpu.dot_dimension_numbers<[1], [0], [0], [1], [0, 0, 1, 1], [], []>} : vector<40x32xbf16>, vector<32x128xbf16>, vector<40x128xf32> -> vector<40x128xf32>
    %10 = arith.addf %4, %9 : vector<40x128xf32>
    %c0_11 = arith.constant 0 : index
    %c2 = arith.constant 2 : index
    %c0_12 = arith.constant 0 : index
    %11 = vector.load %arg2[%c0_11, %c2, %c0_12] : memref<1x64x32xbf16, #tpu.memory_space<vmem>>, vector<1x40x32xbf16>
    %12 = vector.shape_cast %11 : vector<1x40x32xbf16> to vector<40x32xbf16>
    %c2_13 = arith.constant 2 : index
    %c0_14 = arith.constant 0 : index
    %c0_15 = arith.constant 0 : index
    %13 = vector.load %arg3[%c2_13, %c0_14, %c0_15] : memref<9x32x128xbf16, #tpu.memory_space<vmem>>, vector<1x32x128xbf16>
    %14 = vector.shape_cast %13 : vector<1x32x128xbf16> to vector<32x128xbf16>
    %cst_16 = arith.constant dense<0.000000e+00> : vector<40x128xf32>
    %15 = tpu.matmul %12, %14, %cst_16 {dimension_numbers = #tpu.dot_dimension_numbers<[1], [0], [0], [1], [0, 0, 1, 1], [], []>} : vector<40x32xbf16>, vector<32x128xbf16>, vector<40x128xf32> -> vector<40x128xf32>
    %16 = arith.addf %10, %15 : vector<40x128xf32>
    %c0_17 = arith.constant 0 : index
    %c8 = arith.constant 8 : index
    %c0_18 = arith.constant 0 : index
    %17 = vector.load %arg2[%c0_17, %c8, %c0_18] : memref<1x64x32xbf16, #tpu.memory_space<vmem>>, vector<1x40x32xbf16>
    %18 = vector.shape_cast %17 : vector<1x40x32xbf16> to vector<40x32xbf16>
    %c3 = arith.constant 3 : index
    %c0_19 = arith.constant 0 : index
    %c0_20 = arith.constant 0 : index
    %19 = vector.load %arg3[%c3, %c0_19, %c0_20] : memref<9x32x128xbf16, #tpu.memory_space<vmem>>, vector<1x32x128xbf16>
    %20 = vector.shape_cast %19 : vector<1x32x128xbf16> to vector<32x128xbf16>
    %cst_21 = arith.constant dense<0.000000e+00> : vector<40x128xf32>
    %21 = tpu.matmul %18, %20, %cst_21 {dimension_numbers = #tpu.dot_dimension_numbers<[1], [0], [0], [1], [0, 0, 1, 1], [], []>} : vector<40x32xbf16>, vector<32x128xbf16>, vector<40x128xf32> -> vector<40x128xf32>
    %22 = arith.addf %16, %21 : vector<40x128xf32>
    %c0_22 = arith.constant 0 : index
    %c9 = arith.constant 9 : index
    %c0_23 = arith.constant 0 : index
    %23 = vector.load %arg2[%c0_22, %c9, %c0_23] : memref<1x64x32xbf16, #tpu.memory_space<vmem>>, vector<1x40x32xbf16>
    %24 = vector.shape_cast %23 : vector<1x40x32xbf16> to vector<40x32xbf16>
    %c4 = arith.constant 4 : index
    %c0_24 = arith.constant 0 : index
    %c0_25 = arith.constant 0 : index
    %25 = vector.load %arg3[%c4, %c0_24, %c0_25] : memref<9x32x128xbf16, #tpu.memory_space<vmem>>, vector<1x32x128xbf16>
    %26 = vector.shape_cast %25 : vector<1x32x128xbf16> to vector<32x128xbf16>
    %cst_26 = arith.constant dense<0.000000e+00> : vector<40x128xf32>
    %27 = tpu.matmul %24, %26, %cst_26 {dimension_numbers = #tpu.dot_dimension_numbers<[1], [0], [0], [1], [0, 0, 1, 1], [], []>} : vector<40x32xbf16>, vector<32x128xbf16>, vector<40x128xf32> -> vector<40x128xf32>
    %28 = arith.addf %22, %27 : vector<40x128xf32>
    %c0_27 = arith.constant 0 : index
    %c10 = arith.constant 10 : index
    %c0_28 = arith.constant 0 : index
    %29 = vector.load %arg2[%c0_27, %c10, %c0_28] : memref<1x64x32xbf16, #tpu.memory_space<vmem>>, vector<1x40x32xbf16>
    %30 = vector.shape_cast %29 : vector<1x40x32xbf16> to vector<40x32xbf16>
    %c5 = arith.constant 5 : index
    %c0_29 = arith.constant 0 : index
    %c0_30 = arith.constant 0 : index
    %31 = vector.load %arg3[%c5, %c0_29, %c0_30] : memref<9x32x128xbf16, #tpu.memory_space<vmem>>, vector<1x32x128xbf16>
    %32 = vector.shape_cast %31 : vector<1x32x128xbf16> to vector<32x128xbf16>
    %cst_31 = arith.constant dense<0.000000e+00> : vector<40x128xf32>
    %33 = tpu.matmul %30, %32, %cst_31 {dimension_numbers = #tpu.dot_dimension_numbers<[1], [0], [0], [1], [0, 0, 1, 1], [], []>} : vector<40x32xbf16>, vector<32x128xbf16>, vector<40x128xf32> -> vector<40x128xf32>
    %34 = arith.addf %28, %33 : vector<40x128xf32>
    %c0_32 = arith.constant 0 : index
    %c16 = arith.constant 16 : index
    %c0_33 = arith.constant 0 : index
    %35 = vector.load %arg2[%c0_32, %c16, %c0_33] : memref<1x64x32xbf16, #tpu.memory_space<vmem>>, vector<1x40x32xbf16>
    %36 = vector.shape_cast %35 : vector<1x40x32xbf16> to vector<40x32xbf16>
    %c6 = arith.constant 6 : index
    %c0_34 = arith.constant 0 : index
    %c0_35 = arith.constant 0 : index
    %37 = vector.load %arg3[%c6, %c0_34, %c0_35] : memref<9x32x128xbf16, #tpu.memory_space<vmem>>, vector<1x32x128xbf16>
    %38 = vector.shape_cast %37 : vector<1x32x128xbf16> to vector<32x128xbf16>
    %cst_36 = arith.constant dense<0.000000e+00> : vector<40x128xf32>
    %39 = tpu.matmul %36, %38, %cst_36 {dimension_numbers = #tpu.dot_dimension_numbers<[1], [0], [0], [1], [0, 0, 1, 1], [], []>} : vector<40x32xbf16>, vector<32x128xbf16>, vector<40x128xf32> -> vector<40x128xf32>
    %40 = arith.addf %34, %39 : vector<40x128xf32>
    %c0_37 = arith.constant 0 : index
    %c17 = arith.constant 17 : index
    %c0_38 = arith.constant 0 : index
    %41 = vector.load %arg2[%c0_37, %c17, %c0_38] : memref<1x64x32xbf16, #tpu.memory_space<vmem>>, vector<1x40x32xbf16>
    %42 = vector.shape_cast %41 : vector<1x40x32xbf16> to vector<40x32xbf16>
    %c7 = arith.constant 7 : index
    %c0_39 = arith.constant 0 : index
    %c0_40 = arith.constant 0 : index
    %43 = vector.load %arg3[%c7, %c0_39, %c0_40] : memref<9x32x128xbf16, #tpu.memory_space<vmem>>, vector<1x32x128xbf16>
    %44 = vector.shape_cast %43 : vector<1x32x128xbf16> to vector<32x128xbf16>
    %cst_41 = arith.constant dense<0.000000e+00> : vector<40x128xf32>
    %45 = tpu.matmul %42, %44, %cst_41 {dimension_numbers = #tpu.dot_dimension_numbers<[1], [0], [0], [1], [0, 0, 1, 1], [], []>} : vector<40x32xbf16>, vector<32x128xbf16>, vector<40x128xf32> -> vector<40x128xf32>
    %46 = arith.addf %40, %45 : vector<40x128xf32>
    %c0_42 = arith.constant 0 : index
    %c18 = arith.constant 18 : index
    %c0_43 = arith.constant 0 : index
    %47 = vector.load %arg2[%c0_42, %c18, %c0_43] : memref<1x64x32xbf16, #tpu.memory_space<vmem>>, vector<1x40x32xbf16>
    %48 = vector.shape_cast %47 : vector<1x40x32xbf16> to vector<40x32xbf16>
    %c8_44 = arith.constant 8 : index
    %c0_45 = arith.constant 0 : index
    %c0_46 = arith.constant 0 : index
    %49 = vector.load %arg3[%c8_44, %c0_45, %c0_46] : memref<9x32x128xbf16, #tpu.memory_space<vmem>>, vector<1x32x128xbf16>
    %50 = vector.shape_cast %49 : vector<1x32x128xbf16> to vector<32x128xbf16>
    %cst_47 = arith.constant dense<0.000000e+00> : vector<40x128xf32>
    %51 = tpu.matmul %48, %50, %cst_47 {dimension_numbers = #tpu.dot_dimension_numbers<[1], [0], [0], [1], [0, 0, 1, 1], [], []>} : vector<40x32xbf16>, vector<32x128xbf16>, vector<40x128xf32> -> vector<40x128xf32>
    %52 = arith.addf %46, %51 : vector<40x128xf32>
    %c0_48 = arith.constant 0 : index
    %c0_49 = arith.constant 0 : index
    %53 = vector.load %arg4[%c0_48, %c0_49] : memref<40x1xf32, #tpu.memory_space<vmem>>, vector<40x1xf32>
    %54 = vector.broadcast %53 : vector<40x1xf32> to vector<40x128xf32>
    %55 = arith.mulf %52, %54 : vector<40x128xf32>
    %cst_50 = arith.constant dense<0.000000e+00> : vector<128xf32>
    %56 = vector.multi_reduction <add>, %55, %cst_50 [0] : vector<40x128xf32> to vector<128xf32>
    %57 = vector.shape_cast %56 : vector<128xf32> to vector<1x128xf32>
    %58 = arith.mulf %55, %52 : vector<40x128xf32>
    %cst_51 = arith.constant dense<0.000000e+00> : vector<128xf32>
    %59 = vector.multi_reduction <add>, %58, %cst_51 [0] : vector<40x128xf32> to vector<128xf32>
    %60 = vector.shape_cast %59 : vector<128xf32> to vector<1x128xf32>
    %cst_52 = arith.constant 4.000000e-02 : f32
    %61 = vector.broadcast %cst_52 : f32 to vector<1x128xf32>
    %62 = arith.mulf %57, %61 : vector<1x128xf32>
    %cst_53 = arith.constant 4.000000e-02 : f32
    %63 = vector.broadcast %cst_53 : f32 to vector<1x128xf32>
    %64 = arith.mulf %60, %63 : vector<1x128xf32>
    %65 = arith.mulf %62, %62 : vector<1x128xf32>
    %66 = arith.subf %64, %65 : vector<1x128xf32>
    %cst_54 = arith.constant 0.000000e+00 : f32
    %67 = vector.broadcast %cst_54 : f32 to vector<1x128xf32>
    %68 = arith.maximumf %66, %67 : vector<1x128xf32>
    %69 = vector.broadcast %62 : vector<1x128xf32> to vector<40x128xf32>
    %70 = arith.subf %52, %69 : vector<40x128xf32>
    %cst_55 = arith.constant 9.99999974E-6 : f32
    %71 = vector.broadcast %cst_55 : f32 to vector<1x128xf32>
    %72 = arith.addf %68, %71 : vector<1x128xf32>
    %73 = math.rsqrt %72 : vector<1x128xf32>
    %74 = vector.broadcast %73 : vector<1x128xf32> to vector<40x128xf32>
    %75 = arith.mulf %70, %74 : vector<40x128xf32>
    %c0_56 = arith.constant 0 : index
    %c0_57 = arith.constant 0 : index
    %c0_58 = arith.constant 0 : index
    %76 = vector.load %arg5[%c0_56, %c0_57, %c0_58] : memref<1x40x128xbf16, #tpu.memory_space<vmem>>, vector<1x40x128xbf16>
    %77 = vector.shape_cast %76 : vector<1x40x128xbf16> to vector<40x128xbf16>
    %78 = arith.extf %77 : vector<40x128xbf16> to vector<40x128xf32>
    %79 = arith.addf %75, %78 : vector<40x128xf32>
    %80 = arith.truncf %79 : vector<40x128xf32> to vector<40x128xbf16>
    %c0_59 = arith.constant 0 : index
    %c0_60 = arith.constant 0 : index
    %c0_61 = arith.constant 0 : index
    %81 = vector.load %arg6[%c0_59, %c0_60, %c0_61] : memref<1x40x128xbf16, #tpu.memory_space<vmem>>, vector<1x40x128xbf16>
    %82 = vector.shape_cast %81 : vector<1x40x128xbf16> to vector<40x128xbf16>
    %83 = vector.shape_cast %80 : vector<40x128xbf16> to vector<1x40x128xbf16>
    tpu.vector_store %arg6[%c0_59, %c0_60, %c0_61], %83 {strides = array<i32>} : memref<1x40x128xbf16, #tpu.memory_space<vmem>>, vector<1x40x128xbf16>,
    return
  }
  func.func @transform_0(%arg0: i32, %arg1: i32) -> (i32, i32, i32) {
    %c0_i32 = arith.constant 0 : i32
    %c0_i32_0 = arith.constant 0 : i32
    %c0_i32_1 = arith.constant 0 : i32
    return %arg1, %c0_i32, %c0_i32_0 : i32, i32, i32
  }
  func.func @transform_1(%arg0: i32, %arg1: i32) -> (i32, i32, i32) {
    %c0_i32 = arith.constant 0 : i32
    %c0_i32_0 = arith.constant 0 : i32
    %c0_i32_1 = arith.constant 0 : i32
    return %c0_i32, %c0_i32_0, %arg0 : i32, i32, i32
  }
  func.func @transform_2(%arg0: i32, %arg1: i32) -> (i32, i32) {
    %c0_i32 = arith.constant 0 : i32
    %c0_i32_0 = arith.constant 0 : i32
    %c0_i32_1 = arith.constant 0 : i32
    return %c0_i32, %c0_i32_0 : i32, i32
  }
  func.func @transform_3(%arg0: i32, %arg1: i32) -> (i32, i32, i32) {
    %c0_i32 = arith.constant 0 : i32
    %c0_i32_0 = arith.constant 0 : i32
    return %arg1, %c0_i32, %arg0 : i32, i32, i32
  }
  func.func @transform_4(%arg0: i32, %arg1: i32) -> (i32, i32, i32) {
    %c0_i32 = arith.constant 0 : i32
    %c0_i32_0 = arith.constant 0 : i32
    return %arg1, %c0_i32, %arg0 : i32, i32, i32
  }
}

module attributes {stable_mosaic.version = 11 : i64} {
  func.func @_conv_kernel(%arg0: i32, %arg1: i32, %arg2: memref<1x56x128xbf16, #tpu.memory_space<vmem>>, %arg3: memref<4x128x128xbf16, #tpu.memory_space<vmem>>, %arg4: memref<24x1xf32, #tpu.memory_space<vmem>>, %arg5: memref<1x24x128xbf16, #tpu.memory_space<vmem>>) attributes {dimension_semantics = [#tpu.dimension_semantics<parallel>, #tpu.dimension_semantics<parallel>], iteration_bounds = array<i64: 1, 2>, scalar_prefetch = 0 : i64, scratch_operands = 0 : i64, tpu.core_type = #tpu.core_type<tc>, window_params = [{transform_indices = @transform_0, window_bounds = array<i64: 1, 56, 128>}, {transform_indices = @transform_1, window_bounds = array<i64: 4, 128, 128>}, {pipeline_mode = #tpu.pipeline_mode<synchronous>, transform_indices = @transform_2, window_bounds = array<i64: 24, 1>}, {transform_indices = @transform_3, window_bounds = array<i64: 1, 24, 128>}]} {
    %c0 = arith.constant 0 : index
    %c0_0 = arith.constant 0 : index
    %c0_1 = arith.constant 0 : index
    %0 = vector.load %arg2[%c0, %c0_0, %c0_1] : memref<1x56x128xbf16, #tpu.memory_space<vmem>>, vector<1x24x128xbf16>
    %1 = vector.shape_cast %0 : vector<1x24x128xbf16> to vector<24x128xbf16>
    %c0_2 = arith.constant 0 : index
    %c0_3 = arith.constant 0 : index
    %c0_4 = arith.constant 0 : index
    %2 = vector.load %arg3[%c0_2, %c0_3, %c0_4] : memref<4x128x128xbf16, #tpu.memory_space<vmem>>, vector<1x128x128xbf16>
    %3 = vector.shape_cast %2 : vector<1x128x128xbf16> to vector<128x128xbf16>
    %cst = arith.constant dense<0.000000e+00> : vector<24x128xf32>
    %4 = tpu.matmul %1, %3, %cst {dimension_numbers = #tpu.dot_dimension_numbers<[1], [0], [0], [1], [0, 0, 1, 1], [], []>} : vector<24x128xbf16>, vector<128x128xbf16>, vector<24x128xf32> -> vector<24x128xf32>
    %c0_5 = arith.constant 0 : index
    %c1 = arith.constant 1 : index
    %c0_6 = arith.constant 0 : index
    %5 = vector.load %arg2[%c0_5, %c1, %c0_6] : memref<1x56x128xbf16, #tpu.memory_space<vmem>>, vector<1x24x128xbf16>
    %6 = vector.shape_cast %5 : vector<1x24x128xbf16> to vector<24x128xbf16>
    %c1_7 = arith.constant 1 : index
    %c0_8 = arith.constant 0 : index
    %c0_9 = arith.constant 0 : index
    %7 = vector.load %arg3[%c1_7, %c0_8, %c0_9] : memref<4x128x128xbf16, #tpu.memory_space<vmem>>, vector<1x128x128xbf16>
    %8 = vector.shape_cast %7 : vector<1x128x128xbf16> to vector<128x128xbf16>
    %cst_10 = arith.constant dense<0.000000e+00> : vector<24x128xf32>
    %9 = tpu.matmul %6, %8, %cst_10 {dimension_numbers = #tpu.dot_dimension_numbers<[1], [0], [0], [1], [0, 0, 1, 1], [], []>} : vector<24x128xbf16>, vector<128x128xbf16>, vector<24x128xf32> -> vector<24x128xf32>
    %10 = arith.addf %4, %9 : vector<24x128xf32>
    %c0_11 = arith.constant 0 : index
    %c8 = arith.constant 8 : index
    %c0_12 = arith.constant 0 : index
    %11 = vector.load %arg2[%c0_11, %c8, %c0_12] : memref<1x56x128xbf16, #tpu.memory_space<vmem>>, vector<1x24x128xbf16>
    %12 = vector.shape_cast %11 : vector<1x24x128xbf16> to vector<24x128xbf16>
    %c2 = arith.constant 2 : index
    %c0_13 = arith.constant 0 : index
    %c0_14 = arith.constant 0 : index
    %13 = vector.load %arg3[%c2, %c0_13, %c0_14] : memref<4x128x128xbf16, #tpu.memory_space<vmem>>, vector<1x128x128xbf16>
    %14 = vector.shape_cast %13 : vector<1x128x128xbf16> to vector<128x128xbf16>
    %cst_15 = arith.constant dense<0.000000e+00> : vector<24x128xf32>
    %15 = tpu.matmul %12, %14, %cst_15 {dimension_numbers = #tpu.dot_dimension_numbers<[1], [0], [0], [1], [0, 0, 1, 1], [], []>} : vector<24x128xbf16>, vector<128x128xbf16>, vector<24x128xf32> -> vector<24x128xf32>
    %16 = arith.addf %10, %15 : vector<24x128xf32>
    %c0_16 = arith.constant 0 : index
    %c9 = arith.constant 9 : index
    %c0_17 = arith.constant 0 : index
    %17 = vector.load %arg2[%c0_16, %c9, %c0_17] : memref<1x56x128xbf16, #tpu.memory_space<vmem>>, vector<1x24x128xbf16>
    %18 = vector.shape_cast %17 : vector<1x24x128xbf16> to vector<24x128xbf16>
    %c3 = arith.constant 3 : index
    %c0_18 = arith.constant 0 : index
    %c0_19 = arith.constant 0 : index
    %19 = vector.load %arg3[%c3, %c0_18, %c0_19] : memref<4x128x128xbf16, #tpu.memory_space<vmem>>, vector<1x128x128xbf16>
    %20 = vector.shape_cast %19 : vector<1x128x128xbf16> to vector<128x128xbf16>
    %cst_20 = arith.constant dense<0.000000e+00> : vector<24x128xf32>
    %21 = tpu.matmul %18, %20, %cst_20 {dimension_numbers = #tpu.dot_dimension_numbers<[1], [0], [0], [1], [0, 0, 1, 1], [], []>} : vector<24x128xbf16>, vector<128x128xbf16>, vector<24x128xf32> -> vector<24x128xf32>
    %22 = arith.addf %16, %21 : vector<24x128xf32>
    %c0_21 = arith.constant 0 : index
    %c0_22 = arith.constant 0 : index
    %23 = vector.load %arg4[%c0_21, %c0_22] : memref<24x1xf32, #tpu.memory_space<vmem>>, vector<24x1xf32>
    %24 = vector.broadcast %23 : vector<24x1xf32> to vector<24x128xf32>
    %25 = arith.mulf %22, %24 : vector<24x128xf32>
    %cst_23 = arith.constant dense<0.000000e+00> : vector<128xf32>
    %26 = vector.multi_reduction <add>, %25, %cst_23 [0] : vector<24x128xf32> to vector<128xf32>
    %27 = vector.shape_cast %26 : vector<128xf32> to vector<1x128xf32>
    %28 = arith.mulf %25, %22 : vector<24x128xf32>
    %cst_24 = arith.constant dense<0.000000e+00> : vector<128xf32>
    %29 = vector.multi_reduction <add>, %28, %cst_24 [0] : vector<24x128xf32> to vector<128xf32>
    %30 = vector.shape_cast %29 : vector<128xf32> to vector<1x128xf32>
    %cst_25 = arith.constant 0.111111112 : f32
    %31 = vector.broadcast %cst_25 : f32 to vector<1x128xf32>
    %32 = arith.mulf %27, %31 : vector<1x128xf32>
    %cst_26 = arith.constant 0.111111112 : f32
    %33 = vector.broadcast %cst_26 : f32 to vector<1x128xf32>
    %34 = arith.mulf %30, %33 : vector<1x128xf32>
    %35 = arith.mulf %32, %32 : vector<1x128xf32>
    %36 = arith.subf %34, %35 : vector<1x128xf32>
    %cst_27 = arith.constant 0.000000e+00 : f32
    %37 = vector.broadcast %cst_27 : f32 to vector<1x128xf32>
    %38 = arith.maximumf %36, %37 : vector<1x128xf32>
    %39 = vector.broadcast %32 : vector<1x128xf32> to vector<24x128xf32>
    %40 = arith.subf %22, %39 : vector<24x128xf32>
    %cst_28 = arith.constant 9.99999974E-6 : f32
    %41 = vector.broadcast %cst_28 : f32 to vector<1x128xf32>
    %42 = arith.addf %38, %41 : vector<1x128xf32>
    %43 = math.rsqrt %42 : vector<1x128xf32>
    %44 = vector.broadcast %43 : vector<1x128xf32> to vector<24x128xf32>
    %45 = arith.mulf %40, %44 : vector<24x128xf32>
    %cst_29 = arith.constant 2.000000e-01 : f32
    %46 = vector.broadcast %cst_29 : f32 to vector<24x128xf32>
    %47 = arith.mulf %46, %45 : vector<24x128xf32>
    %48 = arith.maximumf %45, %47 : vector<24x128xf32>
    %49 = arith.truncf %48 : vector<24x128xf32> to vector<24x128xbf16>
    %c0_30 = arith.constant 0 : index
    %c0_31 = arith.constant 0 : index
    %c0_32 = arith.constant 0 : index
    %50 = vector.load %arg5[%c0_30, %c0_31, %c0_32] : memref<1x24x128xbf16, #tpu.memory_space<vmem>>, vector<1x24x128xbf16>
    %51 = vector.shape_cast %50 : vector<1x24x128xbf16> to vector<24x128xbf16>
    %52 = vector.shape_cast %49 : vector<24x128xbf16> to vector<1x24x128xbf16>
    tpu.vector_store %arg5[%c0_30, %c0_31, %c0_32], %52 {strides = array<i32>} : memref<1x24x128xbf16, #tpu.memory_space<vmem>>, vector<1x24x128xbf16>,
    return
  }
  func.func @transform_0(%arg0: i32, %arg1: i32) -> (i32, i32, i32) {
    %c0_i32 = arith.constant 0 : i32
    %c0_i32_0 = arith.constant 0 : i32
    %c0_i32_1 = arith.constant 0 : i32
    return %arg1, %c0_i32, %c0_i32_0 : i32, i32, i32
  }
  func.func @transform_1(%arg0: i32, %arg1: i32) -> (i32, i32, i32) {
    %c0_i32 = arith.constant 0 : i32
    %c0_i32_0 = arith.constant 0 : i32
    %c0_i32_1 = arith.constant 0 : i32
    return %c0_i32, %c0_i32_0, %arg0 : i32, i32, i32
  }
  func.func @transform_2(%arg0: i32, %arg1: i32) -> (i32, i32) {
    %c0_i32 = arith.constant 0 : i32
    %c0_i32_0 = arith.constant 0 : i32
    %c0_i32_1 = arith.constant 0 : i32
    return %c0_i32, %c0_i32_0 : i32, i32
  }
  func.func @transform_3(%arg0: i32, %arg1: i32) -> (i32, i32, i32) {
    %c0_i32 = arith.constant 0 : i32
    %c0_i32_0 = arith.constant 0 : i32
    return %arg1, %c0_i32, %arg0 : i32, i32, i32
  }
}

module attributes {stable_mosaic.version = 11 : i64} {
  func.func @_conv_kernel(%arg0: i32, %arg1: i32, %arg2: memref<1x48x64xbf16, #tpu.memory_space<vmem>>, %arg3: memref<9x64x128xbf16, #tpu.memory_space<vmem>>, %arg4: memref<24x1xf32, #tpu.memory_space<vmem>>, %arg5: memref<1x24x128xbf16, #tpu.memory_space<vmem>>) attributes {dimension_semantics = [#tpu.dimension_semantics<parallel>, #tpu.dimension_semantics<parallel>], iteration_bounds = array<i64: 1, 2>, scalar_prefetch = 0 : i64, scratch_operands = 0 : i64, tpu.core_type = #tpu.core_type<tc>, window_params = [{transform_indices = @transform_0, window_bounds = array<i64: 1, 48, 64>}, {transform_indices = @transform_1, window_bounds = array<i64: 9, 64, 128>}, {pipeline_mode = #tpu.pipeline_mode<synchronous>, transform_indices = @transform_2, window_bounds = array<i64: 24, 1>}, {transform_indices = @transform_3, window_bounds = array<i64: 1, 24, 128>}]} {
    %c0 = arith.constant 0 : index
    %c0_0 = arith.constant 0 : index
    %c0_1 = arith.constant 0 : index
    %0 = vector.load %arg2[%c0, %c0_0, %c0_1] : memref<1x48x64xbf16, #tpu.memory_space<vmem>>, vector<1x24x64xbf16>
    %1 = vector.shape_cast %0 : vector<1x24x64xbf16> to vector<24x64xbf16>
    %c0_2 = arith.constant 0 : index
    %c0_3 = arith.constant 0 : index
    %c0_4 = arith.constant 0 : index
    %2 = vector.load %arg3[%c0_2, %c0_3, %c0_4] : memref<9x64x128xbf16, #tpu.memory_space<vmem>>, vector<1x64x128xbf16>
    %3 = vector.shape_cast %2 : vector<1x64x128xbf16> to vector<64x128xbf16>
    %cst = arith.constant dense<0.000000e+00> : vector<24x128xf32>
    %4 = tpu.matmul %1, %3, %cst {dimension_numbers = #tpu.dot_dimension_numbers<[1], [0], [0], [1], [0, 0, 1, 1], [], []>} : vector<24x64xbf16>, vector<64x128xbf16>, vector<24x128xf32> -> vector<24x128xf32>
    %c0_5 = arith.constant 0 : index
    %c1 = arith.constant 1 : index
    %c0_6 = arith.constant 0 : index
    %5 = vector.load %arg2[%c0_5, %c1, %c0_6] : memref<1x48x64xbf16, #tpu.memory_space<vmem>>, vector<1x24x64xbf16>
    %6 = vector.shape_cast %5 : vector<1x24x64xbf16> to vector<24x64xbf16>
    %c1_7 = arith.constant 1 : index
    %c0_8 = arith.constant 0 : index
    %c0_9 = arith.constant 0 : index
    %7 = vector.load %arg3[%c1_7, %c0_8, %c0_9] : memref<9x64x128xbf16, #tpu.memory_space<vmem>>, vector<1x64x128xbf16>
    %8 = vector.shape_cast %7 : vector<1x64x128xbf16> to vector<64x128xbf16>
    %cst_10 = arith.constant dense<0.000000e+00> : vector<24x128xf32>
    %9 = tpu.matmul %6, %8, %cst_10 {dimension_numbers = #tpu.dot_dimension_numbers<[1], [0], [0], [1], [0, 0, 1, 1], [], []>} : vector<24x64xbf16>, vector<64x128xbf16>, vector<24x128xf32> -> vector<24x128xf32>
    %10 = arith.addf %4, %9 : vector<24x128xf32>
    %c0_11 = arith.constant 0 : index
    %c2 = arith.constant 2 : index
    %c0_12 = arith.constant 0 : index
    %11 = vector.load %arg2[%c0_11, %c2, %c0_12] : memref<1x48x64xbf16, #tpu.memory_space<vmem>>, vector<1x24x64xbf16>
    %12 = vector.shape_cast %11 : vector<1x24x64xbf16> to vector<24x64xbf16>
    %c2_13 = arith.constant 2 : index
    %c0_14 = arith.constant 0 : index
    %c0_15 = arith.constant 0 : index
    %13 = vector.load %arg3[%c2_13, %c0_14, %c0_15] : memref<9x64x128xbf16, #tpu.memory_space<vmem>>, vector<1x64x128xbf16>
    %14 = vector.shape_cast %13 : vector<1x64x128xbf16> to vector<64x128xbf16>
    %cst_16 = arith.constant dense<0.000000e+00> : vector<24x128xf32>
    %15 = tpu.matmul %12, %14, %cst_16 {dimension_numbers = #tpu.dot_dimension_numbers<[1], [0], [0], [1], [0, 0, 1, 1], [], []>} : vector<24x64xbf16>, vector<64x128xbf16>, vector<24x128xf32> -> vector<24x128xf32>
    %16 = arith.addf %10, %15 : vector<24x128xf32>
    %c0_17 = arith.constant 0 : index
    %c8 = arith.constant 8 : index
    %c0_18 = arith.constant 0 : index
    %17 = vector.load %arg2[%c0_17, %c8, %c0_18] : memref<1x48x64xbf16, #tpu.memory_space<vmem>>, vector<1x24x64xbf16>
    %18 = vector.shape_cast %17 : vector<1x24x64xbf16> to vector<24x64xbf16>
    %c3 = arith.constant 3 : index
    %c0_19 = arith.constant 0 : index
    %c0_20 = arith.constant 0 : index
    %19 = vector.load %arg3[%c3, %c0_19, %c0_20] : memref<9x64x128xbf16, #tpu.memory_space<vmem>>, vector<1x64x128xbf16>
    %20 = vector.shape_cast %19 : vector<1x64x128xbf16> to vector<64x128xbf16>
    %cst_21 = arith.constant dense<0.000000e+00> : vector<24x128xf32>
    %21 = tpu.matmul %18, %20, %cst_21 {dimension_numbers = #tpu.dot_dimension_numbers<[1], [0], [0], [1], [0, 0, 1, 1], [], []>} : vector<24x64xbf16>, vector<64x128xbf16>, vector<24x128xf32> -> vector<24x128xf32>
    %22 = arith.addf %16, %21 : vector<24x128xf32>
    %c0_22 = arith.constant 0 : index
    %c9 = arith.constant 9 : index
    %c0_23 = arith.constant 0 : index
    %23 = vector.load %arg2[%c0_22, %c9, %c0_23] : memref<1x48x64xbf16, #tpu.memory_space<vmem>>, vector<1x24x64xbf16>
    %24 = vector.shape_cast %23 : vector<1x24x64xbf16> to vector<24x64xbf16>
    %c4 = arith.constant 4 : index
    %c0_24 = arith.constant 0 : index
    %c0_25 = arith.constant 0 : index
    %25 = vector.load %arg3[%c4, %c0_24, %c0_25] : memref<9x64x128xbf16, #tpu.memory_space<vmem>>, vector<1x64x128xbf16>
    %26 = vector.shape_cast %25 : vector<1x64x128xbf16> to vector<64x128xbf16>
    %cst_26 = arith.constant dense<0.000000e+00> : vector<24x128xf32>
    %27 = tpu.matmul %24, %26, %cst_26 {dimension_numbers = #tpu.dot_dimension_numbers<[1], [0], [0], [1], [0, 0, 1, 1], [], []>} : vector<24x64xbf16>, vector<64x128xbf16>, vector<24x128xf32> -> vector<24x128xf32>
    %28 = arith.addf %22, %27 : vector<24x128xf32>
    %c0_27 = arith.constant 0 : index
    %c10 = arith.constant 10 : index
    %c0_28 = arith.constant 0 : index
    %29 = vector.load %arg2[%c0_27, %c10, %c0_28] : memref<1x48x64xbf16, #tpu.memory_space<vmem>>, vector<1x24x64xbf16>
    %30 = vector.shape_cast %29 : vector<1x24x64xbf16> to vector<24x64xbf16>
    %c5 = arith.constant 5 : index
    %c0_29 = arith.constant 0 : index
    %c0_30 = arith.constant 0 : index
    %31 = vector.load %arg3[%c5, %c0_29, %c0_30] : memref<9x64x128xbf16, #tpu.memory_space<vmem>>, vector<1x64x128xbf16>
    %32 = vector.shape_cast %31 : vector<1x64x128xbf16> to vector<64x128xbf16>
    %cst_31 = arith.constant dense<0.000000e+00> : vector<24x128xf32>
    %33 = tpu.matmul %30, %32, %cst_31 {dimension_numbers = #tpu.dot_dimension_numbers<[1], [0], [0], [1], [0, 0, 1, 1], [], []>} : vector<24x64xbf16>, vector<64x128xbf16>, vector<24x128xf32> -> vector<24x128xf32>
    %34 = arith.addf %28, %33 : vector<24x128xf32>
    %c0_32 = arith.constant 0 : index
    %c16 = arith.constant 16 : index
    %c0_33 = arith.constant 0 : index
    %35 = vector.load %arg2[%c0_32, %c16, %c0_33] : memref<1x48x64xbf16, #tpu.memory_space<vmem>>, vector<1x24x64xbf16>
    %36 = vector.shape_cast %35 : vector<1x24x64xbf16> to vector<24x64xbf16>
    %c6 = arith.constant 6 : index
    %c0_34 = arith.constant 0 : index
    %c0_35 = arith.constant 0 : index
    %37 = vector.load %arg3[%c6, %c0_34, %c0_35] : memref<9x64x128xbf16, #tpu.memory_space<vmem>>, vector<1x64x128xbf16>
    %38 = vector.shape_cast %37 : vector<1x64x128xbf16> to vector<64x128xbf16>
    %cst_36 = arith.constant dense<0.000000e+00> : vector<24x128xf32>
    %39 = tpu.matmul %36, %38, %cst_36 {dimension_numbers = #tpu.dot_dimension_numbers<[1], [0], [0], [1], [0, 0, 1, 1], [], []>} : vector<24x64xbf16>, vector<64x128xbf16>, vector<24x128xf32> -> vector<24x128xf32>
    %40 = arith.addf %34, %39 : vector<24x128xf32>
    %c0_37 = arith.constant 0 : index
    %c17 = arith.constant 17 : index
    %c0_38 = arith.constant 0 : index
    %41 = vector.load %arg2[%c0_37, %c17, %c0_38] : memref<1x48x64xbf16, #tpu.memory_space<vmem>>, vector<1x24x64xbf16>
    %42 = vector.shape_cast %41 : vector<1x24x64xbf16> to vector<24x64xbf16>
    %c7 = arith.constant 7 : index
    %c0_39 = arith.constant 0 : index
    %c0_40 = arith.constant 0 : index
    %43 = vector.load %arg3[%c7, %c0_39, %c0_40] : memref<9x64x128xbf16, #tpu.memory_space<vmem>>, vector<1x64x128xbf16>
    %44 = vector.shape_cast %43 : vector<1x64x128xbf16> to vector<64x128xbf16>
    %cst_41 = arith.constant dense<0.000000e+00> : vector<24x128xf32>
    %45 = tpu.matmul %42, %44, %cst_41 {dimension_numbers = #tpu.dot_dimension_numbers<[1], [0], [0], [1], [0, 0, 1, 1], [], []>} : vector<24x64xbf16>, vector<64x128xbf16>, vector<24x128xf32> -> vector<24x128xf32>
    %46 = arith.addf %40, %45 : vector<24x128xf32>
    %c0_42 = arith.constant 0 : index
    %c18 = arith.constant 18 : index
    %c0_43 = arith.constant 0 : index
    %47 = vector.load %arg2[%c0_42, %c18, %c0_43] : memref<1x48x64xbf16, #tpu.memory_space<vmem>>, vector<1x24x64xbf16>
    %48 = vector.shape_cast %47 : vector<1x24x64xbf16> to vector<24x64xbf16>
    %c8_44 = arith.constant 8 : index
    %c0_45 = arith.constant 0 : index
    %c0_46 = arith.constant 0 : index
    %49 = vector.load %arg3[%c8_44, %c0_45, %c0_46] : memref<9x64x128xbf16, #tpu.memory_space<vmem>>, vector<1x64x128xbf16>
    %50 = vector.shape_cast %49 : vector<1x64x128xbf16> to vector<64x128xbf16>
    %cst_47 = arith.constant dense<0.000000e+00> : vector<24x128xf32>
    %51 = tpu.matmul %48, %50, %cst_47 {dimension_numbers = #tpu.dot_dimension_numbers<[1], [0], [0], [1], [0, 0, 1, 1], [], []>} : vector<24x64xbf16>, vector<64x128xbf16>, vector<24x128xf32> -> vector<24x128xf32>
    %52 = arith.addf %46, %51 : vector<24x128xf32>
    %c0_48 = arith.constant 0 : index
    %c0_49 = arith.constant 0 : index
    %53 = vector.load %arg4[%c0_48, %c0_49] : memref<24x1xf32, #tpu.memory_space<vmem>>, vector<24x1xf32>
    %54 = vector.broadcast %53 : vector<24x1xf32> to vector<24x128xf32>
    %55 = arith.mulf %52, %54 : vector<24x128xf32>
    %cst_50 = arith.constant dense<0.000000e+00> : vector<128xf32>
    %56 = vector.multi_reduction <add>, %55, %cst_50 [0] : vector<24x128xf32> to vector<128xf32>
    %57 = vector.shape_cast %56 : vector<128xf32> to vector<1x128xf32>
    %58 = arith.mulf %55, %52 : vector<24x128xf32>
    %cst_51 = arith.constant dense<0.000000e+00> : vector<128xf32>
    %59 = vector.multi_reduction <add>, %58, %cst_51 [0] : vector<24x128xf32> to vector<128xf32>
    %60 = vector.shape_cast %59 : vector<128xf32> to vector<1x128xf32>
    %cst_52 = arith.constant 0.111111112 : f32
    %61 = vector.broadcast %cst_52 : f32 to vector<1x128xf32>
    %62 = arith.mulf %57, %61 : vector<1x128xf32>
    %cst_53 = arith.constant 0.111111112 : f32
    %63 = vector.broadcast %cst_53 : f32 to vector<1x128xf32>
    %64 = arith.mulf %60, %63 : vector<1x128xf32>
    %65 = arith.mulf %62, %62 : vector<1x128xf32>
    %66 = arith.subf %64, %65 : vector<1x128xf32>
    %cst_54 = arith.constant 0.000000e+00 : f32
    %67 = vector.broadcast %cst_54 : f32 to vector<1x128xf32>
    %68 = arith.maximumf %66, %67 : vector<1x128xf32>
    %69 = vector.broadcast %62 : vector<1x128xf32> to vector<24x128xf32>
    %70 = arith.subf %52, %69 : vector<24x128xf32>
    %cst_55 = arith.constant 9.99999974E-6 : f32
    %71 = vector.broadcast %cst_55 : f32 to vector<1x128xf32>
    %72 = arith.addf %68, %71 : vector<1x128xf32>
    %73 = math.rsqrt %72 : vector<1x128xf32>
    %74 = vector.broadcast %73 : vector<1x128xf32> to vector<24x128xf32>
    %75 = arith.mulf %70, %74 : vector<24x128xf32>
    %cst_56 = arith.constant 2.000000e-01 : f32
    %76 = vector.broadcast %cst_56 : f32 to vector<24x128xf32>
    %77 = arith.mulf %76, %75 : vector<24x128xf32>
    %78 = arith.maximumf %75, %77 : vector<24x128xf32>
    %79 = arith.truncf %78 : vector<24x128xf32> to vector<24x128xbf16>
    %c0_57 = arith.constant 0 : index
    %c0_58 = arith.constant 0 : index
    %c0_59 = arith.constant 0 : index
    %80 = vector.load %arg5[%c0_57, %c0_58, %c0_59] : memref<1x24x128xbf16, #tpu.memory_space<vmem>>, vector<1x24x128xbf16>
    %81 = vector.shape_cast %80 : vector<1x24x128xbf16> to vector<24x128xbf16>
    %82 = vector.shape_cast %79 : vector<24x128xbf16> to vector<1x24x128xbf16>
    tpu.vector_store %arg5[%c0_57, %c0_58, %c0_59], %82 {strides = array<i32>} : memref<1x24x128xbf16, #tpu.memory_space<vmem>>, vector<1x24x128xbf16>,
    return
  }
  func.func @transform_0(%arg0: i32, %arg1: i32) -> (i32, i32, i32) {
    %c0_i32 = arith.constant 0 : i32
    %c0_i32_0 = arith.constant 0 : i32
    %c0_i32_1 = arith.constant 0 : i32
    return %arg1, %c0_i32, %c0_i32_0 : i32, i32, i32
  }
  func.func @transform_1(%arg0: i32, %arg1: i32) -> (i32, i32, i32) {
    %c0_i32 = arith.constant 0 : i32
    %c0_i32_0 = arith.constant 0 : i32
    %c0_i32_1 = arith.constant 0 : i32
    return %c0_i32, %c0_i32_0, %arg0 : i32, i32, i32
  }
  func.func @transform_2(%arg0: i32, %arg1: i32) -> (i32, i32) {
    %c0_i32 = arith.constant 0 : i32
    %c0_i32_0 = arith.constant 0 : i32
    %c0_i32_1 = arith.constant 0 : i32
    return %c0_i32, %c0_i32_0 : i32, i32
  }
  func.func @transform_3(%arg0: i32, %arg1: i32) -> (i32, i32, i32) {
    %c0_i32 = arith.constant 0 : i32
    %c0_i32_0 = arith.constant 0 : i32
    return %arg1, %c0_i32, %arg0 : i32, i32, i32
  }
}

module attributes {stable_mosaic.version = 11 : i64} {
  func.func @_conv_kernel(%arg0: i32, %arg1: i32, %arg2: memref<1x48x64xbf16, #tpu.memory_space<vmem>>, %arg3: memref<9x64x128xbf16, #tpu.memory_space<vmem>>, %arg4: memref<24x1xf32, #tpu.memory_space<vmem>>, %arg5: memref<1x24x128xbf16, #tpu.memory_space<vmem>>, %arg6: memref<1x24x128xbf16, #tpu.memory_space<vmem>>) attributes {dimension_semantics = [#tpu.dimension_semantics<parallel>, #tpu.dimension_semantics<parallel>], iteration_bounds = array<i64: 1, 2>, scalar_prefetch = 0 : i64, scratch_operands = 0 : i64, tpu.core_type = #tpu.core_type<tc>, window_params = [{transform_indices = @transform_0, window_bounds = array<i64: 1, 48, 64>}, {transform_indices = @transform_1, window_bounds = array<i64: 9, 64, 128>}, {pipeline_mode = #tpu.pipeline_mode<synchronous>, transform_indices = @transform_2, window_bounds = array<i64: 24, 1>}, {transform_indices = @transform_3, window_bounds = array<i64: 1, 24, 128>}, {transform_indices = @transform_4, window_bounds = array<i64: 1, 24, 128>}]} {
    %c0 = arith.constant 0 : index
    %c0_0 = arith.constant 0 : index
    %c0_1 = arith.constant 0 : index
    %0 = vector.load %arg2[%c0, %c0_0, %c0_1] : memref<1x48x64xbf16, #tpu.memory_space<vmem>>, vector<1x24x64xbf16>
    %1 = vector.shape_cast %0 : vector<1x24x64xbf16> to vector<24x64xbf16>
    %c0_2 = arith.constant 0 : index
    %c0_3 = arith.constant 0 : index
    %c0_4 = arith.constant 0 : index
    %2 = vector.load %arg3[%c0_2, %c0_3, %c0_4] : memref<9x64x128xbf16, #tpu.memory_space<vmem>>, vector<1x64x128xbf16>
    %3 = vector.shape_cast %2 : vector<1x64x128xbf16> to vector<64x128xbf16>
    %cst = arith.constant dense<0.000000e+00> : vector<24x128xf32>
    %4 = tpu.matmul %1, %3, %cst {dimension_numbers = #tpu.dot_dimension_numbers<[1], [0], [0], [1], [0, 0, 1, 1], [], []>} : vector<24x64xbf16>, vector<64x128xbf16>, vector<24x128xf32> -> vector<24x128xf32>
    %c0_5 = arith.constant 0 : index
    %c1 = arith.constant 1 : index
    %c0_6 = arith.constant 0 : index
    %5 = vector.load %arg2[%c0_5, %c1, %c0_6] : memref<1x48x64xbf16, #tpu.memory_space<vmem>>, vector<1x24x64xbf16>
    %6 = vector.shape_cast %5 : vector<1x24x64xbf16> to vector<24x64xbf16>
    %c1_7 = arith.constant 1 : index
    %c0_8 = arith.constant 0 : index
    %c0_9 = arith.constant 0 : index
    %7 = vector.load %arg3[%c1_7, %c0_8, %c0_9] : memref<9x64x128xbf16, #tpu.memory_space<vmem>>, vector<1x64x128xbf16>
    %8 = vector.shape_cast %7 : vector<1x64x128xbf16> to vector<64x128xbf16>
    %cst_10 = arith.constant dense<0.000000e+00> : vector<24x128xf32>
    %9 = tpu.matmul %6, %8, %cst_10 {dimension_numbers = #tpu.dot_dimension_numbers<[1], [0], [0], [1], [0, 0, 1, 1], [], []>} : vector<24x64xbf16>, vector<64x128xbf16>, vector<24x128xf32> -> vector<24x128xf32>
    %10 = arith.addf %4, %9 : vector<24x128xf32>
    %c0_11 = arith.constant 0 : index
    %c2 = arith.constant 2 : index
    %c0_12 = arith.constant 0 : index
    %11 = vector.load %arg2[%c0_11, %c2, %c0_12] : memref<1x48x64xbf16, #tpu.memory_space<vmem>>, vector<1x24x64xbf16>
    %12 = vector.shape_cast %11 : vector<1x24x64xbf16> to vector<24x64xbf16>
    %c2_13 = arith.constant 2 : index
    %c0_14 = arith.constant 0 : index
    %c0_15 = arith.constant 0 : index
    %13 = vector.load %arg3[%c2_13, %c0_14, %c0_15] : memref<9x64x128xbf16, #tpu.memory_space<vmem>>, vector<1x64x128xbf16>
    %14 = vector.shape_cast %13 : vector<1x64x128xbf16> to vector<64x128xbf16>
    %cst_16 = arith.constant dense<0.000000e+00> : vector<24x128xf32>
    %15 = tpu.matmul %12, %14, %cst_16 {dimension_numbers = #tpu.dot_dimension_numbers<[1], [0], [0], [1], [0, 0, 1, 1], [], []>} : vector<24x64xbf16>, vector<64x128xbf16>, vector<24x128xf32> -> vector<24x128xf32>
    %16 = arith.addf %10, %15 : vector<24x128xf32>
    %c0_17 = arith.constant 0 : index
    %c8 = arith.constant 8 : index
    %c0_18 = arith.constant 0 : index
    %17 = vector.load %arg2[%c0_17, %c8, %c0_18] : memref<1x48x64xbf16, #tpu.memory_space<vmem>>, vector<1x24x64xbf16>
    %18 = vector.shape_cast %17 : vector<1x24x64xbf16> to vector<24x64xbf16>
    %c3 = arith.constant 3 : index
    %c0_19 = arith.constant 0 : index
    %c0_20 = arith.constant 0 : index
    %19 = vector.load %arg3[%c3, %c0_19, %c0_20] : memref<9x64x128xbf16, #tpu.memory_space<vmem>>, vector<1x64x128xbf16>
    %20 = vector.shape_cast %19 : vector<1x64x128xbf16> to vector<64x128xbf16>
    %cst_21 = arith.constant dense<0.000000e+00> : vector<24x128xf32>
    %21 = tpu.matmul %18, %20, %cst_21 {dimension_numbers = #tpu.dot_dimension_numbers<[1], [0], [0], [1], [0, 0, 1, 1], [], []>} : vector<24x64xbf16>, vector<64x128xbf16>, vector<24x128xf32> -> vector<24x128xf32>
    %22 = arith.addf %16, %21 : vector<24x128xf32>
    %c0_22 = arith.constant 0 : index
    %c9 = arith.constant 9 : index
    %c0_23 = arith.constant 0 : index
    %23 = vector.load %arg2[%c0_22, %c9, %c0_23] : memref<1x48x64xbf16, #tpu.memory_space<vmem>>, vector<1x24x64xbf16>
    %24 = vector.shape_cast %23 : vector<1x24x64xbf16> to vector<24x64xbf16>
    %c4 = arith.constant 4 : index
    %c0_24 = arith.constant 0 : index
    %c0_25 = arith.constant 0 : index
    %25 = vector.load %arg3[%c4, %c0_24, %c0_25] : memref<9x64x128xbf16, #tpu.memory_space<vmem>>, vector<1x64x128xbf16>
    %26 = vector.shape_cast %25 : vector<1x64x128xbf16> to vector<64x128xbf16>
    %cst_26 = arith.constant dense<0.000000e+00> : vector<24x128xf32>
    %27 = tpu.matmul %24, %26, %cst_26 {dimension_numbers = #tpu.dot_dimension_numbers<[1], [0], [0], [1], [0, 0, 1, 1], [], []>} : vector<24x64xbf16>, vector<64x128xbf16>, vector<24x128xf32> -> vector<24x128xf32>
    %28 = arith.addf %22, %27 : vector<24x128xf32>
    %c0_27 = arith.constant 0 : index
    %c10 = arith.constant 10 : index
    %c0_28 = arith.constant 0 : index
    %29 = vector.load %arg2[%c0_27, %c10, %c0_28] : memref<1x48x64xbf16, #tpu.memory_space<vmem>>, vector<1x24x64xbf16>
    %30 = vector.shape_cast %29 : vector<1x24x64xbf16> to vector<24x64xbf16>
    %c5 = arith.constant 5 : index
    %c0_29 = arith.constant 0 : index
    %c0_30 = arith.constant 0 : index
    %31 = vector.load %arg3[%c5, %c0_29, %c0_30] : memref<9x64x128xbf16, #tpu.memory_space<vmem>>, vector<1x64x128xbf16>
    %32 = vector.shape_cast %31 : vector<1x64x128xbf16> to vector<64x128xbf16>
    %cst_31 = arith.constant dense<0.000000e+00> : vector<24x128xf32>
    %33 = tpu.matmul %30, %32, %cst_31 {dimension_numbers = #tpu.dot_dimension_numbers<[1], [0], [0], [1], [0, 0, 1, 1], [], []>} : vector<24x64xbf16>, vector<64x128xbf16>, vector<24x128xf32> -> vector<24x128xf32>
    %34 = arith.addf %28, %33 : vector<24x128xf32>
    %c0_32 = arith.constant 0 : index
    %c16 = arith.constant 16 : index
    %c0_33 = arith.constant 0 : index
    %35 = vector.load %arg2[%c0_32, %c16, %c0_33] : memref<1x48x64xbf16, #tpu.memory_space<vmem>>, vector<1x24x64xbf16>
    %36 = vector.shape_cast %35 : vector<1x24x64xbf16> to vector<24x64xbf16>
    %c6 = arith.constant 6 : index
    %c0_34 = arith.constant 0 : index
    %c0_35 = arith.constant 0 : index
    %37 = vector.load %arg3[%c6, %c0_34, %c0_35] : memref<9x64x128xbf16, #tpu.memory_space<vmem>>, vector<1x64x128xbf16>
    %38 = vector.shape_cast %37 : vector<1x64x128xbf16> to vector<64x128xbf16>
    %cst_36 = arith.constant dense<0.000000e+00> : vector<24x128xf32>
    %39 = tpu.matmul %36, %38, %cst_36 {dimension_numbers = #tpu.dot_dimension_numbers<[1], [0], [0], [1], [0, 0, 1, 1], [], []>} : vector<24x64xbf16>, vector<64x128xbf16>, vector<24x128xf32> -> vector<24x128xf32>
    %40 = arith.addf %34, %39 : vector<24x128xf32>
    %c0_37 = arith.constant 0 : index
    %c17 = arith.constant 17 : index
    %c0_38 = arith.constant 0 : index
    %41 = vector.load %arg2[%c0_37, %c17, %c0_38] : memref<1x48x64xbf16, #tpu.memory_space<vmem>>, vector<1x24x64xbf16>
    %42 = vector.shape_cast %41 : vector<1x24x64xbf16> to vector<24x64xbf16>
    %c7 = arith.constant 7 : index
    %c0_39 = arith.constant 0 : index
    %c0_40 = arith.constant 0 : index
    %43 = vector.load %arg3[%c7, %c0_39, %c0_40] : memref<9x64x128xbf16, #tpu.memory_space<vmem>>, vector<1x64x128xbf16>
    %44 = vector.shape_cast %43 : vector<1x64x128xbf16> to vector<64x128xbf16>
    %cst_41 = arith.constant dense<0.000000e+00> : vector<24x128xf32>
    %45 = tpu.matmul %42, %44, %cst_41 {dimension_numbers = #tpu.dot_dimension_numbers<[1], [0], [0], [1], [0, 0, 1, 1], [], []>} : vector<24x64xbf16>, vector<64x128xbf16>, vector<24x128xf32> -> vector<24x128xf32>
    %46 = arith.addf %40, %45 : vector<24x128xf32>
    %c0_42 = arith.constant 0 : index
    %c18 = arith.constant 18 : index
    %c0_43 = arith.constant 0 : index
    %47 = vector.load %arg2[%c0_42, %c18, %c0_43] : memref<1x48x64xbf16, #tpu.memory_space<vmem>>, vector<1x24x64xbf16>
    %48 = vector.shape_cast %47 : vector<1x24x64xbf16> to vector<24x64xbf16>
    %c8_44 = arith.constant 8 : index
    %c0_45 = arith.constant 0 : index
    %c0_46 = arith.constant 0 : index
    %49 = vector.load %arg3[%c8_44, %c0_45, %c0_46] : memref<9x64x128xbf16, #tpu.memory_space<vmem>>, vector<1x64x128xbf16>
    %50 = vector.shape_cast %49 : vector<1x64x128xbf16> to vector<64x128xbf16>
    %cst_47 = arith.constant dense<0.000000e+00> : vector<24x128xf32>
    %51 = tpu.matmul %48, %50, %cst_47 {dimension_numbers = #tpu.dot_dimension_numbers<[1], [0], [0], [1], [0, 0, 1, 1], [], []>} : vector<24x64xbf16>, vector<64x128xbf16>, vector<24x128xf32> -> vector<24x128xf32>
    %52 = arith.addf %46, %51 : vector<24x128xf32>
    %c0_48 = arith.constant 0 : index
    %c0_49 = arith.constant 0 : index
    %53 = vector.load %arg4[%c0_48, %c0_49] : memref<24x1xf32, #tpu.memory_space<vmem>>, vector<24x1xf32>
    %54 = vector.broadcast %53 : vector<24x1xf32> to vector<24x128xf32>
    %55 = arith.mulf %52, %54 : vector<24x128xf32>
    %cst_50 = arith.constant dense<0.000000e+00> : vector<128xf32>
    %56 = vector.multi_reduction <add>, %55, %cst_50 [0] : vector<24x128xf32> to vector<128xf32>
    %57 = vector.shape_cast %56 : vector<128xf32> to vector<1x128xf32>
    %58 = arith.mulf %55, %52 : vector<24x128xf32>
    %cst_51 = arith.constant dense<0.000000e+00> : vector<128xf32>
    %59 = vector.multi_reduction <add>, %58, %cst_51 [0] : vector<24x128xf32> to vector<128xf32>
    %60 = vector.shape_cast %59 : vector<128xf32> to vector<1x128xf32>
    %cst_52 = arith.constant 0.111111112 : f32
    %61 = vector.broadcast %cst_52 : f32 to vector<1x128xf32>
    %62 = arith.mulf %57, %61 : vector<1x128xf32>
    %cst_53 = arith.constant 0.111111112 : f32
    %63 = vector.broadcast %cst_53 : f32 to vector<1x128xf32>
    %64 = arith.mulf %60, %63 : vector<1x128xf32>
    %65 = arith.mulf %62, %62 : vector<1x128xf32>
    %66 = arith.subf %64, %65 : vector<1x128xf32>
    %cst_54 = arith.constant 0.000000e+00 : f32
    %67 = vector.broadcast %cst_54 : f32 to vector<1x128xf32>
    %68 = arith.maximumf %66, %67 : vector<1x128xf32>
    %69 = vector.broadcast %62 : vector<1x128xf32> to vector<24x128xf32>
    %70 = arith.subf %52, %69 : vector<24x128xf32>
    %cst_55 = arith.constant 9.99999974E-6 : f32
    %71 = vector.broadcast %cst_55 : f32 to vector<1x128xf32>
    %72 = arith.addf %68, %71 : vector<1x128xf32>
    %73 = math.rsqrt %72 : vector<1x128xf32>
    %74 = vector.broadcast %73 : vector<1x128xf32> to vector<24x128xf32>
    %75 = arith.mulf %70, %74 : vector<24x128xf32>
    %c0_56 = arith.constant 0 : index
    %c0_57 = arith.constant 0 : index
    %c0_58 = arith.constant 0 : index
    %76 = vector.load %arg5[%c0_56, %c0_57, %c0_58] : memref<1x24x128xbf16, #tpu.memory_space<vmem>>, vector<1x24x128xbf16>
    %77 = vector.shape_cast %76 : vector<1x24x128xbf16> to vector<24x128xbf16>
    %78 = arith.extf %77 : vector<24x128xbf16> to vector<24x128xf32>
    %79 = arith.addf %75, %78 : vector<24x128xf32>
    %80 = arith.truncf %79 : vector<24x128xf32> to vector<24x128xbf16>
    %c0_59 = arith.constant 0 : index
    %c0_60 = arith.constant 0 : index
    %c0_61 = arith.constant 0 : index
    %81 = vector.load %arg6[%c0_59, %c0_60, %c0_61] : memref<1x24x128xbf16, #tpu.memory_space<vmem>>, vector<1x24x128xbf16>
    %82 = vector.shape_cast %81 : vector<1x24x128xbf16> to vector<24x128xbf16>
    %83 = vector.shape_cast %80 : vector<24x128xbf16> to vector<1x24x128xbf16>
    tpu.vector_store %arg6[%c0_59, %c0_60, %c0_61], %83 {strides = array<i32>} : memref<1x24x128xbf16, #tpu.memory_space<vmem>>, vector<1x24x128xbf16>,
    return
  }
  func.func @transform_0(%arg0: i32, %arg1: i32) -> (i32, i32, i32) {
    %c0_i32 = arith.constant 0 : i32
    %c0_i32_0 = arith.constant 0 : i32
    %c0_i32_1 = arith.constant 0 : i32
    return %arg1, %c0_i32, %c0_i32_0 : i32, i32, i32
  }
  func.func @transform_1(%arg0: i32, %arg1: i32) -> (i32, i32, i32) {
    %c0_i32 = arith.constant 0 : i32
    %c0_i32_0 = arith.constant 0 : i32
    %c0_i32_1 = arith.constant 0 : i32
    return %c0_i32, %c0_i32_0, %arg0 : i32, i32, i32
  }
  func.func @transform_2(%arg0: i32, %arg1: i32) -> (i32, i32) {
    %c0_i32 = arith.constant 0 : i32
    %c0_i32_0 = arith.constant 0 : i32
    %c0_i32_1 = arith.constant 0 : i32
    return %c0_i32, %c0_i32_0 : i32, i32
  }
  func.func @transform_3(%arg0: i32, %arg1: i32) -> (i32, i32, i32) {
    %c0_i32 = arith.constant 0 : i32
    %c0_i32_0 = arith.constant 0 : i32
    return %arg1, %c0_i32, %arg0 : i32, i32, i32
  }
  func.func @transform_4(%arg0: i32, %arg1: i32) -> (i32, i32, i32) {
    %c0_i32 = arith.constant 0 : i32
    %c0_i32_0 = arith.constant 0 : i32
    return %arg1, %c0_i32, %arg0 : i32, i32, i32
  }
}

module attributes {stable_mosaic.version = 11 : i64} {
  func.func @_conv_kernel(%arg0: i32, %arg1: i32, %arg2: memref<1x64x64xbf16, #tpu.memory_space<vmem>>, %arg3: memref<16x64x128xbf16, #tpu.memory_space<vmem>>, %arg4: memref<32x1xf32, #tpu.memory_space<vmem>>, %arg5: memref<1x32x128xbf16, #tpu.memory_space<vmem>>) attributes {dimension_semantics = [#tpu.dimension_semantics<parallel>, #tpu.dimension_semantics<parallel>], iteration_bounds = array<i64: 1, 2>, scalar_prefetch = 0 : i64, scratch_operands = 0 : i64, tpu.core_type = #tpu.core_type<tc>, window_params = [{transform_indices = @transform_0, window_bounds = array<i64: 1, 64, 64>}, {transform_indices = @transform_1, window_bounds = array<i64: 16, 64, 128>}, {pipeline_mode = #tpu.pipeline_mode<synchronous>, transform_indices = @transform_2, window_bounds = array<i64: 32, 1>}, {transform_indices = @transform_3, window_bounds = array<i64: 1, 32, 128>}]} {
    %c0 = arith.constant 0 : index
    %c0_0 = arith.constant 0 : index
    %c0_1 = arith.constant 0 : index
    %0 = vector.load %arg2[%c0, %c0_0, %c0_1] : memref<1x64x64xbf16, #tpu.memory_space<vmem>>, vector<1x32x64xbf16>
    %1 = vector.shape_cast %0 : vector<1x32x64xbf16> to vector<32x64xbf16>
    %c0_2 = arith.constant 0 : index
    %c0_3 = arith.constant 0 : index
    %c0_4 = arith.constant 0 : index
    %2 = vector.load %arg3[%c0_2, %c0_3, %c0_4] : memref<16x64x128xbf16, #tpu.memory_space<vmem>>, vector<1x64x128xbf16>
    %3 = vector.shape_cast %2 : vector<1x64x128xbf16> to vector<64x128xbf16>
    %cst = arith.constant dense<0.000000e+00> : vector<32x128xf32>
    %4 = tpu.matmul %1, %3, %cst {dimension_numbers = #tpu.dot_dimension_numbers<[1], [0], [0], [1], [0, 0, 1, 1], [], []>} : vector<32x64xbf16>, vector<64x128xbf16>, vector<32x128xf32> -> vector<32x128xf32>
    %c0_5 = arith.constant 0 : index
    %c1 = arith.constant 1 : index
    %c0_6 = arith.constant 0 : index
    %5 = vector.load %arg2[%c0_5, %c1, %c0_6] : memref<1x64x64xbf16, #tpu.memory_space<vmem>>, vector<1x32x64xbf16>
    %6 = vector.shape_cast %5 : vector<1x32x64xbf16> to vector<32x64xbf16>
    %c1_7 = arith.constant 1 : index
    %c0_8 = arith.constant 0 : index
    %c0_9 = arith.constant 0 : index
    %7 = vector.load %arg3[%c1_7, %c0_8, %c0_9] : memref<16x64x128xbf16, #tpu.memory_space<vmem>>, vector<1x64x128xbf16>
    %8 = vector.shape_cast %7 : vector<1x64x128xbf16> to vector<64x128xbf16>
    %cst_10 = arith.constant dense<0.000000e+00> : vector<32x128xf32>
    %9 = tpu.matmul %6, %8, %cst_10 {dimension_numbers = #tpu.dot_dimension_numbers<[1], [0], [0], [1], [0, 0, 1, 1], [], []>} : vector<32x64xbf16>, vector<64x128xbf16>, vector<32x128xf32> -> vector<32x128xf32>
    %10 = arith.addf %4, %9 : vector<32x128xf32>
    %c0_11 = arith.constant 0 : index
    %c2 = arith.constant 2 : index
    %c0_12 = arith.constant 0 : index
    %11 = vector.load %arg2[%c0_11, %c2, %c0_12] : memref<1x64x64xbf16, #tpu.memory_space<vmem>>, vector<1x32x64xbf16>
    %12 = vector.shape_cast %11 : vector<1x32x64xbf16> to vector<32x64xbf16>
    %c2_13 = arith.constant 2 : index
    %c0_14 = arith.constant 0 : index
    %c0_15 = arith.constant 0 : index
    %13 = vector.load %arg3[%c2_13, %c0_14, %c0_15] : memref<16x64x128xbf16, #tpu.memory_space<vmem>>, vector<1x64x128xbf16>
    %14 = vector.shape_cast %13 : vector<1x64x128xbf16> to vector<64x128xbf16>
    %cst_16 = arith.constant dense<0.000000e+00> : vector<32x128xf32>
    %15 = tpu.matmul %12, %14, %cst_16 {dimension_numbers = #tpu.dot_dimension_numbers<[1], [0], [0], [1], [0, 0, 1, 1], [], []>} : vector<32x64xbf16>, vector<64x128xbf16>, vector<32x128xf32> -> vector<32x128xf32>
    %16 = arith.addf %10, %15 : vector<32x128xf32>
    %c0_17 = arith.constant 0 : index
    %c3 = arith.constant 3 : index
    %c0_18 = arith.constant 0 : index
    %17 = vector.load %arg2[%c0_17, %c3, %c0_18] : memref<1x64x64xbf16, #tpu.memory_space<vmem>>, vector<1x32x64xbf16>
    %18 = vector.shape_cast %17 : vector<1x32x64xbf16> to vector<32x64xbf16>
    %c3_19 = arith.constant 3 : index
    %c0_20 = arith.constant 0 : index
    %c0_21 = arith.constant 0 : index
    %19 = vector.load %arg3[%c3_19, %c0_20, %c0_21] : memref<16x64x128xbf16, #tpu.memory_space<vmem>>, vector<1x64x128xbf16>
    %20 = vector.shape_cast %19 : vector<1x64x128xbf16> to vector<64x128xbf16>
    %cst_22 = arith.constant dense<0.000000e+00> : vector<32x128xf32>
    %21 = tpu.matmul %18, %20, %cst_22 {dimension_numbers = #tpu.dot_dimension_numbers<[1], [0], [0], [1], [0, 0, 1, 1], [], []>} : vector<32x64xbf16>, vector<64x128xbf16>, vector<32x128xf32> -> vector<32x128xf32>
    %22 = arith.addf %16, %21 : vector<32x128xf32>
    %c0_23 = arith.constant 0 : index
    %c8 = arith.constant 8 : index
    %c0_24 = arith.constant 0 : index
    %23 = vector.load %arg2[%c0_23, %c8, %c0_24] : memref<1x64x64xbf16, #tpu.memory_space<vmem>>, vector<1x32x64xbf16>
    %24 = vector.shape_cast %23 : vector<1x32x64xbf16> to vector<32x64xbf16>
    %c4 = arith.constant 4 : index
    %c0_25 = arith.constant 0 : index
    %c0_26 = arith.constant 0 : index
    %25 = vector.load %arg3[%c4, %c0_25, %c0_26] : memref<16x64x128xbf16, #tpu.memory_space<vmem>>, vector<1x64x128xbf16>
    %26 = vector.shape_cast %25 : vector<1x64x128xbf16> to vector<64x128xbf16>
    %cst_27 = arith.constant dense<0.000000e+00> : vector<32x128xf32>
    %27 = tpu.matmul %24, %26, %cst_27 {dimension_numbers = #tpu.dot_dimension_numbers<[1], [0], [0], [1], [0, 0, 1, 1], [], []>} : vector<32x64xbf16>, vector<64x128xbf16>, vector<32x128xf32> -> vector<32x128xf32>
    %28 = arith.addf %22, %27 : vector<32x128xf32>
    %c0_28 = arith.constant 0 : index
    %c9 = arith.constant 9 : index
    %c0_29 = arith.constant 0 : index
    %29 = vector.load %arg2[%c0_28, %c9, %c0_29] : memref<1x64x64xbf16, #tpu.memory_space<vmem>>, vector<1x32x64xbf16>
    %30 = vector.shape_cast %29 : vector<1x32x64xbf16> to vector<32x64xbf16>
    %c5 = arith.constant 5 : index
    %c0_30 = arith.constant 0 : index
    %c0_31 = arith.constant 0 : index
    %31 = vector.load %arg3[%c5, %c0_30, %c0_31] : memref<16x64x128xbf16, #tpu.memory_space<vmem>>, vector<1x64x128xbf16>
    %32 = vector.shape_cast %31 : vector<1x64x128xbf16> to vector<64x128xbf16>
    %cst_32 = arith.constant dense<0.000000e+00> : vector<32x128xf32>
    %33 = tpu.matmul %30, %32, %cst_32 {dimension_numbers = #tpu.dot_dimension_numbers<[1], [0], [0], [1], [0, 0, 1, 1], [], []>} : vector<32x64xbf16>, vector<64x128xbf16>, vector<32x128xf32> -> vector<32x128xf32>
    %34 = arith.addf %28, %33 : vector<32x128xf32>
    %c0_33 = arith.constant 0 : index
    %c10 = arith.constant 10 : index
    %c0_34 = arith.constant 0 : index
    %35 = vector.load %arg2[%c0_33, %c10, %c0_34] : memref<1x64x64xbf16, #tpu.memory_space<vmem>>, vector<1x32x64xbf16>
    %36 = vector.shape_cast %35 : vector<1x32x64xbf16> to vector<32x64xbf16>
    %c6 = arith.constant 6 : index
    %c0_35 = arith.constant 0 : index
    %c0_36 = arith.constant 0 : index
    %37 = vector.load %arg3[%c6, %c0_35, %c0_36] : memref<16x64x128xbf16, #tpu.memory_space<vmem>>, vector<1x64x128xbf16>
    %38 = vector.shape_cast %37 : vector<1x64x128xbf16> to vector<64x128xbf16>
    %cst_37 = arith.constant dense<0.000000e+00> : vector<32x128xf32>
    %39 = tpu.matmul %36, %38, %cst_37 {dimension_numbers = #tpu.dot_dimension_numbers<[1], [0], [0], [1], [0, 0, 1, 1], [], []>} : vector<32x64xbf16>, vector<64x128xbf16>, vector<32x128xf32> -> vector<32x128xf32>
    %40 = arith.addf %34, %39 : vector<32x128xf32>
    %c0_38 = arith.constant 0 : index
    %c11 = arith.constant 11 : index
    %c0_39 = arith.constant 0 : index
    %41 = vector.load %arg2[%c0_38, %c11, %c0_39] : memref<1x64x64xbf16, #tpu.memory_space<vmem>>, vector<1x32x64xbf16>
    %42 = vector.shape_cast %41 : vector<1x32x64xbf16> to vector<32x64xbf16>
    %c7 = arith.constant 7 : index
    %c0_40 = arith.constant 0 : index
    %c0_41 = arith.constant 0 : index
    %43 = vector.load %arg3[%c7, %c0_40, %c0_41] : memref<16x64x128xbf16, #tpu.memory_space<vmem>>, vector<1x64x128xbf16>
    %44 = vector.shape_cast %43 : vector<1x64x128xbf16> to vector<64x128xbf16>
    %cst_42 = arith.constant dense<0.000000e+00> : vector<32x128xf32>
    %45 = tpu.matmul %42, %44, %cst_42 {dimension_numbers = #tpu.dot_dimension_numbers<[1], [0], [0], [1], [0, 0, 1, 1], [], []>} : vector<32x64xbf16>, vector<64x128xbf16>, vector<32x128xf32> -> vector<32x128xf32>
    %46 = arith.addf %40, %45 : vector<32x128xf32>
    %c0_43 = arith.constant 0 : index
    %c16 = arith.constant 16 : index
    %c0_44 = arith.constant 0 : index
    %47 = vector.load %arg2[%c0_43, %c16, %c0_44] : memref<1x64x64xbf16, #tpu.memory_space<vmem>>, vector<1x32x64xbf16>
    %48 = vector.shape_cast %47 : vector<1x32x64xbf16> to vector<32x64xbf16>
    %c8_45 = arith.constant 8 : index
    %c0_46 = arith.constant 0 : index
    %c0_47 = arith.constant 0 : index
    %49 = vector.load %arg3[%c8_45, %c0_46, %c0_47] : memref<16x64x128xbf16, #tpu.memory_space<vmem>>, vector<1x64x128xbf16>
    %50 = vector.shape_cast %49 : vector<1x64x128xbf16> to vector<64x128xbf16>
    %cst_48 = arith.constant dense<0.000000e+00> : vector<32x128xf32>
    %51 = tpu.matmul %48, %50, %cst_48 {dimension_numbers = #tpu.dot_dimension_numbers<[1], [0], [0], [1], [0, 0, 1, 1], [], []>} : vector<32x64xbf16>, vector<64x128xbf16>, vector<32x128xf32> -> vector<32x128xf32>
    %52 = arith.addf %46, %51 : vector<32x128xf32>
    %c0_49 = arith.constant 0 : index
    %c17 = arith.constant 17 : index
    %c0_50 = arith.constant 0 : index
    %53 = vector.load %arg2[%c0_49, %c17, %c0_50] : memref<1x64x64xbf16, #tpu.memory_space<vmem>>, vector<1x32x64xbf16>
    %54 = vector.shape_cast %53 : vector<1x32x64xbf16> to vector<32x64xbf16>
    %c9_51 = arith.constant 9 : index
    %c0_52 = arith.constant 0 : index
    %c0_53 = arith.constant 0 : index
    %55 = vector.load %arg3[%c9_51, %c0_52, %c0_53] : memref<16x64x128xbf16, #tpu.memory_space<vmem>>, vector<1x64x128xbf16>
    %56 = vector.shape_cast %55 : vector<1x64x128xbf16> to vector<64x128xbf16>
    %cst_54 = arith.constant dense<0.000000e+00> : vector<32x128xf32>
    %57 = tpu.matmul %54, %56, %cst_54 {dimension_numbers = #tpu.dot_dimension_numbers<[1], [0], [0], [1], [0, 0, 1, 1], [], []>} : vector<32x64xbf16>, vector<64x128xbf16>, vector<32x128xf32> -> vector<32x128xf32>
    %58 = arith.addf %52, %57 : vector<32x128xf32>
    %c0_55 = arith.constant 0 : index
    %c18 = arith.constant 18 : index
    %c0_56 = arith.constant 0 : index
    %59 = vector.load %arg2[%c0_55, %c18, %c0_56] : memref<1x64x64xbf16, #tpu.memory_space<vmem>>, vector<1x32x64xbf16>
    %60 = vector.shape_cast %59 : vector<1x32x64xbf16> to vector<32x64xbf16>
    %c10_57 = arith.constant 10 : index
    %c0_58 = arith.constant 0 : index
    %c0_59 = arith.constant 0 : index
    %61 = vector.load %arg3[%c10_57, %c0_58, %c0_59] : memref<16x64x128xbf16, #tpu.memory_space<vmem>>, vector<1x64x128xbf16>
    %62 = vector.shape_cast %61 : vector<1x64x128xbf16> to vector<64x128xbf16>
    %cst_60 = arith.constant dense<0.000000e+00> : vector<32x128xf32>
    %63 = tpu.matmul %60, %62, %cst_60 {dimension_numbers = #tpu.dot_dimension_numbers<[1], [0], [0], [1], [0, 0, 1, 1], [], []>} : vector<32x64xbf16>, vector<64x128xbf16>, vector<32x128xf32> -> vector<32x128xf32>
    %64 = arith.addf %58, %63 : vector<32x128xf32>
    %c0_61 = arith.constant 0 : index
    %c19 = arith.constant 19 : index
    %c0_62 = arith.constant 0 : index
    %65 = vector.load %arg2[%c0_61, %c19, %c0_62] : memref<1x64x64xbf16, #tpu.memory_space<vmem>>, vector<1x32x64xbf16>
    %66 = vector.shape_cast %65 : vector<1x32x64xbf16> to vector<32x64xbf16>
    %c11_63 = arith.constant 11 : index
    %c0_64 = arith.constant 0 : index
    %c0_65 = arith.constant 0 : index
    %67 = vector.load %arg3[%c11_63, %c0_64, %c0_65] : memref<16x64x128xbf16, #tpu.memory_space<vmem>>, vector<1x64x128xbf16>
    %68 = vector.shape_cast %67 : vector<1x64x128xbf16> to vector<64x128xbf16>
    %cst_66 = arith.constant dense<0.000000e+00> : vector<32x128xf32>
    %69 = tpu.matmul %66, %68, %cst_66 {dimension_numbers = #tpu.dot_dimension_numbers<[1], [0], [0], [1], [0, 0, 1, 1], [], []>} : vector<32x64xbf16>, vector<64x128xbf16>, vector<32x128xf32> -> vector<32x128xf32>
    %70 = arith.addf %64, %69 : vector<32x128xf32>
    %c0_67 = arith.constant 0 : index
    %c24 = arith.constant 24 : index
    %c0_68 = arith.constant 0 : index
    %71 = vector.load %arg2[%c0_67, %c24, %c0_68] : memref<1x64x64xbf16, #tpu.memory_space<vmem>>, vector<1x32x64xbf16>
    %72 = vector.shape_cast %71 : vector<1x32x64xbf16> to vector<32x64xbf16>
    %c12 = arith.constant 12 : index
    %c0_69 = arith.constant 0 : index
    %c0_70 = arith.constant 0 : index
    %73 = vector.load %arg3[%c12, %c0_69, %c0_70] : memref<16x64x128xbf16, #tpu.memory_space<vmem>>, vector<1x64x128xbf16>
    %74 = vector.shape_cast %73 : vector<1x64x128xbf16> to vector<64x128xbf16>
    %cst_71 = arith.constant dense<0.000000e+00> : vector<32x128xf32>
    %75 = tpu.matmul %72, %74, %cst_71 {dimension_numbers = #tpu.dot_dimension_numbers<[1], [0], [0], [1], [0, 0, 1, 1], [], []>} : vector<32x64xbf16>, vector<64x128xbf16>, vector<32x128xf32> -> vector<32x128xf32>
    %76 = arith.addf %70, %75 : vector<32x128xf32>
    %c0_72 = arith.constant 0 : index
    %c25 = arith.constant 25 : index
    %c0_73 = arith.constant 0 : index
    %77 = vector.load %arg2[%c0_72, %c25, %c0_73] : memref<1x64x64xbf16, #tpu.memory_space<vmem>>, vector<1x32x64xbf16>
    %78 = vector.shape_cast %77 : vector<1x32x64xbf16> to vector<32x64xbf16>
    %c13 = arith.constant 13 : index
    %c0_74 = arith.constant 0 : index
    %c0_75 = arith.constant 0 : index
    %79 = vector.load %arg3[%c13, %c0_74, %c0_75] : memref<16x64x128xbf16, #tpu.memory_space<vmem>>, vector<1x64x128xbf16>
    %80 = vector.shape_cast %79 : vector<1x64x128xbf16> to vector<64x128xbf16>
    %cst_76 = arith.constant dense<0.000000e+00> : vector<32x128xf32>
    %81 = tpu.matmul %78, %80, %cst_76 {dimension_numbers = #tpu.dot_dimension_numbers<[1], [0], [0], [1], [0, 0, 1, 1], [], []>} : vector<32x64xbf16>, vector<64x128xbf16>, vector<32x128xf32> -> vector<32x128xf32>
    %82 = arith.addf %76, %81 : vector<32x128xf32>
    %c0_77 = arith.constant 0 : index
    %c26 = arith.constant 26 : index
    %c0_78 = arith.constant 0 : index
    %83 = vector.load %arg2[%c0_77, %c26, %c0_78] : memref<1x64x64xbf16, #tpu.memory_space<vmem>>, vector<1x32x64xbf16>
    %84 = vector.shape_cast %83 : vector<1x32x64xbf16> to vector<32x64xbf16>
    %c14 = arith.constant 14 : index
    %c0_79 = arith.constant 0 : index
    %c0_80 = arith.constant 0 : index
    %85 = vector.load %arg3[%c14, %c0_79, %c0_80] : memref<16x64x128xbf16, #tpu.memory_space<vmem>>, vector<1x64x128xbf16>
    %86 = vector.shape_cast %85 : vector<1x64x128xbf16> to vector<64x128xbf16>
    %cst_81 = arith.constant dense<0.000000e+00> : vector<32x128xf32>
    %87 = tpu.matmul %84, %86, %cst_81 {dimension_numbers = #tpu.dot_dimension_numbers<[1], [0], [0], [1], [0, 0, 1, 1], [], []>} : vector<32x64xbf16>, vector<64x128xbf16>, vector<32x128xf32> -> vector<32x128xf32>
    %88 = arith.addf %82, %87 : vector<32x128xf32>
    %c0_82 = arith.constant 0 : index
    %c27 = arith.constant 27 : index
    %c0_83 = arith.constant 0 : index
    %89 = vector.load %arg2[%c0_82, %c27, %c0_83] : memref<1x64x64xbf16, #tpu.memory_space<vmem>>, vector<1x32x64xbf16>
    %90 = vector.shape_cast %89 : vector<1x32x64xbf16> to vector<32x64xbf16>
    %c15 = arith.constant 15 : index
    %c0_84 = arith.constant 0 : index
    %c0_85 = arith.constant 0 : index
    %91 = vector.load %arg3[%c15, %c0_84, %c0_85] : memref<16x64x128xbf16, #tpu.memory_space<vmem>>, vector<1x64x128xbf16>
    %92 = vector.shape_cast %91 : vector<1x64x128xbf16> to vector<64x128xbf16>
    %cst_86 = arith.constant dense<0.000000e+00> : vector<32x128xf32>
    %93 = tpu.matmul %90, %92, %cst_86 {dimension_numbers = #tpu.dot_dimension_numbers<[1], [0], [0], [1], [0, 0, 1, 1], [], []>} : vector<32x64xbf16>, vector<64x128xbf16>, vector<32x128xf32> -> vector<32x128xf32>
    %94 = arith.addf %88, %93 : vector<32x128xf32>
    %c0_87 = arith.constant 0 : index
    %c0_88 = arith.constant 0 : index
    %95 = vector.load %arg4[%c0_87, %c0_88] : memref<32x1xf32, #tpu.memory_space<vmem>>, vector<32x1xf32>
    %96 = vector.broadcast %95 : vector<32x1xf32> to vector<32x128xf32>
    %97 = arith.mulf %94, %96 : vector<32x128xf32>
    %cst_89 = arith.constant dense<0.000000e+00> : vector<128xf32>
    %98 = vector.multi_reduction <add>, %97, %cst_89 [0] : vector<32x128xf32> to vector<128xf32>
    %99 = vector.shape_cast %98 : vector<128xf32> to vector<1x128xf32>
    %100 = arith.mulf %97, %94 : vector<32x128xf32>
    %cst_90 = arith.constant dense<0.000000e+00> : vector<128xf32>
    %101 = vector.multi_reduction <add>, %100, %cst_90 [0] : vector<32x128xf32> to vector<128xf32>
    %102 = vector.shape_cast %101 : vector<128xf32> to vector<1x128xf32>
    %cst_91 = arith.constant 6.250000e-02 : f32
    %103 = vector.broadcast %cst_91 : f32 to vector<1x128xf32>
    %104 = arith.mulf %99, %103 : vector<1x128xf32>
    %cst_92 = arith.constant 6.250000e-02 : f32
    %105 = vector.broadcast %cst_92 : f32 to vector<1x128xf32>
    %106 = arith.mulf %102, %105 : vector<1x128xf32>
    %107 = arith.mulf %104, %104 : vector<1x128xf32>
    %108 = arith.subf %106, %107 : vector<1x128xf32>
    %cst_93 = arith.constant 0.000000e+00 : f32
    %109 = vector.broadcast %cst_93 : f32 to vector<1x128xf32>
    %110 = arith.maximumf %108, %109 : vector<1x128xf32>
    %111 = vector.broadcast %104 : vector<1x128xf32> to vector<32x128xf32>
    %112 = arith.subf %94, %111 : vector<32x128xf32>
    %cst_94 = arith.constant 9.99999974E-6 : f32
    %113 = vector.broadcast %cst_94 : f32 to vector<1x128xf32>
    %114 = arith.addf %110, %113 : vector<1x128xf32>
    %115 = math.rsqrt %114 : vector<1x128xf32>
    %116 = vector.broadcast %115 : vector<1x128xf32> to vector<32x128xf32>
    %117 = arith.mulf %112, %116 : vector<32x128xf32>
    %cst_95 = arith.constant 2.000000e-01 : f32
    %118 = vector.broadcast %cst_95 : f32 to vector<32x128xf32>
    %119 = arith.mulf %118, %117 : vector<32x128xf32>
    %120 = arith.maximumf %117, %119 : vector<32x128xf32>
    %121 = arith.truncf %120 : vector<32x128xf32> to vector<32x128xbf16>
    %c0_96 = arith.constant 0 : index
    %c0_97 = arith.constant 0 : index
    %c0_98 = arith.constant 0 : index
    %122 = vector.load %arg5[%c0_96, %c0_97, %c0_98] : memref<1x32x128xbf16, #tpu.memory_space<vmem>>, vector<1x32x128xbf16>
    %123 = vector.shape_cast %122 : vector<1x32x128xbf16> to vector<32x128xbf16>
    %124 = vector.shape_cast %121 : vector<32x128xbf16> to vector<1x32x128xbf16>
    tpu.vector_store %arg5[%c0_96, %c0_97, %c0_98], %124 {strides = array<i32>} : memref<1x32x128xbf16, #tpu.memory_space<vmem>>, vector<1x32x128xbf16>,
    return
  }
  func.func @transform_0(%arg0: i32, %arg1: i32) -> (i32, i32, i32) {
    %c0_i32 = arith.constant 0 : i32
    %c0_i32_0 = arith.constant 0 : i32
    %c0_i32_1 = arith.constant 0 : i32
    return %arg1, %c0_i32, %c0_i32_0 : i32, i32, i32
  }
  func.func @transform_1(%arg0: i32, %arg1: i32) -> (i32, i32, i32) {
    %c0_i32 = arith.constant 0 : i32
    %c0_i32_0 = arith.constant 0 : i32
    %c0_i32_1 = arith.constant 0 : i32
    return %c0_i32, %c0_i32_0, %arg0 : i32, i32, i32
  }
  func.func @transform_2(%arg0: i32, %arg1: i32) -> (i32, i32) {
    %c0_i32 = arith.constant 0 : i32
    %c0_i32_0 = arith.constant 0 : i32
    %c0_i32_1 = arith.constant 0 : i32
    return %c0_i32, %c0_i32_0 : i32, i32
  }
  func.func @transform_3(%arg0: i32, %arg1: i32) -> (i32, i32, i32) {
    %c0_i32 = arith.constant 0 : i32
    %c0_i32_0 = arith.constant 0 : i32
    return %arg1, %c0_i32, %arg0 : i32, i32, i32
  }
}

module attributes {stable_mosaic.version = 11 : i64} {
  func.func @_conv_kernel(%arg0: i32, %arg1: i32, %arg2: memref<1x72x128xbf16, #tpu.memory_space<vmem>>, %arg3: memref<16x128x128xbf16, #tpu.memory_space<vmem>>, %arg4: memref<1x128xf32, #tpu.memory_space<vmem>>, %arg5: memref<1x40x128xf32, #tpu.memory_space<vmem>>) attributes {dimension_semantics = [#tpu.dimension_semantics<parallel>, #tpu.dimension_semantics<parallel>], iteration_bounds = array<i64: 1, 2>, scalar_prefetch = 0 : i64, scratch_operands = 0 : i64, tpu.core_type = #tpu.core_type<tc>, window_params = [{transform_indices = @transform_0, window_bounds = array<i64: 1, 72, 128>}, {transform_indices = @transform_1, window_bounds = array<i64: 16, 128, 128>}, {transform_indices = @transform_2, window_bounds = array<i64: 1, 128>}, {transform_indices = @transform_3, window_bounds = array<i64: 1, 40, 128>}]} {
    %c0 = arith.constant 0 : index
    %c0_0 = arith.constant 0 : index
    %c0_1 = arith.constant 0 : index
    %0 = vector.load %arg2[%c0, %c0_0, %c0_1] : memref<1x72x128xbf16, #tpu.memory_space<vmem>>, vector<1x40x128xbf16>
    %1 = vector.shape_cast %0 : vector<1x40x128xbf16> to vector<40x128xbf16>
    %c0_2 = arith.constant 0 : index
    %c0_3 = arith.constant 0 : index
    %c0_4 = arith.constant 0 : index
    %2 = vector.load %arg3[%c0_2, %c0_3, %c0_4] : memref<16x128x128xbf16, #tpu.memory_space<vmem>>, vector<1x128x128xbf16>
    %3 = vector.shape_cast %2 : vector<1x128x128xbf16> to vector<128x128xbf16>
    %cst = arith.constant dense<0.000000e+00> : vector<40x128xf32>
    %4 = tpu.matmul %1, %3, %cst {dimension_numbers = #tpu.dot_dimension_numbers<[1], [0], [0], [1], [0, 0, 1, 1], [], []>} : vector<40x128xbf16>, vector<128x128xbf16>, vector<40x128xf32> -> vector<40x128xf32>
    %c0_5 = arith.constant 0 : index
    %c1 = arith.constant 1 : index
    %c0_6 = arith.constant 0 : index
    %5 = vector.load %arg2[%c0_5, %c1, %c0_6] : memref<1x72x128xbf16, #tpu.memory_space<vmem>>, vector<1x40x128xbf16>
    %6 = vector.shape_cast %5 : vector<1x40x128xbf16> to vector<40x128xbf16>
    %c1_7 = arith.constant 1 : index
    %c0_8 = arith.constant 0 : index
    %c0_9 = arith.constant 0 : index
    %7 = vector.load %arg3[%c1_7, %c0_8, %c0_9] : memref<16x128x128xbf16, #tpu.memory_space<vmem>>, vector<1x128x128xbf16>
    %8 = vector.shape_cast %7 : vector<1x128x128xbf16> to vector<128x128xbf16>
    %cst_10 = arith.constant dense<0.000000e+00> : vector<40x128xf32>
    %9 = tpu.matmul %6, %8, %cst_10 {dimension_numbers = #tpu.dot_dimension_numbers<[1], [0], [0], [1], [0, 0, 1, 1], [], []>} : vector<40x128xbf16>, vector<128x128xbf16>, vector<40x128xf32> -> vector<40x128xf32>
    %10 = arith.addf %4, %9 : vector<40x128xf32>
    %c0_11 = arith.constant 0 : index
    %c2 = arith.constant 2 : index
    %c0_12 = arith.constant 0 : index
    %11 = vector.load %arg2[%c0_11, %c2, %c0_12] : memref<1x72x128xbf16, #tpu.memory_space<vmem>>, vector<1x40x128xbf16>
    %12 = vector.shape_cast %11 : vector<1x40x128xbf16> to vector<40x128xbf16>
    %c2_13 = arith.constant 2 : index
    %c0_14 = arith.constant 0 : index
    %c0_15 = arith.constant 0 : index
    %13 = vector.load %arg3[%c2_13, %c0_14, %c0_15] : memref<16x128x128xbf16, #tpu.memory_space<vmem>>, vector<1x128x128xbf16>
    %14 = vector.shape_cast %13 : vector<1x128x128xbf16> to vector<128x128xbf16>
    %cst_16 = arith.constant dense<0.000000e+00> : vector<40x128xf32>
    %15 = tpu.matmul %12, %14, %cst_16 {dimension_numbers = #tpu.dot_dimension_numbers<[1], [0], [0], [1], [0, 0, 1, 1], [], []>} : vector<40x128xbf16>, vector<128x128xbf16>, vector<40x128xf32> -> vector<40x128xf32>
    %16 = arith.addf %10, %15 : vector<40x128xf32>
    %c0_17 = arith.constant 0 : index
    %c3 = arith.constant 3 : index
    %c0_18 = arith.constant 0 : index
    %17 = vector.load %arg2[%c0_17, %c3, %c0_18] : memref<1x72x128xbf16, #tpu.memory_space<vmem>>, vector<1x40x128xbf16>
    %18 = vector.shape_cast %17 : vector<1x40x128xbf16> to vector<40x128xbf16>
    %c3_19 = arith.constant 3 : index
    %c0_20 = arith.constant 0 : index
    %c0_21 = arith.constant 0 : index
    %19 = vector.load %arg3[%c3_19, %c0_20, %c0_21] : memref<16x128x128xbf16, #tpu.memory_space<vmem>>, vector<1x128x128xbf16>
    %20 = vector.shape_cast %19 : vector<1x128x128xbf16> to vector<128x128xbf16>
    %cst_22 = arith.constant dense<0.000000e+00> : vector<40x128xf32>
    %21 = tpu.matmul %18, %20, %cst_22 {dimension_numbers = #tpu.dot_dimension_numbers<[1], [0], [0], [1], [0, 0, 1, 1], [], []>} : vector<40x128xbf16>, vector<128x128xbf16>, vector<40x128xf32> -> vector<40x128xf32>
    %22 = arith.addf %16, %21 : vector<40x128xf32>
    %c0_23 = arith.constant 0 : index
    %c8 = arith.constant 8 : index
    %c0_24 = arith.constant 0 : index
    %23 = vector.load %arg2[%c0_23, %c8, %c0_24] : memref<1x72x128xbf16, #tpu.memory_space<vmem>>, vector<1x40x128xbf16>
    %24 = vector.shape_cast %23 : vector<1x40x128xbf16> to vector<40x128xbf16>
    %c4 = arith.constant 4 : index
    %c0_25 = arith.constant 0 : index
    %c0_26 = arith.constant 0 : index
    %25 = vector.load %arg3[%c4, %c0_25, %c0_26] : memref<16x128x128xbf16, #tpu.memory_space<vmem>>, vector<1x128x128xbf16>
    %26 = vector.shape_cast %25 : vector<1x128x128xbf16> to vector<128x128xbf16>
    %cst_27 = arith.constant dense<0.000000e+00> : vector<40x128xf32>
    %27 = tpu.matmul %24, %26, %cst_27 {dimension_numbers = #tpu.dot_dimension_numbers<[1], [0], [0], [1], [0, 0, 1, 1], [], []>} : vector<40x128xbf16>, vector<128x128xbf16>, vector<40x128xf32> -> vector<40x128xf32>
    %28 = arith.addf %22, %27 : vector<40x128xf32>
    %c0_28 = arith.constant 0 : index
    %c9 = arith.constant 9 : index
    %c0_29 = arith.constant 0 : index
    %29 = vector.load %arg2[%c0_28, %c9, %c0_29] : memref<1x72x128xbf16, #tpu.memory_space<vmem>>, vector<1x40x128xbf16>
    %30 = vector.shape_cast %29 : vector<1x40x128xbf16> to vector<40x128xbf16>
    %c5 = arith.constant 5 : index
    %c0_30 = arith.constant 0 : index
    %c0_31 = arith.constant 0 : index
    %31 = vector.load %arg3[%c5, %c0_30, %c0_31] : memref<16x128x128xbf16, #tpu.memory_space<vmem>>, vector<1x128x128xbf16>
    %32 = vector.shape_cast %31 : vector<1x128x128xbf16> to vector<128x128xbf16>
    %cst_32 = arith.constant dense<0.000000e+00> : vector<40x128xf32>
    %33 = tpu.matmul %30, %32, %cst_32 {dimension_numbers = #tpu.dot_dimension_numbers<[1], [0], [0], [1], [0, 0, 1, 1], [], []>} : vector<40x128xbf16>, vector<128x128xbf16>, vector<40x128xf32> -> vector<40x128xf32>
    %34 = arith.addf %28, %33 : vector<40x128xf32>
    %c0_33 = arith.constant 0 : index
    %c10 = arith.constant 10 : index
    %c0_34 = arith.constant 0 : index
    %35 = vector.load %arg2[%c0_33, %c10, %c0_34] : memref<1x72x128xbf16, #tpu.memory_space<vmem>>, vector<1x40x128xbf16>
    %36 = vector.shape_cast %35 : vector<1x40x128xbf16> to vector<40x128xbf16>
    %c6 = arith.constant 6 : index
    %c0_35 = arith.constant 0 : index
    %c0_36 = arith.constant 0 : index
    %37 = vector.load %arg3[%c6, %c0_35, %c0_36] : memref<16x128x128xbf16, #tpu.memory_space<vmem>>, vector<1x128x128xbf16>
    %38 = vector.shape_cast %37 : vector<1x128x128xbf16> to vector<128x128xbf16>
    %cst_37 = arith.constant dense<0.000000e+00> : vector<40x128xf32>
    %39 = tpu.matmul %36, %38, %cst_37 {dimension_numbers = #tpu.dot_dimension_numbers<[1], [0], [0], [1], [0, 0, 1, 1], [], []>} : vector<40x128xbf16>, vector<128x128xbf16>, vector<40x128xf32> -> vector<40x128xf32>
    %40 = arith.addf %34, %39 : vector<40x128xf32>
    %c0_38 = arith.constant 0 : index
    %c11 = arith.constant 11 : index
    %c0_39 = arith.constant 0 : index
    %41 = vector.load %arg2[%c0_38, %c11, %c0_39] : memref<1x72x128xbf16, #tpu.memory_space<vmem>>, vector<1x40x128xbf16>
    %42 = vector.shape_cast %41 : vector<1x40x128xbf16> to vector<40x128xbf16>
    %c7 = arith.constant 7 : index
    %c0_40 = arith.constant 0 : index
    %c0_41 = arith.constant 0 : index
    %43 = vector.load %arg3[%c7, %c0_40, %c0_41] : memref<16x128x128xbf16, #tpu.memory_space<vmem>>, vector<1x128x128xbf16>
    %44 = vector.shape_cast %43 : vector<1x128x128xbf16> to vector<128x128xbf16>
    %cst_42 = arith.constant dense<0.000000e+00> : vector<40x128xf32>
    %45 = tpu.matmul %42, %44, %cst_42 {dimension_numbers = #tpu.dot_dimension_numbers<[1], [0], [0], [1], [0, 0, 1, 1], [], []>} : vector<40x128xbf16>, vector<128x128xbf16>, vector<40x128xf32> -> vector<40x128xf32>
    %46 = arith.addf %40, %45 : vector<40x128xf32>
    %c0_43 = arith.constant 0 : index
    %c16 = arith.constant 16 : index
    %c0_44 = arith.constant 0 : index
    %47 = vector.load %arg2[%c0_43, %c16, %c0_44] : memref<1x72x128xbf16, #tpu.memory_space<vmem>>, vector<1x40x128xbf16>
    %48 = vector.shape_cast %47 : vector<1x40x128xbf16> to vector<40x128xbf16>
    %c8_45 = arith.constant 8 : index
    %c0_46 = arith.constant 0 : index
    %c0_47 = arith.constant 0 : index
    %49 = vector.load %arg3[%c8_45, %c0_46, %c0_47] : memref<16x128x128xbf16, #tpu.memory_space<vmem>>, vector<1x128x128xbf16>
    %50 = vector.shape_cast %49 : vector<1x128x128xbf16> to vector<128x128xbf16>
    %cst_48 = arith.constant dense<0.000000e+00> : vector<40x128xf32>
    %51 = tpu.matmul %48, %50, %cst_48 {dimension_numbers = #tpu.dot_dimension_numbers<[1], [0], [0], [1], [0, 0, 1, 1], [], []>} : vector<40x128xbf16>, vector<128x128xbf16>, vector<40x128xf32> -> vector<40x128xf32>
    %52 = arith.addf %46, %51 : vector<40x128xf32>
    %c0_49 = arith.constant 0 : index
    %c17 = arith.constant 17 : index
    %c0_50 = arith.constant 0 : index
    %53 = vector.load %arg2[%c0_49, %c17, %c0_50] : memref<1x72x128xbf16, #tpu.memory_space<vmem>>, vector<1x40x128xbf16>
    %54 = vector.shape_cast %53 : vector<1x40x128xbf16> to vector<40x128xbf16>
    %c9_51 = arith.constant 9 : index
    %c0_52 = arith.constant 0 : index
    %c0_53 = arith.constant 0 : index
    %55 = vector.load %arg3[%c9_51, %c0_52, %c0_53] : memref<16x128x128xbf16, #tpu.memory_space<vmem>>, vector<1x128x128xbf16>
    %56 = vector.shape_cast %55 : vector<1x128x128xbf16> to vector<128x128xbf16>
    %cst_54 = arith.constant dense<0.000000e+00> : vector<40x128xf32>
    %57 = tpu.matmul %54, %56, %cst_54 {dimension_numbers = #tpu.dot_dimension_numbers<[1], [0], [0], [1], [0, 0, 1, 1], [], []>} : vector<40x128xbf16>, vector<128x128xbf16>, vector<40x128xf32> -> vector<40x128xf32>
    %58 = arith.addf %52, %57 : vector<40x128xf32>
    %c0_55 = arith.constant 0 : index
    %c18 = arith.constant 18 : index
    %c0_56 = arith.constant 0 : index
    %59 = vector.load %arg2[%c0_55, %c18, %c0_56] : memref<1x72x128xbf16, #tpu.memory_space<vmem>>, vector<1x40x128xbf16>
    %60 = vector.shape_cast %59 : vector<1x40x128xbf16> to vector<40x128xbf16>
    %c10_57 = arith.constant 10 : index
    %c0_58 = arith.constant 0 : index
    %c0_59 = arith.constant 0 : index
    %61 = vector.load %arg3[%c10_57, %c0_58, %c0_59] : memref<16x128x128xbf16, #tpu.memory_space<vmem>>, vector<1x128x128xbf16>
    %62 = vector.shape_cast %61 : vector<1x128x128xbf16> to vector<128x128xbf16>
    %cst_60 = arith.constant dense<0.000000e+00> : vector<40x128xf32>
    %63 = tpu.matmul %60, %62, %cst_60 {dimension_numbers = #tpu.dot_dimension_numbers<[1], [0], [0], [1], [0, 0, 1, 1], [], []>} : vector<40x128xbf16>, vector<128x128xbf16>, vector<40x128xf32> -> vector<40x128xf32>
    %64 = arith.addf %58, %63 : vector<40x128xf32>
    %c0_61 = arith.constant 0 : index
    %c19 = arith.constant 19 : index
    %c0_62 = arith.constant 0 : index
    %65 = vector.load %arg2[%c0_61, %c19, %c0_62] : memref<1x72x128xbf16, #tpu.memory_space<vmem>>, vector<1x40x128xbf16>
    %66 = vector.shape_cast %65 : vector<1x40x128xbf16> to vector<40x128xbf16>
    %c11_63 = arith.constant 11 : index
    %c0_64 = arith.constant 0 : index
    %c0_65 = arith.constant 0 : index
    %67 = vector.load %arg3[%c11_63, %c0_64, %c0_65] : memref<16x128x128xbf16, #tpu.memory_space<vmem>>, vector<1x128x128xbf16>
    %68 = vector.shape_cast %67 : vector<1x128x128xbf16> to vector<128x128xbf16>
    %cst_66 = arith.constant dense<0.000000e+00> : vector<40x128xf32>
    %69 = tpu.matmul %66, %68, %cst_66 {dimension_numbers = #tpu.dot_dimension_numbers<[1], [0], [0], [1], [0, 0, 1, 1], [], []>} : vector<40x128xbf16>, vector<128x128xbf16>, vector<40x128xf32> -> vector<40x128xf32>
    %70 = arith.addf %64, %69 : vector<40x128xf32>
    %c0_67 = arith.constant 0 : index
    %c24 = arith.constant 24 : index
    %c0_68 = arith.constant 0 : index
    %71 = vector.load %arg2[%c0_67, %c24, %c0_68] : memref<1x72x128xbf16, #tpu.memory_space<vmem>>, vector<1x40x128xbf16>
    %72 = vector.shape_cast %71 : vector<1x40x128xbf16> to vector<40x128xbf16>
    %c12 = arith.constant 12 : index
    %c0_69 = arith.constant 0 : index
    %c0_70 = arith.constant 0 : index
    %73 = vector.load %arg3[%c12, %c0_69, %c0_70] : memref<16x128x128xbf16, #tpu.memory_space<vmem>>, vector<1x128x128xbf16>
    %74 = vector.shape_cast %73 : vector<1x128x128xbf16> to vector<128x128xbf16>
    %cst_71 = arith.constant dense<0.000000e+00> : vector<40x128xf32>
    %75 = tpu.matmul %72, %74, %cst_71 {dimension_numbers = #tpu.dot_dimension_numbers<[1], [0], [0], [1], [0, 0, 1, 1], [], []>} : vector<40x128xbf16>, vector<128x128xbf16>, vector<40x128xf32> -> vector<40x128xf32>
    %76 = arith.addf %70, %75 : vector<40x128xf32>
    %c0_72 = arith.constant 0 : index
    %c25 = arith.constant 25 : index
    %c0_73 = arith.constant 0 : index
    %77 = vector.load %arg2[%c0_72, %c25, %c0_73] : memref<1x72x128xbf16, #tpu.memory_space<vmem>>, vector<1x40x128xbf16>
    %78 = vector.shape_cast %77 : vector<1x40x128xbf16> to vector<40x128xbf16>
    %c13 = arith.constant 13 : index
    %c0_74 = arith.constant 0 : index
    %c0_75 = arith.constant 0 : index
    %79 = vector.load %arg3[%c13, %c0_74, %c0_75] : memref<16x128x128xbf16, #tpu.memory_space<vmem>>, vector<1x128x128xbf16>
    %80 = vector.shape_cast %79 : vector<1x128x128xbf16> to vector<128x128xbf16>
    %cst_76 = arith.constant dense<0.000000e+00> : vector<40x128xf32>
    %81 = tpu.matmul %78, %80, %cst_76 {dimension_numbers = #tpu.dot_dimension_numbers<[1], [0], [0], [1], [0, 0, 1, 1], [], []>} : vector<40x128xbf16>, vector<128x128xbf16>, vector<40x128xf32> -> vector<40x128xf32>
    %82 = arith.addf %76, %81 : vector<40x128xf32>
    %c0_77 = arith.constant 0 : index
    %c26 = arith.constant 26 : index
    %c0_78 = arith.constant 0 : index
    %83 = vector.load %arg2[%c0_77, %c26, %c0_78] : memref<1x72x128xbf16, #tpu.memory_space<vmem>>, vector<1x40x128xbf16>
    %84 = vector.shape_cast %83 : vector<1x40x128xbf16> to vector<40x128xbf16>
    %c14 = arith.constant 14 : index
    %c0_79 = arith.constant 0 : index
    %c0_80 = arith.constant 0 : index
    %85 = vector.load %arg3[%c14, %c0_79, %c0_80] : memref<16x128x128xbf16, #tpu.memory_space<vmem>>, vector<1x128x128xbf16>
    %86 = vector.shape_cast %85 : vector<1x128x128xbf16> to vector<128x128xbf16>
    %cst_81 = arith.constant dense<0.000000e+00> : vector<40x128xf32>
    %87 = tpu.matmul %84, %86, %cst_81 {dimension_numbers = #tpu.dot_dimension_numbers<[1], [0], [0], [1], [0, 0, 1, 1], [], []>} : vector<40x128xbf16>, vector<128x128xbf16>, vector<40x128xf32> -> vector<40x128xf32>
    %88 = arith.addf %82, %87 : vector<40x128xf32>
    %c0_82 = arith.constant 0 : index
    %c27 = arith.constant 27 : index
    %c0_83 = arith.constant 0 : index
    %89 = vector.load %arg2[%c0_82, %c27, %c0_83] : memref<1x72x128xbf16, #tpu.memory_space<vmem>>, vector<1x40x128xbf16>
    %90 = vector.shape_cast %89 : vector<1x40x128xbf16> to vector<40x128xbf16>
    %c15 = arith.constant 15 : index
    %c0_84 = arith.constant 0 : index
    %c0_85 = arith.constant 0 : index
    %91 = vector.load %arg3[%c15, %c0_84, %c0_85] : memref<16x128x128xbf16, #tpu.memory_space<vmem>>, vector<1x128x128xbf16>
    %92 = vector.shape_cast %91 : vector<1x128x128xbf16> to vector<128x128xbf16>
    %cst_86 = arith.constant dense<0.000000e+00> : vector<40x128xf32>
    %93 = tpu.matmul %90, %92, %cst_86 {dimension_numbers = #tpu.dot_dimension_numbers<[1], [0], [0], [1], [0, 0, 1, 1], [], []>} : vector<40x128xbf16>, vector<128x128xbf16>, vector<40x128xf32> -> vector<40x128xf32>
    %94 = arith.addf %88, %93 : vector<40x128xf32>
    %c0_87 = arith.constant 0 : index
    %c0_88 = arith.constant 0 : index
    %95 = vector.load %arg4[%c0_87, %c0_88] : memref<1x128xf32, #tpu.memory_space<vmem>>, vector<1x128xf32>
    %96 = vector.broadcast %95 : vector<1x128xf32> to vector<40x128xf32>
    %97 = arith.addf %94, %96 : vector<40x128xf32>
    %c0_89 = arith.constant 0 : index
    %c0_90 = arith.constant 0 : index
    %c0_91 = arith.constant 0 : index
    %98 = vector.load %arg5[%c0_89, %c0_90, %c0_91] : memref<1x40x128xf32, #tpu.memory_space<vmem>>, vector<1x40x128xf32>
    %99 = vector.shape_cast %98 : vector<1x40x128xf32> to vector<40x128xf32>
    %100 = vector.shape_cast %97 : vector<40x128xf32> to vector<1x40x128xf32>
    tpu.vector_store %arg5[%c0_89, %c0_90, %c0_91], %100 {strides = array<i32>} : memref<1x40x128xf32, #tpu.memory_space<vmem>>, vector<1x40x128xf32>,
    return
  }
  func.func @transform_0(%arg0: i32, %arg1: i32) -> (i32, i32, i32) {
    %c0_i32 = arith.constant 0 : i32
    %c0_i32_0 = arith.constant 0 : i32
    %c0_i32_1 = arith.constant 0 : i32
    return %arg1, %c0_i32, %c0_i32_0 : i32, i32, i32
  }
  func.func @transform_1(%arg0: i32, %arg1: i32) -> (i32, i32, i32) {
    %c0_i32 = arith.constant 0 : i32
    %c0_i32_0 = arith.constant 0 : i32
    %c0_i32_1 = arith.constant 0 : i32
    return %c0_i32, %c0_i32_0, %arg0 : i32, i32, i32
  }
  func.func @transform_2(%arg0: i32, %arg1: i32) -> (i32, i32) {
    %c0_i32 = arith.constant 0 : i32
    %c0_i32_0 = arith.constant 0 : i32
    return %c0_i32, %arg0 : i32, i32
  }
  func.func @transform_3(%arg0: i32, %arg1: i32) -> (i32, i32, i32) {
    %c0_i32 = arith.constant 0 : i32
    %c0_i32_0 = arith.constant 0 : i32
    return %arg1, %c0_i32, %arg0 : i32, i32, i32
  }
}

</mosaic_0001>

<bundles_post_ra>
// kernel: nlayer_res_discriminator_forward.11
= control target key start
LH: loop header
LB: loop body
LE: loop exit
PB: predicated region body
PF: predicated region fallthrough
CT: control target
= control target key end

     0   :  { %s899_s12 = smov 0   ;;  %s901_s13 = smov 0   ;;  %s1053_s0 = inlined_call_operand.vmem [shape: bf16[2,88,64], index: 0, kind: input, shape index: {}]   ;;  %s1054_s1 = inlined_call_operand.vmem [shape: bf16[1,64,128], index: 1, kind: input, shape index: {}]   ;;  %s1055_s2 = inlined_call_operand.vmem [shape: f32[88,1], index: 2, kind: input, shape index: {}]   ;;  %s1056_s3 = inlined_call_operand.vmem [shape: bf16[2,88,128], index: 3, kind: output, shape index: {}]  }
   0x1   :  { %s903_s14 = smov 0  }
   0x2 LB: > { %s22_s15 = sadd.s32 1, %s872_s13  ;;  %p704_p0 = scmp.ge.s32.totalorder %s876_s14, 1  ;;  %s876_s14 = sphi %s903_s14, %s13_s14   ;;  %s872_s13 = sphi %s901_s13, %s1058_s13   ;;  %s868_s12 = sphi %s899_s12, %s1057_s12  }
   0x3   : > { %p23_p1 = scmp.ge.s32.totalorder %s22_s15, 2  ;;  %p160_p2 = scmp.lt.s32.totalorder %s876_s14, 3 }
   0x5   : > { %s1060_s15 = smov (%p23_p1, %s22_s15), 0  ;;  %p161_p3 = pnand %p704_p0, %p160_p2 }
   0x6   : > { %v842_v0 = vld [vmem:[%s1054_s1] sm:$0xff] (!%p161_p3)   ;;  %p191_p4 = scmp.lt.s32.totalorder (!%p161_p3), %s868_s12, 1  ;;  %v843_v1 = vld [vmem:[%s1054_s1 + $0x8] sm:$0xff] (!%p161_p3)   ;;  %v844_v2 = vld [vmem:[%s1054_s1 + $0x10] sm:$0xff] (!%p161_p3)   ;;  %v878_v5 = vmov (!%p161_p3), 0   ;;  %vm280_vm0 = vcmask (!%p161_p3), 523264  }
   0x7   : > { %164 = sbr.rel (%p161_p3) target bundleno = 306 (0x132), region = 32  ;;  %786 = vmatprep.subr.bf16.mxu0 (!%p161_p3), %v842_v0  ;;  %806 = vmatprep.subr.bf16.mxu1 (!%p161_p3), %v842_v0  ;;  %v379_v3 = vld [vmem:[%s1055_s2] sm:$0xff] (!%p161_p3)  ;;  %v381_v4 = vld [vmem:[%s1055_s2 + $0x10] sm:$0xff] (!%p161_p3)  ;;  %v845_v6 = vld [vmem:[%s1054_s1 + $0x18] sm:$0xff] (!%p161_p3)  }
   0x8   : > { %787 = vmatpush3.bf16.msra.mxu0 (!%p161_p3), %v842_v0  ;;  %810 = vmatpush3.bf16.msra.mxu1 (!%p161_p3), %v842_v0  ;;  %v380_v7 = vld [vmem:[%s1055_s2 + $0x8] sm:$0xff] (!%p161_p3)  ;;  %v382_v10 = vld [vmem:[%s1055_s2 + $0x18] sm:$0xff] (!%p161_p3)  ;;  %v383_v11 = vld [vmem:[%s1055_s2 + $0x20] sm:$0xff] (!%p161_p3) }
   0x9   : > { %788 = vmatprep.subr.bf16.mxu0 (!%p161_p3), %v843_v1  ;;  %807 = vmatprep.subr.bf16.mxu1 (!%p161_p3), %v843_v1  ;;  %v384_v14 = vld [vmem:[%s1055_s2 + $0x28] sm:$0xff] (!%p161_p3)  ;;  %v385_v16 = vld [vmem:[%s1055_s2 + $0x30] sm:$0xff] (!%p161_p3)  ;;  %v386_v17 = vld [vmem:[%s1055_s2 + $0x38] sm:$0xff] (!%p161_p3) }
   0xa   : > { %840 = vset.pattern.permute.xlu0 (!%p161_p3), %v878_v5  ;;  %841 = vset.pattern.permute.xlu1 (!%p161_p3), %v878_v5  ;;  %v387_v18 = vld [vmem:[%s1055_s2 + $0x40] sm:$0xff] (!%p161_p3)  ;;  %v388_v20 = vld [vmem:[%s1055_s2 + $0x48] sm:$0xff] (!%p161_p3)  ;;  %v389_v21 = vld [vmem:[%s1055_s2 + $0x50] sm:$0xff] (!%p161_p3) }
   0xb   : > { %392 = vperm.xlu0 (!%p161_p3), %840, %v379_v3   ;;  %402 = vperm.xlu1 (!%p161_p3), %841, %v381_v4  }
   0xc   : > { %789 = vmatpush3.bf16.msra.mxu0 (!%p161_p3), %v843_v1  ;;  %811 = vmatpush3.bf16.msra.mxu1 (!%p161_p3), %v843_v1 }
   0xd   : > { %790 = vmatprep.subr.bf16.mxu0 (!%p161_p3), %v844_v2  ;;  %808 = vmatprep.subr.bf16.mxu1 (!%p161_p3), %v844_v2 }
   0xe   : > { %s1062_s12 = smov (!%p191_p4, %s868_s12), 1 }
   0xf   : > { %s814_s22 = smul.u32 44, %s1062_s12  ;;  %397 = vperm.xlu0 %840, %v380_v7   ;;  %407 = vperm.xlu1 %841, %v382_v10  }
  0x10   : > { %791 = vmatpush3.bf16.msra.mxu0 %v844_v2  ;;  %812 = vmatpush3.bf16.msra.mxu1 %v844_v2 }
  0x11   : > { %s943_s4 = scalar_lea.vmem %s1053_s0, %s814_s22  ;;  %792 = vmatprep.subr.bf16.mxu0 %v845_v6  ;;  %809 = vmatprep.subr.bf16.mxu1 %v845_v6  ;;  %s207_s30 = scalar_lea.vmem %s1056_s3, %s814_s22 }
  0x12   : > { %v846_v8 = vld [vmem:[%s943_s4] sm:$0xff]   ;;  %v847_v9 = vld [vmem:[%s943_s4 + $0x10] sm:$0xff]   ;;  %v848_v12 = vld [vmem:[%s943_s4 + $0x8] sm:$0xff]  }
  0x13   : > { %794 = vmatprep.mubr.msk.bf16.mxu0 %vm280_vm0, %v846_v8  ;;  %798 = vmatprep.mubr.msk.bf16.mxu1 %vm280_vm0, %v847_v9  ;;  %v849_v13 = vld [vmem:[%s943_s4 + $0x18] sm:$0xff]   ;;  %v850_v15 = vld [vmem:[%s943_s4 + $0x20] sm:$0xff]   ;;  %v851_v19 = vld [vmem:[%s943_s4 + $0x28] ss:$0 sps:$4 sm:$0xff]  }
  0x14   : > { %412 = vperm.xlu0 %840, %v383_v11   ;;  %793 = vmatpush3.bf16.msra.mxu0 %v845_v6 }
  0x15   : > { %813 = vmatpush3.bf16.msra.mxu1 %v845_v6  ;;  %417 = vperm.xlu1 %841, %v384_v14  }
  0x17   : > { %795 = vmatmul.mubr.msk.bf16.vlgmr.msra.gmra.mrb[0].mxu0 %vm280_vm0, %v848_v12 }
  0x18   : > { %799 = vmatmul.mubr.msk.bf16.vlgmr.msra.gmra.mrb[0].mxu1 %vm280_vm0, %v849_v13  ;;  %422 = vperm.xlu0 %840, %v385_v16  }
  0x19   : > { %802 = vmatprep.mubr.msk.bf16.mxu1 %vm280_vm0, %v850_v15  ;;  %427 = vperm.xlu1 %841, %v386_v17  }
  0x1c   : > { %432 = vperm.xlu0 %840, %v387_v18  }
  0x1d   : > { %437 = vperm.xlu1 %841, %v388_v20  }
  0x20   : > { %803 = vmatmul.mubr.msk.bf16.gmra.mrb[4].mxu1 %vm280_vm0, %v851_v19  ;;  %442 = vperm.xlu0 %840, %v389_v21  }
  0x8a   : > { %v393_v22 = vpop.permute.xlu0 %392  ;;  %v403_v24 = vpop.permute.xlu1 %402 }
  0x8e   : > { %v398_v23 = vpop.permute.xlu0 %397  ;;  %v408_v26 = vpop.permute.xlu1 %407 }
  0x93   : > { %v413_v25 = vpop.permute.xlu0 %412 }
  0x94   : > { %v418_v38 = vpop.permute.xlu1 %417 }
  0x97   : > { %v423_v43 = vpop.permute.xlu0 %422 }
  0x98   : > { %v428_v55 = vpop.permute.xlu1 %427 }
  0x9b   : > { %v433_v61 = vpop.permute.xlu0 %432 }
  0x9c   : > { %v438_v6 = vpop.permute.xlu1 %437 }
  0x9f   : > { %v443_v11 = vpop.permute.xlu0 %442 }
  0xea   : > { %v984_v27 = vpop.f32.mrb[0].mxu0 }
  0xeb   : > { %v986_v28 = vpop.f32.mrb[0].mxu1  ;;  %v988_v29 = vpop.f32.mrb[1].mxu0  ;;  %v447_v36 = vmul.f32 %v984_v27, %v403_v24 }
  0xec   : > { %v990_v30 = vpop.f32.mrb[1].mxu1  ;;  %v445_v31 = vmul.f32 %v393_v22, %v988_v29  ;;  %v993_v32 = vpop.f32.mrb[2].mxu0  ;;  %v451_v57 = vmul.f32 %v986_v28, %v423_v43 }
  0xed   : > { %v995_v33 = vpop.f32.mrb[2].mxu1  ;;  %v997_v34 = vpop.f32.mrb[3].mxu0  ;;  %v448_v40 = vmul.f32 %v993_v32, %v408_v26  ;;  %v474_v44 = vmul.f32 %v984_v27, %v447_v36  ;;  %v449_v45 = vmul.f32 %v413_v25, %v990_v30 }
  0xee   : > { %v999_v35 = vpop.f32.mrb[3].mxu1  ;;  %v446_v37 = vmul.f32 %v398_v23, %v997_v34  ;;  %v472_v39 = vmul.f32 %v445_v31, %v988_v29  ;;  %v452_v62 = vmul.f32 %v995_v33, %v428_v55  ;;  %v478_v2 = vmul.f32 %v986_v28, %v451_v57 }
  0xef   : > { %v475_v50 = vmul.f32 %v993_v32, %v448_v40  ;;  %v450_v53 = vmul.f32 %v418_v38, %v999_v35  ;;  %v476_v58 = vmul.f32 %v449_v45, %v990_v30 }
  0xf0   : > { %v456_v41 = vadd.f32 %v446_v37, %v445_v31  ;;  %v473_v42 = vmul.f32 %v446_v37, %v997_v34  ;;  %v479_v7 = vmul.f32 %v995_v33, %v452_v62 }
  0xf1   : > { %v477_v0 = vmul.f32 %v450_v53, %v999_v35 }
  0xf2   : > { %v457_v46 = vadd.f32 %v456_v41, %v447_v36  ;;  %v483_v47 = vadd.f32 %v473_v42, %v472_v39 }
  0xf3   : > { %v1008_v48 = vpop.f32.mrb[4].mxu1 }
  0xf4   : > { %v1010_v49 = vpop.f32.mrb[5].mxu1  ;;  %v458_v51 = vadd.f32 %v457_v46, %v448_v40  ;;  %v484_v52 = vadd.f32 %v483_v47, %v474_v44  ;;  %v455_v12 = vmul.f32 %v1008_v48, %v443_v11 }
  0xf5   : > { %v805_v54 = vpop.f32.mrb[6].mxu1  ;;  %v453_v5 = vmul.f32 %v433_v61, %v1010_v49 }
  0xf6   : > { %v1014_v56 = vpop.f32.mrb[7].mxu1  ;;  %v485_v59 = vadd.f32 %v484_v52, %v475_v50  ;;  %v459_v60 = vadd.f32 %v458_v51, %v449_v45  ;;  %v482_v19 = vmul.f32 %v1008_v48, %v455_v12 }
  0xf7   : > { %v454_v10 = vmul.f32 %v438_v6, %v1014_v56  ;;  %v480_v14 = vmul.f32 %v453_v5, %v1010_v49 }
  0xf8   : > { %v460_v63 = vadd.f32 %v459_v60, %v450_v53  ;;  %v486_v1 = vadd.f32 %v485_v59, %v476_v58 }
  0xf9   : > { %v481_v18 = vmul.f32 %v454_v10, %v1014_v56 }
  0xfa   : > { %v461_v3 = vadd.f32 %v460_v63, %v451_v57  ;;  %v487_v4 = vadd.f32 %v486_v1, %v477_v0 }
  0xfc   : > { %v488_v8 = vadd.f32 %v487_v4, %v478_v2  ;;  %v462_v9 = vadd.f32 %v461_v3, %v452_v62 }
  0xfe   : > { %v463_v13 = vadd.f32 %v462_v9, %v453_v5  ;;  %v489_v15 = vadd.f32 %v488_v8, %v479_v7 }
 0x100   : > { %v490_v16 = vadd.f32 %v489_v15, %v480_v14  ;;  %v464_v17 = vadd.f32 %v463_v13, %v454_v10 }
 0x102   : > { %v465_v20 = vadd.f32 %v464_v17, %v455_v12  ;;  %v491_v21 = vadd.f32 %v490_v16, %v481_v18 }
 0x104   : > { %v466_v22 = vrot.slane %v465_v20, 4  ;;  %v492_v23 = vadd.f32 %v491_v21, %v482_v19 }
 0x106   : > { %v467_v24 = vadd.f32 %v466_v22, %v465_v20  ;;  %v493_v25 = vrot.slane %v492_v23, 4 }
 0x108   : > { %v468_v26 = vrot.slane %v467_v24, 2  ;;  %v494_v31 = vadd.f32 %v493_v25, %v492_v23 }
 0x10a   : > { %v469_v36 = vadd.f32 %v468_v26, %v467_v24  ;;  %v495_v37 = vrot.slane %v494_v31, 2 }
 0x10c   : > { %v470_v38 = vrot.slane %v469_v36, 1  ;;  %v496_v39 = vadd.f32 %v495_v37, %v494_v31 }
 0x10e   : > { %v471_v40 = vadd.f32 %v470_v38, %v469_v36  ;;  %v497_v41 = vrot.slane %v496_v39, 1 }
 0x110   : > { %v498_v42 = vadd.f32 %v497_v41, %v496_v39  ;;  %v499_v43 = vmul.f32 0.012345679, %v471_v40 }
 0x112   : > { %v500_v44 = vmul.f32 0.012345679, %v498_v42  ;;  %v501_v45 = vmul.f32 %v499_v43, %v499_v43  ;;  %v504_v46 = vsub.f32 %v988_v29, %v499_v43  ;;  %v505_v47 = vsub.f32 %v997_v34, %v499_v43 }
 0x113   : > { %v506_v50 = vsub.f32 %v984_v27, %v499_v43  ;;  %v507_v51 = vsub.f32 %v993_v32, %v499_v43  ;;  %v508_v52 = vsub.f32 %v990_v30, %v499_v43  ;;  %v509_v53 = vsub.f32 %v999_v35, %v499_v43 }
 0x114   : > { %v502_v54 = vsub.f32 %v500_v44, %v501_v45  ;;  %v510_v55 = vsub.f32 %v986_v28, %v499_v43  ;;  %v511_v57 = vsub.f32 %v995_v33, %v499_v43  ;;  %v512_v58 = vsub.f32 %v1010_v49, %v499_v43 }
 0x115   : > { %v513_v59 = vsub.f32 %v1014_v56, %v499_v43  ;;  %v514_v29 = vsub.f32 %v1008_v48, %v499_v43 }
 0x116   : > { %v503_v34 = vmax.f32 %v502_v54, 0.0 }
 0x118   : > { %v515_v60 = vadd.f32 1e-05, %v503_v34 }
 0x11a   : > { %852 = vrsqrt.f32 %v515_v60 }
 0x124   : > { %v853_v27 = vpop.eup %852 }
 0x125   : > { %v517_v32 = vmul.f32 %v853_v27, %v504_v46  ;;  %v518_v61 = vmul.f32 %v853_v27, %v505_v47  ;;  %v519_v30 = vmul.f32 %v853_v27, %v506_v50  ;;  %v520_v62 = vmul.f32 %v853_v27, %v507_v51 }
 0x126   : > { %v521_v35 = vmul.f32 %v853_v27, %v508_v52  ;;  %v522_v63 = vmul.f32 %v853_v27, %v509_v53  ;;  %v523_v0 = vmul.f32 %v853_v27, %v510_v55  ;;  %v524_v28 = vmul.f32 %v853_v27, %v511_v57 }
 0x127   : > { %v525_v1 = vmul.f32 %v853_v27, %v512_v58  ;;  %v526_v33 = vmul.f32 %v853_v27, %v513_v59  ;;  %v527_v2 = vmul.f32 %v853_v27, %v514_v29  ;;  %v528_v49 = vmul.f32 0.2, %v517_v32 }
 0x128   : > { %v529_v56 = vmul.f32 0.2, %v518_v61  ;;  %v530_v3 = vmul.f32 0.2, %v519_v30  ;;  %v531_v48 = vmul.f32 0.2, %v520_v62 }
 0x129   : > { %v532_v4 = vmul.f32 0.2, %v521_v35  ;;  %v533_v5 = vmul.f32 0.2, %v522_v63  ;;  %v534_v6 = vmul.f32 0.2, %v523_v0  ;;  %v539_v7 = vmax.f32 %v517_v32, %v528_v49 }
 0x12a   : > { %v535_v8 = vmul.f32 0.2, %v524_v28  ;;  %v536_v9 = vmul.f32 0.2, %v525_v1  ;;  %v537_v10 = vmul.f32 0.2, %v526_v33  ;;  %v540_v11 = vmax.f32 %v518_v61, %v529_v56 }
 0x12b   : > { %v538_v12 = vmul.f32 0.2, %v527_v2  ;;  %v541_v13 = vmax.f32 %v519_v30, %v530_v3  ;;  %v542_v14 = vmax.f32 %v520_v62, %v531_v48  ;;  %v543_v15 = vmax.f32 %v521_v35, %v532_v4 }
 0x12c   : > { %v544_v16 = vmax.f32 %v522_v63, %v533_v5  ;;  %v545_v17 = vmax.f32 %v523_v0, %v534_v6  ;;  %v546_v18 = vmax.f32 %v524_v28, %v535_v8  ;;  %v547_v19 = vmax.f32 %v525_v1, %v536_v9 }
 0x12d   : > { %v548_v20 = vmax.f32 %v526_v33, %v537_v10  ;;  %v549_v21 = vmax.f32 %v527_v2, %v538_v12  ;;  %v750_v22 = vpack.c.bf16 %v540_v11, %v539_v7  ;;  %v755_v23 = vpack.c.bf16 %v542_v14, %v541_v13 }
 0x12e   : > { %v760_v24 = vpack.c.bf16 %v544_v16, %v543_v15  ;;  %v765_v25 = vpack.c.bf16 %v546_v18, %v545_v17 }
 0x12f   : > { %v746_v26 = vpack.c.bf16 %v549_v21, %v549_v21  ;;  %751 = vst [vmem:[%s207_s30] sm:$0xff] %v750_v22   ;;  %772 = vst [vmem:[%s207_s30 + $0x8] sm:$0xff] %v755_v23   ;;  %v770_v31 = vpack.c.bf16 %v548_v20, %v547_v19 }
 0x130   : > { %773 = vst [vmem:[%s207_s30 + $0x10] sm:$0xff] %v760_v24   ;;  %774 = vst [vmem:[%s207_s30 + $0x18] sm:$0xff] %v765_v25  }
 0x131   : > { %775 = vst [vmem:[%s207_s30 + $0x20] sm:$0xff] %v770_v31   ;;  %605 = vst [vmem:[%s207_s30 + $0x28] sm:$0xf] %v746_v26 }
 0x132 PF: > { %s13_s14 = sadd.s32 1, %s876_s14   ;;  %s1057_s12 = smov %s872_s13 }
 0x133   : > { %p10_p5 = scmp.ge.s32.totalorder %s13_s14, 4   ;;  %s1058_s13 = smov %s1060_s15 }
 0x135   :  { %12 = sbr.rel (!%p10_p5) target bundleno = 2 (0x2), region = 65 }

// kernel: nlayer_res_discriminator_forward.12
= control target key start
LH: loop header
LB: loop body
LE: loop exit
PB: predicated region body
PF: predicated region fallthrough
CT: control target
= control target key end

     0   :  { %s3773_s12 = smov 0   ;;  %s3775_s13 = smov 0   ;;  %s4516_s0 = inlined_call_operand.vmem [shape: bf16[2,192,16], index: 0, kind: input, shape index: {}]   ;;  %s4517_s1 = inlined_call_operand.vmem [shape: bf16[9,16,128], index: 1, kind: input, shape index: {}]   ;;  %s4518_s2 = inlined_call_operand.vmem [shape: f32[144,1], index: 2, kind: input, shape index: {}]   ;;  %s4519_s3 = inlined_call_operand.vmem [shape: bf16[2,144,128], index: 3, kind: output, shape index: {}]  }
   0x1   :  { %s3777_s14 = smov 0  }
   0x2 LB: > { %s22_s15 = sadd.s32 1, %s3744_s13  ;;  %p2678_p0 = scmp.ge.s32.totalorder %s3748_s14, 1  ;;  %s3748_s14 = sphi %s3777_s14, %s13_s14   ;;  %s3744_s13 = sphi %s3775_s13, %s4521_s13   ;;  %s3740_s12 = sphi %s3773_s12, %s4520_s12  }
   0x3   : > { %p23_p1 = scmp.ge.s32.totalorder %s22_s15, 2  ;;  %p160_p2 = scmp.lt.s32.totalorder %s3748_s14, 3 }
   0x5   : > { %s4523_s15 = smov (%p23_p1, %s22_s15), 0  ;;  %p161_p3 = pnand %p2678_p0, %p160_p2 }
   0x6   : > { %v3794_v0 = vld [vmem:[%s4517_s1 + $0x20] sm:$0xff] (!%p161_p3)   ;;  %v3750_v1 = vmov (!%p161_p3), 0.0   ;;  %v3665_v2 = vld [vmem:[%s4517_s1 + $0x8] sm:$0xff] (!%p161_p3)   ;;  %vm3751_vm0 = vmmov (!%p161_p3), 0   ;;  %p191_p4 = scmp.lt.s32.totalorder (!%p161_p3), %s3740_s12, 1  ;;  %vm364_vm2 = vcmask (!%p161_p3), 130048  }
   0x7   : > { %164 = sbr.rel (%p161_p3) target bundleno = 623 (0x26f), region = 32  ;;  %3171 = vmatprep.subr.bf16.mxu0 (!%p161_p3), %v3750_v1  ;;  %3019 = vmatprep.subr.bf16.mxu1 (!%p161_p3), %v3750_v1  ;;  %vm281_vm1 = vsmask.f32 (!%p161_p3), 7424  ;;  %v3672_v25 = vld [vmem:[%s4517_s1] sm:$0xff] (!%p161_p3)   ;;  %v3670_v27 = vld [vmem:[%s4517_s1 + $0x28] sm:$0xff] (!%p161_p3)   ;;  %vm633_vm3 = vcmask (!%p161_p3), 1046528  }
   0x8   : > { %3172 = vmatpush3.bf16.msra.mxu0 (!%p161_p3), %v3794_v0  ;;  %3021 = vmatprep.mubr.msk.bf16.mxu1 (!%p161_p3), %vm3751_vm0, %v3750_v1 }
   0x9   : > { %3020 = vmatpush3.bf16.msra.mxu1 (!%p161_p3), %v3665_v2  ;;  %3173 = vmatprep.mubr.msk.bf16.mxu0 (!%p161_p3), %vm3751_vm0, %v3750_v1 }
   0xa   : > { %3209 = vmatprep.subr.bf16.mxu0 (!%p161_p3), %v3750_v1  ;;  %3057 = vmatprep.subr.bf16.mxu1 (!%p161_p3), %v3750_v1 }
   0xe   : > { %s4525_s12 = smov (!%p191_p4, %s3740_s12), 1 }
   0xf   : > { %s3633_s20 = smul.u32 96, %s4525_s12 }
  0x11   : > { %s3814_s23 = scalar_lea.vmem %s4516_s0, %s3633_s20 }
  0x12   : > { %v209_v3 = vld [vmem:[%s3814_s23] sm:$0xf]  ;;  %v3818_v4 = vld [vmem:[%s3814_s23 + $0x4] sm:$0xf]  ;;  %v3824_v6 = vld [vmem:[%s3814_s23 + $0x8] sm:$0xff]  }
  0x13   : > { %v3821_v5 = vcombine.low %v209_v3, %v3818_v4  ;;  %v1031_v7 = vld [vmem:[%s3814_s23 + $0x8] sm:$0xf]  ;;  %v3828_v8 = vld [vmem:[%s3814_s23 + $0xc] sm:$0xf]  ;;  %v290_v11 = vshll.u32 %v3824_v6, 16  ;;  %v3835_v13 = vld [vmem:[%s3814_s23 + $0x10] sm:$0xff]  }
  0x14   : > { %v2749_v12 = vcombine.low %v1031_v7, %v3828_v8  ;;  %v3838_v14 = vld [vmem:[%s3814_s23 + $0x10] sm:$0xff]   ;;  %v1109_v19 = vshll.u32 %v3835_v13, 16  ;;  %v3842_v20 = vld [vmem:[%s3814_s23 + $0x18] sm:$0xff]   ;;  %v294_v23 = vshrl.u32 %v3824_v6, 16  ;;  %v1113_v30 = vshrl.u32 %v3835_v13, 16  ;;  %v3867_v38 = vld [vmem:[%s3814_s23 + $0x20] sm:$0xff]  }
  0x15   : > { %v283_v9 = vshrl.u32 %v3821_v5, 16  ;;  %v285_v10 = vshll.u32 %v3821_v5, 16  ;;  %v292_v16 = vrot.slane %v290_v11, 1  ;;  %v298_v24 = vshll.u32 %v3838_v14, 16  ;;  %v3857_v32 = vld [vmem:[%s3814_s23 + $0x18] sm:$0xff]   ;;  %v3870_v39 = vld [vmem:[%s3814_s23 + $0x30] sm:$0xff]  }
  0x16   : > { %v1102_v17 = vshrl.u32 %v2749_v12, 16  ;;  %v1104_v18 = vshll.u32 %v2749_v12, 16  ;;  %v1111_v26 = vrot.slane %v1109_v19, 1  ;;  %v1117_v31 = vshll.u32 %v3842_v20, 16  ;;  %v3883_v50 = vld [vmem:[%s3814_s23 + $0x20] sm:$0xff]   ;;  %v3893_v55 = vld [vmem:[%s3814_s23 + $0x28] sm:$0xff]  }
  0x17   : > { %v287_v15 = vrot.slane %v285_v10, 1  ;;  %v296_v34 = vor.u32 %v294_v23, %v292_v16  ;;  %v300_v35 = vrot.slane %v298_v24, 1  ;;  %v306_v40 = vshll.u32 %v3857_v32, 16  ;;  %v3903_v63 = vld [vmem:[%s3814_s23 + $0x28] sm:$0xff]  }
  0x18   : > { %v1106_v22 = vrot.slane %v1104_v18, 1  ;;  %v1115_v36 = vor.u32 %v1113_v30, %v1111_v26  ;;  %v1119_v37 = vrot.slane %v1117_v31, 1  ;;  %v302_v42 = vshrl.u32 %v3838_v14, 16  ;;  %v1333_v19 = vld [vmem:[%s3814_s23 + $0x8] sm:$0xe] }
  0x19   : > { %v288_v21 = vor.u32 %v287_v15, %v283_v9  ;;  %v301_v41 = vsel %vm281_vm1, %v296_v34, %v300_v35  ;;  %v1141_v43 = vshll.u32 %v3870_v39, 16  ;;  %v1145_v44 = vshrl.u32 %v3870_v39, 16 }
  0x1a   : > { %v1107_v29 = vor.u32 %v1106_v22, %v1102_v17  ;;  %v1121_v45 = vshrl.u32 %v3842_v20, 16  ;;  %v1120_v46 = vsel %vm281_vm1, %v1115_v36, %v1119_v37  ;;  %v1125_v47 = vshll.u32 %v3867_v38, 16  ;;  %v3682_v36 = vld [vmem:[%s4517_s1 + $0x30] sm:$0xff]  }
  0x1b   : > { %v293_v28 = vsel %vm281_vm1, %v288_v21, %v292_v16  ;;  %v1143_v48 = vrot.slane %v1141_v43, 1  ;;  %v308_v49 = vrot.slane %v306_v40, 1  ;;  %v304_v51 = vor.u32 %v302_v42, %v300_v35  ;;  %v3916_v16 = vld [vmem:[%s3814_s23 + $0x30] sm:$0xff]   ;;  %v3951_v40 = vld [vmem:[%s3814_s23 + $0x40] sm:$0xff]  }
  0x1c   : > { %3022 = vmatmul.mubr.msk.bf16.vlgmr.msra.gmra.mrb[0].mxu1 %vm364_vm2, %v293_v28  ;;  %v1112_v33 = vsel %vm281_vm1, %v1107_v29, %v1111_v26  ;;  %v1123_v53 = vor.u32 %v1121_v45, %v1119_v37  ;;  %v1127_v54 = vrot.slane %v1125_v47, 1  ;;  %v314_v56 = vshll.u32 %v3883_v50, 16  ;;  %v3932_v28 = vld [vmem:[%s3814_s23 + $0x38] sm:$0xff]  }
  0x1d   : > { %3025 = vmatprep.mubr.msk.bf16.mxu1 %vm3751_vm0, %v3750_v1  ;;  %3058 = vmatpush3.bf16.msra.mxu1 %v3672_v25  ;;  %v3887_v52 = vor.u32 %v1145_v44, %v1143_v48  ;;  %v309_v57 = vsel %vm281_vm1, %v304_v51, %v308_v49  ;;  %v310_v58 = vshrl.u32 %v3857_v32, 16  ;;  %v1129_v60 = vshrl.u32 %v3867_v38, 16 }
  0x1e   : > { %3174 = vmatmul.mubr.msk.bf16.vlgmr.msra.gmra.mrb[0].mxu0 %vm364_vm2, %v1112_v33  ;;  %3095 = vmatprep.subr.bf16.mxu1 %v3750_v1  ;;  %v1128_v59 = vsel %vm281_vm1, %v1123_v53, %v1127_v54  ;;  %v1133_v61 = vshll.u32 %v3893_v55, 16  ;;  %v316_v62 = vrot.slane %v314_v56, 1  ;;  %v322_v9 = vshll.u32 %v3903_v63, 16 }
  0x1f   : > { %3210 = vmatpush3.bf16.msra.mxu0 %v3670_v27  ;;  %3177 = vmatprep.mubr.msk.bf16.mxu0 %vm3751_vm0, %v3750_v1  ;;  %v312_v2 = vor.u32 %v310_v58, %v308_v49  ;;  %v1131_v3 = vor.u32 %v1129_v60, %v1127_v54  ;;  %v318_v11 = vshrl.u32 %v3883_v50, 16  ;;  %v1137_v15 = vshrl.u32 %v3893_v55, 16 }
  0x20   : > { %3247 = vmatprep.subr.bf16.mxu0 %v3750_v1  ;;  %v1135_v7 = vrot.slane %v1133_v61, 1  ;;  %v324_v17 = vrot.slane %v322_v9, 1  ;;  %v326_v22 = vshrl.u32 %v3903_v63, 16  ;;  %v330_v23 = vshll.u32 %v3916_v16, 16  ;;  %v4022_v9 = vld [vmem:[%s3814_s23 + $0x48] sm:$0xff]  }
  0x21   : > { %v317_v10 = vsel %vm281_vm1, %v312_v2, %v316_v62  ;;  %v320_v18 = vor.u32 %v318_v11, %v316_v62  ;;  %v2771_v26 = vcombine.low %v1333_v19, %v3828_v8  ;;  %v1341_v31 = vrot.slane %v3835_v13, 1  ;;  %v3997_v62 = vld [vmem:[%s3814_s23 + $0x38] sm:$0xff]  }
  0x22   : > { %v1136_v12 = vsel %vm281_vm1, %v1131_v3, %v1135_v7  ;;  %v1139_v21 = vor.u32 %v1137_v15, %v1135_v7  ;;  %v332_v27 = vrot.slane %v330_v23, 1  ;;  %v328_v29 = vor.u32 %v326_v22, %v324_v17  ;;  %v4010_v3 = vld [vmem:[%s3814_s23 + $0x40] sm:$0xff]   ;;  %v3692_v19 = vld [vmem:[%s4517_s1 + $0x38] sm:$0xff]  }
  0x23   : > { %v325_v24 = vsel %vm281_vm1, %v320_v18, %v324_v17  ;;  %v1340_v30 = vrot.slane %v2771_v26, 1  ;;  %v334_v33 = vshrl.u32 %v3916_v16, 16  ;;  %v338_v34 = vshll.u32 %v3932_v28, 16  ;;  %v3691_v18 = vld [vmem:[%s3814_s23 + $0x10] sm:$0xff]   ;;  %v3694_v22 = vld [vmem:[%s3814_s23 + $0x20] sm:$0xff]  }
  0x24   : > { %3026 = vmatmul.mubr.msk.bf16.gmra.mrb[4].mxu1 %vm364_vm2, %v301_v41  ;;  %v1144_v25 = vsel %vm281_vm1, %v1139_v21, %v1143_v48  ;;  %v333_v8 = vsel %vm281_vm1, %v328_v29, %v332_v27  ;;  %v1343_v41 = vrot.slane %v3842_v20, 1  ;;  %v342_v43 = vshrl.u32 %v3932_v28, 16  ;;  %v3966_v48 = vld [vmem:[%s3814_s23 + $0x48] ss:$0 sps:$4 sm:$0x11]   ;;  %v3693_v21 = vld [vmem:[%s3814_s23 + $0x18] sm:$0xff]  }
  0x25   : > { %3029 = vmatprep.mubr.msk.bf16.mxu1 %vm3751_vm0, %v3750_v1  ;;  %v1342_v35 = vsel %vm633_vm3, %v1340_v30, %v1341_v31  ;;  %v336_v37 = vor.u32 %v334_v33, %v332_v27  ;;  %v340_v13 = vrot.slane %v338_v34, 1  ;;  %v346_v44 = vshll.u32 %v3951_v40, 16  ;;  %v626_v23 = vld [vmem:[%s3814_s23] sm:$0xe]  ;;  %v3697_v30 = vld [vmem:[%s3814_s23 + $0x30] sm:$0xff]  }
  0x26   : > { %3178 = vmatmul.mubr.msk.bf16.gmra.mrb[4].mxu0 %vm364_vm2, %v1120_v46  ;;  %v1344_v45 = vsel %vm633_vm3, %v1341_v31, %v1343_v41  ;;  %v1345_v20 = vrot.slane %v3867_v38, 1  ;;  %v350_v51 = vshrl.u32 %v3951_v40, 16  ;;  %v354_v53 = vshll.u32 %v3966_v48, 16  ;;  %v3700_v34 = vld [vmem:[%s3814_s23 + $0x40] sm:$0xff]  }
  0x27   : > { %3181 = vmatprep.mubr.msk.bf16.mxu0 %vm3751_vm0, %v3750_v1  ;;  %v341_v42 = vsel %vm281_vm1, %v336_v37, %v340_v13  ;;  %v344_v46 = vor.u32 %v342_v43, %v340_v13  ;;  %v348_v47 = vrot.slane %v346_v44, 1  ;;  %v1347_v38 = vrot.slane %v3893_v55, 1  ;;  %v3686_v55 = vld [vmem:[%s4517_s1 + $0x10] sm:$0xff]   ;;  %v3701_v13 = vld [vmem:[%s3814_s23 + $0x48] sm:$0xff]  }
  0x28   : > { %v1346_v54 = vsel %vm633_vm3, %v1343_v41, %v1345_v20  ;;  %v1349_v60 = vrot.slane %v3870_v39, 1  ;;  %v1351_v39 = vrot.slane %v3997_v62, 1  ;;  %v635_v27 = vrot.slane %v3824_v6, 1 }
  0x29   : > { %v349_v49 = vsel %vm281_vm1, %v344_v46, %v348_v47  ;;  %v352_v56 = vor.u32 %v350_v51, %v348_v47 }
  0x2a   : > { %v1350_v61 = vsel %vm633_vm3, %v1347_v38, %v1349_v60  ;;  %v1352_v2 = vsel %vm633_vm3, %v1349_v60, %v1351_v39 }
  0x2c   : > { %3030 = vmatmul.mubr.msk.bf16.gmra.mrb[8].mxu1 %vm364_vm2, %v309_v57  ;;  %v356_v57 = vrot.slane %v354_v53, 1  ;;  %v4150_v53 = vld [vmem:[%s3814_s23 + $0x20] sm:$0xff]  }
  0x2d   : > { %3033 = vmatprep.mubr.msk.bf16.mxu1 %vm3751_vm0, %v3750_v1 }
  0x2e   : > { %3182 = vmatmul.mubr.msk.bf16.gmra.mrb[8].mxu0 %vm364_vm2, %v1128_v59  ;;  %v357_v58 = vsel %vm281_vm1, %v352_v56, %v356_v57  ;;  %v1348_v59 = vsel %vm633_vm3, %v1345_v20, %v1347_v38  ;;  %v3705_v57 = vld [vmem:[%s4517_s1 + $0x40] sm:$0xff]   ;;  %v1823_v38 = vshll.u32 %v4150_v53, 16 }
  0x2f   : > { %3185 = vmatprep.mubr.msk.bf16.mxu0 %vm3751_vm0, %v3750_v1 }
  0x30   : > { %v1825_v60 = vrot.slane %v1823_v38, 1  ;;  %v2236_v38 = vld [vmem:[%s4518_s2 + $0x78] sm:$0xff] }
  0x34   : > { %3034 = vmatmul.mubr.msk.bf16.gmra.mrb[12].mxu1 %vm364_vm2, %v317_v10  ;;  %v1355_v10 = vrot.slane %v4022_v9, 1 }
  0x35   : > { %3037 = vmatprep.mubr.msk.bf16.mxu1 %vm3751_vm0, %v3750_v1 }
  0x36   : > { %3186 = vmatmul.mubr.msk.bf16.gmra.mrb[12].mxu0 %vm364_vm2, %v1136_v12  ;;  %v4034_v12 = vld [vmem:[%s3814_s23 + $0x50] ss:$0 sps:$4 sm:$0x11]  }
  0x37   : > { %3189 = vmatprep.mubr.msk.bf16.mxu0 %vm3751_vm0, %v3750_v1  ;;  %v1357_v15 = vrot.slane %v4034_v12, 1 }
  0x39   : > { %v1358_v17 = vsel %vm633_vm3, %v1355_v10, %v1357_v15 }
  0x3c   : > { %3038 = vmatmul.mubr.msk.bf16.gmra.mrb[16].mxu1 %vm364_vm2, %v325_v24  ;;  %v2715_v24 = vcombine.low %v626_v23, %v3818_v4  ;;  %v3698_v4 = vld [vmem:[%s4517_s1 + $0x18] sm:$0xff]  }
  0x3d   : > { %3041 = vmatprep.mubr.msk.bf16.mxu1 %vm3751_vm0, %v3750_v1 }
  0x3e   : > { %3190 = vmatmul.mubr.msk.bf16.gmra.mrb[16].mxu0 %vm364_vm2, %v1144_v25  ;;  %v3695_v25 = vld [vmem:[%s3814_s23 + $0x28] sm:$0xff]   ;;  %v634_v26 = vrot.slane %v2715_v24, 1 }
  0x3f   : > { %3211 = vmatprep.mubr.msk.bf16.mxu0 %vm3751_vm0, %v3750_v1 }
  0x40   : > { %v636_v29 = vsel %vm633_vm3, %v634_v26, %v635_v27  ;;  %v2225_v26 = vld [vmem:[%s4518_s2 + $0x20] sm:$0xff] }
  0x44   : > { %3042 = vmatmul.mubr.msk.bf16.gmra.mrb[20].mxu1 %vm364_vm2, %v333_v8  ;;  %v3699_v8 = vld [vmem:[%s3814_s23 + $0x38] sm:$0xff]  }
  0x45   : > { %3045 = vmatprep.mubr.msk.bf16.mxu1 %vm3751_vm0, %v3750_v1 }
  0x46   : > { %3212 = vmatmul.mubr.msk.bf16.vlgmr.msra.gmra.mrb[0].mxu0 %vm364_vm2, %v1342_v35  ;;  %v641_v35 = vrot.slane %v3883_v50, 1 }
  0x47   : > { %3248 = vmatpush3.bf16.msra.mxu0 %v3682_v36  ;;  %3215 = vmatprep.mubr.msk.bf16.mxu0 %vm3751_vm0, %v3750_v1  ;;  %v4124_v36 = vld [vmem:[%s3814_s23 + $0x14] sm:$0xf] }
  0x48   : > { %3285 = vmatprep.subr.bf16.mxu0 %v3750_v1 }
  0x4c   : > { %3046 = vmatmul.mubr.msk.bf16.gmra.mrb[24].mxu1 %vm364_vm2, %v341_v42  ;;  %v4137_v42 = vld [vmem:[%s3814_s23 + $0x18] sm:$0xff]  }
  0x4d   : > { %3049 = vmatprep.mubr.msk.bf16.mxu1 %vm3751_vm0, %v3750_v1  ;;  %v1815_v20 = vshll.u32 %v4137_v42, 16 }
  0x4e   : > { %3216 = vmatmul.mubr.msk.bf16.gmra.mrb[4].mxu0 %vm364_vm2, %v1344_v45  ;;  %v3702_v45 = vld [vmem:[%s3814_s23 + $0x50] sm:$0xff]  }
  0x4f   : > { %3219 = vmatprep.mubr.msk.bf16.mxu0 %vm3751_vm0, %v3750_v1  ;;  %v1817_v51 = vrot.slane %v1815_v20, 1 }
  0x54   : > { %3050 = vmatmul.mubr.msk.bf16.gmra.mrb[28].mxu1 %vm364_vm2, %v349_v49 }
  0x55   : > { %3053 = vmatprep.mubr.msk.bf16.mxu1 %vm3751_vm0, %v3750_v1 }
  0x56   : > { %3220 = vmatmul.mubr.msk.bf16.gmra.mrb[8].mxu0 %vm364_vm2, %v1346_v54 }
  0x57   : > { %3223 = vmatprep.mubr.msk.bf16.mxu0 %vm3751_vm0, %v3750_v1 }
  0x5c   : > { %3054 = vmatmul.mubr.msk.bf16.gmra.mrb[32].mxu1 %vm364_vm2, %v357_v58  ;;  %v647_v58 = vrot.slane %v3932_v28, 1 }
  0x5d   : > { %3059 = vmatprep.mubr.msk.bf16.mxu1 %vm3751_vm0, %v3750_v1 }
  0x5e   : > { %3224 = vmatmul.mubr.msk.bf16.gmra.mrb[12].mxu0 %vm364_vm2, %v1348_v59 }
  0x5f   : > { %3227 = vmatprep.mubr.msk.bf16.mxu0 %vm3751_vm0, %v3750_v1 }
  0x64   : > { %3060 = vmatmul.mubr.msk.bf16.vlgmr.msra.gmra.mrb[0].mxu1 %vm364_vm2, %v3821_v5  ;;  %v1353_v5 = vrot.slane %v4010_v3, 1 }
  0x65   : > { %3063 = vmatprep.mubr.msk.bf16.mxu1 %vm3751_vm0, %v3750_v1  ;;  %3096 = vmatpush3.bf16.msra.mxu1 %v3686_v55  ;;  %v4167_v55 = vld [vmem:[%s3814_s23 + $0x28] sm:$0xff]  }
  0x66   : > { %3228 = vmatmul.mubr.msk.bf16.gmra.mrb[16].mxu0 %vm364_vm2, %v1350_v61  ;;  %3133 = vmatprep.subr.bf16.mxu1 %v3750_v1  ;;  %v1354_v7 = vsel %vm633_vm3, %v1351_v39, %v1353_v5  ;;  %v1356_v11 = vsel %vm633_vm3, %v1353_v5, %v1355_v10  ;;  %v1831_v5 = vshll.u32 %v4167_v55, 16  ;;  %v2223_v10 = vld [vmem:[%s4518_s2 + $0x10] sm:$0xff]  ;;  %v1835_v23 = vshrl.u32 %v4167_v55, 16 }
  0x67   : > { %3231 = vmatprep.mubr.msk.bf16.mxu0 %vm3751_vm0, %v3750_v1 }
  0x68   : > { %v1833_v15 = vrot.slane %v1831_v5, 1 }
  0x6c   : > { %3064 = vmatmul.mubr.msk.bf16.gmra.mrb[4].mxu1 %vm364_vm2, %v3824_v6  ;;  %v637_v6 = vrot.slane %v3838_v14, 1 }
  0x6d   : > { %3067 = vmatprep.mubr.msk.bf16.mxu1 %vm3751_vm0, %v3750_v1 }
  0x6e   : > { %3232 = vmatmul.mubr.msk.bf16.gmra.mrb[20].mxu0 %vm364_vm2, %v1352_v2  ;;  %v638_v31 = vsel %vm633_vm3, %v635_v27, %v637_v6  ;;  %v1827_v2 = vshrl.u32 %v4150_v53, 16  ;;  %v2226_v27 = vld [vmem:[%s4518_s2 + $0x28] sm:$0xff] }
  0x6f   : > { %3235 = vmatprep.mubr.msk.bf16.mxu0 %vm3751_vm0, %v3750_v1 }
  0x74   : > { %3068 = vmatmul.mubr.msk.bf16.gmra.mrb[8].mxu1 %vm364_vm2, %v3838_v14  ;;  %v639_v14 = vrot.slane %v3857_v32, 1 }
  0x75   : > { %3071 = vmatprep.mubr.msk.bf16.mxu1 %vm3751_vm0, %v3750_v1 }
  0x76   : > { %3236 = vmatmul.mubr.msk.bf16.gmra.mrb[24].mxu0 %vm364_vm2, %v1354_v7  ;;  %v640_v33 = vsel %vm633_vm3, %v637_v6, %v639_v14  ;;  %v642_v37 = vsel %vm633_vm3, %v639_v14, %v641_v35  ;;  %v2221_v7 = vld [vmem:[%s4518_s2] sm:$0xff]  ;;  %v2227_v6 = vld [vmem:[%s4518_s2 + $0x30] sm:$0xff] }
  0x77   : > { %3239 = vmatprep.mubr.msk.bf16.mxu0 %vm3751_vm0, %v3750_v1 }
  0x7c   : > { %3072 = vmatmul.mubr.msk.bf16.gmra.mrb[12].mxu1 %vm364_vm2, %v3857_v32  ;;  %v1737_v32 = vld [vmem:[%s3814_s23 + $0x10] sm:$0xf] }
  0x7d   : > { %3075 = vmatprep.mubr.msk.bf16.mxu1 %vm3751_vm0, %v3750_v1  ;;  %v2805_v41 = vcombine.low %v1737_v32, %v4124_v36 }
  0x7e   : > { %3240 = vmatmul.mubr.msk.bf16.gmra.mrb[28].mxu0 %vm364_vm2, %v1356_v11  ;;  %v1829_v11 = vor.u32 %v1827_v2, %v1825_v60  ;;  %v3713_v2 = vld [vmem:[%s3814_s23 + $0x18] sm:$0xff]  }
  0x7f   : > { %3243 = vmatprep.mubr.msk.bf16.mxu0 %vm3751_vm0, %v3750_v1  ;;  %v1810_v43 = vshll.u32 %v2805_v41, 16  ;;  %v1808_v46 = vshrl.u32 %v2805_v41, 16  ;;  %v3709_v41 = vld [vmem:[%s3814_s23 + $0x8] sm:$0xff]  }
  0x81   : > { %v1812_v47 = vrot.slane %v1810_v43, 1 }
  0x83   : > { %v1813_v49 = vor.u32 %v1812_v47, %v1808_v46  ;;  %v2232_v46 = vld [vmem:[%s4518_s2 + $0x58] sm:$0xff]  ;;  %v2233_v47 = vld [vmem:[%s4518_s2 + $0x60] sm:$0xff] }
  0x84   : > { %3076 = vmatmul.mubr.msk.bf16.gmra.mrb[16].mxu1 %vm364_vm2, %v3883_v50  ;;  %v643_v50 = vrot.slane %v3903_v63, 1 }
  0x85   : > { %3079 = vmatprep.mubr.msk.bf16.mxu1 %vm3751_vm0, %v3750_v1  ;;  %v1818_v56 = vsel %vm281_vm1, %v1813_v49, %v1817_v51  ;;  %v4261_v49 = vld [vmem:[%s3814_s23 + $0x48] sm:$0xff]  }
  0x86   : > { %3244 = vmatmul.mubr.msk.bf16.gmra.mrb[32].mxu0 %vm364_vm2, %v1358_v17  ;;  %v644_v44 = vsel %vm633_vm3, %v641_v35, %v643_v50  ;;  %v4187_v17 = vld [vmem:[%s3814_s23 + $0x30] sm:$0xff]   ;;  %v2230_v35 = vld [vmem:[%s4518_s2 + $0x48] sm:$0xff] }
  0x87   : > { %3249 = vmatprep.mubr.msk.bf16.mxu0 %vm3751_vm0, %v3750_v1  ;;  %v1839_v24 = vshll.u32 %v4187_v17, 16  ;;  %v1843_v14 = vshrl.u32 %v4187_v17, 16 }
  0x8c   : > { %3080 = vmatmul.mubr.msk.bf16.gmra.mrb[20].mxu1 %vm364_vm2, %v3903_v63  ;;  %v645_v63 = vrot.slane %v3916_v16, 1 }
  0x8d   : > { %3083 = vmatprep.mubr.msk.bf16.mxu1 %vm3751_vm0, %v3750_v1 }
  0x8e   : > { %3250 = vmatmul.mubr.msk.bf16.vlgmr.msra.gmra.mrb[0].mxu0 %vm364_vm2, %v3691_v18  ;;  %v646_v54 = vsel %vm633_vm3, %v643_v50, %v645_v63  ;;  %v648_v61 = vsel %vm633_vm3, %v645_v63, %v647_v58  ;;  %v3752_v18 = vmov 0   ;;  %v2231_v50 = vld [vmem:[%s4518_s2 + $0x50] sm:$0xff] }
  0x8f   : > { %3286 = vmatpush3.bf16.msra.mxu0 %v3692_v19  ;;  %3253 = vmatprep.mubr.msk.bf16.mxu0 %vm3751_vm0, %v3750_v1  ;;  %v2222_v19 = vld [vmem:[%s4518_s2 + $0x8] sm:$0xff] }
  0x90   : > { %3323 = vmatprep.subr.bf16.mxu0 %v3750_v1  ;;  %3662 = vset.pattern.permute.xlu0 %v3752_v18 }
  0x91   : > { %2241 = vperm.xlu0 %3662, %v2221_v7   ;;  %3663 = vset.pattern.permute.xlu1 %v3752_v18  ;;  %v3715_v18 = vld [vmem:[%s3814_s23 + $0x20] sm:$0xff]  }
  0x92   : > { %2251 = vperm.xlu1 %3663, %v2223_v10  }
  0x94   : > { %3084 = vmatmul.mubr.msk.bf16.gmra.mrb[24].mxu1 %vm364_vm2, %v3916_v16  ;;  %v1819_v16 = vshrl.u32 %v4137_v42, 16 }
  0x95   : > { %3087 = vmatprep.mubr.msk.bf16.mxu1 %vm3751_vm0, %v3750_v1  ;;  %2246 = vperm.xlu0 %3662, %v2222_v19  }
  0x96   : > { %3254 = vmatmul.mubr.msk.bf16.gmra.mrb[4].mxu0 %vm364_vm2, %v3693_v21  ;;  %v1821_v59 = vor.u32 %v1819_v16, %v1817_v51  ;;  %v2224_v21 = vld [vmem:[%s4518_s2 + $0x18] sm:$0xff]  ;;  %v2234_v51 = vld [vmem:[%s4518_s2 + $0x68] sm:$0xff]  ;;  %v1863_v16 = vshll.u32 %v4261_v49, 16 }
  0x97   : > { %3257 = vmatprep.mubr.msk.bf16.mxu0 %vm3751_vm0, %v3750_v1  ;;  %2256 = vperm.xlu1 %3663, %v2224_v21  }
  0x98   : > { %v1826_v39 = vsel %vm281_vm1, %v1821_v59, %v1825_v60  ;;  %v1865_v60 = vrot.slane %v1863_v16, 1 }
  0x99   : > { %2261 = vperm.xlu0 %3662, %v2225_v26  }
  0x9b   : > { %2266 = vperm.xlu1 %3663, %v2226_v27  }
  0x9c   : > { %3088 = vmatmul.mubr.msk.bf16.gmra.mrb[28].mxu1 %vm364_vm2, %v3932_v28  ;;  %v649_v28 = vrot.slane %v3951_v40, 1 }
  0x9d   : > { %3091 = vmatprep.mubr.msk.bf16.mxu1 %vm3751_vm0, %v3750_v1  ;;  %2271 = vperm.xlu0 %3662, %v2227_v6  }
  0x9e   : > { %3258 = vmatmul.mubr.msk.bf16.gmra.mrb[8].mxu0 %vm364_vm2, %v3694_v22  ;;  %v1834_v22 = vsel %vm281_vm1, %v1829_v11, %v1833_v15 }
  0x9f   : > { %3261 = vmatprep.mubr.msk.bf16.mxu0 %vm3751_vm0, %v3750_v1 }
  0xa4   : > { %3092 = vmatmul.mubr.msk.bf16.gmra.mrb[32].mxu1 %vm364_vm2, %v3951_v40  ;;  %v650_v40 = vsel %vm633_vm3, %v647_v58, %v649_v28  ;;  %v2237_v58 = vld [vmem:[%s4518_s2 + $0x80] sm:$0xff] }
  0xa5   : > { %3097 = vmatprep.mubr.msk.bf16.mxu1 %vm3751_vm0, %v3750_v1 }
  0xa6   : > { %3262 = vmatmul.mubr.msk.bf16.gmra.mrb[12].mxu0 %vm364_vm2, %v3695_v25  ;;  %v651_v25 = vrot.slane %v3966_v48, 1 }
  0xa7   : > { %3265 = vmatprep.mubr.msk.bf16.mxu0 %vm3751_vm0, %v3750_v1 }
  0xa8   : > { %v652_v48 = vsel %vm633_vm3, %v649_v28, %v651_v25  ;;  %v1867_v28 = vshrl.u32 %v4261_v49, 16  ;;  %v2039_v25 = vld [vmem:[%s3814_s23 + $0x10] sm:$0xe] }
  0xa9   : > { %v2827_v27 = vcombine.low %v2039_v25, %v4124_v36  ;;  %v2049_v36 = vrot.slane %v4150_v53, 1  ;;  %v2053_v53 = vrot.slane %v4187_v17, 1 }
  0xaa   : > { %v1869_v10 = vor.u32 %v1867_v28, %v1865_v60 }
  0xac   : > { %3098 = vmatmul.mubr.msk.bf16.vlgmr.msra.gmra.mrb[0].mxu1 %vm364_vm2, %v636_v29  ;;  %v1837_v29 = vor.u32 %v1835_v23, %v1833_v15  ;;  %v4302_v15 = vld [vmem:[%s3814_s23 + $0x58] ss:$0 sps:$4 sm:$0x11]  }
  0xad   : > { %3101 = vmatprep.mubr.msk.bf16.mxu1 %vm3751_vm0, %v3750_v1  ;;  %3134 = vmatpush3.bf16.msra.mxu1 %v3698_v4  ;;  %v1841_v4 = vrot.slane %v1839_v24, 1  ;;  %v1879_v21 = vshll.u32 %v4302_v15, 16  ;;  %v3717_v24 = vld [vmem:[%s3814_s23 + $0x28] sm:$0xff]   ;;  %v2063_v16 = vrot.slane %v4302_v15, 1 }
  0xae   : > { %3266 = vmatmul.mubr.msk.bf16.gmra.mrb[16].mxu0 %vm364_vm2, %v3697_v30  ;;  %3361 = vmatprep.subr.bf16.mxu1 %v3750_v1  ;;  %v4213_v30 = vld [vmem:[%s3814_s23 + $0x38] sm:$0xff]  }
  0xaf   : > { %3269 = vmatprep.mubr.msk.bf16.mxu0 %vm3751_vm0, %v3750_v1  ;;  %v1845_v32 = vor.u32 %v1843_v14, %v1841_v4  ;;  %v1881_v23 = vrot.slane %v1879_v21, 1  ;;  %v3722_v14 = vld [vmem:[%s3814_s23 + $0x40] sm:$0xff]  }
  0xb4   : > { %3102 = vmatmul.mubr.msk.bf16.gmra.mrb[4].mxu1 %vm364_vm2, %v638_v31  ;;  %v2228_v31 = vld [vmem:[%s4518_s2 + $0x38] sm:$0xff] }
  0xb5   : > { %3105 = vmatprep.mubr.msk.bf16.mxu1 %vm3751_vm0, %v3750_v1  ;;  %2276 = vperm.xlu1 %3663, %v2228_v31   ;;  %v3721_v31 = vld [vmem:[%s3814_s23 + $0x38] sm:$0xff]  }
  0xb6   : > { %3270 = vmatmul.mubr.msk.bf16.gmra.mrb[20].mxu0 %vm364_vm2, %v3699_v8  ;;  %v1842_v8 = vsel %vm281_vm1, %v1837_v29, %v1841_v4  ;;  %v2046_v29 = vrot.slane %v2827_v27, 1  ;;  %v2047_v4 = vrot.slane %v4137_v42, 1  ;;  %v2051_v42 = vrot.slane %v4167_v55, 1 }
  0xb7   : > { %3273 = vmatprep.mubr.msk.bf16.mxu0 %vm3751_vm0, %v3750_v1 }
  0xb8   : > { %v2048_v6 = vsel %vm633_vm3, %v2046_v29, %v2047_v4  ;;  %v2054_v55 = vsel %vm633_vm3, %v2051_v42, %v2053_v53 }
  0xb9   : > { %2286 = vperm.xlu1 %3663, %v2230_v35   ;;  %v1149_v35 = vshll.u32 %v3997_v62, 16 }
  0xbc   : > { %3106 = vmatmul.mubr.msk.bf16.gmra.mrb[8].mxu1 %vm364_vm2, %v640_v33  ;;  %v1847_v33 = vshll.u32 %v4213_v30, 16 }
  0xbd   : > { %3109 = vmatprep.mubr.msk.bf16.mxu1 %vm3751_vm0, %v3750_v1  ;;  %2296 = vperm.xlu1 %3663, %v2232_v46   ;;  %v1165_v46 = vshll.u32 %v4022_v9, 16 }
  0xbe   : > { %3274 = vmatmul.mubr.msk.bf16.gmra.mrb[24].mxu0 %vm364_vm2, %v3700_v34  ;;  %v2229_v34 = vld [vmem:[%s4518_s2 + $0x40] sm:$0xff] }
  0xbf   : > { %3277 = vmatprep.mubr.msk.bf16.mxu0 %vm3751_vm0, %v3750_v1  ;;  %2281 = vperm.xlu0 %3662, %v2229_v34   ;;  %v3723_v34 = vld [vmem:[%s3814_s23 + $0x48] sm:$0xff]  }
  0xc1   : > { %2306 = vperm.xlu1 %3663, %v2234_v51   ;;  %v1169_v51 = vshrl.u32 %v4022_v9, 16 }
  0xc3   : > { %2291 = vperm.xlu0 %3662, %v2231_v50   ;;  %v1157_v50 = vshll.u32 %v4010_v3, 16 }
  0xc4   : > { %3110 = vmatmul.mubr.msk.bf16.gmra.mrb[12].mxu1 %vm364_vm2, %v642_v37  ;;  %v1849_v37 = vrot.slane %v1847_v33, 1  ;;  %v2052_v33 = vsel %vm633_vm3, %v2049_v36, %v2051_v42 }
  0xc5   : > { %3113 = vmatprep.mubr.msk.bf16.mxu1 %vm3751_vm0, %v3750_v1  ;;  %2316 = vperm.xlu1 %3663, %v2236_v38  }
  0xc6   : > { %3278 = vmatmul.mubr.msk.bf16.gmra.mrb[28].mxu0 %vm364_vm2, %v3701_v13  ;;  %v4238_v13 = vld [vmem:[%s3814_s23 + $0x40] sm:$0xff]   ;;  %v1850_v43 = vsel %vm281_vm1, %v1845_v32, %v1849_v37  ;;  %v1151_v32 = vrot.slane %v1149_v35, 1 }
  0xc7   : > { %3281 = vmatprep.mubr.msk.bf16.mxu0 %vm3751_vm0, %v3750_v1  ;;  %2301 = vperm.xlu0 %3662, %v2233_v47  }
  0xc8   : > { %v1152_v17 = vsel %vm281_vm1, %v3887_v52, %v1151_v32  ;;  %v2057_v52 = vrot.slane %v4238_v13, 1 }
  0xcc   : > { %3114 = vmatmul.mubr.msk.bf16.gmra.mrb[16].mxu1 %vm364_vm2, %v644_v44  ;;  %v1851_v44 = vshrl.u32 %v4213_v30, 16 }
  0xcd   : > { %3117 = vmatprep.mubr.msk.bf16.mxu1 %vm3751_vm0, %v3750_v1 }
  0xce   : > { %3282 = vmatmul.mubr.msk.bf16.gmra.mrb[32].mxu0 %vm364_vm2, %v3702_v45  ;;  %v1855_v45 = vshll.u32 %v4238_v13, 16  ;;  %v1853_v20 = vor.u32 %v1851_v44, %v1849_v37  ;;  %v2055_v37 = vrot.slane %v4213_v30, 1  ;;  %v1161_v30 = vshrl.u32 %v4010_v3, 16 }
  0xcf   : > { %3287 = vmatprep.mubr.msk.bf16.mxu0 %vm3751_vm0, %v3750_v1 }
  0xd0   : > { %v1857_v63 = vrot.slane %v1855_v45, 1  ;;  %v1159_v45 = vrot.slane %v1157_v50, 1  ;;  %v2058_v47 = vsel %vm633_vm3, %v2055_v37, %v2057_v52 }
  0xd4   : > { %3118 = vmatmul.mubr.msk.bf16.gmra.mrb[20].mxu1 %vm364_vm2, %v646_v54  ;;  %v3711_v54 = vld [vmem:[%s3814_s23 + $0x10] sm:$0xff]  }
  0xd5   : > { %3121 = vmatprep.mubr.msk.bf16.mxu1 %vm3751_vm0, %v3750_v1 }
  0xd6   : > { %3288 = vmatmul.mubr.msk.bf16.vlgmr.msra.gmra.mrb[0].mxu0 %vm364_vm2, %v1818_v56  ;;  %v1858_v56 = vsel %vm281_vm1, %v1853_v20, %v1857_v63  ;;  %v1163_v20 = vor.u32 %v1161_v30, %v1159_v45 }
  0xd7   : > { %3324 = vmatpush3.bf16.msra.mxu0 %v3705_v57  ;;  %3291 = vmatprep.mubr.msk.bf16.mxu0 %vm3751_vm0, %v3750_v1  ;;  %v1859_v57 = vshrl.u32 %v4238_v13, 16  ;;  %v2059_v13 = vrot.slane %v4261_v49, 1 }
  0xd9   : > { %v1861_v59 = vor.u32 %v1859_v57, %v1857_v63  ;;  %v1167_v63 = vrot.slane %v1165_v46, 1 }
  0xdb   : > { %v1866_v5 = vsel %vm281_vm1, %v1861_v59, %v1865_v60  ;;  %v1168_v3 = vsel %vm281_vm1, %v1163_v20, %v1167_v63 }
  0xdc   : > { %3122 = vmatmul.mubr.msk.bf16.gmra.mrb[24].mxu1 %vm364_vm2, %v648_v61  ;;  %v4286_v61 = vld [vmem:[%s3814_s23 + $0x50] sm:$0xff]  }
  0xdd   : > { %3125 = vmatprep.mubr.msk.bf16.mxu1 %vm3751_vm0, %v3750_v1  ;;  %v1871_v7 = vshll.u32 %v4286_v61, 16  ;;  %v1875_v19 = vshrl.u32 %v4286_v61, 16  ;;  %v2061_v49 = vrot.slane %v4286_v61, 1 }
  0xde   : > { %3292 = vmatmul.mubr.msk.bf16.gmra.mrb[4].mxu0 %vm364_vm2, %v1826_v39  ;;  %v2238_v39 = vld [vmem:[%s4518_s2 + $0x88] sm:$0xff] }
  0xdf   : > { %3295 = vmatprep.mubr.msk.bf16.mxu0 %vm3751_vm0, %v3750_v1  ;;  %2326 = vperm.xlu1 %3663, %v2238_v39   ;;  %v1873_v11 = vrot.slane %v1871_v7, 1  ;;  %v2064_v38 = vsel %vm633_vm3, %v2061_v49, %v2063_v16 }
  0xe4   : > { %3126 = vmatmul.mubr.msk.bf16.gmra.mrb[28].mxu1 %vm364_vm2, %v650_v40  ;;  %v1874_v40 = vsel %vm281_vm1, %v1869_v10, %v1873_v11 }
  0xe5   : > { %3129 = vmatprep.mubr.msk.bf16.mxu1 %vm3751_vm0, %v3750_v1 }
  0xe6   : > { %3296 = vmatmul.mubr.msk.bf16.gmra.mrb[8].mxu0 %vm364_vm2, %v1834_v22  ;;  %v1877_v22 = vor.u32 %v1875_v19, %v1873_v11 }
  0xe7   : > { %3299 = vmatprep.mubr.msk.bf16.mxu0 %vm3751_vm0, %v3750_v1 }
  0xe8   : > { %v1882_v26 = vsel %vm281_vm1, %v1877_v22, %v1881_v23 }
  0xec   : > { %3130 = vmatmul.mubr.msk.bf16.gmra.mrb[32].mxu1 %vm364_vm2, %v652_v48  ;;  %v3719_v48 = vld [vmem:[%s3814_s23 + $0x30] sm:$0xff]   ;;  %s3634_s23 = smul.u32 72, %s4525_s12 }
  0xed   : > { %3135 = vmatprep.mubr.msk.bf16.mxu1 %vm3751_vm0, %v3750_v1 }
  0xee   : > { %3300 = vmatmul.mubr.msk.bf16.gmra.mrb[12].mxu0 %vm364_vm2, %v1842_v8  ;;  %v2050_v8 = vsel %vm633_vm3, %v2047_v4, %v2049_v36  ;;  %s207_s5 = scalar_lea.vmem %s4519_s3, %s3634_s23 }
  0xef   : > { %3303 = vmatprep.mubr.msk.bf16.mxu0 %vm3751_vm0, %v3750_v1 }
  0xf4   : > { %3136 = vmatmul.mubr.msk.bf16.vlgmr.msra.gmra.mrb[0].mxu1 %vm364_vm2, %v3709_v41  ;;  %v1153_v41 = vshrl.u32 %v3997_v62, 16 }
  0xf5   : > { %3139 = vmatprep.mubr.msk.bf16.mxu1 %vm3751_vm0, %v3750_v1  ;;  %3362 = vmatpush3.bf16.msra.mxu1 %v3794_v0  ;;  %v2235_v0 = vld [vmem:[%s4518_s2 + $0x70] sm:$0xff] }
  0xf6   : > { %3304 = vmatmul.mubr.msk.bf16.gmra.mrb[16].mxu0 %vm364_vm2, %v1850_v43  ;;  %2311 = vperm.xlu0 %3662, %v2235_v0   ;;  %v2056_v43 = vsel %vm633_vm3, %v2053_v53, %v2055_v37  ;;  %v1155_v44 = vor.u32 %v1153_v41, %v1151_v32  ;;  %v2060_v0 = vsel %vm633_vm3, %v2057_v52, %v2059_v13 }
  0xf7   : > { %3307 = vmatprep.mubr.msk.bf16.mxu0 %vm3751_vm0, %v3750_v1 }
  0xf8   : > { %v1160_v62 = vsel %vm281_vm1, %v1155_v44, %v1159_v45 }
  0xfa   : > { %2321 = vperm.xlu0 %3662, %v2237_v58  }
  0xfc   : > { %3140 = vmatmul.mubr.msk.bf16.gmra.mrb[4].mxu1 %vm364_vm2, %v3711_v54  ;;  %v1173_v54 = vshll.u32 %v4034_v12, 16  ;;  %v2062_v12 = vsel %vm633_vm3, %v2059_v13, %v2061_v49 }
  0xfd   : > { %3143 = vmatprep.mubr.msk.bf16.mxu1 %vm3751_vm0, %v3750_v1 }
  0xfe   : > { %3308 = vmatmul.mubr.msk.bf16.gmra.mrb[20].mxu0 %vm364_vm2, %v1858_v56  ;;  %v1171_v56 = vor.u32 %v1169_v51, %v1167_v63  ;;  %v1175_v57 = vrot.slane %v1173_v54, 1 }
  0xff   : > { %3311 = vmatprep.mubr.msk.bf16.mxu0 %vm3751_vm0, %v3750_v1 }
 0x100   : > { %v1176_v9 = vsel %vm281_vm1, %v1171_v56, %v1175_v57 }
 0x104   : > { %3144 = vmatmul.mubr.msk.bf16.gmra.mrb[8].mxu1 %vm364_vm2, %v3713_v2 }
 0x105   : > { %3147 = vmatprep.mubr.msk.bf16.mxu1 %vm3751_vm0, %v3750_v1 }
 0x106   : > { %3312 = vmatmul.mubr.msk.bf16.gmra.mrb[24].mxu0 %vm364_vm2, %v1866_v5 }
 0x107   : > { %3315 = vmatprep.mubr.msk.bf16.mxu0 %vm3751_vm0, %v3750_v1 }
 0x10c   : > { %3148 = vmatmul.mubr.msk.bf16.gmra.mrb[12].mxu1 %vm364_vm2, %v3715_v18 }
 0x10d   : > { %3151 = vmatprep.mubr.msk.bf16.mxu1 %vm3751_vm0, %v3750_v1 }
 0x10e   : > { %3316 = vmatmul.mubr.msk.bf16.gmra.mrb[28].mxu0 %vm364_vm2, %v1874_v40 }
 0x10f   : > { %3319 = vmatprep.mubr.msk.bf16.mxu0 %vm3751_vm0, %v3750_v1 }
 0x110   : > { %v2242_v25 = vpop.permute.xlu0 %2241 }
 0x114   : > { %3152 = vmatmul.mubr.msk.bf16.gmra.mrb[16].mxu1 %vm364_vm2, %v3717_v24  ;;  %v2247_v36 = vpop.permute.xlu0 %2246 }
 0x115   : > { %3155 = vmatprep.mubr.msk.bf16.mxu1 %vm3751_vm0, %v3750_v1 }
 0x116   : > { %3320 = vmatmul.mubr.msk.bf16.gmra.mrb[32].mxu0 %vm364_vm2, %v1882_v26 }
 0x117   : > { %3325 = vmatprep.mubr.msk.bf16.mxu0 %vm3751_vm0, %v3750_v1 }
 0x118   : > { %v2262_v63 = vpop.permute.xlu0 %2261 }
 0x11c   : > { %3156 = vmatmul.mubr.msk.bf16.gmra.mrb[20].mxu1 %vm364_vm2, %v3719_v48 }
 0x11d   : > { %3159 = vmatprep.mubr.msk.bf16.mxu1 %vm3751_vm0, %v3750_v1 }
 0x11e   : > { %3326 = vmatmul.mubr.msk.bf16.vlgmr.msra.gmra.mrb[0].mxu0 %vm364_vm2, %v2048_v6 }
 0x11f   : > { %3329 = vmatprep.mubr.msk.bf16.mxu0 %vm3751_vm0, %v3750_v1 }
 0x124   : > { %3160 = vmatmul.mubr.msk.bf16.gmra.mrb[24].mxu1 %vm364_vm2, %v3721_v31  ;;  %v2252_v31 = vpop.permute.xlu1 %2251 }
 0x125   : > { %3163 = vmatprep.mubr.msk.bf16.mxu1 %vm3751_vm0, %v3750_v1 }
 0x126   : > { %3330 = vmatmul.mubr.msk.bf16.gmra.mrb[4].mxu0 %vm364_vm2, %v2050_v8 }
 0x127   : > { %3333 = vmatprep.mubr.msk.bf16.mxu0 %vm3751_vm0, %v3750_v1 }
 0x12c   : > { %3164 = vmatmul.mubr.msk.bf16.gmra.mrb[28].mxu1 %vm364_vm2, %v3722_v14 }
 0x12d   : > { %3167 = vmatprep.mubr.msk.bf16.mxu1 %vm3751_vm0, %v3750_v1 }
 0x12e   : > { %3334 = vmatmul.mubr.msk.bf16.gmra.mrb[8].mxu0 %vm364_vm2, %v2052_v33 }
 0x12f   : > { %3337 = vmatprep.mubr.msk.bf16.mxu0 %vm3751_vm0, %v3750_v1 }
 0x134   : > { %3168 = vmatmul.mubr.msk.bf16.gmra.mrb[32].mxu1 %vm364_vm2, %v3723_v34 }
 0x135   : > { %3193 = vmatprep.mubr.msk.bf16.mxu1 %vm3751_vm0, %v3750_v1 }
 0x136   : > { %3338 = vmatmul.mubr.msk.bf16.gmra.mrb[12].mxu0 %vm364_vm2, %v2054_v55 }
 0x137   : > { %3341 = vmatprep.mubr.msk.bf16.mxu0 %vm3751_vm0, %v3750_v1 }
 0x13c   : > { %3194 = vmatmul.mubr.msk.bf16.vlgmr.msra.gmra.mrb[20].mxu1 %vm364_vm2, %v1152_v17  ;;  %v2257_v17 = vpop.permute.xlu1 %2256 }
 0x13d   : > { %3197 = vmatprep.mubr.msk.bf16.mxu1 %vm3751_vm0, %v3750_v1 }
 0x13e   : > { %3342 = vmatmul.mubr.msk.bf16.gmra.mrb[16].mxu0 %vm364_vm2, %v2056_v43 }
 0x13f   : > { %3345 = vmatprep.mubr.msk.bf16.mxu0 %vm3751_vm0, %v3750_v1 }
 0x140   : > { %v2267_v56 = vpop.permute.xlu1 %2266 }
 0x144   : > { %3198 = vmatmul.mubr.msk.bf16.gmra.mrb[24].mxu1 %vm364_vm2, %v1160_v62 }
 0x145   : > { %3201 = vmatprep.mubr.msk.bf16.mxu1 %vm3751_vm0, %v3750_v1 }
 0x146   : > { %3346 = vmatmul.mubr.msk.bf16.gmra.mrb[20].mxu0 %vm364_vm2, %v2058_v47 }
 0x147   : > { %3349 = vmatprep.mubr.msk.bf16.mxu0 %vm3751_vm0, %v3750_v1 }
 0x14c   : > { %3202 = vmatmul.mubr.msk.bf16.gmra.mrb[28].mxu1 %vm364_vm2, %v1168_v3 }
 0x14d   : > { %3205 = vmatprep.mubr.msk.bf16.mxu1 %vm3751_vm0, %v3750_v1 }
 0x14e   : > { %3350 = vmatmul.mubr.msk.bf16.gmra.mrb[24].mxu0 %vm364_vm2, %v2060_v0 }
 0x14f   : > { %3353 = vmatprep.mubr.msk.bf16.mxu0 %vm3751_vm0, %v3750_v1 }
 0x154   : > { %3206 = vmatmul.mubr.msk.bf16.gmra.mrb[32].mxu1 %vm364_vm2, %v1176_v9 }
 0x156   : > { %3354 = vmatmul.mubr.msk.bf16.gmra.mrb[28].mxu0 %vm364_vm2, %v2062_v12 }
 0x157   : > { %3357 = vmatprep.mubr.msk.bf16.mxu0 %vm3751_vm0, %v3750_v1 }
 0x15e   : > { %3358 = vmatmul.mubr.msk.bf16.gmra.mrb[32].mxu0 %vm364_vm2, %v2064_v38 }
 0x1c7   : > { %v942_v58 = vpop.f32.mrb[0].mxu1 }
 0x1c8   : > { %v3137_v59 = vpop.f32.mrb[1].mxu1 }
 0x1c9   : > { %v945_v60 = vpop.f32.mrb[2].mxu1 }
 0x1ca   : > { %v3138_v61 = vpop.f32.mrb[3].mxu1 }
 0x1cf   : > { %v950_v39 = vpop.f32.mrb[4].mxu1 }
 0x1d0   : > { %v3141_v2 = vpop.f32.mrb[5].mxu1 }
 0x1d1   : > { %v953_v5 = vpop.f32.mrb[6].mxu1  ;;  %v2272_v2 = vpop.permute.xlu0 %2271 }
 0x1d2   : > { %v3142_v28 = vpop.f32.mrb[7].mxu1 }
 0x1d7   : > { %v958_v7 = vpop.f32.mrb[8].mxu1 }
 0x1d8   : > { %v3145_v10 = vpop.f32.mrb[9].mxu1 }
 0x1d9   : > { %v961_v11 = vpop.f32.mrb[10].mxu1 }
 0x1da   : > { %v3146_v18 = vpop.f32.mrb[11].mxu1 }
 0x1df   : > { %v966_v40 = vpop.f32.mrb[12].mxu1 }
 0x1e0   : > { %v3149_v1 = vpop.f32.mrb[13].mxu1 }
 0x1e1   : > { %v969_v19 = vpop.f32.mrb[14].mxu1 }
 0x1e2   : > { %v3150_v15 = vpop.f32.mrb[15].mxu1 }
 0x1e7   : > { %v4405_v21 = vpop.f32.mrb[16].mxu1 }
 0x1e8   : > { %v3153_v22 = vpop.f32.mrb[17].mxu1 }
 0x1e9   : > { %v4407_v23 = vpop.f32.mrb[18].mxu1 }
 0x1ea   : > { %v3154_v24 = vpop.f32.mrb[19].mxu1 }
 0x1f1   : > { %v2132_v26 = vpop.f32.mrb[0].mxu0 }
 0x1f2   : > { %v4409_v27 = vadd.f32 %v2132_v26, %v942_v58  ;;  %v3327_v29 = vpop.f32.mrb[1].mxu0 }
 0x1f3   : > { %v2135_v4 = vpop.f32.mrb[2].mxu0 }
 0x1f4   : > { %v4411_v48 = vadd.f32 %v2135_v4, %v945_v60  ;;  %v3328_v6 = vpop.f32.mrb[3].mxu0  ;;  %v2329_v14 = vmul.f32 %v4409_v27, %v2242_v25 }
 0x1f6   : > { %v2330_v8 = vmul.f32 %v4411_v48, %v2247_v36  ;;  %v2370_v50 = vmul.f32 %v4409_v27, %v2329_v14 }
 0x1f8   : > { %v2371_v35 = vmul.f32 %v4411_v48, %v2330_v8  ;;  %v2347_v41 = vadd.f32 %v2330_v8, %v2329_v14  ;;  %v2282_v8 = vpop.permute.xlu0 %2281 }
 0x1f9   : > { %v2140_v42 = vpop.f32.mrb[4].mxu0 }
 0x1fa   : > { %v4415_v33 = vadd.f32 %v2140_v42, %v950_v39  ;;  %v3331_v53 = vpop.f32.mrb[5].mxu0  ;;  %v2388_v45 = vadd.f32 %v2371_v35, %v2370_v50 }
 0x1fb   : > { %v2143_v34 = vpop.f32.mrb[6].mxu0 }
 0x1fc   : > { %v2331_v55 = vmul.f32 %v4415_v33, %v2252_v31  ;;  %v4419_v32 = vadd.f32 %v2143_v34, %v953_v5  ;;  %v3332_v37 = vpop.f32.mrb[7].mxu0 }
 0x1fe   : > { %v2372_v43 = vmul.f32 %v4415_v33, %v2331_v55  ;;  %v2332_v44 = vmul.f32 %v4419_v32, %v2257_v17  ;;  %v2348_v52 = vadd.f32 %v2347_v41, %v2331_v55 }
 0x200   : > { %v2389_v30 = vadd.f32 %v2388_v45, %v2372_v43  ;;  %v2373_v46 = vmul.f32 %v4419_v32, %v2332_v44  ;;  %v2349_v3 = vadd.f32 %v2348_v52, %v2332_v44 }
 0x201   : > { %v2148_v62 = vpop.f32.mrb[8].mxu0 }
 0x202   : > { %v4425_v47 = vadd.f32 %v2148_v62, %v958_v7  ;;  %v3335_v20 = vpop.f32.mrb[9].mxu0  ;;  %v2390_v57 = vadd.f32 %v2389_v30, %v2373_v46 }
 0x203   : > { %v2151_v13 = vpop.f32.mrb[10].mxu0  ;;  %v2292_v20 = vpop.permute.xlu0 %2291 }
 0x204   : > { %v2333_v51 = vmul.f32 %v4425_v47, %v2262_v63  ;;  %v4428_v54 = vadd.f32 %v2151_v13, %v961_v11  ;;  %v3336_v0 = vpop.f32.mrb[11].mxu0  ;;  %v2277_v11 = vpop.permute.xlu1 %2276 }
 0x206   : > { %v2350_v49 = vadd.f32 %v2349_v3, %v2333_v51  ;;  %v2374_v9 = vmul.f32 %v4425_v47, %v2333_v51  ;;  %v2334_v12 = vmul.f32 %v4428_v54, %v2267_v56 }
 0x208   : > { %v2391_v16 = vadd.f32 %v2390_v57, %v2374_v9  ;;  %v2351_v38 = vadd.f32 %v2350_v49, %v2334_v12  ;;  %v2375_v58 = vmul.f32 %v4428_v54, %v2334_v12  ;;  %v2287_v35 = vpop.permute.xlu1 %2286 }
 0x209   : > { %v2156_v59 = vpop.f32.mrb[12].mxu0 }
 0x20a   : > { %v2392_v60 = vadd.f32 %v2391_v16, %v2375_v58  ;;  %v4433_v61 = vadd.f32 %v2156_v59, %v966_v40  ;;  %v3339_v39 = vpop.f32.mrb[13].mxu0 }
 0x20b   : > { %v2159_v5 = vpop.f32.mrb[14].mxu0 }
 0x20c   : > { %v2335_v28 = vmul.f32 %v4433_v61, %v2272_v2  ;;  %v4436_v7 = vadd.f32 %v2159_v5, %v969_v19  ;;  %v3340_v10 = vpop.f32.mrb[15].mxu0  ;;  %v2297_v0 = vpop.permute.xlu1 %2296 }
 0x20d   : > { %v2302_v10 = vpop.permute.xlu0 %2301 }
 0x20e   : > { %v2352_v18 = vadd.f32 %v2351_v38, %v2335_v28  ;;  %v2376_v1 = vmul.f32 %v4433_v61, %v2335_v28  ;;  %v2336_v15 = vmul.f32 %v4436_v7, %v2277_v11 }
 0x20f   : > { %v1284_v22 = vpop.f32.mrb[20].mxu1 }
 0x210   : > { %v2393_v24 = vadd.f32 %v2392_v60, %v2376_v1  ;;  %v2353_v25 = vadd.f32 %v2352_v18, %v2336_v15  ;;  %v2377_v40 = vmul.f32 %v4436_v7, %v2336_v15  ;;  %v3195_v26 = vpop.f32.mrb[21].mxu1 }
 0x211   : > { %v2164_v29 = vpop.f32.mrb[16].mxu0  ;;  %v1287_v4 = vpop.f32.mrb[22].mxu1 }
 0x212   : > { %v2394_v6 = vadd.f32 %v2393_v24, %v2377_v40  ;;  %v4442_v36 = vadd.f32 %v2164_v29, %v4405_v21  ;;  %v3343_v19 = vpop.f32.mrb[17].mxu0  ;;  %v3196_v31 = vpop.f32.mrb[23].mxu1 }
 0x213   : > { %v2167_v42 = vpop.f32.mrb[18].mxu0 }
 0x214   : > { %v2337_v14 = vmul.f32 %v4442_v36, %v2282_v8  ;;  %v4446_v53 = vadd.f32 %v2167_v42, %v4407_v23  ;;  %v3344_v34 = vpop.f32.mrb[19].mxu0 }
 0x216   : > { %v2354_v55 = vadd.f32 %v2353_v25, %v2337_v14  ;;  %v2378_v37 = vmul.f32 %v4442_v36, %v2337_v14  ;;  %v2338_v17 = vmul.f32 %v4446_v53, %v2287_v35 }
 0x217   : > { %v1292_v41 = vpop.f32.mrb[24].mxu1 }
 0x218   : > { %v2395_v50 = vadd.f32 %v2394_v6, %v2378_v37  ;;  %v2355_v21 = vadd.f32 %v2354_v55, %v2338_v17  ;;  %v2379_v43 = vmul.f32 %v4446_v53, %v2338_v17  ;;  %v3199_v44 = vpop.f32.mrb[25].mxu1  ;;  %v2312_v55 = vpop.permute.xlu0 %2311 }
 0x219   : > { %v2172_v45 = vpop.f32.mrb[20].mxu0  ;;  %v1295_v52 = vpop.f32.mrb[26].mxu1 }
 0x21a   : > { %v2396_v62 = vadd.f32 %v2395_v50, %v2379_v43  ;;  %v4451_v30 = vadd.f32 %v2172_v45, %v1284_v22  ;;  %v3347_v23 = vpop.f32.mrb[21].mxu0  ;;  %v3200_v46 = vpop.f32.mrb[27].mxu1 }
 0x21b   : > { %v2175_v63 = vpop.f32.mrb[22].mxu0  ;;  %v2307_v22 = vpop.permute.xlu1 %2306 }
 0x21c   : > { %v2339_v13 = vmul.f32 %v4451_v30, %v2292_v20  ;;  %v4454_v3 = vadd.f32 %v2175_v63, %v1287_v4  ;;  %v3348_v51 = vpop.f32.mrb[23].mxu0 }
 0x21d   : > { %v2322_v51 = vpop.permute.xlu0 %2321 }
 0x21e   : > { %v2356_v56 = vadd.f32 %v2355_v21, %v2339_v13  ;;  %v2380_v57 = vmul.f32 %v4451_v30, %v2339_v13  ;;  %v2340_v49 = vmul.f32 %v4454_v3, %v2297_v0 }
 0x21f   : > { %v1300_v9 = vpop.f32.mrb[28].mxu1  ;;  %v2317_v21 = vpop.permute.xlu1 %2316 }
 0x220   : > { %v2397_v12 = vadd.f32 %v2396_v62, %v2380_v57  ;;  %v2357_v16 = vadd.f32 %v2356_v56, %v2340_v49  ;;  %v2381_v38 = vmul.f32 %v4454_v3, %v2340_v49  ;;  %v3203_v58 = vpop.f32.mrb[29].mxu1 }
 0x221   : > { %v2180_v59 = vpop.f32.mrb[24].mxu0  ;;  %v1303_v60 = vpop.f32.mrb[30].mxu1 }
 0x222   : > { %v2398_v39 = vadd.f32 %v2397_v12, %v2381_v38  ;;  %v4459_v2 = vadd.f32 %v2180_v59, %v1292_v41  ;;  %v3351_v5 = vpop.f32.mrb[25].mxu0  ;;  %v3204_v28 = vpop.f32.mrb[31].mxu1 }
 0x223   : > { %v2183_v11 = vpop.f32.mrb[26].mxu0 }
 0x224   : > { %v2341_v18 = vmul.f32 %v4459_v2, %v2302_v10  ;;  %v4462_v1 = vadd.f32 %v2183_v11, %v1295_v52  ;;  %v3352_v15 = vpop.f32.mrb[27].mxu0 }
 0x226   : > { %v2358_v24 = vadd.f32 %v2357_v16, %v2341_v18  ;;  %v2382_v25 = vmul.f32 %v4459_v2, %v2341_v18  ;;  %v2342_v40 = vmul.f32 %v4462_v1, %v2307_v22 }
 0x227   : > { %v1308_v26 = vpop.f32.mrb[32].mxu1 }
 0x228   : > { %v2399_v29 = vadd.f32 %v2398_v39, %v2382_v25  ;;  %v2359_v4 = vadd.f32 %v2358_v24, %v2342_v40  ;;  %v2383_v6 = vmul.f32 %v4462_v1, %v2342_v40  ;;  %v3207_v19 = vpop.f32.mrb[33].mxu1 }
 0x229   : > { %v2188_v31 = vpop.f32.mrb[28].mxu0  ;;  %v1311_v8 = vpop.f32.mrb[34].mxu1 }
 0x22a   : > { %v2400_v42 = vadd.f32 %v2399_v29, %v2383_v6  ;;  %v4467_v14 = vadd.f32 %v2188_v31, %v1300_v9  ;;  %v3355_v34 = vpop.f32.mrb[29].mxu0  ;;  %v3208_v35 = vpop.f32.mrb[35].mxu1 }
 0x22b   : > { %v2191_v37 = vpop.f32.mrb[30].mxu0  ;;  %v2327_v9 = vpop.permute.xlu1 %2326 }
 0x22c   : > { %v2343_v17 = vmul.f32 %v4467_v14, %v2312_v55  ;;  %v4470_v41 = vadd.f32 %v2191_v37, %v1303_v60  ;;  %v3356_v50 = vpop.f32.mrb[31].mxu0 }
 0x22e   : > { %v2360_v43 = vadd.f32 %v2359_v4, %v2343_v17  ;;  %v2384_v44 = vmul.f32 %v4467_v14, %v2343_v17  ;;  %v2344_v45 = vmul.f32 %v4470_v41, %v2317_v21 }
 0x230   : > { %v2401_v52 = vadd.f32 %v2400_v42, %v2384_v44  ;;  %v2361_v62 = vadd.f32 %v2360_v43, %v2344_v45  ;;  %v2385_v23 = vmul.f32 %v4470_v41, %v2344_v45 }
 0x231   : > { %v2196_v46 = vpop.f32.mrb[32].mxu0 }
 0x232   : > { %v2402_v20 = vadd.f32 %v2401_v52, %v2385_v23  ;;  %v4475_v63 = vadd.f32 %v2196_v46, %v1308_v26  ;;  %v3359_v13 = vpop.f32.mrb[33].mxu0 }
 0x233   : > { %v2199_v0 = vpop.f32.mrb[34].mxu0 }
 0x234   : > { %v2345_v56 = vmul.f32 %v4475_v63, %v2322_v51  ;;  %v4478_v57 = vadd.f32 %v2199_v0, %v1311_v8  ;;  %v3360_v49 = vpop.f32.mrb[35].mxu0 }
 0x236   : > { %v2362_v12 = vadd.f32 %v2361_v62, %v2345_v56  ;;  %v2386_v16 = vmul.f32 %v4475_v63, %v2345_v56  ;;  %v2346_v38 = vmul.f32 %v4478_v57, %v2327_v9 }
 0x238   : > { %v2403_v58 = vadd.f32 %v2402_v20, %v2386_v16  ;;  %v2363_v59 = vadd.f32 %v2362_v12, %v2346_v38  ;;  %v2387_v60 = vmul.f32 %v4478_v57, %v2346_v38 }
 0x23a   : > { %v2364_v39 = vrot.slane %v2363_v59, 4  ;;  %v2404_v5 = vadd.f32 %v2403_v58, %v2387_v60 }
 0x23c   : > { %v2365_v28 = vadd.f32 %v2364_v39, %v2363_v59  ;;  %v2405_v10 = vrot.slane %v2404_v5, 4 }
 0x23e   : > { %v2366_v11 = vrot.slane %v2365_v28, 2  ;;  %v2406_v18 = vadd.f32 %v2405_v10, %v2404_v5 }
 0x240   : > { %v2367_v15 = vadd.f32 %v2366_v11, %v2365_v28  ;;  %v2407_v22 = vrot.slane %v2406_v18, 2 }
 0x242   : > { %v2368_v24 = vrot.slane %v2367_v15, 1  ;;  %v2408_v25 = vadd.f32 %v2407_v22, %v2406_v18 }
 0x244   : > { %v2369_v40 = vadd.f32 %v2368_v24, %v2367_v15  ;;  %v2409_v26 = vrot.slane %v2408_v25, 1 }
 0x246   : > { %v2410_v29 = vadd.f32 %v2409_v26, %v2408_v25  ;;  %v2411_v4 = vmul.f32 0.012345679, %v2369_v40 }
 0x248   : > { %v2412_v6 = vmul.f32 0.012345679, %v2410_v29  ;;  %v2413_v19 = vmul.f32 %v2411_v4, %v2411_v4  ;;  %v2419_v31 = vsub.f32 %v4419_v32, %v2411_v4  ;;  %v2420_v8 = vsub.f32 %v4425_v47, %v2411_v4 }
 0x249   : > { %v2421_v42 = vsub.f32 %v4428_v54, %v2411_v4  ;;  %v2422_v35 = vsub.f32 %v4433_v61, %v2411_v4  ;;  %v2423_v55 = vsub.f32 %v4436_v7, %v2411_v4  ;;  %v2424_v37 = vsub.f32 %v4442_v36, %v2411_v4 }
 0x24a   : > { %v2414_v34 = vsub.f32 %v2412_v6, %v2413_v19  ;;  %v2425_v17 = vsub.f32 %v4446_v53, %v2411_v4  ;;  %v2426_v50 = vsub.f32 %v4451_v30, %v2411_v4  ;;  %v2427_v21 = vsub.f32 %v4454_v3, %v2411_v4 }
 0x24b   : > { %v2428_v43 = vsub.f32 %v4459_v2, %v2411_v4  ;;  %v2429_v47 = vsub.f32 %v4462_v1, %v2411_v4  ;;  %v2430_v54 = vsub.f32 %v4467_v14, %v2411_v4  ;;  %v2431_v44 = vsub.f32 %v4470_v41, %v2411_v4 }
 0x24c   : > { %v2415_v32 = vmax.f32 %v2414_v34, 0.0  ;;  %v2432_v61 = vsub.f32 %v4475_v63, %v2411_v4  ;;  %v2433_v7 = vsub.f32 %v4478_v57, %v2411_v4  ;;  %v2416_v53 = vsub.f32 %v4409_v27, %v2411_v4 }
 0x24d   : > { %v2417_v30 = vsub.f32 %v4411_v48, %v2411_v4  ;;  %v2418_v3 = vsub.f32 %v4415_v33, %v2411_v4 }
 0x24e   : > { %v2434_v36 = vadd.f32 1e-05, %v2415_v32 }
 0x250   : > { %3724 = vrsqrt.f32 %v2434_v36 }
 0x25a   : > { %v3725_v2 = vpop.eup %3724 }
 0x25b   : > { %v2436_v45 = vmul.f32 %v3725_v2, %v2416_v53  ;;  %v2437_v1 = vmul.f32 %v3725_v2, %v2417_v30  ;;  %v2438_v52 = vmul.f32 %v3725_v2, %v2418_v3  ;;  %v2439_v14 = vmul.f32 %v3725_v2, %v2419_v31 }
 0x25c   : > { %v2440_v62 = vmul.f32 %v3725_v2, %v2420_v8  ;;  %v2441_v41 = vmul.f32 %v3725_v2, %v2421_v42  ;;  %v2442_v23 = vmul.f32 %v3725_v2, %v2422_v35  ;;  %v2443_v46 = vmul.f32 %v3725_v2, %v2423_v55 }
 0x25d   : > { %v2444_v20 = vmul.f32 %v3725_v2, %v2424_v37  ;;  %v2445_v63 = vmul.f32 %v3725_v2, %v2425_v17  ;;  %v2446_v13 = vmul.f32 %v3725_v2, %v2426_v50  ;;  %v2447_v51 = vmul.f32 %v3725_v2, %v2427_v21 }
 0x25e   : > { %v2448_v0 = vmul.f32 %v3725_v2, %v2428_v43  ;;  %v2449_v27 = vmul.f32 %v3725_v2, %v2429_v47  ;;  %v2450_v56 = vmul.f32 %v3725_v2, %v2430_v54  ;;  %v2451_v48 = vmul.f32 %v3725_v2, %v2431_v44 }
 0x25f   : > { %v2452_v33 = vmul.f32 %v3725_v2, %v2432_v61  ;;  %v2453_v57 = vmul.f32 %v3725_v2, %v2433_v7  ;;  %v2454_v49 = vmul.f32 0.2, %v2436_v45  ;;  %v2455_v9 = vmul.f32 0.2, %v2437_v1 }
 0x260   : > { %v2456_v12 = vmul.f32 0.2, %v2438_v52  ;;  %v2457_v16 = vmul.f32 0.2, %v2439_v14  ;;  %v2458_v38 = vmul.f32 0.2, %v2440_v62 }
 0x261   : > { %v2459_v58 = vmul.f32 0.2, %v2441_v41  ;;  %v2460_v59 = vmul.f32 0.2, %v2442_v23  ;;  %v2461_v60 = vmul.f32 0.2, %v2443_v46  ;;  %v2472_v39 = vmax.f32 %v2436_v45, %v2454_v49 }
 0x262   : > { %v2462_v5 = vmul.f32 0.2, %v2444_v20  ;;  %v2463_v28 = vmul.f32 0.2, %v2445_v63  ;;  %v2464_v10 = vmul.f32 0.2, %v2446_v13  ;;  %v2473_v11 = vmax.f32 %v2437_v1, %v2455_v9 }
 0x263   : > { %v2465_v18 = vmul.f32 0.2, %v2447_v51  ;;  %v2466_v15 = vmul.f32 0.2, %v2448_v0  ;;  %v2467_v22 = vmul.f32 0.2, %v2449_v27  ;;  %v2474_v24 = vmax.f32 %v2438_v52, %v2456_v12 }
 0x264   : > { %v2468_v25 = vmul.f32 0.2, %v2450_v56  ;;  %v2469_v40 = vmul.f32 0.2, %v2451_v48  ;;  %v2470_v26 = vmul.f32 0.2, %v2452_v33  ;;  %v2475_v29 = vmax.f32 %v2439_v14, %v2457_v16 }
 0x265   : > { %v2471_v4 = vmul.f32 0.2, %v2453_v57  ;;  %v2476_v6 = vmax.f32 %v2440_v62, %v2458_v38  ;;  %v2477_v19 = vmax.f32 %v2441_v41, %v2459_v58  ;;  %v2478_v31 = vmax.f32 %v2442_v23, %v2460_v59 }
 0x266   : > { %v2479_v8 = vmax.f32 %v2443_v46, %v2461_v60  ;;  %v2480_v42 = vmax.f32 %v2444_v20, %v2462_v5  ;;  %v2481_v34 = vmax.f32 %v2445_v63, %v2463_v28  ;;  %v2482_v35 = vmax.f32 %v2446_v13, %v2464_v10 }
 0x267   : > { %v2483_v55 = vmax.f32 %v2447_v51, %v2465_v18  ;;  %v2484_v37 = vmax.f32 %v2448_v0, %v2466_v15  ;;  %v2485_v17 = vmax.f32 %v2449_v27, %v2467_v22  ;;  %v2486_v50 = vmax.f32 %v2450_v56, %v2468_v25 }
 0x268   : > { %v2487_v21 = vmax.f32 %v2451_v48, %v2469_v40  ;;  %v2488_v43 = vmax.f32 %v2452_v33, %v2470_v26  ;;  %v2489_v32 = vmax.f32 %v2453_v57, %v2471_v4  ;;  %v2879_v47 = vpack.c.bf16 %v2473_v11, %v2472_v39 }
 0x269   : > { %v2884_v54 = vpack.c.bf16 %v2475_v29, %v2474_v24  ;;  %v2889_v44 = vpack.c.bf16 %v2477_v19, %v2476_v6  ;;  %v2894_v61 = vpack.c.bf16 %v2479_v8, %v2478_v31  ;;  %v2899_v7 = vpack.c.bf16 %v2481_v34, %v2480_v42 }
 0x26a   : > { %2880 = vst [vmem:[%s207_s5] sm:$0xff] %v2879_v47   ;;  %v2904_v36 = vpack.c.bf16 %v2483_v55, %v2482_v35  ;;  %v2909_v53 = vpack.c.bf16 %v2485_v17, %v2484_v37  ;;  %v2914_v30 = vpack.c.bf16 %v2487_v21, %v2486_v50  ;;  %v2919_v3 = vpack.c.bf16 %v2489_v32, %v2488_v43 }
 0x26b   : > { %2921 = vst [vmem:[%s207_s5 + $0x8] sm:$0xff] %v2884_v54   ;;  %2922 = vst [vmem:[%s207_s5 + $0x10] sm:$0xff] %v2889_v44  }
 0x26c   : > { %2923 = vst [vmem:[%s207_s5 + $0x18] sm:$0xff] %v2894_v61   ;;  %2924 = vst [vmem:[%s207_s5 + $0x20] sm:$0xff] %v2899_v7  }
 0x26d   : > { %2925 = vst [vmem:[%s207_s5 + $0x28] sm:$0xff] %v2904_v36   ;;  %2926 = vst [vmem:[%s207_s5 + $0x30] sm:$0xff] %v2909_v53  }
 0x26e   : > { %2927 = vst [vmem:[%s207_s5 + $0x38] sm:$0xff] %v2914_v30   ;;  %2928 = vst [vmem:[%s207_s5 + $0x40] sm:$0xff] %v2919_v3  }
 0x26f PF: > { %s13_s14 = sadd.s32 1, %s3748_s14   ;;  %s4520_s12 = smov %s3744_s13 }
 0x270   : > { %p10_p5 = scmp.ge.s32.totalorder %s13_s14, 4   ;;  %s4521_s13 = smov %s4523_s15 }
 0x272   :  { %12 = sbr.rel (!%p10_p5) target bundleno = 2 (0x2), region = 73 }

// kernel: nlayer_res_discriminator_forward.13
= control target key start
LH: loop header
LB: loop body
LE: loop exit
PB: predicated region body
PF: predicated region fallthrough
CT: control target
= control target key end

     0   :  { %s3917_s15 = smov 0   ;;  %s3919_s16 = smov 0   ;;  %s4687_s0 = inlined_call_operand.vmem [shape: bf16[2,192,16], index: 0, kind: input, shape index: {}]   ;;  %s4688_s1 = inlined_call_operand.vmem [shape: bf16[9,16,128], index: 1, kind: input, shape index: {}]   ;;  %s4689_s2 = inlined_call_operand.vmem [shape: f32[144,1], index: 2, kind: input, shape index: {}]   ;;  %s4690_s3 = inlined_call_operand.vmem [shape: bf16[2,144,128], index: 3, kind: input, shape index: {}]   ;;  %s4691_s4 = inlined_call_operand.vmem [shape: bf16[2,144,128], index: 4, kind: output, shape index: {}]  }
   0x1   :  { %s3921_s17 = smov 0  }
   0x2 LB: > { %s23_s18 = sadd.s32 1, %s3883_s16  ;;  %p2772_p0 = scmp.ge.s32.totalorder %s3887_s17, 1  ;;  %s3887_s17 = sphi %s3921_s17, %s14_s17   ;;  %s3883_s16 = sphi %s3919_s16, %s4693_s16   ;;  %s3879_s15 = sphi %s3917_s15, %s4692_s15  }
   0x3   : > { %p24_p1 = scmp.ge.s32.totalorder %s23_s18, 2  ;;  %p200_p2 = scmp.lt.s32.totalorder %s3887_s17, 3 }
   0x5   : > { %s4695_s18 = smov (%p24_p1, %s23_s18), 0  ;;  %p201_p3 = pnand %p2772_p0, %p200_p2 }
   0x6   : > { %v3938_v0 = vld [vmem:[%s4688_s1 + $0x20] sm:$0xff] (!%p201_p3)   ;;  %v3889_v1 = vmov (!%p201_p3), 0.0   ;;  %v3804_v2 = vld [vmem:[%s4688_s1 + $0x8] sm:$0xff] (!%p201_p3)   ;;  %vm3890_vm0 = vmmov (!%p201_p3), 0   ;;  %p241_p4 = scmp.lt.s32.totalorder (!%p201_p3), %s3879_s15, 1  ;;  %vm422_vm2 = vcmask (!%p201_p3), 130048  }
   0x7   : > { %204 = sbr.rel (%p201_p3) target bundleno = 619 (0x26b), region = 36  ;;  %3310 = vmatprep.subr.bf16.mxu0 (!%p201_p3), %v3889_v1  ;;  %3158 = vmatprep.subr.bf16.mxu1 (!%p201_p3), %v3889_v1  ;;  %vm339_vm1 = vsmask.f32 (!%p201_p3), 7424  ;;  %v3811_v25 = vld [vmem:[%s4688_s1] sm:$0xff] (!%p201_p3)   ;;  %v3809_v27 = vld [vmem:[%s4688_s1 + $0x28] sm:$0xff] (!%p201_p3)   ;;  %vm691_vm3 = vcmask (!%p201_p3), 1046528  }
   0x8   : > { %3311 = vmatpush3.bf16.msra.mxu0 (!%p201_p3), %v3938_v0  ;;  %3160 = vmatprep.mubr.msk.bf16.mxu1 (!%p201_p3), %vm3890_vm0, %v3889_v1 }
   0x9   : > { %3159 = vmatpush3.bf16.msra.mxu1 (!%p201_p3), %v3804_v2  ;;  %3312 = vmatprep.mubr.msk.bf16.mxu0 (!%p201_p3), %vm3890_vm0, %v3889_v1 }
   0xa   : > { %3348 = vmatprep.subr.bf16.mxu0 (!%p201_p3), %v3889_v1  ;;  %3196 = vmatprep.subr.bf16.mxu1 (!%p201_p3), %v3889_v1 }
   0xe   : > { %s4697_s15 = smov (!%p241_p4, %s3879_s15), 1 }
   0xf   : > { %s3772_s23 = smul.u32 96, %s4697_s15 }
  0x11   : > { %s3958_s26 = scalar_lea.vmem %s4687_s0, %s3772_s23 }
  0x12   : > { %v267_v3 = vld [vmem:[%s3958_s26] sm:$0xf]  ;;  %v3962_v4 = vld [vmem:[%s3958_s26 + $0x4] sm:$0xf]  ;;  %v3968_v6 = vld [vmem:[%s3958_s26 + $0x8] sm:$0xff]  }
  0x13   : > { %v3965_v5 = vcombine.low %v267_v3, %v3962_v4  ;;  %v1089_v7 = vld [vmem:[%s3958_s26 + $0x8] sm:$0xf]  ;;  %v3972_v8 = vld [vmem:[%s3958_s26 + $0xc] sm:$0xf]  ;;  %v348_v11 = vshll.u32 %v3968_v6, 16  ;;  %v3979_v13 = vld [vmem:[%s3958_s26 + $0x10] sm:$0xff]  }
  0x14   : > { %v2844_v12 = vcombine.low %v1089_v7, %v3972_v8  ;;  %v3982_v14 = vld [vmem:[%s3958_s26 + $0x10] sm:$0xff]   ;;  %v1167_v19 = vshll.u32 %v3979_v13, 16  ;;  %v3986_v20 = vld [vmem:[%s3958_s26 + $0x18] sm:$0xff]   ;;  %v352_v23 = vshrl.u32 %v3968_v6, 16  ;;  %v1171_v30 = vshrl.u32 %v3979_v13, 16  ;;  %v4011_v38 = vld [vmem:[%s3958_s26 + $0x20] sm:$0xff]  }
  0x15   : > { %v341_v9 = vshrl.u32 %v3965_v5, 16  ;;  %v343_v10 = vshll.u32 %v3965_v5, 16  ;;  %v350_v16 = vrot.slane %v348_v11, 1  ;;  %v356_v24 = vshll.u32 %v3982_v14, 16  ;;  %v4001_v32 = vld [vmem:[%s3958_s26 + $0x18] sm:$0xff]   ;;  %v4014_v39 = vld [vmem:[%s3958_s26 + $0x30] sm:$0xff]  }
  0x16   : > { %v1160_v17 = vshrl.u32 %v2844_v12, 16  ;;  %v1162_v18 = vshll.u32 %v2844_v12, 16  ;;  %v1169_v26 = vrot.slane %v1167_v19, 1  ;;  %v1175_v31 = vshll.u32 %v3986_v20, 16  ;;  %v4027_v50 = vld [vmem:[%s3958_s26 + $0x20] sm:$0xff]   ;;  %v4037_v55 = vld [vmem:[%s3958_s26 + $0x28] sm:$0xff]  }
  0x17   : > { %v345_v15 = vrot.slane %v343_v10, 1  ;;  %v354_v34 = vor.u32 %v352_v23, %v350_v16  ;;  %v358_v35 = vrot.slane %v356_v24, 1  ;;  %v364_v40 = vshll.u32 %v4001_v32, 16  ;;  %v4047_v63 = vld [vmem:[%s3958_s26 + $0x28] sm:$0xff]  }
  0x18   : > { %v1164_v22 = vrot.slane %v1162_v18, 1  ;;  %v1173_v36 = vor.u32 %v1171_v30, %v1169_v26  ;;  %v1177_v37 = vrot.slane %v1175_v31, 1  ;;  %v360_v42 = vshrl.u32 %v3982_v14, 16  ;;  %v1391_v19 = vld [vmem:[%s3958_s26 + $0x8] sm:$0xe] }
  0x19   : > { %v346_v21 = vor.u32 %v345_v15, %v341_v9  ;;  %v359_v41 = vsel %vm339_vm1, %v354_v34, %v358_v35  ;;  %v1199_v43 = vshll.u32 %v4014_v39, 16  ;;  %v1203_v44 = vshrl.u32 %v4014_v39, 16 }
  0x1a   : > { %v1165_v29 = vor.u32 %v1164_v22, %v1160_v17  ;;  %v1179_v45 = vshrl.u32 %v3986_v20, 16  ;;  %v1178_v46 = vsel %vm339_vm1, %v1173_v36, %v1177_v37  ;;  %v1183_v47 = vshll.u32 %v4011_v38, 16  ;;  %v3821_v36 = vld [vmem:[%s4688_s1 + $0x30] sm:$0xff]  }
  0x1b   : > { %v351_v28 = vsel %vm339_vm1, %v346_v21, %v350_v16  ;;  %v1201_v48 = vrot.slane %v1199_v43, 1  ;;  %v366_v49 = vrot.slane %v364_v40, 1  ;;  %v362_v51 = vor.u32 %v360_v42, %v358_v35  ;;  %v4060_v16 = vld [vmem:[%s3958_s26 + $0x30] sm:$0xff]   ;;  %v4095_v40 = vld [vmem:[%s3958_s26 + $0x40] sm:$0xff]  }
  0x1c   : > { %3161 = vmatmul.mubr.msk.bf16.vlgmr.msra.gmra.mrb[0].mxu1 %vm422_vm2, %v351_v28  ;;  %v1170_v33 = vsel %vm339_vm1, %v1165_v29, %v1169_v26  ;;  %v1181_v53 = vor.u32 %v1179_v45, %v1177_v37  ;;  %v1185_v54 = vrot.slane %v1183_v47, 1  ;;  %v372_v56 = vshll.u32 %v4027_v50, 16  ;;  %v4076_v28 = vld [vmem:[%s3958_s26 + $0x38] sm:$0xff]  }
  0x1d   : > { %3164 = vmatprep.mubr.msk.bf16.mxu1 %vm3890_vm0, %v3889_v1  ;;  %3197 = vmatpush3.bf16.msra.mxu1 %v3811_v25  ;;  %v4031_v52 = vor.u32 %v1203_v44, %v1201_v48  ;;  %v367_v57 = vsel %vm339_vm1, %v362_v51, %v366_v49  ;;  %v368_v58 = vshrl.u32 %v4001_v32, 16  ;;  %v1187_v60 = vshrl.u32 %v4011_v38, 16 }
  0x1e   : > { %3313 = vmatmul.mubr.msk.bf16.vlgmr.msra.gmra.mrb[0].mxu0 %vm422_vm2, %v1170_v33  ;;  %3234 = vmatprep.subr.bf16.mxu1 %v3889_v1  ;;  %v1186_v59 = vsel %vm339_vm1, %v1181_v53, %v1185_v54  ;;  %v1191_v61 = vshll.u32 %v4037_v55, 16  ;;  %v374_v62 = vrot.slane %v372_v56, 1  ;;  %v380_v9 = vshll.u32 %v4047_v63, 16 }
  0x1f   : > { %3349 = vmatpush3.bf16.msra.mxu0 %v3809_v27  ;;  %3316 = vmatprep.mubr.msk.bf16.mxu0 %vm3890_vm0, %v3889_v1  ;;  %v370_v2 = vor.u32 %v368_v58, %v366_v49  ;;  %v1189_v3 = vor.u32 %v1187_v60, %v1185_v54  ;;  %v376_v11 = vshrl.u32 %v4027_v50, 16  ;;  %v1195_v15 = vshrl.u32 %v4037_v55, 16 }
  0x20   : > { %3386 = vmatprep.subr.bf16.mxu0 %v3889_v1  ;;  %v1193_v7 = vrot.slane %v1191_v61, 1  ;;  %v382_v17 = vrot.slane %v380_v9, 1  ;;  %v384_v22 = vshrl.u32 %v4047_v63, 16  ;;  %v388_v23 = vshll.u32 %v4060_v16, 16  ;;  %v4166_v9 = vld [vmem:[%s3958_s26 + $0x48] sm:$0xff]  }
  0x21   : > { %v375_v10 = vsel %vm339_vm1, %v370_v2, %v374_v62  ;;  %v378_v18 = vor.u32 %v376_v11, %v374_v62  ;;  %v2866_v26 = vcombine.low %v1391_v19, %v3972_v8  ;;  %v1399_v31 = vrot.slane %v3979_v13, 1  ;;  %v4141_v62 = vld [vmem:[%s3958_s26 + $0x38] sm:$0xff]  }
  0x22   : > { %v1194_v12 = vsel %vm339_vm1, %v1189_v3, %v1193_v7  ;;  %v1197_v21 = vor.u32 %v1195_v15, %v1193_v7  ;;  %v390_v27 = vrot.slane %v388_v23, 1  ;;  %v386_v29 = vor.u32 %v384_v22, %v382_v17  ;;  %v4154_v3 = vld [vmem:[%s3958_s26 + $0x40] sm:$0xff]   ;;  %v3831_v19 = vld [vmem:[%s4688_s1 + $0x38] sm:$0xff]  }
  0x23   : > { %v383_v24 = vsel %vm339_vm1, %v378_v18, %v382_v17  ;;  %v1398_v30 = vrot.slane %v2866_v26, 1  ;;  %v392_v33 = vshrl.u32 %v4060_v16, 16  ;;  %v396_v34 = vshll.u32 %v4076_v28, 16  ;;  %v3830_v18 = vld [vmem:[%s3958_s26 + $0x10] sm:$0xff]   ;;  %v3833_v22 = vld [vmem:[%s3958_s26 + $0x20] sm:$0xff]  }
  0x24   : > { %3165 = vmatmul.mubr.msk.bf16.gmra.mrb[4].mxu1 %vm422_vm2, %v359_v41  ;;  %v1202_v25 = vsel %vm339_vm1, %v1197_v21, %v1201_v48  ;;  %v391_v8 = vsel %vm339_vm1, %v386_v29, %v390_v27  ;;  %v1401_v41 = vrot.slane %v3986_v20, 1  ;;  %v400_v43 = vshrl.u32 %v4076_v28, 16  ;;  %v4110_v48 = vld [vmem:[%s3958_s26 + $0x48] ss:$0 sps:$4 sm:$0x11]   ;;  %v3832_v21 = vld [vmem:[%s3958_s26 + $0x18] sm:$0xff]  }
  0x25   : > { %3168 = vmatprep.mubr.msk.bf16.mxu1 %vm3890_vm0, %v3889_v1  ;;  %v1400_v35 = vsel %vm691_vm3, %v1398_v30, %v1399_v31  ;;  %v394_v37 = vor.u32 %v392_v33, %v390_v27  ;;  %v398_v13 = vrot.slane %v396_v34, 1  ;;  %v404_v44 = vshll.u32 %v4095_v40, 16  ;;  %v684_v23 = vld [vmem:[%s3958_s26] sm:$0xe]  ;;  %v3836_v30 = vld [vmem:[%s3958_s26 + $0x30] sm:$0xff]  }
  0x26   : > { %3317 = vmatmul.mubr.msk.bf16.gmra.mrb[4].mxu0 %vm422_vm2, %v1178_v46  ;;  %v1402_v45 = vsel %vm691_vm3, %v1399_v31, %v1401_v41  ;;  %v1403_v20 = vrot.slane %v4011_v38, 1  ;;  %v408_v51 = vshrl.u32 %v4095_v40, 16  ;;  %v412_v53 = vshll.u32 %v4110_v48, 16  ;;  %v3839_v34 = vld [vmem:[%s3958_s26 + $0x40] sm:$0xff]  }
  0x27   : > { %3320 = vmatprep.mubr.msk.bf16.mxu0 %vm3890_vm0, %v3889_v1  ;;  %v399_v42 = vsel %vm339_vm1, %v394_v37, %v398_v13  ;;  %v402_v46 = vor.u32 %v400_v43, %v398_v13  ;;  %v406_v47 = vrot.slane %v404_v44, 1  ;;  %v1405_v38 = vrot.slane %v4037_v55, 1  ;;  %v3825_v55 = vld [vmem:[%s4688_s1 + $0x10] sm:$0xff]   ;;  %v3840_v13 = vld [vmem:[%s3958_s26 + $0x48] sm:$0xff]  }
  0x28   : > { %v1404_v54 = vsel %vm691_vm3, %v1401_v41, %v1403_v20  ;;  %v1407_v60 = vrot.slane %v4014_v39, 1  ;;  %v1409_v39 = vrot.slane %v4141_v62, 1  ;;  %v693_v27 = vrot.slane %v3968_v6, 1 }
  0x29   : > { %v407_v49 = vsel %vm339_vm1, %v402_v46, %v406_v47  ;;  %v410_v56 = vor.u32 %v408_v51, %v406_v47 }
  0x2a   : > { %v1408_v61 = vsel %vm691_vm3, %v1405_v38, %v1407_v60  ;;  %v1410_v2 = vsel %vm691_vm3, %v1407_v60, %v1409_v39 }
  0x2c   : > { %3169 = vmatmul.mubr.msk.bf16.gmra.mrb[8].mxu1 %vm422_vm2, %v367_v57  ;;  %v414_v57 = vrot.slane %v412_v53, 1  ;;  %v4294_v53 = vld [vmem:[%s3958_s26 + $0x20] sm:$0xff]  }
  0x2d   : > { %3172 = vmatprep.mubr.msk.bf16.mxu1 %vm3890_vm0, %v3889_v1 }
  0x2e   : > { %3321 = vmatmul.mubr.msk.bf16.gmra.mrb[8].mxu0 %vm422_vm2, %v1186_v59  ;;  %v415_v58 = vsel %vm339_vm1, %v410_v56, %v414_v57  ;;  %v1406_v59 = vsel %vm691_vm3, %v1403_v20, %v1405_v38  ;;  %v3844_v57 = vld [vmem:[%s4688_s1 + $0x40] sm:$0xff]   ;;  %v1881_v38 = vshll.u32 %v4294_v53, 16 }
  0x2f   : > { %3324 = vmatprep.mubr.msk.bf16.mxu0 %vm3890_vm0, %v3889_v1 }
  0x30   : > { %v1883_v60 = vrot.slane %v1881_v38, 1  ;;  %v2294_v38 = vld [vmem:[%s4689_s2 + $0x78] sm:$0xff] }
  0x34   : > { %3173 = vmatmul.mubr.msk.bf16.gmra.mrb[12].mxu1 %vm422_vm2, %v375_v10  ;;  %v1413_v10 = vrot.slane %v4166_v9, 1 }
  0x35   : > { %3176 = vmatprep.mubr.msk.bf16.mxu1 %vm3890_vm0, %v3889_v1 }
  0x36   : > { %3325 = vmatmul.mubr.msk.bf16.gmra.mrb[12].mxu0 %vm422_vm2, %v1194_v12  ;;  %v4178_v12 = vld [vmem:[%s3958_s26 + $0x50] ss:$0 sps:$4 sm:$0x11]  }
  0x37   : > { %3328 = vmatprep.mubr.msk.bf16.mxu0 %vm3890_vm0, %v3889_v1  ;;  %v1415_v15 = vrot.slane %v4178_v12, 1 }
  0x39   : > { %v1416_v17 = vsel %vm691_vm3, %v1413_v10, %v1415_v15 }
  0x3c   : > { %3177 = vmatmul.mubr.msk.bf16.gmra.mrb[16].mxu1 %vm422_vm2, %v383_v24  ;;  %v2810_v24 = vcombine.low %v684_v23, %v3962_v4  ;;  %v3837_v4 = vld [vmem:[%s4688_s1 + $0x18] sm:$0xff]  }
  0x3d   : > { %3180 = vmatprep.mubr.msk.bf16.mxu1 %vm3890_vm0, %v3889_v1 }
  0x3e   : > { %3329 = vmatmul.mubr.msk.bf16.gmra.mrb[16].mxu0 %vm422_vm2, %v1202_v25  ;;  %v3834_v25 = vld [vmem:[%s3958_s26 + $0x28] sm:$0xff]   ;;  %v692_v26 = vrot.slane %v2810_v24, 1 }
  0x3f   : > { %3350 = vmatprep.mubr.msk.bf16.mxu0 %vm3890_vm0, %v3889_v1 }
  0x40   : > { %v694_v29 = vsel %vm691_vm3, %v692_v26, %v693_v27  ;;  %v2283_v26 = vld [vmem:[%s4689_s2 + $0x20] sm:$0xff] }
  0x44   : > { %3181 = vmatmul.mubr.msk.bf16.gmra.mrb[20].mxu1 %vm422_vm2, %v391_v8  ;;  %v3838_v8 = vld [vmem:[%s3958_s26 + $0x38] sm:$0xff]  }
  0x45   : > { %3184 = vmatprep.mubr.msk.bf16.mxu1 %vm3890_vm0, %v3889_v1 }
  0x46   : > { %3351 = vmatmul.mubr.msk.bf16.vlgmr.msra.gmra.mrb[0].mxu0 %vm422_vm2, %v1400_v35  ;;  %v699_v35 = vrot.slane %v4027_v50, 1 }
  0x47   : > { %3387 = vmatpush3.bf16.msra.mxu0 %v3821_v36  ;;  %3354 = vmatprep.mubr.msk.bf16.mxu0 %vm3890_vm0, %v3889_v1  ;;  %v4268_v36 = vld [vmem:[%s3958_s26 + $0x14] sm:$0xf] }
  0x48   : > { %3424 = vmatprep.subr.bf16.mxu0 %v3889_v1 }
  0x4c   : > { %3185 = vmatmul.mubr.msk.bf16.gmra.mrb[24].mxu1 %vm422_vm2, %v399_v42  ;;  %v4281_v42 = vld [vmem:[%s3958_s26 + $0x18] sm:$0xff]  }
  0x4d   : > { %3188 = vmatprep.mubr.msk.bf16.mxu1 %vm3890_vm0, %v3889_v1  ;;  %v1873_v20 = vshll.u32 %v4281_v42, 16 }
  0x4e   : > { %3355 = vmatmul.mubr.msk.bf16.gmra.mrb[4].mxu0 %vm422_vm2, %v1402_v45  ;;  %v3841_v45 = vld [vmem:[%s3958_s26 + $0x50] sm:$0xff]  }
  0x4f   : > { %3358 = vmatprep.mubr.msk.bf16.mxu0 %vm3890_vm0, %v3889_v1  ;;  %v1875_v51 = vrot.slane %v1873_v20, 1 }
  0x54   : > { %3189 = vmatmul.mubr.msk.bf16.gmra.mrb[28].mxu1 %vm422_vm2, %v407_v49 }
  0x55   : > { %3192 = vmatprep.mubr.msk.bf16.mxu1 %vm3890_vm0, %v3889_v1 }
  0x56   : > { %3359 = vmatmul.mubr.msk.bf16.gmra.mrb[8].mxu0 %vm422_vm2, %v1404_v54 }
  0x57   : > { %3362 = vmatprep.mubr.msk.bf16.mxu0 %vm3890_vm0, %v3889_v1 }
  0x5c   : > { %3193 = vmatmul.mubr.msk.bf16.gmra.mrb[32].mxu1 %vm422_vm2, %v415_v58  ;;  %v705_v58 = vrot.slane %v4076_v28, 1 }
  0x5d   : > { %3198 = vmatprep.mubr.msk.bf16.mxu1 %vm3890_vm0, %v3889_v1 }
  0x5e   : > { %3363 = vmatmul.mubr.msk.bf16.gmra.mrb[12].mxu0 %vm422_vm2, %v1406_v59 }
  0x5f   : > { %3366 = vmatprep.mubr.msk.bf16.mxu0 %vm3890_vm0, %v3889_v1 }
  0x64   : > { %3199 = vmatmul.mubr.msk.bf16.vlgmr.msra.gmra.mrb[0].mxu1 %vm422_vm2, %v3965_v5  ;;  %v1411_v5 = vrot.slane %v4154_v3, 1 }
  0x65   : > { %3202 = vmatprep.mubr.msk.bf16.mxu1 %vm3890_vm0, %v3889_v1  ;;  %3235 = vmatpush3.bf16.msra.mxu1 %v3825_v55  ;;  %v4311_v55 = vld [vmem:[%s3958_s26 + $0x28] sm:$0xff]  }
  0x66   : > { %3367 = vmatmul.mubr.msk.bf16.gmra.mrb[16].mxu0 %vm422_vm2, %v1408_v61  ;;  %3272 = vmatprep.subr.bf16.mxu1 %v3889_v1  ;;  %v1412_v7 = vsel %vm691_vm3, %v1409_v39, %v1411_v5  ;;  %v1414_v11 = vsel %vm691_vm3, %v1411_v5, %v1413_v10  ;;  %v1889_v5 = vshll.u32 %v4311_v55, 16  ;;  %v2281_v10 = vld [vmem:[%s4689_s2 + $0x10] sm:$0xff]  ;;  %v1893_v23 = vshrl.u32 %v4311_v55, 16 }
  0x67   : > { %3370 = vmatprep.mubr.msk.bf16.mxu0 %vm3890_vm0, %v3889_v1 }
  0x68   : > { %v1891_v15 = vrot.slane %v1889_v5, 1 }
  0x6c   : > { %3203 = vmatmul.mubr.msk.bf16.gmra.mrb[4].mxu1 %vm422_vm2, %v3968_v6  ;;  %v695_v6 = vrot.slane %v3982_v14, 1 }
  0x6d   : > { %3206 = vmatprep.mubr.msk.bf16.mxu1 %vm3890_vm0, %v3889_v1 }
  0x6e   : > { %3371 = vmatmul.mubr.msk.bf16.gmra.mrb[20].mxu0 %vm422_vm2, %v1410_v2  ;;  %v696_v31 = vsel %vm691_vm3, %v693_v27, %v695_v6  ;;  %v1885_v2 = vshrl.u32 %v4294_v53, 16  ;;  %v2284_v27 = vld [vmem:[%s4689_s2 + $0x28] sm:$0xff] }
  0x6f   : > { %3374 = vmatprep.mubr.msk.bf16.mxu0 %vm3890_vm0, %v3889_v1 }
  0x74   : > { %3207 = vmatmul.mubr.msk.bf16.gmra.mrb[8].mxu1 %vm422_vm2, %v3982_v14  ;;  %v697_v14 = vrot.slane %v4001_v32, 1 }
  0x75   : > { %3210 = vmatprep.mubr.msk.bf16.mxu1 %vm3890_vm0, %v3889_v1 }
  0x76   : > { %3375 = vmatmul.mubr.msk.bf16.gmra.mrb[24].mxu0 %vm422_vm2, %v1412_v7  ;;  %v698_v33 = vsel %vm691_vm3, %v695_v6, %v697_v14  ;;  %v700_v37 = vsel %vm691_vm3, %v697_v14, %v699_v35  ;;  %v2279_v7 = vld [vmem:[%s4689_s2] sm:$0xff]  ;;  %v2285_v6 = vld [vmem:[%s4689_s2 + $0x30] sm:$0xff] }
  0x77   : > { %3378 = vmatprep.mubr.msk.bf16.mxu0 %vm3890_vm0, %v3889_v1 }
  0x7c   : > { %3211 = vmatmul.mubr.msk.bf16.gmra.mrb[12].mxu1 %vm422_vm2, %v4001_v32  ;;  %v1795_v32 = vld [vmem:[%s3958_s26 + $0x10] sm:$0xf] }
  0x7d   : > { %3214 = vmatprep.mubr.msk.bf16.mxu1 %vm3890_vm0, %v3889_v1  ;;  %v2900_v41 = vcombine.low %v1795_v32, %v4268_v36 }
  0x7e   : > { %3379 = vmatmul.mubr.msk.bf16.gmra.mrb[28].mxu0 %vm422_vm2, %v1414_v11  ;;  %v1887_v11 = vor.u32 %v1885_v2, %v1883_v60  ;;  %v3852_v2 = vld [vmem:[%s3958_s26 + $0x18] sm:$0xff]  }
  0x7f   : > { %3382 = vmatprep.mubr.msk.bf16.mxu0 %vm3890_vm0, %v3889_v1  ;;  %v1868_v43 = vshll.u32 %v2900_v41, 16  ;;  %v1866_v46 = vshrl.u32 %v2900_v41, 16  ;;  %v3848_v41 = vld [vmem:[%s3958_s26 + $0x8] sm:$0xff]  }
  0x81   : > { %v1870_v47 = vrot.slane %v1868_v43, 1 }
  0x83   : > { %v1871_v49 = vor.u32 %v1870_v47, %v1866_v46  ;;  %v2290_v46 = vld [vmem:[%s4689_s2 + $0x58] sm:$0xff]  ;;  %v2291_v47 = vld [vmem:[%s4689_s2 + $0x60] sm:$0xff] }
  0x84   : > { %3215 = vmatmul.mubr.msk.bf16.gmra.mrb[16].mxu1 %vm422_vm2, %v4027_v50  ;;  %v701_v50 = vrot.slane %v4047_v63, 1 }
  0x85   : > { %3218 = vmatprep.mubr.msk.bf16.mxu1 %vm3890_vm0, %v3889_v1  ;;  %v1876_v56 = vsel %vm339_vm1, %v1871_v49, %v1875_v51  ;;  %v4405_v49 = vld [vmem:[%s3958_s26 + $0x48] sm:$0xff]  }
  0x86   : > { %3383 = vmatmul.mubr.msk.bf16.gmra.mrb[32].mxu0 %vm422_vm2, %v1416_v17  ;;  %v702_v44 = vsel %vm691_vm3, %v699_v35, %v701_v50  ;;  %v4331_v17 = vld [vmem:[%s3958_s26 + $0x30] sm:$0xff]   ;;  %v2288_v35 = vld [vmem:[%s4689_s2 + $0x48] sm:$0xff] }
  0x87   : > { %3388 = vmatprep.mubr.msk.bf16.mxu0 %vm3890_vm0, %v3889_v1  ;;  %v1897_v24 = vshll.u32 %v4331_v17, 16  ;;  %v1901_v14 = vshrl.u32 %v4331_v17, 16 }
  0x8c   : > { %3219 = vmatmul.mubr.msk.bf16.gmra.mrb[20].mxu1 %vm422_vm2, %v4047_v63  ;;  %v703_v63 = vrot.slane %v4060_v16, 1 }
  0x8d   : > { %3222 = vmatprep.mubr.msk.bf16.mxu1 %vm3890_vm0, %v3889_v1 }
  0x8e   : > { %3389 = vmatmul.mubr.msk.bf16.vlgmr.msra.gmra.mrb[0].mxu0 %vm422_vm2, %v3830_v18  ;;  %v704_v54 = vsel %vm691_vm3, %v701_v50, %v703_v63  ;;  %v706_v61 = vsel %vm691_vm3, %v703_v63, %v705_v58  ;;  %v3891_v18 = vmov 0   ;;  %v2289_v50 = vld [vmem:[%s4689_s2 + $0x50] sm:$0xff] }
  0x8f   : > { %3425 = vmatpush3.bf16.msra.mxu0 %v3831_v19  ;;  %3392 = vmatprep.mubr.msk.bf16.mxu0 %vm3890_vm0, %v3889_v1  ;;  %v2280_v19 = vld [vmem:[%s4689_s2 + $0x8] sm:$0xff] }
  0x90   : > { %3462 = vmatprep.subr.bf16.mxu0 %v3889_v1  ;;  %3801 = vset.pattern.permute.xlu0 %v3891_v18 }
  0x91   : > { %2299 = vperm.xlu0 %3801, %v2279_v7   ;;  %3802 = vset.pattern.permute.xlu1 %v3891_v18  ;;  %v3854_v18 = vld [vmem:[%s3958_s26 + $0x20] sm:$0xff]  }
  0x92   : > { %2309 = vperm.xlu1 %3802, %v2281_v10  }
  0x94   : > { %3223 = vmatmul.mubr.msk.bf16.gmra.mrb[24].mxu1 %vm422_vm2, %v4060_v16  ;;  %v1877_v16 = vshrl.u32 %v4281_v42, 16 }
  0x95   : > { %3226 = vmatprep.mubr.msk.bf16.mxu1 %vm3890_vm0, %v3889_v1  ;;  %2304 = vperm.xlu0 %3801, %v2280_v19  }
  0x96   : > { %3393 = vmatmul.mubr.msk.bf16.gmra.mrb[4].mxu0 %vm422_vm2, %v3832_v21  ;;  %v1879_v59 = vor.u32 %v1877_v16, %v1875_v51  ;;  %v2282_v21 = vld [vmem:[%s4689_s2 + $0x18] sm:$0xff]  ;;  %v2292_v51 = vld [vmem:[%s4689_s2 + $0x68] sm:$0xff]  ;;  %v1921_v16 = vshll.u32 %v4405_v49, 16 }
  0x97   : > { %3396 = vmatprep.mubr.msk.bf16.mxu0 %vm3890_vm0, %v3889_v1  ;;  %2314 = vperm.xlu1 %3802, %v2282_v21  }
  0x98   : > { %v1884_v39 = vsel %vm339_vm1, %v1879_v59, %v1883_v60  ;;  %v1923_v60 = vrot.slane %v1921_v16, 1 }
  0x99   : > { %2319 = vperm.xlu0 %3801, %v2283_v26  }
  0x9b   : > { %2324 = vperm.xlu1 %3802, %v2284_v27  }
  0x9c   : > { %3227 = vmatmul.mubr.msk.bf16.gmra.mrb[28].mxu1 %vm422_vm2, %v4076_v28  ;;  %v707_v28 = vrot.slane %v4095_v40, 1 }
  0x9d   : > { %3230 = vmatprep.mubr.msk.bf16.mxu1 %vm3890_vm0, %v3889_v1  ;;  %2329 = vperm.xlu0 %3801, %v2285_v6  }
  0x9e   : > { %3397 = vmatmul.mubr.msk.bf16.gmra.mrb[8].mxu0 %vm422_vm2, %v3833_v22  ;;  %v1892_v22 = vsel %vm339_vm1, %v1887_v11, %v1891_v15 }
  0x9f   : > { %3400 = vmatprep.mubr.msk.bf16.mxu0 %vm3890_vm0, %v3889_v1 }
  0xa4   : > { %3231 = vmatmul.mubr.msk.bf16.gmra.mrb[32].mxu1 %vm422_vm2, %v4095_v40  ;;  %v708_v40 = vsel %vm691_vm3, %v705_v58, %v707_v28  ;;  %v2295_v58 = vld [vmem:[%s4689_s2 + $0x80] sm:$0xff] }
  0xa5   : > { %3236 = vmatprep.mubr.msk.bf16.mxu1 %vm3890_vm0, %v3889_v1 }
  0xa6   : > { %3401 = vmatmul.mubr.msk.bf16.gmra.mrb[12].mxu0 %vm422_vm2, %v3834_v25  ;;  %v709_v25 = vrot.slane %v4110_v48, 1 }
  0xa7   : > { %3404 = vmatprep.mubr.msk.bf16.mxu0 %vm3890_vm0, %v3889_v1 }
  0xa8   : > { %v710_v48 = vsel %vm691_vm3, %v707_v28, %v709_v25  ;;  %v1925_v28 = vshrl.u32 %v4405_v49, 16  ;;  %v2097_v25 = vld [vmem:[%s3958_s26 + $0x10] sm:$0xe] }
  0xa9   : > { %v2922_v27 = vcombine.low %v2097_v25, %v4268_v36  ;;  %v2107_v36 = vrot.slane %v4294_v53, 1  ;;  %v2111_v53 = vrot.slane %v4331_v17, 1 }
  0xaa   : > { %v1927_v10 = vor.u32 %v1925_v28, %v1923_v60 }
  0xac   : > { %3237 = vmatmul.mubr.msk.bf16.vlgmr.msra.gmra.mrb[0].mxu1 %vm422_vm2, %v694_v29  ;;  %v1895_v29 = vor.u32 %v1893_v23, %v1891_v15  ;;  %v4446_v15 = vld [vmem:[%s3958_s26 + $0x58] ss:$0 sps:$4 sm:$0x11]  }
  0xad   : > { %3240 = vmatprep.mubr.msk.bf16.mxu1 %vm3890_vm0, %v3889_v1  ;;  %3273 = vmatpush3.bf16.msra.mxu1 %v3837_v4  ;;  %v1899_v4 = vrot.slane %v1897_v24, 1  ;;  %v1937_v21 = vshll.u32 %v4446_v15, 16  ;;  %v3856_v24 = vld [vmem:[%s3958_s26 + $0x28] sm:$0xff]   ;;  %v2121_v16 = vrot.slane %v4446_v15, 1 }
  0xae   : > { %3405 = vmatmul.mubr.msk.bf16.gmra.mrb[16].mxu0 %vm422_vm2, %v3836_v30  ;;  %3500 = vmatprep.subr.bf16.mxu1 %v3889_v1  ;;  %v4357_v30 = vld [vmem:[%s3958_s26 + $0x38] sm:$0xff]  }
  0xaf   : > { %3408 = vmatprep.mubr.msk.bf16.mxu0 %vm3890_vm0, %v3889_v1  ;;  %v1903_v32 = vor.u32 %v1901_v14, %v1899_v4  ;;  %v1939_v23 = vrot.slane %v1937_v21, 1  ;;  %v3861_v14 = vld [vmem:[%s3958_s26 + $0x40] sm:$0xff]  }
  0xb4   : > { %3241 = vmatmul.mubr.msk.bf16.gmra.mrb[4].mxu1 %vm422_vm2, %v696_v31  ;;  %v2286_v31 = vld [vmem:[%s4689_s2 + $0x38] sm:$0xff] }
  0xb5   : > { %3244 = vmatprep.mubr.msk.bf16.mxu1 %vm3890_vm0, %v3889_v1  ;;  %2334 = vperm.xlu1 %3802, %v2286_v31   ;;  %v3860_v31 = vld [vmem:[%s3958_s26 + $0x38] sm:$0xff]  }
  0xb6   : > { %3409 = vmatmul.mubr.msk.bf16.gmra.mrb[20].mxu0 %vm422_vm2, %v3838_v8  ;;  %v1900_v8 = vsel %vm339_vm1, %v1895_v29, %v1899_v4  ;;  %v2104_v29 = vrot.slane %v2922_v27, 1  ;;  %v2105_v4 = vrot.slane %v4281_v42, 1  ;;  %v2109_v42 = vrot.slane %v4311_v55, 1 }
  0xb7   : > { %3412 = vmatprep.mubr.msk.bf16.mxu0 %vm3890_vm0, %v3889_v1 }
  0xb8   : > { %v2106_v6 = vsel %vm691_vm3, %v2104_v29, %v2105_v4  ;;  %v2112_v55 = vsel %vm691_vm3, %v2109_v42, %v2111_v53 }
  0xb9   : > { %2344 = vperm.xlu1 %3802, %v2288_v35   ;;  %v1207_v35 = vshll.u32 %v4141_v62, 16 }
  0xbc   : > { %3245 = vmatmul.mubr.msk.bf16.gmra.mrb[8].mxu1 %vm422_vm2, %v698_v33  ;;  %v1905_v33 = vshll.u32 %v4357_v30, 16 }
  0xbd   : > { %3248 = vmatprep.mubr.msk.bf16.mxu1 %vm3890_vm0, %v3889_v1  ;;  %2354 = vperm.xlu1 %3802, %v2290_v46   ;;  %v1223_v46 = vshll.u32 %v4166_v9, 16 }
  0xbe   : > { %3413 = vmatmul.mubr.msk.bf16.gmra.mrb[24].mxu0 %vm422_vm2, %v3839_v34  ;;  %v2287_v34 = vld [vmem:[%s4689_s2 + $0x40] sm:$0xff] }
  0xbf   : > { %3416 = vmatprep.mubr.msk.bf16.mxu0 %vm3890_vm0, %v3889_v1  ;;  %2339 = vperm.xlu0 %3801, %v2287_v34   ;;  %v3862_v34 = vld [vmem:[%s3958_s26 + $0x48] sm:$0xff]  }
  0xc1   : > { %2364 = vperm.xlu1 %3802, %v2292_v51   ;;  %v1227_v51 = vshrl.u32 %v4166_v9, 16 }
  0xc3   : > { %2349 = vperm.xlu0 %3801, %v2289_v50   ;;  %v1215_v50 = vshll.u32 %v4154_v3, 16 }
  0xc4   : > { %3249 = vmatmul.mubr.msk.bf16.gmra.mrb[12].mxu1 %vm422_vm2, %v700_v37  ;;  %v1907_v37 = vrot.slane %v1905_v33, 1  ;;  %v2110_v33 = vsel %vm691_vm3, %v2107_v36, %v2109_v42 }
  0xc5   : > { %3252 = vmatprep.mubr.msk.bf16.mxu1 %vm3890_vm0, %v3889_v1  ;;  %2374 = vperm.xlu1 %3802, %v2294_v38  }
  0xc6   : > { %3417 = vmatmul.mubr.msk.bf16.gmra.mrb[28].mxu0 %vm422_vm2, %v3840_v13  ;;  %v4382_v13 = vld [vmem:[%s3958_s26 + $0x40] sm:$0xff]   ;;  %v1908_v43 = vsel %vm339_vm1, %v1903_v32, %v1907_v37  ;;  %v1209_v32 = vrot.slane %v1207_v35, 1 }
  0xc7   : > { %3420 = vmatprep.mubr.msk.bf16.mxu0 %vm3890_vm0, %v3889_v1  ;;  %2359 = vperm.xlu0 %3801, %v2291_v47  }
  0xc8   : > { %v1210_v17 = vsel %vm339_vm1, %v4031_v52, %v1209_v32  ;;  %v2115_v52 = vrot.slane %v4382_v13, 1 }
  0xcc   : > { %3253 = vmatmul.mubr.msk.bf16.gmra.mrb[16].mxu1 %vm422_vm2, %v702_v44  ;;  %v1909_v44 = vshrl.u32 %v4357_v30, 16 }
  0xcd   : > { %3256 = vmatprep.mubr.msk.bf16.mxu1 %vm3890_vm0, %v3889_v1 }
  0xce   : > { %3421 = vmatmul.mubr.msk.bf16.gmra.mrb[32].mxu0 %vm422_vm2, %v3841_v45  ;;  %v1913_v45 = vshll.u32 %v4382_v13, 16  ;;  %v1911_v20 = vor.u32 %v1909_v44, %v1907_v37  ;;  %v2113_v37 = vrot.slane %v4357_v30, 1  ;;  %v1219_v30 = vshrl.u32 %v4154_v3, 16 }
  0xcf   : > { %3426 = vmatprep.mubr.msk.bf16.mxu0 %vm3890_vm0, %v3889_v1 }
  0xd0   : > { %v1915_v63 = vrot.slane %v1913_v45, 1  ;;  %v1217_v45 = vrot.slane %v1215_v50, 1  ;;  %v2116_v47 = vsel %vm691_vm3, %v2113_v37, %v2115_v52 }
  0xd4   : > { %3257 = vmatmul.mubr.msk.bf16.gmra.mrb[20].mxu1 %vm422_vm2, %v704_v54  ;;  %v3850_v54 = vld [vmem:[%s3958_s26 + $0x10] sm:$0xff]  }
  0xd5   : > { %3260 = vmatprep.mubr.msk.bf16.mxu1 %vm3890_vm0, %v3889_v1 }
  0xd6   : > { %3427 = vmatmul.mubr.msk.bf16.vlgmr.msra.gmra.mrb[0].mxu0 %vm422_vm2, %v1876_v56  ;;  %v1916_v56 = vsel %vm339_vm1, %v1911_v20, %v1915_v63  ;;  %v1221_v20 = vor.u32 %v1219_v30, %v1217_v45 }
  0xd7   : > { %3463 = vmatpush3.bf16.msra.mxu0 %v3844_v57  ;;  %3430 = vmatprep.mubr.msk.bf16.mxu0 %vm3890_vm0, %v3889_v1  ;;  %v1917_v57 = vshrl.u32 %v4382_v13, 16  ;;  %v2117_v13 = vrot.slane %v4405_v49, 1 }
  0xd9   : > { %v1919_v59 = vor.u32 %v1917_v57, %v1915_v63  ;;  %v1225_v63 = vrot.slane %v1223_v46, 1 }
  0xdb   : > { %v1924_v5 = vsel %vm339_vm1, %v1919_v59, %v1923_v60  ;;  %v1226_v3 = vsel %vm339_vm1, %v1221_v20, %v1225_v63 }
  0xdc   : > { %3261 = vmatmul.mubr.msk.bf16.gmra.mrb[24].mxu1 %vm422_vm2, %v706_v61  ;;  %v4430_v61 = vld [vmem:[%s3958_s26 + $0x50] sm:$0xff]  }
  0xdd   : > { %3264 = vmatprep.mubr.msk.bf16.mxu1 %vm3890_vm0, %v3889_v1  ;;  %v1929_v7 = vshll.u32 %v4430_v61, 16  ;;  %v1933_v19 = vshrl.u32 %v4430_v61, 16  ;;  %v2119_v49 = vrot.slane %v4430_v61, 1 }
  0xde   : > { %3431 = vmatmul.mubr.msk.bf16.gmra.mrb[4].mxu0 %vm422_vm2, %v1884_v39  ;;  %v2296_v39 = vld [vmem:[%s4689_s2 + $0x88] sm:$0xff] }
  0xdf   : > { %3434 = vmatprep.mubr.msk.bf16.mxu0 %vm3890_vm0, %v3889_v1  ;;  %2384 = vperm.xlu1 %3802, %v2296_v39   ;;  %v1931_v11 = vrot.slane %v1929_v7, 1  ;;  %v2122_v38 = vsel %vm691_vm3, %v2119_v49, %v2121_v16 }
  0xe4   : > { %3265 = vmatmul.mubr.msk.bf16.gmra.mrb[28].mxu1 %vm422_vm2, %v708_v40  ;;  %v1932_v40 = vsel %vm339_vm1, %v1927_v10, %v1931_v11 }
  0xe5   : > { %3268 = vmatprep.mubr.msk.bf16.mxu1 %vm3890_vm0, %v3889_v1 }
  0xe6   : > { %3435 = vmatmul.mubr.msk.bf16.gmra.mrb[8].mxu0 %vm422_vm2, %v1892_v22  ;;  %v1935_v22 = vor.u32 %v1933_v19, %v1931_v11 }
  0xe7   : > { %3438 = vmatprep.mubr.msk.bf16.mxu0 %vm3890_vm0, %v3889_v1 }
  0xe8   : > { %v1940_v26 = vsel %vm339_vm1, %v1935_v22, %v1939_v23 }
  0xec   : > { %3269 = vmatmul.mubr.msk.bf16.gmra.mrb[32].mxu1 %vm422_vm2, %v710_v48  ;;  %v3858_v48 = vld [vmem:[%s3958_s26 + $0x30] sm:$0xff]   ;;  %s3773_s26 = smul.u32 72, %s4697_s15 }
  0xed   : > { %3274 = vmatprep.mubr.msk.bf16.mxu1 %vm3890_vm0, %v3889_v1 }
  0xee   : > { %3439 = vmatmul.mubr.msk.bf16.gmra.mrb[12].mxu0 %vm422_vm2, %v1900_v8  ;;  %v2108_v8 = vsel %vm691_vm3, %v2105_v4, %v2107_v36  ;;  %s257_s11 = scalar_lea.vmem %s4690_s3, %s3773_s26  ;;  %s265_s14 = scalar_lea.vmem %s4691_s4, %s3773_s26 }
  0xef   : > { %3442 = vmatprep.mubr.msk.bf16.mxu0 %vm3890_vm0, %v3889_v1 }
  0xf4   : > { %3275 = vmatmul.mubr.msk.bf16.vlgmr.msra.gmra.mrb[0].mxu1 %vm422_vm2, %v3848_v41  ;;  %v1211_v41 = vshrl.u32 %v4141_v62, 16 }
  0xf5   : > { %3278 = vmatprep.mubr.msk.bf16.mxu1 %vm3890_vm0, %v3889_v1  ;;  %3501 = vmatpush3.bf16.msra.mxu1 %v3938_v0  ;;  %v2293_v0 = vld [vmem:[%s4689_s2 + $0x70] sm:$0xff] }
  0xf6   : > { %3443 = vmatmul.mubr.msk.bf16.gmra.mrb[16].mxu0 %vm422_vm2, %v1908_v43  ;;  %2369 = vperm.xlu0 %3801, %v2293_v0   ;;  %v2114_v43 = vsel %vm691_vm3, %v2111_v53, %v2113_v37  ;;  %v1213_v44 = vor.u32 %v1211_v41, %v1209_v32  ;;  %v2118_v0 = vsel %vm691_vm3, %v2115_v52, %v2117_v13 }
  0xf7   : > { %3446 = vmatprep.mubr.msk.bf16.mxu0 %vm3890_vm0, %v3889_v1 }
  0xf8   : > { %v1218_v62 = vsel %vm339_vm1, %v1213_v44, %v1217_v45 }
  0xfa   : > { %2379 = vperm.xlu0 %3801, %v2295_v58  }
  0xfc   : > { %3279 = vmatmul.mubr.msk.bf16.gmra.mrb[4].mxu1 %vm422_vm2, %v3850_v54  ;;  %v1231_v54 = vshll.u32 %v4178_v12, 16  ;;  %v2120_v12 = vsel %vm691_vm3, %v2117_v13, %v2119_v49 }
  0xfd   : > { %3282 = vmatprep.mubr.msk.bf16.mxu1 %vm3890_vm0, %v3889_v1 }
  0xfe   : > { %3447 = vmatmul.mubr.msk.bf16.gmra.mrb[20].mxu0 %vm422_vm2, %v1916_v56  ;;  %v1229_v56 = vor.u32 %v1227_v51, %v1225_v63  ;;  %v1233_v57 = vrot.slane %v1231_v54, 1 }
  0xff   : > { %3450 = vmatprep.mubr.msk.bf16.mxu0 %vm3890_vm0, %v3889_v1 }
 0x100   : > { %v1234_v9 = vsel %vm339_vm1, %v1229_v56, %v1233_v57 }
 0x104   : > { %3283 = vmatmul.mubr.msk.bf16.gmra.mrb[8].mxu1 %vm422_vm2, %v3852_v2 }
 0x105   : > { %3286 = vmatprep.mubr.msk.bf16.mxu1 %vm3890_vm0, %v3889_v1 }
 0x106   : > { %3451 = vmatmul.mubr.msk.bf16.gmra.mrb[24].mxu0 %vm422_vm2, %v1924_v5 }
 0x107   : > { %3454 = vmatprep.mubr.msk.bf16.mxu0 %vm3890_vm0, %v3889_v1 }
 0x10c   : > { %3287 = vmatmul.mubr.msk.bf16.gmra.mrb[12].mxu1 %vm422_vm2, %v3854_v18 }
 0x10d   : > { %3290 = vmatprep.mubr.msk.bf16.mxu1 %vm3890_vm0, %v3889_v1 }
 0x10e   : > { %3455 = vmatmul.mubr.msk.bf16.gmra.mrb[28].mxu0 %vm422_vm2, %v1932_v40 }
 0x10f   : > { %3458 = vmatprep.mubr.msk.bf16.mxu0 %vm3890_vm0, %v3889_v1 }
 0x110   : > { %v2300_v25 = vpop.permute.xlu0 %2299 }
 0x114   : > { %3291 = vmatmul.mubr.msk.bf16.gmra.mrb[16].mxu1 %vm422_vm2, %v3856_v24  ;;  %v2305_v36 = vpop.permute.xlu0 %2304 }
 0x115   : > { %3294 = vmatprep.mubr.msk.bf16.mxu1 %vm3890_vm0, %v3889_v1 }
 0x116   : > { %3459 = vmatmul.mubr.msk.bf16.gmra.mrb[32].mxu0 %vm422_vm2, %v1940_v26 }
 0x117   : > { %3464 = vmatprep.mubr.msk.bf16.mxu0 %vm3890_vm0, %v3889_v1 }
 0x118   : > { %v2320_v63 = vpop.permute.xlu0 %2319 }
 0x11c   : > { %3295 = vmatmul.mubr.msk.bf16.gmra.mrb[20].mxu1 %vm422_vm2, %v3858_v48 }
 0x11d   : > { %3298 = vmatprep.mubr.msk.bf16.mxu1 %vm3890_vm0, %v3889_v1 }
 0x11e   : > { %3465 = vmatmul.mubr.msk.bf16.vlgmr.msra.gmra.mrb[0].mxu0 %vm422_vm2, %v2106_v6 }
 0x11f   : > { %3468 = vmatprep.mubr.msk.bf16.mxu0 %vm3890_vm0, %v3889_v1 }
 0x124   : > { %3299 = vmatmul.mubr.msk.bf16.gmra.mrb[24].mxu1 %vm422_vm2, %v3860_v31  ;;  %v2310_v31 = vpop.permute.xlu1 %2309 }
 0x125   : > { %3302 = vmatprep.mubr.msk.bf16.mxu1 %vm3890_vm0, %v3889_v1 }
 0x126   : > { %3469 = vmatmul.mubr.msk.bf16.gmra.mrb[4].mxu0 %vm422_vm2, %v2108_v8 }
 0x127   : > { %3472 = vmatprep.mubr.msk.bf16.mxu0 %vm3890_vm0, %v3889_v1 }
 0x12c   : > { %3303 = vmatmul.mubr.msk.bf16.gmra.mrb[28].mxu1 %vm422_vm2, %v3861_v14 }
 0x12d   : > { %3306 = vmatprep.mubr.msk.bf16.mxu1 %vm3890_vm0, %v3889_v1 }
 0x12e   : > { %3473 = vmatmul.mubr.msk.bf16.gmra.mrb[8].mxu0 %vm422_vm2, %v2110_v33 }
 0x12f   : > { %3476 = vmatprep.mubr.msk.bf16.mxu0 %vm3890_vm0, %v3889_v1 }
 0x134   : > { %3307 = vmatmul.mubr.msk.bf16.gmra.mrb[32].mxu1 %vm422_vm2, %v3862_v34 }
 0x135   : > { %3332 = vmatprep.mubr.msk.bf16.mxu1 %vm3890_vm0, %v3889_v1 }
 0x136   : > { %3477 = vmatmul.mubr.msk.bf16.gmra.mrb[12].mxu0 %vm422_vm2, %v2112_v55 }
 0x137   : > { %3480 = vmatprep.mubr.msk.bf16.mxu0 %vm3890_vm0, %v3889_v1 }
 0x13c   : > { %3333 = vmatmul.mubr.msk.bf16.vlgmr.msra.gmra.mrb[20].mxu1 %vm422_vm2, %v1210_v17  ;;  %v2315_v17 = vpop.permute.xlu1 %2314 }
 0x13d   : > { %3336 = vmatprep.mubr.msk.bf16.mxu1 %vm3890_vm0, %v3889_v1 }
 0x13e   : > { %3481 = vmatmul.mubr.msk.bf16.gmra.mrb[16].mxu0 %vm422_vm2, %v2114_v43 }
 0x13f   : > { %3484 = vmatprep.mubr.msk.bf16.mxu0 %vm3890_vm0, %v3889_v1 }
 0x140   : > { %v2325_v56 = vpop.permute.xlu1 %2324 }
 0x144   : > { %3337 = vmatmul.mubr.msk.bf16.gmra.mrb[24].mxu1 %vm422_vm2, %v1218_v62 }
 0x145   : > { %3340 = vmatprep.mubr.msk.bf16.mxu1 %vm3890_vm0, %v3889_v1 }
 0x146   : > { %3485 = vmatmul.mubr.msk.bf16.gmra.mrb[20].mxu0 %vm422_vm2, %v2116_v47 }
 0x147   : > { %3488 = vmatprep.mubr.msk.bf16.mxu0 %vm3890_vm0, %v3889_v1 }
 0x14c   : > { %3341 = vmatmul.mubr.msk.bf16.gmra.mrb[28].mxu1 %vm422_vm2, %v1226_v3 }
 0x14d   : > { %3344 = vmatprep.mubr.msk.bf16.mxu1 %vm3890_vm0, %v3889_v1 }
 0x14e   : > { %3489 = vmatmul.mubr.msk.bf16.gmra.mrb[24].mxu0 %vm422_vm2, %v2118_v0 }
 0x14f   : > { %3492 = vmatprep.mubr.msk.bf16.mxu0 %vm3890_vm0, %v3889_v1 }
 0x154   : > { %3345 = vmatmul.mubr.msk.bf16.gmra.mrb[32].mxu1 %vm422_vm2, %v1234_v9 }
 0x156   : > { %3493 = vmatmul.mubr.msk.bf16.gmra.mrb[28].mxu0 %vm422_vm2, %v2120_v12 }
 0x157   : > { %3496 = vmatprep.mubr.msk.bf16.mxu0 %vm3890_vm0, %v3889_v1 }
 0x15e   : > { %3497 = vmatmul.mubr.msk.bf16.gmra.mrb[32].mxu0 %vm422_vm2, %v2122_v38 }
 0x1c7   : > { %v1000_v58 = vpop.f32.mrb[0].mxu1 }
 0x1c8   : > { %v3276_v59 = vpop.f32.mrb[1].mxu1 }
 0x1c9   : > { %v1003_v60 = vpop.f32.mrb[2].mxu1 }
 0x1ca   : > { %v3277_v61 = vpop.f32.mrb[3].mxu1 }
 0x1cf   : > { %v1008_v39 = vpop.f32.mrb[4].mxu1 }
 0x1d0   : > { %v3280_v2 = vpop.f32.mrb[5].mxu1 }
 0x1d1   : > { %v1011_v5 = vpop.f32.mrb[6].mxu1  ;;  %v2330_v2 = vpop.permute.xlu0 %2329 }
 0x1d2   : > { %v3281_v28 = vpop.f32.mrb[7].mxu1 }
 0x1d7   : > { %v1016_v7 = vpop.f32.mrb[8].mxu1 }
 0x1d8   : > { %v3284_v10 = vpop.f32.mrb[9].mxu1 }
 0x1d9   : > { %v1019_v11 = vpop.f32.mrb[10].mxu1 }
 0x1da   : > { %v3285_v18 = vpop.f32.mrb[11].mxu1 }
 0x1df   : > { %v1024_v40 = vpop.f32.mrb[12].mxu1 }
 0x1e0   : > { %v3288_v1 = vpop.f32.mrb[13].mxu1 }
 0x1e1   : > { %v1027_v19 = vpop.f32.mrb[14].mxu1 }
 0x1e2   : > { %v3289_v15 = vpop.f32.mrb[15].mxu1 }
 0x1e7   : > { %v4549_v21 = vpop.f32.mrb[16].mxu1 }
 0x1e8   : > { %v3292_v22 = vpop.f32.mrb[17].mxu1 }
 0x1e9   : > { %v4551_v23 = vpop.f32.mrb[18].mxu1 }
 0x1ea   : > { %v3293_v24 = vpop.f32.mrb[19].mxu1 }
 0x1f1   : > { %v2190_v26 = vpop.f32.mrb[0].mxu0 }
 0x1f2   : > { %v4553_v27 = vadd.f32 %v2190_v26, %v1000_v58  ;;  %v3466_v29 = vpop.f32.mrb[1].mxu0 }
 0x1f3   : > { %v2193_v4 = vpop.f32.mrb[2].mxu0 }
 0x1f4   : > { %v4555_v48 = vadd.f32 %v2193_v4, %v1003_v60  ;;  %v3467_v6 = vpop.f32.mrb[3].mxu0  ;;  %v2387_v14 = vmul.f32 %v4553_v27, %v2300_v25 }
 0x1f6   : > { %v2388_v8 = vmul.f32 %v4555_v48, %v2305_v36  ;;  %v2428_v50 = vmul.f32 %v4553_v27, %v2387_v14 }
 0x1f8   : > { %v2429_v35 = vmul.f32 %v4555_v48, %v2388_v8  ;;  %v2405_v41 = vadd.f32 %v2388_v8, %v2387_v14  ;;  %v2340_v8 = vpop.permute.xlu0 %2339 }
 0x1f9   : > { %v2198_v42 = vpop.f32.mrb[4].mxu0 }
 0x1fa   : > { %v4559_v33 = vadd.f32 %v2198_v42, %v1008_v39  ;;  %v3470_v53 = vpop.f32.mrb[5].mxu0  ;;  %v2446_v45 = vadd.f32 %v2429_v35, %v2428_v50 }
 0x1fb   : > { %v2201_v34 = vpop.f32.mrb[6].mxu0 }
 0x1fc   : > { %v2389_v55 = vmul.f32 %v4559_v33, %v2310_v31  ;;  %v4563_v32 = vadd.f32 %v2201_v34, %v1011_v5  ;;  %v3471_v37 = vpop.f32.mrb[7].mxu0 }
 0x1fe   : > { %v2430_v43 = vmul.f32 %v4559_v33, %v2389_v55  ;;  %v2390_v44 = vmul.f32 %v4563_v32, %v2315_v17  ;;  %v2406_v52 = vadd.f32 %v2405_v41, %v2389_v55 }
 0x200   : > { %v2447_v30 = vadd.f32 %v2446_v45, %v2430_v43  ;;  %v2431_v46 = vmul.f32 %v4563_v32, %v2390_v44  ;;  %v2407_v3 = vadd.f32 %v2406_v52, %v2390_v44 }
 0x201   : > { %v2206_v62 = vpop.f32.mrb[8].mxu0 }
 0x202   : > { %v4569_v47 = vadd.f32 %v2206_v62, %v1016_v7  ;;  %v3474_v20 = vpop.f32.mrb[9].mxu0  ;;  %v2448_v57 = vadd.f32 %v2447_v30, %v2431_v46 }
 0x203   : > { %v2209_v13 = vpop.f32.mrb[10].mxu0  ;;  %v2350_v20 = vpop.permute.xlu0 %2349 }
 0x204   : > { %v2391_v51 = vmul.f32 %v4569_v47, %v2320_v63  ;;  %v4572_v54 = vadd.f32 %v2209_v13, %v1019_v11  ;;  %v3475_v0 = vpop.f32.mrb[11].mxu0  ;;  %v2335_v11 = vpop.permute.xlu1 %2334 }
 0x206   : > { %v2408_v49 = vadd.f32 %v2407_v3, %v2391_v51  ;;  %v2432_v9 = vmul.f32 %v4569_v47, %v2391_v51  ;;  %v2392_v12 = vmul.f32 %v4572_v54, %v2325_v56 }
 0x208   : > { %v2449_v16 = vadd.f32 %v2448_v57, %v2432_v9  ;;  %v2409_v38 = vadd.f32 %v2408_v49, %v2392_v12  ;;  %v2433_v58 = vmul.f32 %v4572_v54, %v2392_v12  ;;  %v2345_v35 = vpop.permute.xlu1 %2344 }
 0x209   : > { %v2214_v59 = vpop.f32.mrb[12].mxu0 }
 0x20a   : > { %v2450_v60 = vadd.f32 %v2449_v16, %v2433_v58  ;;  %v4577_v61 = vadd.f32 %v2214_v59, %v1024_v40  ;;  %v3478_v39 = vpop.f32.mrb[13].mxu0 }
 0x20b   : > { %v2217_v5 = vpop.f32.mrb[14].mxu0 }
 0x20c   : > { %v2393_v28 = vmul.f32 %v4577_v61, %v2330_v2  ;;  %v4580_v7 = vadd.f32 %v2217_v5, %v1027_v19  ;;  %v3479_v10 = vpop.f32.mrb[15].mxu0  ;;  %v2355_v0 = vpop.permute.xlu1 %2354 }
 0x20d   : > { %v2360_v10 = vpop.permute.xlu0 %2359 }
 0x20e   : > { %v2410_v18 = vadd.f32 %v2409_v38, %v2393_v28  ;;  %v2434_v1 = vmul.f32 %v4577_v61, %v2393_v28  ;;  %v2394_v15 = vmul.f32 %v4580_v7, %v2335_v11 }
 0x20f   : > { %v1342_v22 = vpop.f32.mrb[20].mxu1 }
 0x210   : > { %v2451_v24 = vadd.f32 %v2450_v60, %v2434_v1  ;;  %v2411_v25 = vadd.f32 %v2410_v18, %v2394_v15  ;;  %v2435_v40 = vmul.f32 %v4580_v7, %v2394_v15  ;;  %v3334_v26 = vpop.f32.mrb[21].mxu1 }
 0x211   : > { %v2222_v29 = vpop.f32.mrb[16].mxu0  ;;  %v1345_v4 = vpop.f32.mrb[22].mxu1 }
 0x212   : > { %v2452_v6 = vadd.f32 %v2451_v24, %v2435_v40  ;;  %v4586_v36 = vadd.f32 %v2222_v29, %v4549_v21  ;;  %v3482_v19 = vpop.f32.mrb[17].mxu0  ;;  %v3335_v31 = vpop.f32.mrb[23].mxu1 }
 0x213   : > { %v2225_v42 = vpop.f32.mrb[18].mxu0 }
 0x214   : > { %v2395_v14 = vmul.f32 %v4586_v36, %v2340_v8  ;;  %v4590_v53 = vadd.f32 %v2225_v42, %v4551_v23  ;;  %v3483_v34 = vpop.f32.mrb[19].mxu0 }
 0x216   : > { %v2412_v55 = vadd.f32 %v2411_v25, %v2395_v14  ;;  %v2436_v37 = vmul.f32 %v4586_v36, %v2395_v14  ;;  %v2396_v17 = vmul.f32 %v4590_v53, %v2345_v35 }
 0x217   : > { %v1350_v41 = vpop.f32.mrb[24].mxu1 }
 0x218   : > { %v2453_v50 = vadd.f32 %v2452_v6, %v2436_v37  ;;  %v2413_v21 = vadd.f32 %v2412_v55, %v2396_v17  ;;  %v2437_v43 = vmul.f32 %v4590_v53, %v2396_v17  ;;  %v3338_v44 = vpop.f32.mrb[25].mxu1  ;;  %v2370_v55 = vpop.permute.xlu0 %2369 }
 0x219   : > { %v2230_v45 = vpop.f32.mrb[20].mxu0  ;;  %v1353_v52 = vpop.f32.mrb[26].mxu1 }
 0x21a   : > { %v2454_v62 = vadd.f32 %v2453_v50, %v2437_v43  ;;  %v4595_v30 = vadd.f32 %v2230_v45, %v1342_v22  ;;  %v3486_v23 = vpop.f32.mrb[21].mxu0  ;;  %v3339_v46 = vpop.f32.mrb[27].mxu1 }
 0x21b   : > { %v2233_v63 = vpop.f32.mrb[22].mxu0  ;;  %v2365_v22 = vpop.permute.xlu1 %2364 }
 0x21c   : > { %v2397_v13 = vmul.f32 %v4595_v30, %v2350_v20  ;;  %v4598_v3 = vadd.f32 %v2233_v63, %v1345_v4  ;;  %v3487_v51 = vpop.f32.mrb[23].mxu0 }
 0x21d   : > { %v2380_v51 = vpop.permute.xlu0 %2379 }
 0x21e   : > { %v2414_v56 = vadd.f32 %v2413_v21, %v2397_v13  ;;  %v2438_v57 = vmul.f32 %v4595_v30, %v2397_v13  ;;  %v2398_v49 = vmul.f32 %v4598_v3, %v2355_v0 }
 0x21f   : > { %v1358_v9 = vpop.f32.mrb[28].mxu1  ;;  %v2375_v21 = vpop.permute.xlu1 %2374 }
 0x220   : > { %v2455_v12 = vadd.f32 %v2454_v62, %v2438_v57  ;;  %v2415_v16 = vadd.f32 %v2414_v56, %v2398_v49  ;;  %v2439_v38 = vmul.f32 %v4598_v3, %v2398_v49  ;;  %v3342_v58 = vpop.f32.mrb[29].mxu1 }
 0x221   : > { %v2238_v59 = vpop.f32.mrb[24].mxu0  ;;  %v1361_v60 = vpop.f32.mrb[30].mxu1 }
 0x222   : > { %v2456_v39 = vadd.f32 %v2455_v12, %v2439_v38  ;;  %v4603_v2 = vadd.f32 %v2238_v59, %v1350_v41  ;;  %v3490_v5 = vpop.f32.mrb[25].mxu0  ;;  %v3343_v28 = vpop.f32.mrb[31].mxu1 }
 0x223   : > { %v2241_v11 = vpop.f32.mrb[26].mxu0 }
 0x224   : > { %v2399_v18 = vmul.f32 %v4603_v2, %v2360_v10  ;;  %v4606_v1 = vadd.f32 %v2241_v11, %v1353_v52  ;;  %v3491_v15 = vpop.f32.mrb[27].mxu0 }
 0x226   : > { %v2416_v24 = vadd.f32 %v2415_v16, %v2399_v18  ;;  %v2440_v25 = vmul.f32 %v4603_v2, %v2399_v18  ;;  %v2400_v40 = vmul.f32 %v4606_v1, %v2365_v22 }
 0x227   : > { %v1366_v26 = vpop.f32.mrb[32].mxu1 }
 0x228   : > { %v2457_v29 = vadd.f32 %v2456_v39, %v2440_v25  ;;  %v2417_v4 = vadd.f32 %v2416_v24, %v2400_v40  ;;  %v2441_v6 = vmul.f32 %v4606_v1, %v2400_v40  ;;  %v3346_v19 = vpop.f32.mrb[33].mxu1 }
 0x229   : > { %v2246_v31 = vpop.f32.mrb[28].mxu0  ;;  %v1369_v8 = vpop.f32.mrb[34].mxu1 }
 0x22a   : > { %v2458_v42 = vadd.f32 %v2457_v29, %v2441_v6  ;;  %v4611_v14 = vadd.f32 %v2246_v31, %v1358_v9  ;;  %v3494_v34 = vpop.f32.mrb[29].mxu0  ;;  %v3347_v35 = vpop.f32.mrb[35].mxu1 }
 0x22b   : > { %v2249_v37 = vpop.f32.mrb[30].mxu0  ;;  %v2385_v9 = vpop.permute.xlu1 %2384 }
 0x22c   : > { %v2401_v17 = vmul.f32 %v4611_v14, %v2370_v55  ;;  %v4614_v41 = vadd.f32 %v2249_v37, %v1361_v60  ;;  %v3495_v50 = vpop.f32.mrb[31].mxu0 }
 0x22e   : > { %v2418_v43 = vadd.f32 %v2417_v4, %v2401_v17  ;;  %v2442_v44 = vmul.f32 %v4611_v14, %v2401_v17  ;;  %v2402_v45 = vmul.f32 %v4614_v41, %v2375_v21  ;;  %v3053_v21 = vld [vmem:[%s257_s11 + $0x10] sm:$0xff]  }
 0x230   : > { %v2459_v52 = vadd.f32 %v2458_v42, %v2442_v44  ;;  %v2419_v62 = vadd.f32 %v2418_v43, %v2402_v45  ;;  %v2443_v23 = vmul.f32 %v4614_v41, %v2402_v45  ;;  %v3055_v43 = vld [vmem:[%s257_s11 + $0x20] sm:$0xff]   ;;  %v3057_v45 = vld [vmem:[%s257_s11 + $0x30] sm:$0xff]  }
 0x231   : > { %v2254_v46 = vpop.f32.mrb[32].mxu0 }
 0x232   : > { %v2460_v20 = vadd.f32 %v2459_v52, %v2443_v23  ;;  %v4619_v63 = vadd.f32 %v2254_v46, %v1366_v26  ;;  %v3498_v13 = vpop.f32.mrb[33].mxu0  ;;  %v2981_v46 = vunpack.c.l.bf16 %v3053_v21 }
 0x233   : > { %v2257_v0 = vpop.f32.mrb[34].mxu0 }
 0x234   : > { %v2403_v56 = vmul.f32 %v4619_v63, %v2380_v51  ;;  %v4622_v57 = vadd.f32 %v2257_v0, %v1369_v8  ;;  %v3499_v49 = vpop.f32.mrb[35].mxu0  ;;  %v2989_v51 = vunpack.c.l.bf16 %v3055_v43  ;;  %v3058_v0 = vld [vmem:[%s257_s11 + $0x38] sm:$0xff]  }
 0x236   : > { %v2420_v12 = vadd.f32 %v2419_v62, %v2403_v56  ;;  %v2444_v16 = vmul.f32 %v4619_v63, %v2403_v56  ;;  %v2404_v38 = vmul.f32 %v4622_v57, %v2385_v9  ;;  %v3059_v56 = vld [vmem:[%s257_s11 + $0x40] sm:$0xff]  }
 0x238   : > { %v2461_v58 = vadd.f32 %v2460_v20, %v2444_v16  ;;  %v2421_v59 = vadd.f32 %v2420_v12, %v2404_v38  ;;  %v2445_v60 = vmul.f32 %v4622_v57, %v2404_v38  ;;  %v2982_v20 = vunpack.c.h.bf16 %v3053_v21 }
 0x239   : > { %v2997_v12 = vunpack.c.l.bf16 %v3057_v45 }
 0x23a   : > { %v2422_v39 = vrot.slane %v2421_v59, 4  ;;  %v2462_v5 = vadd.f32 %v2461_v58, %v2445_v60 }
 0x23c   : > { %v2423_v28 = vadd.f32 %v2422_v39, %v2421_v59  ;;  %v2463_v10 = vrot.slane %v2462_v5, 4  ;;  %v2998_v59 = vunpack.c.h.bf16 %v3057_v45  ;;  %v3001_v39 = vunpack.c.l.bf16 %v3058_v0 }
 0x23e   : > { %v2424_v11 = vrot.slane %v2423_v28, 2  ;;  %v2464_v18 = vadd.f32 %v2463_v10, %v2462_v5  ;;  %v3002_v5 = vunpack.c.h.bf16 %v3058_v0  ;;  %v3006_v10 = vunpack.c.h.bf16 %v3059_v56 }
 0x240   : > { %v2425_v15 = vadd.f32 %v2424_v11, %v2423_v28  ;;  %v2465_v22 = vrot.slane %v2464_v18, 2  ;;  %v3005_v28 = vunpack.c.l.bf16 %v3059_v56 }
 0x242   : > { %v2426_v24 = vrot.slane %v2425_v15, 1  ;;  %v2466_v25 = vadd.f32 %v2465_v22, %v2464_v18 }
 0x244   : > { %v2427_v40 = vadd.f32 %v2426_v24, %v2425_v15  ;;  %v2467_v26 = vrot.slane %v2466_v25, 1 }
 0x246   : > { %v2468_v29 = vadd.f32 %v2467_v26, %v2466_v25  ;;  %v4627_v4 = vmul.f32 0.012345679, %v2427_v40 }
 0x248   : > { %v2470_v6 = vmul.f32 0.012345679, %v2468_v29  ;;  %v2471_v19 = vmul.f32 %v4627_v4, %v4627_v4  ;;  %v2477_v31 = vsub.f32 %v4563_v32, %v4627_v4  ;;  %v2478_v8 = vsub.f32 %v4569_v47, %v4627_v4 }
 0x249   : > { %v2479_v42 = vsub.f32 %v4572_v54, %v4627_v4  ;;  %v2480_v35 = vsub.f32 %v4577_v61, %v4627_v4  ;;  %v2481_v55 = vsub.f32 %v4580_v7, %v4627_v4  ;;  %v2482_v37 = vsub.f32 %v4586_v36, %v4627_v4 }
 0x24a   : > { %v2472_v34 = vsub.f32 %v2470_v6, %v2471_v19  ;;  %v2483_v32 = vsub.f32 %v4590_v53, %v4627_v4  ;;  %v2484_v47 = vsub.f32 %v4595_v30, %v4627_v4  ;;  %v2485_v54 = vsub.f32 %v4598_v3, %v4627_v4 }
 0x24b   : > { %v2486_v17 = vsub.f32 %v4603_v2, %v4627_v4  ;;  %v2487_v7 = vsub.f32 %v4606_v1, %v4627_v4  ;;  %v2488_v36 = vsub.f32 %v4611_v14, %v4627_v4  ;;  %v2489_v50 = vsub.f32 %v4614_v41, %v4627_v4  ;;  %v2972_v2 = vld [vmem:[%s257_s11] sm:$0xff]   ;;  %v3052_v1 = vld [vmem:[%s257_s11 + $0x8] sm:$0xff]   ;;  %v3054_v14 = vld [vmem:[%s257_s11 + $0x18] sm:$0xff]  }
 0x24c   : > { %v2473_v61 = vmax.f32 %v2472_v34, 0.0  ;;  %v2490_v53 = vsub.f32 %v4619_v63, %v4627_v4  ;;  %v2491_v30 = vsub.f32 %v4622_v57, %v4627_v4  ;;  %v2973_v44 = vunpack.c.l.bf16 %v2972_v2  ;;  %v3056_v41 = vld [vmem:[%s257_s11 + $0x28] sm:$0xff]  }
 0x24d   : > { %v2974_v52 = vunpack.c.h.bf16 %v2972_v2  ;;  %v2977_v62 = vunpack.c.l.bf16 %v3052_v1  ;;  %v2978_v23 = vunpack.c.h.bf16 %v3052_v1  ;;  %v2985_v63 = vunpack.c.l.bf16 %v3054_v14 }
 0x24e   : > { %v2492_v3 = vadd.f32 1e-05, %v2473_v61  ;;  %v2986_v13 = vunpack.c.h.bf16 %v3054_v14  ;;  %v2990_v57 = vunpack.c.h.bf16 %v3055_v43  ;;  %v2993_v49 = vunpack.c.l.bf16 %v3056_v41 }
 0x24f   : > { %v2994_v9 = vunpack.c.h.bf16 %v3056_v41  ;;  %v2474_v16 = vsub.f32 %v4553_v27, %v4627_v4  ;;  %v2475_v38 = vsub.f32 %v4555_v48, %v4627_v4  ;;  %v2476_v58 = vsub.f32 %v4559_v33, %v4627_v4 }
 0x250   : > { %3863 = vrsqrt.f32 %v2492_v3 }
 0x25a   : > { %v3864_v60 = vpop.eup %3863 }
 0x25b   : > { %v2494_v11 = vmul.f32 %v3864_v60, %v2474_v16  ;;  %v2495_v18 = vmul.f32 %v3864_v60, %v2475_v38  ;;  %v2496_v15 = vmul.f32 %v3864_v60, %v2476_v58  ;;  %v2497_v22 = vmul.f32 %v3864_v60, %v2477_v31 }
 0x25c   : > { %v2498_v24 = vmul.f32 %v3864_v60, %v2478_v8  ;;  %v2499_v25 = vmul.f32 %v3864_v60, %v2479_v42  ;;  %v2500_v40 = vmul.f32 %v3864_v60, %v2480_v35  ;;  %v2501_v27 = vmul.f32 %v3864_v60, %v2481_v55 }
 0x25d   : > { %v2502_v26 = vmul.f32 %v3864_v60, %v2482_v37  ;;  %v2503_v29 = vmul.f32 %v3864_v60, %v2483_v32  ;;  %v2504_v48 = vmul.f32 %v3864_v60, %v2484_v47  ;;  %v2505_v6 = vmul.f32 %v3864_v60, %v2485_v54 }
 0x25e   : > { %v2506_v19 = vmul.f32 %v3864_v60, %v2486_v17  ;;  %v2507_v33 = vmul.f32 %v3864_v60, %v2487_v7  ;;  %v2508_v4 = vmul.f32 %v3864_v60, %v2488_v36  ;;  %v2509_v34 = vmul.f32 %v3864_v60, %v2489_v50 }
 0x25f   : > { %v2510_v61 = vmul.f32 %v3864_v60, %v2490_v53  ;;  %v2511_v3 = vmul.f32 %v3864_v60, %v2491_v30  ;;  %v2548_v2 = vadd.f32 %v2973_v44, %v2494_v11  ;;  %v2549_v1 = vadd.f32 %v2974_v52, %v2495_v18 }
 0x260   : > { %v2550_v21 = vadd.f32 %v2977_v62, %v2496_v15  ;;  %v2551_v14 = vadd.f32 %v2978_v23, %v2497_v22  ;;  %v2552_v31 = vadd.f32 %v2981_v46, %v2498_v24  ;;  %v2553_v8 = vadd.f32 %v2982_v20, %v2499_v25 }
 0x261   : > { %v2554_v42 = vadd.f32 %v2985_v63, %v2500_v40  ;;  %v2555_v35 = vadd.f32 %v2986_v13, %v2501_v27  ;;  %v2556_v55 = vadd.f32 %v2989_v51, %v2502_v26  ;;  %v2557_v37 = vadd.f32 %v2990_v57, %v2503_v29 }
 0x262   : > { %v2558_v32 = vadd.f32 %v2993_v49, %v2504_v48  ;;  %v2559_v47 = vadd.f32 %v2994_v9, %v2505_v6  ;;  %v2560_v54 = vadd.f32 %v2997_v12, %v2506_v19  ;;  %v2561_v17 = vadd.f32 %v2998_v59, %v2507_v33 }
 0x263   : > { %v2562_v7 = vadd.f32 %v3001_v39, %v2508_v4  ;;  %v2563_v36 = vadd.f32 %v3002_v5, %v2509_v34  ;;  %v2564_v50 = vadd.f32 %v3005_v28, %v2510_v61  ;;  %v2565_v53 = vadd.f32 %v3006_v10, %v2511_v3 }
 0x264   : > { %v3010_v30 = vpack.c.bf16 %v2549_v1, %v2548_v2  ;;  %v3015_v43 = vpack.c.bf16 %v2551_v14, %v2550_v21  ;;  %v3020_v44 = vpack.c.bf16 %v2553_v8, %v2552_v31  ;;  %v3025_v41 = vpack.c.bf16 %v2555_v35, %v2554_v42 }
 0x265   : > { %v3030_v45 = vpack.c.bf16 %v2557_v37, %v2556_v55  ;;  %v3035_v52 = vpack.c.bf16 %v2559_v47, %v2558_v32  ;;  %v3040_v62 = vpack.c.bf16 %v2561_v17, %v2560_v54  ;;  %v3045_v23 = vpack.c.bf16 %v2563_v36, %v2562_v7 }
 0x266   : > { %3011 = vst [vmem:[%s265_s14] sm:$0xff] %v3010_v30   ;;  %3060 = vst [vmem:[%s265_s14 + $0x8] sm:$0xff] %v3015_v43   ;;  %v3050_v46 = vpack.c.bf16 %v2565_v53, %v2564_v50 }
 0x267   : > { %3061 = vst [vmem:[%s265_s14 + $0x10] sm:$0xff] %v3020_v44   ;;  %3062 = vst [vmem:[%s265_s14 + $0x18] sm:$0xff] %v3025_v41  }
 0x268   : > { %3063 = vst [vmem:[%s265_s14 + $0x20] sm:$0xff] %v3030_v45   ;;  %3064 = vst [vmem:[%s265_s14 + $0x28] sm:$0xff] %v3035_v52  }
 0x269   : > { %3065 = vst [vmem:[%s265_s14 + $0x30] sm:$0xff] %v3040_v62   ;;  %3066 = vst [vmem:[%s265_s14 + $0x38] sm:$0xff] %v3045_v23  }
 0x26a   : > { %3067 = vst [vmem:[%s265_s14 + $0x40] sm:$0xff] %v3050_v46  }
 0x26b PF: > { %s14_s17 = sadd.s32 1, %s3887_s17   ;;  %s4692_s15 = smov %s3883_s16 }
 0x26c   : > { %p11_p5 = scmp.ge.s32.totalorder %s14_s17, 4   ;;  %s4693_s16 = smov %s4695_s18 }
 0x26e   :  { %13 = sbr.rel (!%p11_p5) target bundleno = 2 (0x2), region = 80 }

// kernel: nlayer_res_discriminator_forward.14
= control target key start
LH: loop header
LB: loop body
LE: loop exit
PB: predicated region body
PF: predicated region fallthrough
CT: control target
= control target key end

     0   :  { %s1247_s12 = smov 0   ;;  %s1249_s13 = smov 0   ;;  %s1441_s0 = inlined_call_operand.vmem [shape: bf16[2,72,64], index: 0, kind: input, shape index: {}]   ;;  %s1442_s1 = inlined_call_operand.vmem [shape: bf16[4,64,128], index: 1, kind: input, shape index: {}]   ;;  %s1443_s2 = inlined_call_operand.vmem [shape: f32[40,1], index: 2, kind: input, shape index: {}]   ;;  %s1444_s3 = inlined_call_operand.vmem [shape: bf16[2,40,128], index: 3, kind: output, shape index: {}]  }
   0x1   :  { %s1251_s14 = smov 0  }
   0x2 LB: > { %s22_s15 = sadd.s32 1, %s1218_s13  ;;  %p916_p0 = scmp.ge.s32.totalorder %s1222_s14, 1  ;;  %s1222_s14 = sphi %s1251_s14, %s13_s14   ;;  %s1218_s13 = sphi %s1249_s13, %s1446_s13   ;;  %s1214_s12 = sphi %s1247_s12, %s1445_s12  }
   0x3   : > { %p23_p1 = scmp.ge.s32.totalorder %s22_s15, 2  ;;  %p160_p2 = scmp.lt.s32.totalorder %s1222_s14, 3 }
   0x5   : > { %s1448_s15 = smov (%p23_p1, %s22_s15), 0  ;;  %p161_p3 = pnand %p916_p0, %p160_p2 }
   0x6   : > { %v1172_v0 = vld [vmem:[%s1442_s1 + $0x20] sm:$0xff] (!%p161_p3)   ;;  %v1224_v1 = vmov (!%p161_p3), 0.0   ;;  %v1174_v3 = vld [vmem:[%s1442_s1 + $0x28] sm:$0xff] (!%p161_p3)   ;;  %vm1225_vm0 = vmmov (!%p161_p3), 0   ;;  %p191_p4 = scmp.lt.s32.totalorder (!%p161_p3), %s1214_s12, 1  ;;  %v1176_v5 = vld [vmem:[%s1442_s1 + $0x30] sm:$0xff] (!%p161_p3)  }
   0x7   : > { %164 = sbr.rel (%p161_p3) target bundleno = 329 (0x149), region = 32  ;;  %1032 = vmatprep.subr.bf16.mxu1 (!%p161_p3), %v1224_v1  ;;  %1072 = vmatprep.subr.bf16.mxu0 (!%p161_p3), %v1224_v1  ;;  %v1173_v2 = vld [vmem:[%s1442_s1 + $0x40] sm:$0xff] (!%p161_p3)   ;;  %v1175_v4 = vld [vmem:[%s1442_s1 + $0x48] sm:$0xff] (!%p161_p3)   ;;  %v1226_v6 = vmov (!%p161_p3), 0   ;;  %v1177_v7 = vld [vmem:[%s1442_s1 + $0x50] sm:$0xff] (!%p161_p3)   ;;  %vm295_vm2 = vcmask (!%p161_p3), 523264  }
   0x8   : > { %1033 = vmatpush3.bf16.msra.mxu1 (!%p161_p3), %v1172_v0  ;;  %1040 = vmatprep.mubr.msk.bf16.mxu1 (!%p161_p3), %vm1225_vm0, %v1224_v1  ;;  %v1178_v11 = vld [vmem:[%s1442_s1 + $0x38] sm:$0xff] (!%p161_p3)   ;;  %vm247_vm1 = vsmask.f32 (!%p161_p3), 7424  ;;  %v1183_v21 = vld [vmem:[%s1442_s1] sm:$0xff] (!%p161_p3)   ;;  %v1185_v31 = vld [vmem:[%s1442_s1 + $0x8] sm:$0xff] (!%p161_p3)  }
   0x9   : > { %1073 = vmatpush3.bf16.msra.mxu0 (!%p161_p3), %v1173_v2  ;;  %1034 = vmatprep.subr.bf16.mxu1 (!%p161_p3), %v1224_v1  ;;  %v1179_v14 = vld [vmem:[%s1442_s1 + $0x58] sm:$0xff] (!%p161_p3)   ;;  %v1184_v22 = vld [vmem:[%s1442_s1 + $0x60] sm:$0xff] (!%p161_p3)   ;;  %v1186_v32 = vld [vmem:[%s1442_s1 + $0x68] sm:$0xff] (!%p161_p3)  }
   0xa   : > { %1074 = vmatprep.subr.bf16.mxu0 (!%p161_p3), %v1224_v1  ;;  %1080 = vmatprep.mubr.msk.bf16.mxu0 (!%p161_p3), %vm1225_vm0, %v1224_v1  ;;  %v705_v36 = vld [vmem:[%s1443_s2] sm:$0xff] (!%p161_p3)  ;;  %v1190_v37 = vld [vmem:[%s1442_s1 + $0x70] sm:$0xff] (!%p161_p3)   ;;  %v1193_v43 = vld [vmem:[%s1442_s1 + $0x78] sm:$0xff] (!%p161_p3)  }
   0xb   : > { %1170 = vset.pattern.permute.xlu0 (!%p161_p3), %v1226_v6  ;;  %1171 = vset.pattern.permute.xlu1 (!%p161_p3), %v1226_v6  ;;  %v707_v39 = vld [vmem:[%s1443_s2 + $0x10] sm:$0xff] (!%p161_p3)  ;;  %v706_v46 = vld [vmem:[%s1443_s2 + $0x8] sm:$0xff] (!%p161_p3)  ;;  %v1192_v47 = vld [vmem:[%s1442_s1 + $0x18] sm:$0xff] (!%p161_p3)  }
   0xc   : > { %1035 = vmatpush3.bf16.msra.mxu1 (!%p161_p3), %v1174_v3  ;;  %712 = vperm.xlu0 (!%p161_p3), %1170, %v705_v36   ;;  %v1189_v41 = vld [vmem:[%s1442_s1 + $0x10] sm:$0xff] (!%p161_p3)   ;;  %v708_v48 = vld [vmem:[%s1443_s2 + $0x18] sm:$0xff] (!%p161_p3)  ;;  %v709_v54 = vld [vmem:[%s1443_s2 + $0x20] sm:$0xff] (!%p161_p3) }
   0xd   : > { %1075 = vmatpush3.bf16.msra.mxu0 (!%p161_p3), %v1175_v4  ;;  %1036 = vmatprep.subr.bf16.mxu1 (!%p161_p3), %v1224_v1 }
   0xe   : > { %s1450_s12 = smov (!%p191_p4, %s1214_s12), 1  ;;  %1076 = vmatprep.subr.bf16.mxu0 %v1224_v1  ;;  %722 = vperm.xlu1 %1171, %v707_v39  }
   0xf   : > { %s1141_s26 = smul.u32 36, %s1450_s12 }
  0x10   : > { %1037 = vmatpush3.bf16.msra.mxu1 %v1176_v5  ;;  %717 = vperm.xlu0 %1170, %v706_v46  }
  0x11   : > { %s1299_s4 = scalar_lea.vmem %s1441_s0, %s1141_s26  ;;  %1077 = vmatpush3.bf16.msra.mxu0 %v1177_v7  ;;  %1038 = vmatprep.subr.bf16.mxu1 %v1224_v1 }
  0x12   : > { %v209_v8 = vld [vmem:[%s1299_s4] sm:$0xf]  ;;  %v210_v9 = vld [vmem:[%s1299_s4 + $0x4] sm:$0xf]  ;;  %v211_v10 = vld [vmem:[%s1299_s4 + $0x8] sm:$0xf]  ;;  %1078 = vmatprep.subr.bf16.mxu0 %v1224_v1  ;;  %727 = vperm.xlu1 %1171, %v708_v48  }
  0x13   : > { %v212_v12 = vld [vmem:[%s1299_s4 + $0xc] sm:$0xf]  ;;  %v1308_v13 = vcombine.low %v209_v8, %v210_v9  ;;  %v953_v20 = vcombine.low %v210_v9, %v211_v10  ;;  %v1327_v23 = vld [vmem:[%s1299_s4 + $0x10] sm:$0xf]  ;;  %v222_v24 = vld [vmem:[%s1299_s4 + $0x14] sm:$0x1] }
  0x14   : > { %v1314_v15 = vcombine.low %v211_v10, %v212_v12  ;;  %1039 = vmatpush3.bf16.msra.mxu1 %v1178_v11  ;;  %v929_v26 = vcombine.low %v1327_v23, %v222_v24  ;;  %v954_v35 = vcombine.low %v212_v12, %v1327_v23  ;;  %v1194_v38 = vld [vmem:[%s1299_s4 + $0x4] sm:$0xff]   ;;  %v1195_v44 = vld [vmem:[%s1299_s4 + $0xc] sm:$0xff]   ;;  %v1191_v49 = vld [vmem:[%s1299_s4 + $0x14] ss:$0 sps:$4 sm:$0xff]   ;;  %732 = vperm.xlu0 %1170, %v709_v54  }
  0x15   : > { %v249_v16 = vshrl.u32 %v1308_v13, 16  ;;  %v251_v17 = vshll.u32 %v1308_v13, 16  ;;  %1079 = vmatpush3.bf16.msra.mxu0 %v1179_v14  ;;  %1052 = vmatprep.subr.bf16.mxu1 %v1224_v1  ;;  %v591_v45 = vshll.u32 %v1194_v38, 16  ;;  %v589_v51 = vshrl.u32 %v1194_v38, 16  ;;  %v1196_v57 = vld [vmem:[%s1299_s4 + $0x14] sm:$0x1f]  }
  0x16   : > { %v256_v18 = vshll.u32 %v1314_v15, 16  ;;  %v260_v27 = vshrl.u32 %v1314_v15, 16  ;;  %1092 = vmatprep.subr.bf16.mxu0 %v1224_v1  ;;  %v264_v29 = vshll.u32 %v929_v26, 16  ;;  %v268_v42 = vshrl.u32 %v929_v26, 16  ;;  %s1142_s4 = smul.u32 20, %s1450_s12 }
  0x17   : > { %v253_v19 = vrot.slane %v251_v17, 1  ;;  %v593_v52 = vrot.slane %v591_v45, 1  ;;  %v596_v53 = vshll.u32 %v1195_v44, 16  ;;  %v600_v59 = vshrl.u32 %v1195_v44, 16 }
  0x18   : > { %v258_v25 = vrot.slane %v256_v18, 1  ;;  %1081 = vmatmul.mubr.msk.bf16.vlgmr.msra.gmra.mrb[0].mxu0 %vm295_vm2, %v953_v20  ;;  %v266_v33 = vrot.slane %v264_v29, 1  ;;  %v604_v60 = vshll.u32 %v1196_v57, 16  ;;  %v608_v0 = vshrl.u32 %v1196_v57, 16  ;;  %s207_s19 = scalar_lea.vmem %s1444_s3, %s1142_s4 }
  0x19   : > { %v254_v28 = vor.u32 %v253_v19, %v249_v16  ;;  %1093 = vmatpush3.bf16.msra.mxu0 %v1184_v22  ;;  %1084 = vmatprep.mubr.msk.bf16.mxu0 %vm1225_vm0, %v1224_v1  ;;  %v594_v55 = vor.u32 %v593_v52, %v589_v51  ;;  %v598_v56 = vrot.slane %v596_v53, 1  ;;  %v937_v3 = vcombine.low %v1327_v23, %v1327_v23 }
  0x1a   : > { %1094 = vmatprep.subr.bf16.mxu0 %v1224_v1  ;;  %v262_v34 = vor.u32 %v260_v27, %v258_v25  ;;  %v270_v50 = vor.u32 %v268_v42, %v266_v33  ;;  %v606_v62 = vrot.slane %v604_v60, 1 }
  0x1b   : > { %v259_v30 = vsel %vm247_vm1, %v254_v28, %v258_v25  ;;  %v599_v58 = vsel %vm247_vm1, %v594_v55, %v598_v56  ;;  %v602_v61 = vor.u32 %v600_v59, %v598_v56 }
  0x1c   : > { %1041 = vmatmul.mubr.msk.bf16.vlgmr.msra.gmra.mrb[0].mxu1 %vm295_vm2, %v259_v30  ;;  %v267_v40 = vsel %vm247_vm1, %v262_v34, %v266_v33  ;;  %v610_v2 = vor.u32 %v608_v0, %v606_v62 }
  0x1d   : > { %1053 = vmatpush3.bf16.msra.mxu1 %v1183_v21  ;;  %1044 = vmatprep.mubr.msk.bf16.mxu1 %vm1225_vm0, %v1224_v1  ;;  %v607_v63 = vsel %vm247_vm1, %v602_v61, %v606_v62 }
  0x1e   : > { %1054 = vmatprep.subr.bf16.mxu1 %v1224_v1  ;;  %1095 = vmatpush3.bf16.msra.mxu0 %v1186_v32 }
  0x1f   : > { %1096 = vmatprep.subr.bf16.mxu0 %v1224_v1 }
  0x20   : > { %1085 = vmatmul.mubr.msk.bf16.gmra.mrb[4].mxu0 %vm295_vm2, %v954_v35 }
  0x21   : > { %1055 = vmatpush3.bf16.msra.mxu1 %v1185_v31  ;;  %1088 = vmatprep.mubr.msk.bf16.mxu0 %vm1225_vm0, %v1224_v1 }
  0x22   : > { %1056 = vmatprep.subr.bf16.mxu1 %v1224_v1  ;;  %1097 = vmatpush3.bf16.msra.mxu0 %v1190_v37 }
  0x23   : > { %1098 = vmatprep.subr.bf16.mxu0 %v1224_v1 }
  0x24   : > { %1045 = vmatmul.mubr.msk.bf16.gmra.mrb[4].mxu1 %vm295_vm2, %v267_v40 }
  0x25   : > { %1057 = vmatpush3.bf16.msra.mxu1 %v1189_v41  ;;  %1048 = vmatprep.mubr.msk.bf16.mxu1 %vm1225_vm0, %v1224_v1 }
  0x26   : > { %1058 = vmatprep.subr.bf16.mxu1 %v1224_v1  ;;  %1099 = vmatpush3.bf16.msra.mxu0 %v1193_v43 }
  0x28   : > { %1089 = vmatmul.mubr.msk.bf16.gmra.mrb[8].mxu0 %vm295_vm2, %v1191_v49 }
  0x29   : > { %1059 = vmatpush3.bf16.msra.mxu1 %v1192_v47  ;;  %1100 = vmatprep.mubr.msk.bf16.mxu0 %vm1225_vm0, %v1224_v1 }
  0x2c   : > { %1049 = vmatmul.mubr.msk.bf16.gmra.mrb[8].mxu1 %vm295_vm2, %v270_v50 }
  0x2d   : > { %1060 = vmatprep.mubr.msk.bf16.mxu1 %vm1225_vm0, %v1224_v1 }
  0x30   : > { %1101 = vmatmul.mubr.msk.bf16.vlgmr.msra.gmra.mrb[0].mxu0 %vm295_vm2, %v599_v58 }
  0x31   : > { %1104 = vmatprep.mubr.msk.bf16.mxu0 %vm1225_vm0, %v1224_v1 }
  0x34   : > { %1061 = vmatmul.mubr.msk.bf16.vlgmr.msra.gmra.mrb[0].mxu1 %vm295_vm2, %v1308_v13 }
  0x35   : > { %1064 = vmatprep.mubr.msk.bf16.mxu1 %vm1225_vm0, %v1224_v1 }
  0x38   : > { %1105 = vmatmul.mubr.msk.bf16.gmra.mrb[4].mxu0 %vm295_vm2, %v607_v63 }
  0x39   : > { %1108 = vmatprep.mubr.msk.bf16.mxu0 %vm1225_vm0, %v1224_v1 }
  0x3c   : > { %1065 = vmatmul.mubr.msk.bf16.gmra.mrb[4].mxu1 %vm295_vm2, %v1314_v15 }
  0x3d   : > { %1068 = vmatprep.mubr.msk.bf16.mxu1 %vm1225_vm0, %v1224_v1 }
  0x40   : > { %1109 = vmatmul.mubr.msk.bf16.gmra.mrb[8].mxu0 %vm295_vm2, %v610_v2 }
  0x44   : > { %1069 = vmatmul.mubr.msk.bf16.gmra.mrb[8].mxu1 %vm295_vm2, %v937_v3 }
  0x8b   : > { %v713_v4 = vpop.permute.xlu0 %712 }
  0x8d   : > { %v723_v5 = vpop.permute.xlu1 %722 }
  0x8f   : > { %v718_v7 = vpop.permute.xlu0 %717 }
  0x91   : > { %v728_v22 = vpop.permute.xlu1 %727 }
  0x93   : > { %v733_v37 = vpop.permute.xlu0 %732 }
 0x103   : > { %v678_v6 = vpop.f32.mrb[0].mxu0 }
 0x104   : > { %v1102_v9 = vpop.f32.mrb[1].mxu0 }
 0x105   : > { %v681_v12 = vpop.f32.mrb[2].mxu0 }
 0x106   : > { %v1103_v1 = vpop.f32.mrb[3].mxu0 }
 0x107   : > { %v427_v8 = vpop.f32.mrb[0].mxu1 }
 0x108   : > { %v1418_v10 = vadd.f32 %v678_v6, %v427_v8  ;;  %v1062_v11 = vpop.f32.mrb[1].mxu1 }
 0x109   : > { %v430_v13 = vpop.f32.mrb[2].mxu1 }
 0x10a   : > { %v1420_v14 = vadd.f32 %v681_v12, %v430_v13  ;;  %v1063_v15 = vpop.f32.mrb[3].mxu1  ;;  %v735_v16 = vmul.f32 %v1418_v10, %v713_v4 }
 0x10b   : > { %v686_v21 = vpop.f32.mrb[4].mxu0 }
 0x10c   : > { %v736_v17 = vmul.f32 %v1420_v14, %v718_v7  ;;  %v750_v19 = vmul.f32 %v1418_v10, %v735_v16  ;;  %v1106_v24 = vpop.f32.mrb[5].mxu0 }
 0x10d   : > { %v689_v28 = vpop.f32.mrb[6].mxu0 }
 0x10e   : > { %v740_v18 = vadd.f32 %v736_v17, %v735_v16  ;;  %v751_v20 = vmul.f32 %v1420_v14, %v736_v17  ;;  %v1107_v30 = vpop.f32.mrb[7].mxu0 }
 0x10f   : > { %v435_v23 = vpop.f32.mrb[4].mxu1 }
 0x110   : > { %v755_v25 = vadd.f32 %v751_v20, %v750_v19  ;;  %v1114_v26 = vadd.f32 %v686_v21, %v435_v23  ;;  %v1066_v27 = vpop.f32.mrb[5].mxu1 }
 0x111   : > { %v438_v29 = vpop.f32.mrb[6].mxu1 }
 0x112   : > { %v737_v31 = vmul.f32 %v1114_v26, %v723_v5  ;;  %v1115_v32 = vadd.f32 %v689_v28, %v438_v29  ;;  %v1067_v33 = vpop.f32.mrb[7].mxu1 }
 0x113   : > { %v694_v41 = vpop.f32.mrb[8].mxu0 }
 0x114   : > { %v752_v34 = vmul.f32 %v1114_v26, %v737_v31  ;;  %v738_v35 = vmul.f32 %v1115_v32, %v728_v22  ;;  %v741_v36 = vadd.f32 %v740_v18, %v737_v31  ;;  %v1110_v43 = vpop.f32.mrb[9].mxu0 }
 0x115   : > { %v697_v47 = vpop.f32.mrb[10].mxu0 }
 0x116   : > { %v742_v38 = vadd.f32 %v741_v36, %v738_v35  ;;  %v753_v39 = vmul.f32 %v1115_v32, %v738_v35  ;;  %v756_v40 = vadd.f32 %v755_v25, %v752_v34  ;;  %v1111_v49 = vpop.f32.mrb[11].mxu0 }
 0x117   : > { %v443_v42 = vpop.f32.mrb[8].mxu1 }
 0x118   : > { %v757_v44 = vadd.f32 %v756_v40, %v753_v39  ;;  %v1116_v45 = vadd.f32 %v694_v41, %v443_v42  ;;  %v1070_v46 = vpop.f32.mrb[9].mxu1 }
 0x119   : > { %v446_v48 = vpop.f32.mrb[10].mxu1 }
 0x11a   : > { %v739_v50 = vmul.f32 %v1116_v45, %v733_v37  ;;  %v1071_v51 = vpop.f32.mrb[11].mxu1 }
 0x11c   : > { %v743_v52 = vadd.f32 %v742_v38, %v739_v50  ;;  %v754_v53 = vmul.f32 %v1116_v45, %v739_v50 }
 0x11e   : > { %v744_v54 = vrot.slane %v743_v52, 4  ;;  %v758_v55 = vadd.f32 %v757_v44, %v754_v53 }
 0x120   : > { %v745_v56 = vadd.f32 %v744_v54, %v743_v52  ;;  %v759_v57 = vrot.slane %v758_v55, 4 }
 0x122   : > { %v746_v58 = vrot.slane %v745_v56, 2  ;;  %v760_v59 = vadd.f32 %v759_v57, %v758_v55 }
 0x124   : > { %v747_v60 = vadd.f32 %v746_v58, %v745_v56  ;;  %v761_v61 = vrot.slane %v760_v59, 2 }
 0x126   : > { %v748_v62 = vrot.slane %v747_v60, 1  ;;  %v762_v63 = vadd.f32 %v761_v61, %v760_v59 }
 0x128   : > { %v749_v0 = vadd.f32 %v748_v62, %v747_v60  ;;  %v763_v2 = vrot.slane %v762_v63, 1 }
 0x12a   : > { %v764_v3 = vadd.f32 %v763_v2, %v762_v63  ;;  %v765_v4 = vmul.f32 0.04, %v749_v0 }
 0x12c   : > { %v766_v5 = vmul.f32 0.04, %v764_v3  ;;  %v767_v6 = vmul.f32 %v765_v4, %v765_v4  ;;  %v770_v7 = vsub.f32 %v1418_v10, %v765_v4  ;;  %v771_v8 = vsub.f32 %v1420_v14, %v765_v4 }
 0x12d   : > { %v772_v9 = vsub.f32 %v1114_v26, %v765_v4  ;;  %v773_v11 = vsub.f32 %v1115_v32, %v765_v4  ;;  %v774_v12 = vsub.f32 %v1116_v45, %v765_v4 }
 0x12e   : > { %v768_v13 = vsub.f32 %v766_v5, %v767_v6 }
 0x130   : > { %v769_v1 = vmax.f32 %v768_v13, 0.0 }
 0x132   : > { %v775_v15 = vadd.f32 1e-05, %v769_v1 }
 0x134   : > { %1198 = vrsqrt.f32 %v775_v15 }
 0x13e   : > { %v1199_v16 = vpop.eup %1198 }
 0x13f   : > { %v777_v17 = vmul.f32 %v1199_v16, %v770_v7  ;;  %v778_v18 = vmul.f32 %v1199_v16, %v771_v8  ;;  %v779_v19 = vmul.f32 %v1199_v16, %v772_v9  ;;  %v780_v20 = vmul.f32 %v1199_v16, %v773_v11 }
 0x140   : > { %v781_v21 = vmul.f32 %v1199_v16, %v774_v12 }
 0x141   : > { %v782_v22 = vmul.f32 0.2, %v777_v17  ;;  %v783_v23 = vmul.f32 0.2, %v778_v18  ;;  %v784_v24 = vmul.f32 0.2, %v779_v19 }
 0x142   : > { %v785_v10 = vmul.f32 0.2, %v780_v20  ;;  %v786_v25 = vmul.f32 0.2, %v781_v21 }
 0x143   : > { %v787_v14 = vmax.f32 %v777_v17, %v782_v22  ;;  %v788_v26 = vmax.f32 %v778_v18, %v783_v23  ;;  %v789_v27 = vmax.f32 %v779_v19, %v784_v24 }
 0x144   : > { %v790_v28 = vmax.f32 %v780_v20, %v785_v10  ;;  %v791_v29 = vmax.f32 %v781_v21, %v786_v25 }
 0x145   : > { %v996_v30 = vpack.c.bf16 %v788_v26, %v787_v14 }
 0x146   : > { %v992_v31 = vpack.c.bf16 %v791_v29, %v791_v29  ;;  %v1001_v32 = vpack.c.bf16 %v790_v28, %v789_v27 }
 0x147   : > { %997 = vst [vmem:[%s207_s19] sm:$0xff] %v996_v30  }
 0x148   : > { %1003 = vst [vmem:[%s207_s19 + $0x8] sm:$0xff] %v1001_v32   ;;  %817 = vst [vmem:[%s207_s19 + $0x10] sm:$0xf] %v992_v31 }
 0x149 PF: > { %s13_s14 = sadd.s32 1, %s1222_s14   ;;  %s1445_s12 = smov %s1218_s13 }
 0x14a   : > { %p10_p5 = scmp.ge.s32.totalorder %s13_s14, 4   ;;  %s1446_s13 = smov %s1448_s15 }
 0x14c   :  { %12 = sbr.rel (!%p10_p5) target bundleno = 2 (0x2), region = 68 }

// kernel: nlayer_res_discriminator_forward.15
= control target key start
LH: loop header
LB: loop body
LE: loop exit
PB: predicated region body
PF: predicated region fallthrough
CT: control target
= control target key end

     0   :  { %s1887_s12 = smov 0   ;;  %s1889_s13 = smov 0   ;;  %s2252_s0 = inlined_call_operand.vmem [shape: bf16[2,64,32], index: 0, kind: input, shape index: {}]   ;;  %s2253_s1 = inlined_call_operand.vmem [shape: bf16[9,32,128], index: 1, kind: input, shape index: {}]   ;;  %s2254_s2 = inlined_call_operand.vmem [shape: f32[40,1], index: 2, kind: input, shape index: {}]   ;;  %s2255_s3 = inlined_call_operand.vmem [shape: bf16[2,40,128], index: 3, kind: output, shape index: {}]  }
   0x1   :  { %s1891_s14 = smov 0  }
   0x2 LB: > { %s22_s15 = sadd.s32 1, %s1858_s13  ;;  %p1365_p0 = scmp.ge.s32.totalorder %s1862_s14, 1  ;;  %s1862_s14 = sphi %s1891_s14, %s13_s14   ;;  %s1858_s13 = sphi %s1889_s13, %s2257_s13   ;;  %s1854_s12 = sphi %s1887_s12, %s2256_s12  }
   0x3   : > { %p23_p1 = scmp.ge.s32.totalorder %s22_s15, 2  ;;  %p160_p2 = scmp.lt.s32.totalorder %s1862_s14, 3 }
   0x5   : > { %s2259_s15 = smov (%p23_p1, %s22_s15), 0  ;;  %p161_p3 = pnand %p1365_p0, %p160_p2 }
   0x6   : > { %v1801_v0 = vld [vmem:[%s2253_s1 + $0x10] sm:$0xff] (!%p161_p3)   ;;  %v1864_v1 = vmov (!%p161_p3), 0.0   ;;  %v1913_v2 = vld [vmem:[%s2253_s1 + $0x40] sm:$0xff] (!%p161_p3)   ;;  %v1803_v3 = vld [vmem:[%s2253_s1 + $0x18] sm:$0xff] (!%p161_p3)   ;;  %vm1865_vm0 = vmmov (!%p161_p3), 0   ;;  %p191_p4 = scmp.lt.s32.totalorder (!%p161_p3), %s1854_s12, 1 }
   0x7   : > { %164 = sbr.rel (%p161_p3) target bundleno = 392 (0x188), region = 32  ;;  %1534 = vmatprep.subr.bf16.mxu1 (!%p161_p3), %v1864_v1  ;;  %1598 = vmatprep.subr.bf16.mxu0 (!%p161_p3), %v1864_v1  ;;  %v1925_v4 = vld [vmem:[%s2253_s1 + $0x48] sm:$0xff] (!%p161_p3)   ;;  %vm275_vm1 = vcmask (!%p161_p3), 261120   ;;  %vm239_vm2 = vsmask.f32 (!%p161_p3), 7424  ;;  %v1807_v32 = vld [vmem:[%s2253_s1] sm:$0xff] (!%p161_p3)  }
   0x8   : > { %1535 = vmatpush3.bf16.msra.mxu1 (!%p161_p3), %v1801_v0  ;;  %1538 = vmatprep.mubr.msk.bf16.mxu1 (!%p161_p3), %vm1865_vm0, %v1864_v1  ;;  %v1811_v37 = vld [vmem:[%s2253_s1 + $0x50] sm:$0xff] (!%p161_p3)   ;;  %v1813_v44 = vld [vmem:[%s2253_s1 + $0x58] sm:$0xff] (!%p161_p3)   ;;  %v1814_v45 = vld [vmem:[%s2253_s1 + $0x8] sm:$0xff] (!%p161_p3)   ;;  %vm426_vm3 = vcmask (!%p161_p3), 1046528  }
   0x9   : > { %1599 = vmatpush3.bf16.msra.mxu0 (!%p161_p3), %v1913_v2  ;;  %1536 = vmatprep.subr.bf16.mxu1 (!%p161_p3), %v1864_v1  ;;  %v1816_v61 = vld [vmem:[%s2253_s1 + $0x60] sm:$0xff] (!%p161_p3)  }
   0xa   : > { %1600 = vmatprep.subr.bf16.mxu0 (!%p161_p3), %v1864_v1  ;;  %1602 = vmatprep.mubr.msk.bf16.mxu0 (!%p161_p3), %vm1865_vm0, %v1864_v1 }
   0xc   : > { %1537 = vmatpush3.bf16.msra.mxu1 (!%p161_p3), %v1803_v3 }
   0xd   : > { %1601 = vmatpush3.bf16.msra.mxu0 (!%p161_p3), %v1925_v4  ;;  %1550 = vmatprep.subr.bf16.mxu1 (!%p161_p3), %v1864_v1 }
   0xe   : > { %s2261_s12 = smov (!%p191_p4, %s1854_s12), 1  ;;  %1614 = vmatprep.subr.bf16.mxu0 %v1864_v1 }
   0xf   : > { %s1472_s24 = sshll.u32 %s2261_s12, 5 }
  0x10   : > { %s1938_s27 = scalar_lea.vmem %s2252_s0, %s1472_s24 }
  0x11   : > { %v209_v5 = vld [vmem:[%s1938_s27] sm:$0xf]  ;;  %v1942_v6 = vld [vmem:[%s1938_s27 + $0x4] sm:$0xf]  ;;  %v1945_v7 = vld [vmem:[%s1938_s27 + $0x8] sm:$0xf] }
  0x12   : > { %v1949_v8 = vld [vmem:[%s1938_s27 + $0xc] sm:$0xf]  ;;  %v1952_v9 = vcombine.low %v209_v5, %v1942_v6  ;;  %v607_v10 = vld [vmem:[%s1938_s27 + $0x4] sm:$0xf]  ;;  %v1956_v11 = vld [vmem:[%s1938_s27 + $0x8] sm:$0xf]  ;;  %v1401_v12 = vcombine.low %v1942_v6, %v1945_v7 }
  0x13   : > { %v1962_v13 = vcombine.low %v1945_v7, %v1949_v8  ;;  %v1965_v14 = vld [vmem:[%s1938_s27 + $0xc] sm:$0xf]  ;;  %v1968_v15 = vld [vmem:[%s1938_s27 + $0x10] sm:$0xf]  ;;  %v1413_v16 = vcombine.low %v607_v10, %v1956_v11  ;;  %v218_v21 = vld [vmem:[%s1938_s27 + $0x14] sm:$0x1] }
  0x14   : > { %v1972_v17 = vld [vmem:[%s1938_s27 + $0x10] sm:$0xf]  ;;  %v241_v18 = vshrl.u32 %v1952_v9, 16  ;;  %v243_v19 = vshll.u32 %v1952_v9, 16  ;;  %v1978_v20 = vcombine.low %v1965_v14, %v1968_v15  ;;  %v738_v38 = vld [vmem:[%s1938_s27 + $0x4] sm:$0xe] }
  0x15   : > { %v248_v22 = vshll.u32 %v1962_v13, 16  ;;  %v634_v23 = vshrl.u32 %v1413_v16, 16  ;;  %v636_v24 = vshll.u32 %v1413_v16, 16  ;;  %v1983_v25 = vcombine.low %v1972_v17, %v218_v21  ;;  %v2012_v48 = vld [vmem:[%s1938_s27 + $0x14] sm:$0xf] }
  0x16   : > { %v245_v26 = vrot.slane %v243_v19, 1  ;;  %v641_v27 = vshll.u32 %v1978_v20, 16  ;;  %v645_v28 = vshrl.u32 %v1978_v20, 16  ;;  %v252_v34 = vshrl.u32 %v1962_v13, 16  ;;  %v612_v49 = vld [vmem:[%s1938_s27 + $0x18] sm:$0x1] }
  0x17   : > { %v250_v29 = vrot.slane %v248_v22, 1  ;;  %v638_v30 = vrot.slane %v636_v24, 1  ;;  %v256_v35 = vshll.u32 %v1983_v25, 16  ;;  %v1402_v46 = vcombine.low %v1949_v8, %v1972_v17  ;;  %v1830_v55 = vld [vmem:[%s1938_s27 + $0x10] sm:$0xff]   ;;  %v2033_v58 = vld [vmem:[%s1938_s27 + $0x18] sm:$0x1f]  }
  0x18   : > { %v246_v31 = vor.u32 %v245_v26, %v241_v18  ;;  %v643_v33 = vrot.slane %v641_v27, 1  ;;  %v1425_v47 = vcombine.low %v738_v38, %v1956_v11  ;;  %v748_v52 = vrot.slane %v1978_v20, 1  ;;  %v2040_v63 = vld [vmem:[%s1938_s27 + $0xc] sm:$0xf]  ;;  %v1058_v5 = vld [vmem:[%s1938_s27 + $0x8] sm:$0xe] }
  0x19   : > { %v639_v36 = vor.u32 %v638_v30, %v634_v23  ;;  %v254_v42 = vor.u32 %v252_v34, %v250_v29  ;;  %v258_v43 = vrot.slane %v256_v35, 1  ;;  %v2022_v53 = vcombine.low %v2012_v48, %v612_v49  ;;  %v1154_v22 = vld [vmem:[%s2254_s2] sm:$0xff]  ;;  %v1819_v24 = vld [vmem:[%s2253_s1 + $0x68] sm:$0xff]   ;;  %v1157_v35 = vld [vmem:[%s2254_s2 + $0x18] sm:$0xff] }
  0x1a   : > { %v251_v39 = vsel %vm239_vm2, %v246_v31, %v250_v29  ;;  %v647_v40 = vor.u32 %v645_v28, %v643_v33  ;;  %v747_v51 = vrot.slane %v1425_v47, 1  ;;  %v260_v54 = vshrl.u32 %v1983_v25, 16  ;;  %v1156_v31 = vld [vmem:[%s2254_s2 + $0x10] sm:$0xff]  ;;  %v1820_v38 = vld [vmem:[%s2253_s1 + $0x28] sm:$0xff]  }
  0x1b   : > { %1539 = vmatmul.mubr.msk.bf16.vlgmr.msra.gmra.mrb[0].mxu1 %vm275_vm1, %v251_v39  ;;  %v644_v41 = vsel %vm239_vm2, %v639_v36, %v643_v33  ;;  %v259_v50 = vsel %vm239_vm2, %v254_v42, %v258_v43  ;;  %v649_v56 = vshll.u32 %v2022_v53, 16  ;;  %v961_v57 = vshll.u32 %v1830_v55, 16  ;;  %v1155_v33 = vld [vmem:[%s2254_s2 + $0x8] sm:$0xff]  ;;  %v1818_v36 = vld [vmem:[%s2253_s1 + $0x20] sm:$0xff]   ;;  %v1822_v39 = vld [vmem:[%s2253_s1 + $0x70] sm:$0xff]  }
  0x1c   : > { %1551 = vmatpush3.bf16.msra.mxu1 %v1807_v32  ;;  %1603 = vmatmul.mubr.msk.bf16.vlgmr.msra.gmra.mrb[0].mxu0 %vm275_vm1, %v644_v41  ;;  %v965_v59 = vshrl.u32 %v1830_v55, 16  ;;  %v749_v60 = vsel %vm426_vm3, %v747_v51, %v748_v52  ;;  %v262_v62 = vor.u32 %v260_v54, %v258_v43  ;;  %v969_v3 = vshll.u32 %v2033_v58, 16  ;;  %v1828_v51 = vld [vmem:[%s2253_s1 + $0x38] sm:$0xff]  }
  0x1d   : > { %1615 = vmatpush3.bf16.msra.mxu0 %v1811_v37  ;;  %1542 = vmatprep.mubr.msk.bf16.mxu1 %vm1865_vm0, %v1864_v1  ;;  %v2042_v0 = vrot.slane %v961_v57, 1  ;;  %v1459_v10 = vcombine.low %v1058_v5, %v2040_v63  ;;  %v1068_v16 = vrot.slane %v1830_v55, 1  ;;  %v1070_v18 = vrot.slane %v2033_v58, 1  ;;  %v1158_v37 = vld [vmem:[%s2254_s2 + $0x20] sm:$0xff] }
  0x1e   : > { %1616 = vmatprep.subr.bf16.mxu0 %v1864_v1  ;;  %1552 = vmatprep.subr.bf16.mxu1 %v1864_v1  ;;  %v2048_v19 = vrot.slane %v649_v56, 1  ;;  %v2052_v21 = vrot.slane %v969_v3, 1  ;;  %v750_v23 = vrot.slane %v2022_v53, 1  ;;  %v1866_v30 = vmov 0   ;;  %v1831_v57 = vld [vmem:[%s2253_s1 + $0x80] sm:$0xff]  }
  0x1f   : > { %1618 = vmatprep.mubr.msk.bf16.mxu0 %vm1865_vm0, %v1864_v1  ;;  %v967_v20 = vor.u32 %v965_v59, %v2042_v0  ;;  %v1067_v26 = vrot.slane %v1459_v10, 1  ;;  %v2066_v27 = vsel %vm426_vm3, %v1068_v16, %v1070_v18  ;;  %1799 = vset.pattern.permute.xlu0 %v1866_v30  ;;  %v1381_v41 = vcombine.low %v1972_v17, %v1972_v17  ;;  %v1834_v59 = vld [vmem:[%s2253_s1 + $0x88] sm:$0xff]  }
  0x20   : > { %1553 = vmatpush3.bf16.msra.mxu1 %v1814_v45  ;;  %v2070_v28 = vsel %vm239_vm2, %v647_v40, %v2048_v19  ;;  %1161 = vperm.xlu0 %1799, %v1154_v22   ;;  %v751_v34 = vsel %vm426_vm3, %v748_v52, %v750_v23  ;;  %v417_v40 = vld [vmem:[%s1938_s27] sm:$0xe]  ;;  %v1436_v43 = vcombine.low %v1968_v15, %v2012_v48  ;;  %v428_v45 = vrot.slane %v1962_v13, 1 }
  0x21   : > { %1617 = vmatpush3.bf16.msra.mxu0 %v1813_v44  ;;  %1566 = vmatprep.subr.bf16.mxu1 %v1864_v1  ;;  %v2075_v29 = vsel %vm239_vm2, %v967_v20, %v2052_v21  ;;  %v2082_v32 = vsel %vm426_vm3, %v1067_v26, %v1068_v16  ;;  %v1391_v42 = vcombine.low %v417_v40, %v1942_v6  ;;  %v430_v48 = vrot.slane %v1983_v25, 1 }
  0x22   : > { %1630 = vmatprep.subr.bf16.mxu0 %v1864_v1  ;;  %1800 = vset.pattern.permute.xlu1 %v1866_v30 }
  0x23   : > { %1543 = vmatmul.mubr.msk.bf16.gmra.mrb[4].mxu1 %vm275_vm1, %v259_v50  ;;  %1171 = vperm.xlu1 %1800, %v1156_v31   ;;  %v427_v44 = vrot.slane %v1391_v42, 1  ;;  %v1825_v50 = vld [vmem:[%s2253_s1 + $0x30] sm:$0xff]   ;;  %v431_v55 = vsel %vm426_vm3, %v428_v45, %v430_v48 }
  0x24   : > { %1546 = vmatprep.mubr.msk.bf16.mxu1 %vm1865_vm0, %v1864_v1  ;;  %1166 = vperm.xlu0 %1799, %v1155_v33  }
  0x25   : > { %v429_v49 = vsel %vm426_vm3, %v427_v44, %v428_v45 }
  0x27   : > { %1176 = vperm.xlu1 %1800, %v1157_v35  }
  0x28   : > { %1619 = vmatmul.mubr.msk.bf16.vlgmr.msra.gmra.mrb[0].mxu0 %vm275_vm1, %v749_v60  ;;  %1181 = vperm.xlu0 %1799, %v1158_v37   ;;  %v973_v60 = vshrl.u32 %v2033_v58, 16 }
  0x29   : > { %1631 = vmatpush3.bf16.msra.mxu0 %v1816_v61  ;;  %1622 = vmatprep.mubr.msk.bf16.mxu0 %vm1865_vm0, %v1864_v1 }
  0x2a   : > { %1632 = vmatprep.subr.bf16.mxu0 %v1864_v1  ;;  %v975_v61 = vor.u32 %v973_v60, %v2052_v21 }
  0x2b   : > { %1547 = vmatmul.mubr.msk.bf16.gmra.mrb[8].mxu1 %vm275_vm1, %v262_v62 }
  0x2c   : > { %1554 = vmatprep.mubr.msk.bf16.mxu1 %vm1865_vm0, %v1864_v1 }
  0x2d   : > { %1633 = vmatpush3.bf16.msra.mxu0 %v1819_v24 }
  0x2e   : > { %1646 = vmatprep.subr.bf16.mxu0 %v1864_v1 }
  0x30   : > { %1623 = vmatmul.mubr.msk.bf16.gmra.mrb[4].mxu0 %vm275_vm1, %v751_v34 }
  0x31   : > { %1626 = vmatprep.mubr.msk.bf16.mxu0 %vm1865_vm0, %v1864_v1 }
  0x33   : > { %1555 = vmatmul.mubr.msk.bf16.vlgmr.msra.gmra.mrb[0].mxu1 %vm275_vm1, %v1952_v9  ;;  %v1435_v9 = vcombine.low %v1956_v11, %v1965_v14  ;;  %v1827_v11 = vld [vmem:[%s2253_s1 + $0x78] sm:$0xff]   ;;  %v927_v14 = vld [vmem:[%s1938_s27 + $0x8] sm:$0xf] }
  0x34   : > { %1567 = vmatpush3.bf16.msra.mxu1 %v1818_v36  ;;  %1558 = vmatprep.mubr.msk.bf16.mxu1 %vm1865_vm0, %v1864_v1  ;;  %v1447_v47 = vcombine.low %v927_v14, %v2040_v63 }
  0x35   : > { %1568 = vmatprep.subr.bf16.mxu1 %v1864_v1 }
  0x36   : > { %v956_v15 = vshll.u32 %v1447_v47, 16  ;;  %v954_v52 = vshrl.u32 %v1447_v47, 16 }
  0x38   : > { %1627 = vmatmul.mubr.msk.bf16.gmra.mrb[8].mxu0 %vm275_vm1, %v750_v23  ;;  %1569 = vmatpush3.bf16.msra.mxu1 %v1820_v38  ;;  %v958_v54 = vrot.slane %v956_v15, 1 }
  0x39   : > { %1634 = vmatprep.mubr.msk.bf16.mxu0 %vm1865_vm0, %v1864_v1  ;;  %1582 = vmatprep.subr.bf16.mxu1 %v1864_v1 }
  0x3a   : > { %v959_v56 = vor.u32 %v958_v54, %v954_v52 }
  0x3b   : > { %1559 = vmatmul.mubr.msk.bf16.gmra.mrb[4].mxu1 %vm275_vm1, %v1962_v13  ;;  %v1826_v13 = vld [vmem:[%s1938_s27 + $0x18] ss:$0 sps:$4 sm:$0xff]  }
  0x3c   : > { %1562 = vmatprep.mubr.msk.bf16.mxu1 %vm1865_vm0, %v1864_v1  ;;  %v964_v25 = vsel %vm239_vm2, %v959_v56, %v2042_v0 }
  0x40   : > { %1635 = vmatmul.mubr.msk.bf16.vlgmr.msra.gmra.mrb[0].mxu0 %vm275_vm1, %v1435_v9 }
  0x41   : > { %1647 = vmatpush3.bf16.msra.mxu0 %v1822_v39  ;;  %1638 = vmatprep.mubr.msk.bf16.mxu0 %vm1865_vm0, %v1864_v1 }
  0x42   : > { %1648 = vmatprep.subr.bf16.mxu0 %v1864_v1 }
  0x43   : > { %1563 = vmatmul.mubr.msk.bf16.gmra.mrb[8].mxu1 %vm275_vm1, %v1381_v41 }
  0x44   : > { %1570 = vmatprep.mubr.msk.bf16.mxu1 %vm1865_vm0, %v1864_v1 }
  0x45   : > { %1649 = vmatpush3.bf16.msra.mxu0 %v1827_v11 }
  0x46   : > { %1662 = vmatprep.subr.bf16.mxu0 %v1864_v1 }
  0x48   : > { %1639 = vmatmul.mubr.msk.bf16.gmra.mrb[4].mxu0 %vm275_vm1, %v1436_v43 }
  0x49   : > { %1642 = vmatprep.mubr.msk.bf16.mxu0 %vm1865_vm0, %v1864_v1 }
  0x4b   : > { %1571 = vmatmul.mubr.msk.bf16.vlgmr.msra.gmra.mrb[0].mxu1 %vm275_vm1, %v429_v49 }
  0x4c   : > { %1583 = vmatpush3.bf16.msra.mxu1 %v1825_v50  ;;  %1574 = vmatprep.mubr.msk.bf16.mxu1 %vm1865_vm0, %v1864_v1 }
  0x4d   : > { %1584 = vmatprep.subr.bf16.mxu1 %v1864_v1 }
  0x50   : > { %1643 = vmatmul.mubr.msk.bf16.gmra.mrb[8].mxu0 %vm275_vm1, %v1826_v13  ;;  %1585 = vmatpush3.bf16.msra.mxu1 %v1828_v51 }
  0x51   : > { %1650 = vmatprep.mubr.msk.bf16.mxu0 %vm1865_vm0, %v1864_v1  ;;  %1678 = vmatprep.subr.bf16.mxu1 %v1864_v1 }
  0x53   : > { %1575 = vmatmul.mubr.msk.bf16.gmra.mrb[4].mxu1 %vm275_vm1, %v431_v55 }
  0x54   : > { %1578 = vmatprep.mubr.msk.bf16.mxu1 %vm1865_vm0, %v1864_v1 }
  0x58   : > { %1651 = vmatmul.mubr.msk.bf16.vlgmr.msra.gmra.mrb[0].mxu0 %vm275_vm1, %v964_v25 }
  0x59   : > { %1663 = vmatpush3.bf16.msra.mxu0 %v1831_v57  ;;  %1654 = vmatprep.mubr.msk.bf16.mxu0 %vm1865_vm0, %v1864_v1 }
  0x5a   : > { %1664 = vmatprep.subr.bf16.mxu0 %v1864_v1 }
  0x5b   : > { %1579 = vmatmul.mubr.msk.bf16.gmra.mrb[8].mxu1 %vm275_vm1, %v430_v48 }
  0x5c   : > { %1586 = vmatprep.mubr.msk.bf16.mxu1 %vm1865_vm0, %v1864_v1 }
  0x5d   : > { %1665 = vmatpush3.bf16.msra.mxu0 %v1834_v59 }
  0x60   : > { %1655 = vmatmul.mubr.msk.bf16.gmra.mrb[4].mxu0 %vm275_vm1, %v2075_v29 }
  0x61   : > { %1658 = vmatprep.mubr.msk.bf16.mxu0 %vm1865_vm0, %v1864_v1 }
  0x63   : > { %1587 = vmatmul.mubr.msk.bf16.vlgmr.msra.gmra.mrb[0].mxu1 %vm275_vm1, %v1401_v12 }
  0x64   : > { %1680 = vmatpush3.bf16.msra.mxu1 %v1913_v2  ;;  %1590 = vmatprep.mubr.msk.bf16.mxu1 %vm1865_vm0, %v1864_v1  ;;  %v1837_v2 = vld [vmem:[%s1938_s27 + $0x14] ss:$0 sps:$4 sm:$0xff]   ;;  %s1771_s27 = smul.u32 20, %s2261_s12 }
  0x65   : > { %1679 = vmatprep.subr.bf16.mxu1 %v1864_v1 }
  0x66   : > { %s207_s23 = scalar_lea.vmem %s2255_s3, %s1771_s27 }
  0x68   : > { %1659 = vmatmul.mubr.msk.bf16.gmra.mrb[8].mxu0 %vm275_vm1, %v975_v61  ;;  %1681 = vmatpush3.bf16.msra.mxu1 %v1925_v4  ;;  %v653_v4 = vshrl.u32 %v2022_v53, 16 }
  0x69   : > { %1666 = vmatprep.mubr.msk.bf16.mxu0 %vm1865_vm0, %v1864_v1 }
  0x6a   : > { %v655_v6 = vor.u32 %v653_v4, %v2048_v19 }
  0x6b   : > { %1591 = vmatmul.mubr.msk.bf16.gmra.mrb[4].mxu1 %vm275_vm1, %v1402_v46 }
  0x6c   : > { %1594 = vmatprep.mubr.msk.bf16.mxu1 %vm1865_vm0, %v1864_v1 }
  0x70   : > { %1667 = vmatmul.mubr.msk.bf16.vlgmr.msra.gmra.mrb[0].mxu0 %vm275_vm1, %v2082_v32 }
  0x71   : > { %1670 = vmatprep.mubr.msk.bf16.mxu0 %vm1865_vm0, %v1864_v1 }
  0x73   : > { %1595 = vmatmul.mubr.msk.bf16.gmra.mrb[8].mxu1 %vm275_vm1, %v1837_v2 }
  0x74   : > { %1606 = vmatprep.mubr.msk.bf16.mxu1 %vm1865_vm0, %v1864_v1 }
  0x78   : > { %1671 = vmatmul.mubr.msk.bf16.gmra.mrb[4].mxu0 %vm275_vm1, %v2066_v27 }
  0x79   : > { %1674 = vmatprep.mubr.msk.bf16.mxu0 %vm1865_vm0, %v1864_v1 }
  0x7b   : > { %1607 = vmatmul.mubr.msk.bf16.vlgmr.msra.gmra.mrb[4].mxu1 %vm275_vm1, %v2070_v28 }
  0x7c   : > { %1610 = vmatprep.mubr.msk.bf16.mxu1 %vm1865_vm0, %v1864_v1 }
  0x80   : > { %1675 = vmatmul.mubr.msk.bf16.gmra.mrb[8].mxu0 %vm275_vm1, %v1070_v18 }
  0x83   : > { %1611 = vmatmul.mubr.msk.bf16.gmra.mrb[8].mxu1 %vm275_vm1, %v655_v6 }
  0x9f   : > { %v1162_v46 = vpop.permute.xlu0 %1161 }
  0xa2   : > { %v1172_v20 = vpop.permute.xlu1 %1171 }
  0xa3   : > { %v1167_v3 = vpop.permute.xlu0 %1166 }
  0xa6   : > { %v1177_v31 = vpop.permute.xlu1 %1176 }
  0xa7   : > { %v1182_v47 = vpop.permute.xlu0 %1181 }
 0x136   : > { %v580_v7 = vpop.f32.mrb[0].mxu1 }
 0x137   : > { %v1588_v8 = vpop.f32.mrb[1].mxu1 }
 0x138   : > { %v583_v12 = vpop.f32.mrb[2].mxu1 }
 0x139   : > { %v1589_v17 = vpop.f32.mrb[3].mxu1 }
 0x143   : > { %v1127_v62 = vpop.f32.mrb[0].mxu0 }
 0x144   : > { %v2229_v63 = vadd.f32 %v1127_v62, %v580_v7  ;;  %v1668_v53 = vpop.f32.mrb[1].mxu0 }
 0x145   : > { %v1130_v0 = vpop.f32.mrb[2].mxu0 }
 0x146   : > { %v2231_v1 = vadd.f32 %v1130_v0, %v583_v12  ;;  %v1669_v5 = vpop.f32.mrb[3].mxu0  ;;  %v1184_v58 = vmul.f32 %v2229_v63, %v1162_v46 }
 0x148   : > { %v1185_v10 = vmul.f32 %v2231_v1, %v1167_v3  ;;  %v1199_v18 = vmul.f32 %v2229_v63, %v1184_v58 }
 0x14a   : > { %v1189_v16 = vadd.f32 %v1185_v10, %v1184_v58  ;;  %v1200_v19 = vmul.f32 %v2231_v1, %v1185_v10 }
 0x14b   : > { %v1135_v21 = vpop.f32.mrb[4].mxu0 }
 0x14c   : > { %v1204_v22 = vadd.f32 %v1200_v19, %v1199_v18  ;;  %v1672_v23 = vpop.f32.mrb[5].mxu0 }
 0x14d   : > { %v1138_v24 = vpop.f32.mrb[6].mxu0 }
 0x14e   : > { %v1673_v26 = vpop.f32.mrb[7].mxu0  ;;  %v719_v27 = vpop.f32.mrb[4].mxu1 }
 0x14f   : > { %v1684_v28 = vadd.f32 %v1135_v21, %v719_v27  ;;  %v1608_v29 = vpop.f32.mrb[5].mxu1 }
 0x150   : > { %v722_v30 = vpop.f32.mrb[6].mxu1 }
 0x151   : > { %v1186_v32 = vmul.f32 %v1684_v28, %v1172_v20  ;;  %v1685_v33 = vadd.f32 %v1138_v24, %v722_v30  ;;  %v1609_v34 = vpop.f32.mrb[7].mxu1 }
 0x153   : > { %v1201_v35 = vmul.f32 %v1684_v28, %v1186_v32  ;;  %v1187_v36 = vmul.f32 %v1685_v33, %v1177_v31  ;;  %v1190_v37 = vadd.f32 %v1189_v16, %v1186_v32  ;;  %v1143_v38 = vpop.f32.mrb[8].mxu0 }
 0x154   : > { %v1676_v9 = vpop.f32.mrb[9].mxu0 }
 0x155   : > { %v1191_v39 = vadd.f32 %v1190_v37, %v1187_v36  ;;  %v1202_v40 = vmul.f32 %v1685_v33, %v1187_v36  ;;  %v1205_v41 = vadd.f32 %v1204_v22, %v1201_v35  ;;  %v1146_v42 = vpop.f32.mrb[10].mxu0 }
 0x156   : > { %v1677_v11 = vpop.f32.mrb[11].mxu0  ;;  %v727_v14 = vpop.f32.mrb[8].mxu1 }
 0x157   : > { %v1206_v43 = vadd.f32 %v1205_v41, %v1202_v40  ;;  %v1686_v44 = vadd.f32 %v1143_v38, %v727_v14  ;;  %v1612_v45 = vpop.f32.mrb[9].mxu1 }
 0x158   : > { %v730_v49 = vpop.f32.mrb[10].mxu1 }
 0x159   : > { %v1188_v50 = vmul.f32 %v1686_v44, %v1182_v47  ;;  %v1613_v15 = vpop.f32.mrb[11].mxu1 }
 0x15b   : > { %v1192_v13 = vadd.f32 %v1191_v39, %v1188_v50  ;;  %v1203_v48 = vmul.f32 %v1686_v44, %v1188_v50 }
 0x15d   : > { %v1193_v51 = vrot.slane %v1192_v13, 4  ;;  %v1207_v52 = vadd.f32 %v1206_v43, %v1203_v48 }
 0x15f   : > { %v1194_v54 = vadd.f32 %v1193_v51, %v1192_v13  ;;  %v1208_v55 = vrot.slane %v1207_v52, 4 }
 0x161   : > { %v1195_v56 = vrot.slane %v1194_v54, 2  ;;  %v1209_v25 = vadd.f32 %v1208_v55, %v1207_v52 }
 0x163   : > { %v1196_v57 = vadd.f32 %v1195_v56, %v1194_v54  ;;  %v1210_v59 = vrot.slane %v1209_v25, 2 }
 0x165   : > { %v1197_v60 = vrot.slane %v1196_v57, 1  ;;  %v1211_v61 = vadd.f32 %v1210_v59, %v1209_v25 }
 0x167   : > { %v1198_v2 = vadd.f32 %v1197_v60, %v1196_v57  ;;  %v1212_v4 = vrot.slane %v1211_v61, 1 }
 0x169   : > { %v1213_v6 = vadd.f32 %v1212_v4, %v1211_v61  ;;  %v1214_v7 = vmul.f32 0.04, %v1198_v2 }
 0x16b   : > { %v1215_v8 = vmul.f32 0.04, %v1213_v6  ;;  %v1216_v12 = vmul.f32 %v1214_v7, %v1214_v7  ;;  %v1219_v17 = vsub.f32 %v2229_v63, %v1214_v7  ;;  %v1220_v46 = vsub.f32 %v2231_v1, %v1214_v7 }
 0x16c   : > { %v1221_v62 = vsub.f32 %v1684_v28, %v1214_v7  ;;  %v1222_v53 = vsub.f32 %v1685_v33, %v1214_v7  ;;  %v1223_v0 = vsub.f32 %v1686_v44, %v1214_v7 }
 0x16d   : > { %v1217_v3 = vsub.f32 %v1215_v8, %v1216_v12 }
 0x16f   : > { %v1218_v5 = vmax.f32 %v1217_v3, 0.0 }
 0x171   : > { %v1224_v58 = vadd.f32 1e-05, %v1218_v5 }
 0x173   : > { %1838 = vrsqrt.f32 %v1224_v58 }
 0x17d   : > { %v1839_v10 = vpop.eup %1838 }
 0x17e   : > { %v1226_v16 = vmul.f32 %v1839_v10, %v1219_v17  ;;  %v1227_v18 = vmul.f32 %v1839_v10, %v1220_v46  ;;  %v1228_v19 = vmul.f32 %v1839_v10, %v1221_v62  ;;  %v1229_v20 = vmul.f32 %v1839_v10, %v1222_v53 }
 0x17f   : > { %v1230_v21 = vmul.f32 %v1839_v10, %v1223_v0 }
 0x180   : > { %v1231_v22 = vmul.f32 0.2, %v1226_v16  ;;  %v1232_v23 = vmul.f32 0.2, %v1227_v18  ;;  %v1233_v24 = vmul.f32 0.2, %v1228_v19 }
 0x181   : > { %v1234_v63 = vmul.f32 0.2, %v1229_v20  ;;  %v1235_v26 = vmul.f32 0.2, %v1230_v21 }
 0x182   : > { %v1236_v1 = vmax.f32 %v1226_v16, %v1231_v22  ;;  %v1237_v27 = vmax.f32 %v1227_v18, %v1232_v23  ;;  %v1238_v28 = vmax.f32 %v1228_v19, %v1233_v24 }
 0x183   : > { %v1239_v29 = vmax.f32 %v1229_v20, %v1234_v63  ;;  %v1240_v30 = vmax.f32 %v1230_v21, %v1235_v26 }
 0x184   : > { %v1481_v31 = vpack.c.bf16 %v1237_v27, %v1236_v1 }
 0x185   : > { %v1477_v32 = vpack.c.bf16 %v1240_v30, %v1240_v30  ;;  %v1486_v33 = vpack.c.bf16 %v1239_v29, %v1238_v28 }
 0x186   : > { %1482 = vst [vmem:[%s207_s23] sm:$0xff] %v1481_v31  }
 0x187   : > { %1488 = vst [vmem:[%s207_s23 + $0x8] sm:$0xff] %v1486_v33   ;;  %1266 = vst [vmem:[%s207_s23 + $0x10] sm:$0xf] %v1477_v32 }
 0x188 PF: > { %s13_s14 = sadd.s32 1, %s1862_s14   ;;  %s2256_s12 = smov %s1858_s13 }
 0x189   : > { %p10_p5 = scmp.ge.s32.totalorder %s13_s14, 4   ;;  %s2257_s13 = smov %s2259_s15 }
 0x18b   :  { %12 = sbr.rel (!%p10_p5) target bundleno = 2 (0x2), region = 73 }

// kernel: nlayer_res_discriminator_forward.16
= control target key start
LH: loop header
LB: loop body
LE: loop exit
PB: predicated region body
PF: predicated region fallthrough
CT: control target
= control target key end

     0   :  { %s1983_s15 = smov 0   ;;  %s1985_s16 = smov 0   ;;  %s2356_s0 = inlined_call_operand.vmem [shape: bf16[2,64,32], index: 0, kind: input, shape index: {}]   ;;  %s2357_s1 = inlined_call_operand.vmem [shape: bf16[9,32,128], index: 1, kind: input, shape index: {}]   ;;  %s2358_s2 = inlined_call_operand.vmem [shape: f32[40,1], index: 2, kind: input, shape index: {}]   ;;  %s2359_s3 = inlined_call_operand.vmem [shape: bf16[2,40,128], index: 3, kind: input, shape index: {}]   ;;  %s2360_s4 = inlined_call_operand.vmem [shape: bf16[2,40,128], index: 4, kind: output, shape index: {}]  }
   0x1   :  { %s1987_s17 = smov 0  }
   0x2 LB: > { %s23_s18 = sadd.s32 1, %s1949_s16  ;;  %p1446_p0 = scmp.ge.s32.totalorder %s1953_s17, 1  ;;  %s1953_s17 = sphi %s1987_s17, %s14_s17   ;;  %s1949_s16 = sphi %s1985_s16, %s2362_s16   ;;  %s1945_s15 = sphi %s1983_s15, %s2361_s15  }
   0x3   : > { %p24_p1 = scmp.ge.s32.totalorder %s23_s18, 2  ;;  %p200_p2 = scmp.lt.s32.totalorder %s1953_s17, 3 }
   0x5   : > { %s2364_s18 = smov (%p24_p1, %s23_s18), 0  ;;  %p201_p3 = pnand %p1446_p0, %p200_p2 }
   0x6   : > { %v1892_v0 = vld [vmem:[%s2357_s1 + $0x10] sm:$0xff] (!%p201_p3)   ;;  %v1955_v1 = vmov (!%p201_p3), 0.0   ;;  %v2009_v2 = vld [vmem:[%s2357_s1 + $0x40] sm:$0xff] (!%p201_p3)   ;;  %v1894_v3 = vld [vmem:[%s2357_s1 + $0x18] sm:$0xff] (!%p201_p3)   ;;  %vm1956_vm0 = vmmov (!%p201_p3), 0   ;;  %p241_p4 = scmp.lt.s32.totalorder (!%p201_p3), %s1945_s15, 1 }
   0x7   : > { %204 = sbr.rel (%p201_p3) target bundleno = 390 (0x186), region = 36  ;;  %1625 = vmatprep.subr.bf16.mxu1 (!%p201_p3), %v1955_v1  ;;  %1689 = vmatprep.subr.bf16.mxu0 (!%p201_p3), %v1955_v1  ;;  %v2021_v4 = vld [vmem:[%s2357_s1 + $0x48] sm:$0xff] (!%p201_p3)   ;;  %vm333_vm1 = vcmask (!%p201_p3), 261120   ;;  %vm297_vm2 = vsmask.f32 (!%p201_p3), 7424  ;;  %v1898_v32 = vld [vmem:[%s2357_s1] sm:$0xff] (!%p201_p3)  }
   0x8   : > { %1626 = vmatpush3.bf16.msra.mxu1 (!%p201_p3), %v1892_v0  ;;  %1629 = vmatprep.mubr.msk.bf16.mxu1 (!%p201_p3), %vm1956_vm0, %v1955_v1  ;;  %v1902_v37 = vld [vmem:[%s2357_s1 + $0x50] sm:$0xff] (!%p201_p3)   ;;  %v1904_v44 = vld [vmem:[%s2357_s1 + $0x58] sm:$0xff] (!%p201_p3)   ;;  %v1905_v45 = vld [vmem:[%s2357_s1 + $0x8] sm:$0xff] (!%p201_p3)   ;;  %vm484_vm3 = vcmask (!%p201_p3), 1046528  }
   0x9   : > { %1690 = vmatpush3.bf16.msra.mxu0 (!%p201_p3), %v2009_v2  ;;  %1627 = vmatprep.subr.bf16.mxu1 (!%p201_p3), %v1955_v1  ;;  %v1907_v61 = vld [vmem:[%s2357_s1 + $0x60] sm:$0xff] (!%p201_p3)  }
   0xa   : > { %1691 = vmatprep.subr.bf16.mxu0 (!%p201_p3), %v1955_v1  ;;  %1693 = vmatprep.mubr.msk.bf16.mxu0 (!%p201_p3), %vm1956_vm0, %v1955_v1 }
   0xc   : > { %1628 = vmatpush3.bf16.msra.mxu1 (!%p201_p3), %v1894_v3 }
   0xd   : > { %1692 = vmatpush3.bf16.msra.mxu0 (!%p201_p3), %v2021_v4  ;;  %1641 = vmatprep.subr.bf16.mxu1 (!%p201_p3), %v1955_v1 }
   0xe   : > { %s2366_s15 = smov (!%p241_p4, %s1945_s15), 1  ;;  %1705 = vmatprep.subr.bf16.mxu0 %v1955_v1 }
   0xf   : > { %s1554_s27 = sshll.u32 %s2366_s15, 5 }
  0x10   : > { %s2034_s30 = scalar_lea.vmem %s2356_s0, %s1554_s27 }
  0x11   : > { %v267_v5 = vld [vmem:[%s2034_s30] sm:$0xf]  ;;  %v2038_v6 = vld [vmem:[%s2034_s30 + $0x4] sm:$0xf]  ;;  %v2041_v7 = vld [vmem:[%s2034_s30 + $0x8] sm:$0xf] }
  0x12   : > { %v2045_v8 = vld [vmem:[%s2034_s30 + $0xc] sm:$0xf]  ;;  %v2048_v9 = vcombine.low %v267_v5, %v2038_v6  ;;  %v665_v10 = vld [vmem:[%s2034_s30 + $0x4] sm:$0xf]  ;;  %v2052_v11 = vld [vmem:[%s2034_s30 + $0x8] sm:$0xf]  ;;  %v1483_v12 = vcombine.low %v2038_v6, %v2041_v7 }
  0x13   : > { %v2058_v13 = vcombine.low %v2041_v7, %v2045_v8  ;;  %v2061_v14 = vld [vmem:[%s2034_s30 + $0xc] sm:$0xf]  ;;  %v2064_v15 = vld [vmem:[%s2034_s30 + $0x10] sm:$0xf]  ;;  %v1495_v16 = vcombine.low %v665_v10, %v2052_v11  ;;  %v276_v21 = vld [vmem:[%s2034_s30 + $0x14] sm:$0x1] }
  0x14   : > { %v2068_v17 = vld [vmem:[%s2034_s30 + $0x10] sm:$0xf]  ;;  %v299_v18 = vshrl.u32 %v2048_v9, 16  ;;  %v301_v19 = vshll.u32 %v2048_v9, 16  ;;  %v2074_v20 = vcombine.low %v2061_v14, %v2064_v15  ;;  %v796_v38 = vld [vmem:[%s2034_s30 + $0x4] sm:$0xe] }
  0x15   : > { %v306_v22 = vshll.u32 %v2058_v13, 16  ;;  %v692_v23 = vshrl.u32 %v1495_v16, 16  ;;  %v694_v24 = vshll.u32 %v1495_v16, 16  ;;  %v2079_v25 = vcombine.low %v2068_v17, %v276_v21  ;;  %v2108_v48 = vld [vmem:[%s2034_s30 + $0x14] sm:$0xf] }
  0x16   : > { %v303_v26 = vrot.slane %v301_v19, 1  ;;  %v699_v27 = vshll.u32 %v2074_v20, 16  ;;  %v703_v28 = vshrl.u32 %v2074_v20, 16  ;;  %v310_v34 = vshrl.u32 %v2058_v13, 16  ;;  %v670_v49 = vld [vmem:[%s2034_s30 + $0x18] sm:$0x1] }
  0x17   : > { %v308_v29 = vrot.slane %v306_v22, 1  ;;  %v696_v30 = vrot.slane %v694_v24, 1  ;;  %v314_v35 = vshll.u32 %v2079_v25, 16  ;;  %v1484_v46 = vcombine.low %v2045_v8, %v2068_v17  ;;  %v1921_v55 = vld [vmem:[%s2034_s30 + $0x10] sm:$0xff]   ;;  %v2129_v58 = vld [vmem:[%s2034_s30 + $0x18] sm:$0x1f]  }
  0x18   : > { %v304_v31 = vor.u32 %v303_v26, %v299_v18  ;;  %v701_v33 = vrot.slane %v699_v27, 1  ;;  %v1507_v47 = vcombine.low %v796_v38, %v2052_v11  ;;  %v806_v52 = vrot.slane %v2074_v20, 1  ;;  %v2136_v63 = vld [vmem:[%s2034_s30 + $0xc] sm:$0xf]  ;;  %v1116_v5 = vld [vmem:[%s2034_s30 + $0x8] sm:$0xe] }
  0x19   : > { %v697_v36 = vor.u32 %v696_v30, %v692_v23  ;;  %v312_v42 = vor.u32 %v310_v34, %v308_v29  ;;  %v316_v43 = vrot.slane %v314_v35, 1  ;;  %v2118_v53 = vcombine.low %v2108_v48, %v670_v49  ;;  %v1212_v22 = vld [vmem:[%s2358_s2] sm:$0xff]  ;;  %v1910_v24 = vld [vmem:[%s2357_s1 + $0x68] sm:$0xff]   ;;  %v1215_v35 = vld [vmem:[%s2358_s2 + $0x18] sm:$0xff] }
  0x1a   : > { %v309_v39 = vsel %vm297_vm2, %v304_v31, %v308_v29  ;;  %v705_v40 = vor.u32 %v703_v28, %v701_v33  ;;  %v805_v51 = vrot.slane %v1507_v47, 1  ;;  %v318_v54 = vshrl.u32 %v2079_v25, 16  ;;  %v1214_v31 = vld [vmem:[%s2358_s2 + $0x10] sm:$0xff]  ;;  %v1911_v38 = vld [vmem:[%s2357_s1 + $0x28] sm:$0xff]  }
  0x1b   : > { %1630 = vmatmul.mubr.msk.bf16.vlgmr.msra.gmra.mrb[0].mxu1 %vm333_vm1, %v309_v39  ;;  %v702_v41 = vsel %vm297_vm2, %v697_v36, %v701_v33  ;;  %v317_v50 = vsel %vm297_vm2, %v312_v42, %v316_v43  ;;  %v707_v56 = vshll.u32 %v2118_v53, 16  ;;  %v1019_v57 = vshll.u32 %v1921_v55, 16  ;;  %v1213_v33 = vld [vmem:[%s2358_s2 + $0x8] sm:$0xff]  ;;  %v1909_v36 = vld [vmem:[%s2357_s1 + $0x20] sm:$0xff]   ;;  %v1913_v39 = vld [vmem:[%s2357_s1 + $0x70] sm:$0xff]  }
  0x1c   : > { %1642 = vmatpush3.bf16.msra.mxu1 %v1898_v32  ;;  %1694 = vmatmul.mubr.msk.bf16.vlgmr.msra.gmra.mrb[0].mxu0 %vm333_vm1, %v702_v41  ;;  %v1023_v59 = vshrl.u32 %v1921_v55, 16  ;;  %v807_v60 = vsel %vm484_vm3, %v805_v51, %v806_v52  ;;  %v320_v62 = vor.u32 %v318_v54, %v316_v43  ;;  %v1027_v3 = vshll.u32 %v2129_v58, 16  ;;  %v1919_v51 = vld [vmem:[%s2357_s1 + $0x38] sm:$0xff]  }
  0x1d   : > { %1706 = vmatpush3.bf16.msra.mxu0 %v1902_v37  ;;  %1633 = vmatprep.mubr.msk.bf16.mxu1 %vm1956_vm0, %v1955_v1  ;;  %v2138_v0 = vrot.slane %v1019_v57, 1  ;;  %v1541_v10 = vcombine.low %v1116_v5, %v2136_v63  ;;  %v1126_v16 = vrot.slane %v1921_v55, 1  ;;  %v1128_v18 = vrot.slane %v2129_v58, 1  ;;  %v1216_v37 = vld [vmem:[%s2358_s2 + $0x20] sm:$0xff] }
  0x1e   : > { %1707 = vmatprep.subr.bf16.mxu0 %v1955_v1  ;;  %1643 = vmatprep.subr.bf16.mxu1 %v1955_v1  ;;  %v2144_v19 = vrot.slane %v707_v56, 1  ;;  %v2148_v21 = vrot.slane %v1027_v3, 1  ;;  %v808_v23 = vrot.slane %v2118_v53, 1  ;;  %v1957_v30 = vmov 0   ;;  %v1922_v57 = vld [vmem:[%s2357_s1 + $0x80] sm:$0xff]  }
  0x1f   : > { %1709 = vmatprep.mubr.msk.bf16.mxu0 %vm1956_vm0, %v1955_v1  ;;  %v1025_v20 = vor.u32 %v1023_v59, %v2138_v0  ;;  %v1125_v26 = vrot.slane %v1541_v10, 1  ;;  %v2162_v27 = vsel %vm484_vm3, %v1126_v16, %v1128_v18  ;;  %1890 = vset.pattern.permute.xlu0 %v1957_v30  ;;  %v1463_v41 = vcombine.low %v2068_v17, %v2068_v17  ;;  %v1925_v59 = vld [vmem:[%s2357_s1 + $0x88] sm:$0xff]  }
  0x20   : > { %1644 = vmatpush3.bf16.msra.mxu1 %v1905_v45  ;;  %v2166_v28 = vsel %vm297_vm2, %v705_v40, %v2144_v19  ;;  %1219 = vperm.xlu0 %1890, %v1212_v22   ;;  %v809_v34 = vsel %vm484_vm3, %v806_v52, %v808_v23  ;;  %v475_v40 = vld [vmem:[%s2034_s30] sm:$0xe]  ;;  %v1518_v43 = vcombine.low %v2064_v15, %v2108_v48  ;;  %v486_v45 = vrot.slane %v2058_v13, 1 }
  0x21   : > { %1708 = vmatpush3.bf16.msra.mxu0 %v1904_v44  ;;  %1657 = vmatprep.subr.bf16.mxu1 %v1955_v1  ;;  %v2171_v29 = vsel %vm297_vm2, %v1025_v20, %v2148_v21  ;;  %v2178_v32 = vsel %vm484_vm3, %v1125_v26, %v1126_v16  ;;  %v1473_v42 = vcombine.low %v475_v40, %v2038_v6  ;;  %v488_v48 = vrot.slane %v2079_v25, 1 }
  0x22   : > { %1721 = vmatprep.subr.bf16.mxu0 %v1955_v1  ;;  %1891 = vset.pattern.permute.xlu1 %v1957_v30 }
  0x23   : > { %1634 = vmatmul.mubr.msk.bf16.gmra.mrb[4].mxu1 %vm333_vm1, %v317_v50  ;;  %1229 = vperm.xlu1 %1891, %v1214_v31   ;;  %v485_v44 = vrot.slane %v1473_v42, 1  ;;  %v1916_v50 = vld [vmem:[%s2357_s1 + $0x30] sm:$0xff]   ;;  %v489_v55 = vsel %vm484_vm3, %v486_v45, %v488_v48 }
  0x24   : > { %1637 = vmatprep.mubr.msk.bf16.mxu1 %vm1956_vm0, %v1955_v1  ;;  %1224 = vperm.xlu0 %1890, %v1213_v33  }
  0x25   : > { %v487_v49 = vsel %vm484_vm3, %v485_v44, %v486_v45 }
  0x27   : > { %1234 = vperm.xlu1 %1891, %v1215_v35  }
  0x28   : > { %1710 = vmatmul.mubr.msk.bf16.vlgmr.msra.gmra.mrb[0].mxu0 %vm333_vm1, %v807_v60  ;;  %1239 = vperm.xlu0 %1890, %v1216_v37   ;;  %v1031_v60 = vshrl.u32 %v2129_v58, 16 }
  0x29   : > { %1722 = vmatpush3.bf16.msra.mxu0 %v1907_v61  ;;  %1713 = vmatprep.mubr.msk.bf16.mxu0 %vm1956_vm0, %v1955_v1 }
  0x2a   : > { %1723 = vmatprep.subr.bf16.mxu0 %v1955_v1  ;;  %v1033_v61 = vor.u32 %v1031_v60, %v2148_v21 }
  0x2b   : > { %1638 = vmatmul.mubr.msk.bf16.gmra.mrb[8].mxu1 %vm333_vm1, %v320_v62 }
  0x2c   : > { %1645 = vmatprep.mubr.msk.bf16.mxu1 %vm1956_vm0, %v1955_v1 }
  0x2d   : > { %1724 = vmatpush3.bf16.msra.mxu0 %v1910_v24 }
  0x2e   : > { %1737 = vmatprep.subr.bf16.mxu0 %v1955_v1 }
  0x30   : > { %1714 = vmatmul.mubr.msk.bf16.gmra.mrb[4].mxu0 %vm333_vm1, %v809_v34 }
  0x31   : > { %1717 = vmatprep.mubr.msk.bf16.mxu0 %vm1956_vm0, %v1955_v1 }
  0x33   : > { %1646 = vmatmul.mubr.msk.bf16.vlgmr.msra.gmra.mrb[0].mxu1 %vm333_vm1, %v2048_v9  ;;  %v1517_v9 = vcombine.low %v2052_v11, %v2061_v14  ;;  %v1918_v11 = vld [vmem:[%s2357_s1 + $0x78] sm:$0xff]   ;;  %v985_v14 = vld [vmem:[%s2034_s30 + $0x8] sm:$0xf] }
  0x34   : > { %1658 = vmatpush3.bf16.msra.mxu1 %v1909_v36  ;;  %1649 = vmatprep.mubr.msk.bf16.mxu1 %vm1956_vm0, %v1955_v1  ;;  %v1529_v47 = vcombine.low %v985_v14, %v2136_v63 }
  0x35   : > { %1659 = vmatprep.subr.bf16.mxu1 %v1955_v1 }
  0x36   : > { %v1014_v15 = vshll.u32 %v1529_v47, 16  ;;  %v1012_v52 = vshrl.u32 %v1529_v47, 16 }
  0x38   : > { %1718 = vmatmul.mubr.msk.bf16.gmra.mrb[8].mxu0 %vm333_vm1, %v808_v23  ;;  %1660 = vmatpush3.bf16.msra.mxu1 %v1911_v38  ;;  %v1016_v54 = vrot.slane %v1014_v15, 1 }
  0x39   : > { %1725 = vmatprep.mubr.msk.bf16.mxu0 %vm1956_vm0, %v1955_v1  ;;  %1673 = vmatprep.subr.bf16.mxu1 %v1955_v1 }
  0x3a   : > { %v1017_v56 = vor.u32 %v1016_v54, %v1012_v52 }
  0x3b   : > { %1650 = vmatmul.mubr.msk.bf16.gmra.mrb[4].mxu1 %vm333_vm1, %v2058_v13  ;;  %v1917_v13 = vld [vmem:[%s2034_s30 + $0x18] ss:$0 sps:$4 sm:$0xff]  }
  0x3c   : > { %1653 = vmatprep.mubr.msk.bf16.mxu1 %vm1956_vm0, %v1955_v1  ;;  %v1022_v25 = vsel %vm297_vm2, %v1017_v56, %v2138_v0 }
  0x40   : > { %1726 = vmatmul.mubr.msk.bf16.vlgmr.msra.gmra.mrb[0].mxu0 %vm333_vm1, %v1517_v9 }
  0x41   : > { %1738 = vmatpush3.bf16.msra.mxu0 %v1913_v39  ;;  %1729 = vmatprep.mubr.msk.bf16.mxu0 %vm1956_vm0, %v1955_v1 }
  0x42   : > { %1739 = vmatprep.subr.bf16.mxu0 %v1955_v1 }
  0x43   : > { %1654 = vmatmul.mubr.msk.bf16.gmra.mrb[8].mxu1 %vm333_vm1, %v1463_v41 }
  0x44   : > { %1661 = vmatprep.mubr.msk.bf16.mxu1 %vm1956_vm0, %v1955_v1 }
  0x45   : > { %1740 = vmatpush3.bf16.msra.mxu0 %v1918_v11 }
  0x46   : > { %1753 = vmatprep.subr.bf16.mxu0 %v1955_v1 }
  0x48   : > { %1730 = vmatmul.mubr.msk.bf16.gmra.mrb[4].mxu0 %vm333_vm1, %v1518_v43 }
  0x49   : > { %1733 = vmatprep.mubr.msk.bf16.mxu0 %vm1956_vm0, %v1955_v1 }
  0x4b   : > { %1662 = vmatmul.mubr.msk.bf16.vlgmr.msra.gmra.mrb[0].mxu1 %vm333_vm1, %v487_v49 }
  0x4c   : > { %1674 = vmatpush3.bf16.msra.mxu1 %v1916_v50  ;;  %1665 = vmatprep.mubr.msk.bf16.mxu1 %vm1956_vm0, %v1955_v1 }
  0x4d   : > { %1675 = vmatprep.subr.bf16.mxu1 %v1955_v1 }
  0x50   : > { %1734 = vmatmul.mubr.msk.bf16.gmra.mrb[8].mxu0 %vm333_vm1, %v1917_v13  ;;  %1676 = vmatpush3.bf16.msra.mxu1 %v1919_v51 }
  0x51   : > { %1741 = vmatprep.mubr.msk.bf16.mxu0 %vm1956_vm0, %v1955_v1  ;;  %1769 = vmatprep.subr.bf16.mxu1 %v1955_v1 }
  0x53   : > { %1666 = vmatmul.mubr.msk.bf16.gmra.mrb[4].mxu1 %vm333_vm1, %v489_v55 }
  0x54   : > { %1669 = vmatprep.mubr.msk.bf16.mxu1 %vm1956_vm0, %v1955_v1 }
  0x58   : > { %1742 = vmatmul.mubr.msk.bf16.vlgmr.msra.gmra.mrb[0].mxu0 %vm333_vm1, %v1022_v25 }
  0x59   : > { %1754 = vmatpush3.bf16.msra.mxu0 %v1922_v57  ;;  %1745 = vmatprep.mubr.msk.bf16.mxu0 %vm1956_vm0, %v1955_v1 }
  0x5a   : > { %1755 = vmatprep.subr.bf16.mxu0 %v1955_v1 }
  0x5b   : > { %1670 = vmatmul.mubr.msk.bf16.gmra.mrb[8].mxu1 %vm333_vm1, %v488_v48 }
  0x5c   : > { %1677 = vmatprep.mubr.msk.bf16.mxu1 %vm1956_vm0, %v1955_v1 }
  0x5d   : > { %1756 = vmatpush3.bf16.msra.mxu0 %v1925_v59 }
  0x60   : > { %1746 = vmatmul.mubr.msk.bf16.gmra.mrb[4].mxu0 %vm333_vm1, %v2171_v29 }
  0x61   : > { %1749 = vmatprep.mubr.msk.bf16.mxu0 %vm1956_vm0, %v1955_v1 }
  0x63   : > { %1678 = vmatmul.mubr.msk.bf16.vlgmr.msra.gmra.mrb[0].mxu1 %vm333_vm1, %v1483_v12 }
  0x64   : > { %1771 = vmatpush3.bf16.msra.mxu1 %v2009_v2  ;;  %1681 = vmatprep.mubr.msk.bf16.mxu1 %vm1956_vm0, %v1955_v1  ;;  %v1928_v2 = vld [vmem:[%s2034_s30 + $0x14] ss:$0 sps:$4 sm:$0xff]   ;;  %s1862_s30 = smul.u32 20, %s2366_s15 }
  0x65   : > { %1770 = vmatprep.subr.bf16.mxu1 %v1955_v1 }
  0x66   : > { %s257_s28 = scalar_lea.vmem %s2359_s3, %s1862_s30  ;;  %s265_s5 = scalar_lea.vmem %s2360_s4, %s1862_s30 }
  0x68   : > { %1750 = vmatmul.mubr.msk.bf16.gmra.mrb[8].mxu0 %vm333_vm1, %v1033_v61  ;;  %1772 = vmatpush3.bf16.msra.mxu1 %v2021_v4  ;;  %v711_v4 = vshrl.u32 %v2118_v53, 16 }
  0x69   : > { %1757 = vmatprep.mubr.msk.bf16.mxu0 %vm1956_vm0, %v1955_v1 }
  0x6a   : > { %v713_v6 = vor.u32 %v711_v4, %v2144_v19 }
  0x6b   : > { %1682 = vmatmul.mubr.msk.bf16.gmra.mrb[4].mxu1 %vm333_vm1, %v1484_v46 }
  0x6c   : > { %1685 = vmatprep.mubr.msk.bf16.mxu1 %vm1956_vm0, %v1955_v1 }
  0x70   : > { %1758 = vmatmul.mubr.msk.bf16.vlgmr.msra.gmra.mrb[0].mxu0 %vm333_vm1, %v2178_v32 }
  0x71   : > { %1761 = vmatprep.mubr.msk.bf16.mxu0 %vm1956_vm0, %v1955_v1 }
  0x73   : > { %1686 = vmatmul.mubr.msk.bf16.gmra.mrb[8].mxu1 %vm333_vm1, %v1928_v2 }
  0x74   : > { %1697 = vmatprep.mubr.msk.bf16.mxu1 %vm1956_vm0, %v1955_v1 }
  0x78   : > { %1762 = vmatmul.mubr.msk.bf16.gmra.mrb[4].mxu0 %vm333_vm1, %v2162_v27 }
  0x79   : > { %1765 = vmatprep.mubr.msk.bf16.mxu0 %vm1956_vm0, %v1955_v1 }
  0x7b   : > { %1698 = vmatmul.mubr.msk.bf16.vlgmr.msra.gmra.mrb[4].mxu1 %vm333_vm1, %v2166_v28 }
  0x7c   : > { %1701 = vmatprep.mubr.msk.bf16.mxu1 %vm1956_vm0, %v1955_v1 }
  0x80   : > { %1766 = vmatmul.mubr.msk.bf16.gmra.mrb[8].mxu0 %vm333_vm1, %v1128_v18 }
  0x83   : > { %1702 = vmatmul.mubr.msk.bf16.gmra.mrb[8].mxu1 %vm333_vm1, %v713_v6 }
  0x9f   : > { %v1220_v46 = vpop.permute.xlu0 %1219 }
  0xa2   : > { %v1230_v20 = vpop.permute.xlu1 %1229 }
  0xa3   : > { %v1225_v3 = vpop.permute.xlu0 %1224 }
  0xa6   : > { %v1235_v31 = vpop.permute.xlu1 %1234 }
  0xa7   : > { %v1240_v47 = vpop.permute.xlu0 %1239 }
 0x136   : > { %v638_v7 = vpop.f32.mrb[0].mxu1 }
 0x137   : > { %v1679_v8 = vpop.f32.mrb[1].mxu1 }
 0x138   : > { %v641_v12 = vpop.f32.mrb[2].mxu1 }
 0x139   : > { %v1680_v17 = vpop.f32.mrb[3].mxu1 }
 0x143   : > { %v1185_v62 = vpop.f32.mrb[0].mxu0 }
 0x144   : > { %v2325_v63 = vadd.f32 %v1185_v62, %v638_v7  ;;  %v1759_v53 = vpop.f32.mrb[1].mxu0 }
 0x145   : > { %v1188_v0 = vpop.f32.mrb[2].mxu0 }
 0x146   : > { %v2327_v1 = vadd.f32 %v1188_v0, %v641_v12  ;;  %v1760_v5 = vpop.f32.mrb[3].mxu0  ;;  %v1242_v58 = vmul.f32 %v2325_v63, %v1220_v46 }
 0x148   : > { %v1243_v10 = vmul.f32 %v2327_v1, %v1225_v3  ;;  %v1257_v18 = vmul.f32 %v2325_v63, %v1242_v58 }
 0x14a   : > { %v1247_v16 = vadd.f32 %v1243_v10, %v1242_v58  ;;  %v1258_v19 = vmul.f32 %v2327_v1, %v1243_v10  ;;  %v1561_v10 = vld [vmem:[%s257_s28] sm:$0xff]  }
 0x14b   : > { %v1193_v21 = vpop.f32.mrb[4].mxu0 }
 0x14c   : > { %v1262_v22 = vadd.f32 %v1258_v19, %v1257_v18  ;;  %v1763_v23 = vpop.f32.mrb[5].mxu0  ;;  %v1293_v18 = vld [vmem:[%s257_s28 + $0x10] sm:$0xf]  ;;  %v1562_v19 = vunpack.c.l.bf16 %v1561_v10 }
 0x14d   : > { %v1196_v24 = vpop.f32.mrb[6].mxu0 }
 0x14e   : > { %v1764_v26 = vpop.f32.mrb[7].mxu0  ;;  %v777_v27 = vpop.f32.mrb[4].mxu1 }
 0x14f   : > { %v2333_v28 = vadd.f32 %v1193_v21, %v777_v27  ;;  %v1699_v29 = vpop.f32.mrb[5].mxu1 }
 0x150   : > { %v780_v30 = vpop.f32.mrb[6].mxu1 }
 0x151   : > { %v1244_v32 = vmul.f32 %v2333_v28, %v1230_v20  ;;  %v1776_v33 = vadd.f32 %v1196_v24, %v780_v30  ;;  %v1700_v34 = vpop.f32.mrb[7].mxu1 }
 0x153   : > { %v1259_v35 = vmul.f32 %v2333_v28, %v1244_v32  ;;  %v1245_v36 = vmul.f32 %v1776_v33, %v1235_v31  ;;  %v1248_v37 = vadd.f32 %v1247_v16, %v1244_v32  ;;  %v1201_v38 = vpop.f32.mrb[8].mxu0  ;;  %v1578_v16 = vld [vmem:[%s257_s28 + $0x8] sm:$0xff]  }
 0x154   : > { %v1767_v9 = vpop.f32.mrb[9].mxu0  ;;  %v1566_v20 = vunpack.c.l.bf16 %v1578_v16 }
 0x155   : > { %v1249_v39 = vadd.f32 %v1248_v37, %v1245_v36  ;;  %v1260_v40 = vmul.f32 %v1776_v33, %v1245_v36  ;;  %v1263_v41 = vadd.f32 %v1262_v22, %v1259_v35  ;;  %v1204_v42 = vpop.f32.mrb[10].mxu0  ;;  %v1298_v22 = vunpack.c.l.bf16 %v1293_v18 }
 0x156   : > { %v1768_v11 = vpop.f32.mrb[11].mxu0  ;;  %v785_v14 = vpop.f32.mrb[8].mxu1 }
 0x157   : > { %v1264_v43 = vadd.f32 %v1263_v41, %v1260_v40  ;;  %v1777_v44 = vadd.f32 %v1201_v38, %v785_v14  ;;  %v1703_v45 = vpop.f32.mrb[9].mxu1 }
 0x158   : > { %v788_v49 = vpop.f32.mrb[10].mxu1 }
 0x159   : > { %v1246_v50 = vmul.f32 %v1777_v44, %v1240_v47  ;;  %v1704_v15 = vpop.f32.mrb[11].mxu1 }
 0x15b   : > { %v1250_v13 = vadd.f32 %v1249_v39, %v1246_v50  ;;  %v1261_v48 = vmul.f32 %v1777_v44, %v1246_v50 }
 0x15d   : > { %v1251_v51 = vrot.slane %v1250_v13, 4  ;;  %v1265_v52 = vadd.f32 %v1264_v43, %v1261_v48 }
 0x15f   : > { %v1252_v54 = vadd.f32 %v1251_v51, %v1250_v13  ;;  %v1266_v55 = vrot.slane %v1265_v52, 4 }
 0x161   : > { %v1253_v56 = vrot.slane %v1252_v54, 2  ;;  %v1267_v25 = vadd.f32 %v1266_v55, %v1265_v52 }
 0x163   : > { %v1254_v57 = vadd.f32 %v1253_v56, %v1252_v54  ;;  %v1268_v59 = vrot.slane %v1267_v25, 2 }
 0x165   : > { %v1255_v60 = vrot.slane %v1254_v57, 1  ;;  %v1269_v61 = vadd.f32 %v1268_v59, %v1267_v25 }
 0x167   : > { %v1256_v2 = vadd.f32 %v1255_v60, %v1254_v57  ;;  %v1270_v4 = vrot.slane %v1269_v61, 1 }
 0x169   : > { %v1271_v6 = vadd.f32 %v1270_v4, %v1269_v61  ;;  %v1272_v7 = vmul.f32 0.04, %v1256_v2 }
 0x16b   : > { %v1273_v8 = vmul.f32 0.04, %v1271_v6  ;;  %v1274_v12 = vmul.f32 %v1272_v7, %v1272_v7  ;;  %v1277_v17 = vsub.f32 %v2325_v63, %v1272_v7  ;;  %v1278_v46 = vsub.f32 %v2327_v1, %v1272_v7 }
 0x16c   : > { %v1279_v62 = vsub.f32 %v2333_v28, %v1272_v7  ;;  %v1280_v53 = vsub.f32 %v1776_v33, %v1272_v7  ;;  %v1281_v0 = vsub.f32 %v1777_v44, %v1272_v7  ;;  %v1563_v63 = vunpack.c.h.bf16 %v1561_v10 }
 0x16d   : > { %v1275_v3 = vsub.f32 %v1273_v8, %v1274_v12  ;;  %v1567_v1 = vunpack.c.h.bf16 %v1578_v16 }
 0x16f   : > { %v1276_v5 = vmax.f32 %v1275_v3, 0.0 }
 0x171   : > { %v1282_v58 = vadd.f32 1e-05, %v1276_v5 }
 0x173   : > { %1929 = vrsqrt.f32 %v1282_v58 }
 0x17d   : > { %v1930_v21 = vpop.eup %1929 }
 0x17e   : > { %v1284_v23 = vmul.f32 %v1930_v21, %v1277_v17  ;;  %v1285_v24 = vmul.f32 %v1930_v21, %v1278_v46  ;;  %v1286_v26 = vmul.f32 %v1930_v21, %v1279_v62  ;;  %v1287_v27 = vmul.f32 %v1930_v21, %v1280_v53 }
 0x17f   : > { %v1288_v28 = vmul.f32 %v1930_v21, %v1281_v0 }
 0x180   : > { %v1299_v29 = vadd.f32 %v1562_v19, %v1284_v23  ;;  %v1300_v30 = vadd.f32 %v1563_v63, %v1285_v24  ;;  %v1301_v31 = vadd.f32 %v1566_v20, %v1286_v26  ;;  %v1302_v32 = vadd.f32 %v1567_v1, %v1287_v27 }
 0x181   : > { %v1303_v33 = vadd.f32 %v1298_v22, %v1288_v28 }
 0x182   : > { %v1571_v34 = vpack.c.bf16 %v1300_v30, %v1299_v29  ;;  %v1576_v35 = vpack.c.bf16 %v1302_v32, %v1301_v31 }
 0x183   : > { %v1559_v36 = vpack.c.bf16 %v1303_v33, %v1303_v33 }
 0x184   : > { %1572 = vst [vmem:[%s265_s5] sm:$0xff] %v1571_v34   ;;  %1579 = vst [vmem:[%s265_s5 + $0x8] sm:$0xff] %v1576_v35  }
 0x185   : > { %1329 = vst [vmem:[%s265_s5 + $0x10] sm:$0xf] %v1559_v36 }
 0x186 PF: > { %s14_s17 = sadd.s32 1, %s1953_s17   ;;  %s2361_s15 = smov %s1949_s16 }
 0x187   : > { %p11_p5 = scmp.ge.s32.totalorder %s14_s17, 4   ;;  %s2362_s16 = smov %s2364_s18 }
 0x189   :  { %13 = sbr.rel (!%p11_p5) target bundleno = 2 (0x2), region = 80 }

// kernel: nlayer_res_discriminator_forward.17
= control target key start
LH: loop header
LB: loop body
LE: loop exit
PB: predicated region body
PF: predicated region fallthrough
CT: control target
= control target key end

     0   :  { %s1261_s12 = smov 0   ;;  %s1263_s13 = smov 0   ;;  %s1421_s0 = inlined_call_operand.vmem [shape: bf16[2,56,128], index: 0, kind: input, shape index: {}]   ;;  %s1422_s1 = inlined_call_operand.vmem [shape: bf16[4,128,128], index: 1, kind: input, shape index: {}]   ;;  %s1423_s2 = inlined_call_operand.vmem [shape: f32[24,1], index: 2, kind: input, shape index: {}]   ;;  %s1424_s3 = inlined_call_operand.vmem [shape: bf16[2,24,128], index: 3, kind: output, shape index: {}]  }
   0x1   :  { %s1265_s14 = smov 0  }
   0x2 LB: > { %s22_s15 = sadd.s32 1, %s1234_s13  ;;  %p912_p0 = scmp.ge.s32.totalorder %s1238_s14, 1  ;;  %s1238_s14 = sphi %s1265_s14, %s13_s14   ;;  %s1234_s13 = sphi %s1263_s13, %s1426_s13   ;;  %s1230_s12 = sphi %s1261_s12, %s1425_s12  }
   0x3   : > { %p23_p1 = scmp.ge.s32.totalorder %s22_s15, 2  ;;  %p160_p2 = scmp.lt.s32.totalorder %s1238_s14, 3 }
   0x5   : > { %s1428_s15 = smov (%p23_p1, %s22_s15), 0  ;;  %p161_p3 = pnand %p912_p0, %p160_p2 }
   0x6   : > { %v1175_v0 = vld [vmem:[%s1422_s1 + $0x40] sm:$0xff] (!%p161_p3)   ;;  %p191_p4 = scmp.lt.s32.totalorder (!%p161_p3), %s1230_s12, 1  ;;  %v1177_v2 = vld [vmem:[%s1422_s1 + $0x48] sm:$0xff] (!%p161_p3)   ;;  %v1240_v3 = vmov (!%p161_p3), 0   ;;  %v1179_v5 = vld [vmem:[%s1422_s1 + $0x50] sm:$0xff] (!%p161_p3)  }
   0x7   : > { %164 = sbr.rel (%p161_p3) target bundleno = 337 (0x151), region = 32  ;;  %v1176_v1 = vld [vmem:[%s1422_s1 + $0x80] sm:$0xff] (!%p161_p3)   ;;  %1055 = vmatprep.subr.bf16.mxu1 (!%p161_p3), %v1175_v0  ;;  %1173 = vset.pattern.permute.xlu0 (!%p161_p3), %v1240_v3  ;;  %v1178_v4 = vld [vmem:[%s1422_s1 + $0x88] sm:$0xff] (!%p161_p3)   ;;  %v1180_v6 = vld [vmem:[%s1422_s1 + $0x90] sm:$0xff] (!%p161_p3)   ;;  %vm256_vm0 = vsmask.f32 (!%p161_p3), 7424 }
   0x8   : > { %1095 = vmatprep.subr.bf16.mxu0 (!%p161_p3), %v1176_v1  ;;  %1056 = vmatpush3.bf16.msra.mxu1 (!%p161_p3), %v1175_v0  ;;  %v1181_v7 = vld [vmem:[%s1422_s1 + $0x58] sm:$0xff] (!%p161_p3)   ;;  %v1183_v9 = vld [vmem:[%s1422_s1 + $0x60] sm:$0xff] (!%p161_p3)   ;;  %v1185_v11 = vld [vmem:[%s1422_s1 + $0x68] sm:$0xff] (!%p161_p3)  }
   0x9   : > { %1096 = vmatpush3.bf16.msra.mxu0 (!%p161_p3), %v1176_v1  ;;  %1057 = vmatprep.subr.bf16.mxu1 (!%p161_p3), %v1177_v2  ;;  %v1182_v8 = vld [vmem:[%s1422_s1 + $0x98] sm:$0xff] (!%p161_p3)   ;;  %v1184_v10 = vld [vmem:[%s1422_s1 + $0xa0] sm:$0xff] (!%p161_p3)   ;;  %v1186_v15 = vld [vmem:[%s1422_s1 + $0xa8] sm:$0xff] (!%p161_p3)  }
   0xa   : > { %1097 = vmatprep.subr.bf16.mxu0 (!%p161_p3), %v1178_v4  ;;  %1174 = vset.pattern.permute.xlu1 (!%p161_p3), %v1240_v3  ;;  %v1187_v22 = vld [vmem:[%s1422_s1 + $0x70] sm:$0xff] (!%p161_p3)   ;;  %v1189_v28 = vld [vmem:[%s1422_s1 + $0x78] sm:$0xff] (!%p161_p3)   ;;  %v1193_v32 = vld [vmem:[%s1422_s1] sm:$0xff] (!%p161_p3)  }
   0xb   : > { %v1188_v24 = vld [vmem:[%s1422_s1 + $0xb0] sm:$0xff] (!%p161_p3)   ;;  %v1190_v29 = vld [vmem:[%s1422_s1 + $0xb8] sm:$0xff] (!%p161_p3)   ;;  %v1195_v33 = vld [vmem:[%s1422_s1 + $0xc0] sm:$0xff] (!%p161_p3)  }
   0xc   : > { %1058 = vmatpush3.bf16.msra.mxu1 (!%p161_p3), %v1177_v2  ;;  %v1197_v36 = vld [vmem:[%s1422_s1 + $0x8] sm:$0xff] (!%p161_p3)   ;;  %v1199_v38 = vld [vmem:[%s1422_s1 + $0x10] sm:$0xff] (!%p161_p3)   ;;  %v739_v41 = vld [vmem:[%s1423_s2] sm:$0xff] (!%p161_p3) }
   0xd   : > { %1098 = vmatpush3.bf16.msra.mxu0 (!%p161_p3), %v1178_v4  ;;  %1059 = vmatprep.subr.bf16.mxu1 (!%p161_p3), %v1179_v5  ;;  %v1198_v37 = vld [vmem:[%s1422_s1 + $0xc8] sm:$0xff] (!%p161_p3)   ;;  %v1200_v42 = vld [vmem:[%s1422_s1 + $0xd0] sm:$0xff] (!%p161_p3)   ;;  %v1201_v48 = vld [vmem:[%s1422_s1 + $0x18] sm:$0xff] (!%p161_p3)  }
   0xe   : > { %s1430_s12 = smov (!%p191_p4, %s1230_s12), 1  ;;  %1099 = vmatprep.subr.bf16.mxu0 %v1180_v6  ;;  %v741_v43 = vld [vmem:[%s1423_s2 + $0x10] sm:$0xff]  ;;  %744 = vperm.xlu0 %1173, %v739_v41   ;;  %v740_v47 = vld [vmem:[%s1423_s2 + $0x8] sm:$0xff]  ;;  %v1202_v51 = vld [vmem:[%s1422_s1 + $0xd8] sm:$0xff]  }
   0xf   : > { %s1146_s5 = smul.u32 28, %s1430_s12  ;;  %754 = vperm.xlu1 %1174, %v741_v43   ;;  %v1203_v53 = vld [vmem:[%s1422_s1 + $0x20] sm:$0xff]   ;;  %v1205_v56 = vld [vmem:[%s1422_s1 + $0x28] sm:$0xff]   ;;  %v1207_v58 = vld [vmem:[%s1422_s1 + $0x30] sm:$0xff]  }
  0x10   : > { %1060 = vmatpush3.bf16.msra.mxu1 %v1179_v5  ;;  %v1204_v55 = vld [vmem:[%s1422_s1 + $0xe0] sm:$0xff]   ;;  %v1206_v57 = vld [vmem:[%s1422_s1 + $0xe8] sm:$0xff]   ;;  %v1208_v59 = vld [vmem:[%s1422_s1 + $0xf0] sm:$0xff]   ;;  %s1147_s22 = smul.u32 12, %s1430_s12 }
  0x11   : > { %1100 = vmatpush3.bf16.msra.mxu0 %v1180_v6  ;;  %1061 = vmatprep.subr.bf16.mxu1 %v1181_v7  ;;  %s1316_s16 = scalar_lea.vmem %s1421_s0, %s1146_s5  ;;  %v1209_v60 = vld [vmem:[%s1422_s1 + $0x38] sm:$0xff]  }
  0x12   : > { %1101 = vmatprep.subr.bf16.mxu0 %v1182_v8  ;;  %v209_v12 = vld [vmem:[%s1316_s16] sm:$0xf]  ;;  %v210_v13 = vld [vmem:[%s1316_s16 + $0x4] sm:$0xf]  ;;  %v1324_v14 = vld [vmem:[%s1316_s16 + $0x8] sm:$0xf]  ;;  %749 = vperm.xlu0 %1173, %v740_v47   ;;  %s207_s24 = scalar_lea.vmem %s1424_s3, %s1147_s22 }
  0x13   : > { %v228_v16 = vld [vmem:[%s1316_s16 + $0xc] sm:$0x1]  ;;  %v931_v17 = vcombine.low %v209_v12, %v210_v13  ;;  %v966_v18 = vcombine.low %v210_v13, %v1324_v14  ;;  %v1211_v39 = vld [vmem:[%s1316_s16 + $0x4] sm:$0xff]   ;;  %v1210_v61 = vld [vmem:[%s1422_s1 + $0xf8] sm:$0xff]   ;;  %v941_v63 = vcombine.low %v1324_v14, %v1324_v14 }
  0x14   : > { %1062 = vmatpush3.bf16.msra.mxu1 %v1181_v7  ;;  %v932_v19 = vcombine.low %v1324_v14, %v228_v16  ;;  %v1196_v35 = vld [vmem:[%s1316_s16 + $0xc] ss:$0 sps:$4 sm:$0xff]   ;;  %v624_v44 = vshrl.u32 %v1211_v39, 16  ;;  %v626_v45 = vshll.u32 %v1211_v39, 16 }
  0x15   : > { %1102 = vmatpush3.bf16.msra.mxu0 %v1182_v8  ;;  %1063 = vmatprep.subr.bf16.mxu1 %v1183_v9  ;;  %v258_v20 = vshrl.u32 %v931_v17, 16  ;;  %v260_v21 = vshll.u32 %v931_v17, 16  ;;  %v1212_v40 = vld [vmem:[%s1316_s16 + $0xc] sm:$0x1f]  }
  0x16   : > { %1103 = vmatprep.subr.bf16.mxu0 %v1184_v10  ;;  %1111 = vmatprep.mubr.bf16.mxu0 %v966_v18  ;;  %v265_v23 = vshll.u32 %v932_v19, 16  ;;  %v269_v31 = vshrl.u32 %v932_v19, 16  ;;  %v631_v46 = vshll.u32 %v1212_v40, 16  ;;  %v628_v49 = vrot.slane %v626_v45, 1 }
  0x17   : > { %v262_v25 = vrot.slane %v260_v21, 1  ;;  %v635_v62 = vshrl.u32 %v1212_v40, 16 }
  0x18   : > { %1064 = vmatpush3.bf16.msra.mxu1 %v1183_v9  ;;  %v267_v26 = vrot.slane %v265_v23, 1  ;;  %v633_v50 = vrot.slane %v631_v46, 1  ;;  %v629_v52 = vor.u32 %v628_v49, %v624_v44 }
  0x19   : > { %1104 = vmatpush3.bf16.msra.mxu0 %v1184_v10  ;;  %1065 = vmatprep.subr.bf16.mxu1 %v1185_v11  ;;  %v263_v27 = vor.u32 %v262_v25, %v258_v20 }
  0x1a   : > { %1105 = vmatprep.subr.bf16.mxu0 %v1186_v15  ;;  %v271_v34 = vor.u32 %v269_v31, %v267_v26  ;;  %v634_v54 = vsel %vm256_vm0, %v629_v52, %v633_v50  ;;  %v637_v0 = vor.u32 %v635_v62, %v633_v50 }
  0x1b   : > { %v268_v30 = vsel %vm256_vm0, %v263_v27, %v267_v26 }
  0x1c   : > { %1066 = vmatpush3.bf16.msra.mxu1 %v1185_v11  ;;  %1071 = vmatprep.mubr.bf16.mxu1 %v268_v30 }
  0x1d   : > { %1106 = vmatpush3.bf16.msra.mxu0 %v1186_v15  ;;  %1067 = vmatprep.subr.bf16.mxu1 %v1187_v22 }
  0x1e   : > { %1107 = vmatprep.subr.bf16.mxu0 %v1188_v24 }
  0x20   : > { %1068 = vmatpush3.bf16.msra.mxu1 %v1187_v22 }
  0x21   : > { %1108 = vmatpush3.bf16.msra.mxu0 %v1188_v24  ;;  %1069 = vmatprep.subr.bf16.mxu1 %v1189_v28 }
  0x22   : > { %1109 = vmatprep.subr.bf16.mxu0 %v1190_v29 }
  0x24   : > { %1070 = vmatpush3.bf16.msra.mxu1 %v1189_v28 }
  0x25   : > { %1110 = vmatpush3.bf16.msra.mxu0 %v1190_v29  ;;  %1075 = vmatprep.subr.bf16.mxu1 %v1193_v32 }
  0x26   : > { %1115 = vmatprep.subr.bf16.mxu0 %v1195_v33 }
  0x27   : > { %1072 = vmatmul.mubr.bf16.vlgmr.msra.gmra.mrb[0].mxu1 %v271_v34 }
  0x28   : > { %1076 = vmatpush3.bf16.msra.mxu1 %v1193_v32  ;;  %1112 = vmatmul.mubr.bf16.vlgmr.msra.gmra.mrb[0].mxu0 %v1196_v35 }
  0x29   : > { %1116 = vmatpush3.bf16.msra.mxu0 %v1195_v33  ;;  %1077 = vmatprep.subr.bf16.mxu1 %v1197_v36 }
  0x2a   : > { %1117 = vmatprep.subr.bf16.mxu0 %v1198_v37  ;;  %1091 = vmatprep.mubr.bf16.mxu1 %v931_v17 }
  0x2b   : > { %1131 = vmatprep.mubr.bf16.mxu0 %v634_v54 }
  0x2c   : > { %1078 = vmatpush3.bf16.msra.mxu1 %v1197_v36 }
  0x2d   : > { %1118 = vmatpush3.bf16.msra.mxu0 %v1198_v37  ;;  %1079 = vmatprep.subr.bf16.mxu1 %v1199_v38 }
  0x2e   : > { %1119 = vmatprep.subr.bf16.mxu0 %v1200_v42 }
  0x30   : > { %1080 = vmatpush3.bf16.msra.mxu1 %v1199_v38 }
  0x31   : > { %1120 = vmatpush3.bf16.msra.mxu0 %v1200_v42  ;;  %1081 = vmatprep.subr.bf16.mxu1 %v1201_v48 }
  0x32   : > { %1121 = vmatprep.subr.bf16.mxu0 %v1202_v51 }
  0x34   : > { %1082 = vmatpush3.bf16.msra.mxu1 %v1201_v48 }
  0x35   : > { %1122 = vmatpush3.bf16.msra.mxu0 %v1202_v51  ;;  %1083 = vmatprep.subr.bf16.mxu1 %v1203_v53 }
  0x36   : > { %1123 = vmatprep.subr.bf16.mxu0 %v1204_v55 }
  0x38   : > { %1084 = vmatpush3.bf16.msra.mxu1 %v1203_v53 }
  0x39   : > { %1124 = vmatpush3.bf16.msra.mxu0 %v1204_v55  ;;  %1085 = vmatprep.subr.bf16.mxu1 %v1205_v56 }
  0x3a   : > { %1125 = vmatprep.subr.bf16.mxu0 %v1206_v57 }
  0x3c   : > { %1086 = vmatpush3.bf16.msra.mxu1 %v1205_v56 }
  0x3d   : > { %1126 = vmatpush3.bf16.msra.mxu0 %v1206_v57  ;;  %1087 = vmatprep.subr.bf16.mxu1 %v1207_v58 }
  0x3e   : > { %1127 = vmatprep.subr.bf16.mxu0 %v1208_v59 }
  0x40   : > { %1088 = vmatpush3.bf16.msra.mxu1 %v1207_v58 }
  0x41   : > { %1128 = vmatpush3.bf16.msra.mxu0 %v1208_v59  ;;  %1089 = vmatprep.subr.bf16.mxu1 %v1209_v60 }
  0x42   : > { %1129 = vmatprep.subr.bf16.mxu0 %v1210_v61 }
  0x44   : > { %1090 = vmatpush3.bf16.msra.mxu1 %v1209_v60 }
  0x45   : > { %1130 = vmatpush3.bf16.msra.mxu0 %v1210_v61 }
  0x47   : > { %1092 = vmatmul.mubr.bf16.vlgmr.msra.gmra.mrb[0].mxu1 %v941_v63 }
  0x48   : > { %1132 = vmatmul.mubr.bf16.vlgmr.msra.gmra.mrb[0].mxu0 %v637_v0 }
  0x8d   : > { %v745_v1 = vpop.permute.xlu0 %744 }
  0x8e   : > { %v755_v11 = vpop.permute.xlu1 %754 }
  0x91   : > { %v750_v14 = vpop.permute.xlu0 %749 }
 0x11a   : > { %v1093_v2 = vpop.f32.mrb[0].mxu1 }
 0x11b   : > { %v1133_v3 = vpop.f32.mrb[0].mxu0  ;;  %v455_v4 = vpop.f32.mrb[1].mxu1 }
 0x11c   : > { %v1135_v5 = vadd.f32 %v1133_v3, %v1093_v2  ;;  %v722_v6 = vpop.f32.mrb[1].mxu0  ;;  %v1094_v7 = vpop.f32.mrb[2].mxu1 }
 0x11d   : > { %v1136_v8 = vadd.f32 %v722_v6, %v455_v4  ;;  %v1134_v9 = vpop.f32.mrb[2].mxu0  ;;  %v458_v10 = vpop.f32.mrb[3].mxu1 }
 0x11e   : > { %v725_v12 = vpop.f32.mrb[3].mxu0  ;;  %v759_v16 = vmul.f32 %v1135_v5, %v755_v11 }
 0x11f   : > { %v757_v13 = vmul.f32 %v1136_v8, %v745_v1  ;;  %v1137_v15 = vadd.f32 %v725_v12, %v458_v10 }
 0x120   : > { %v770_v21 = vmul.f32 %v1135_v5, %v759_v16 }
 0x121   : > { %v758_v17 = vmul.f32 %v1137_v15, %v750_v14  ;;  %v768_v18 = vmul.f32 %v1136_v8, %v757_v13 }
 0x123   : > { %v760_v19 = vadd.f32 %v758_v17, %v757_v13  ;;  %v769_v20 = vmul.f32 %v1137_v15, %v758_v17 }
 0x125   : > { %v761_v22 = vadd.f32 %v760_v19, %v759_v16  ;;  %v771_v23 = vadd.f32 %v769_v20, %v768_v18 }
 0x127   : > { %v762_v24 = vrot.slane %v761_v22, 4  ;;  %v772_v25 = vadd.f32 %v771_v23, %v770_v21 }
 0x129   : > { %v763_v26 = vadd.f32 %v762_v24, %v761_v22  ;;  %v773_v27 = vrot.slane %v772_v25, 4 }
 0x12b   : > { %v764_v28 = vrot.slane %v763_v26, 2  ;;  %v774_v29 = vadd.f32 %v773_v27, %v772_v25 }
 0x12d   : > { %v765_v30 = vadd.f32 %v764_v28, %v763_v26  ;;  %v775_v31 = vrot.slane %v774_v29, 2 }
 0x12f   : > { %v766_v32 = vrot.slane %v765_v30, 1  ;;  %v776_v33 = vadd.f32 %v775_v31, %v774_v29 }
 0x131   : > { %v767_v34 = vadd.f32 %v766_v32, %v765_v30  ;;  %v777_v35 = vrot.slane %v776_v33, 1 }
 0x133   : > { %v778_v36 = vadd.f32 %v777_v35, %v776_v33  ;;  %v779_v37 = vmul.f32 0.11111111, %v767_v34 }
 0x135   : > { %v780_v38 = vmul.f32 0.11111111, %v778_v36  ;;  %v781_v39 = vmul.f32 %v779_v37, %v779_v37  ;;  %v784_v40 = vsub.f32 %v1136_v8, %v779_v37  ;;  %v785_v41 = vsub.f32 %v1137_v15, %v779_v37 }
 0x136   : > { %v786_v42 = vsub.f32 %v1135_v5, %v779_v37 }
 0x137   : > { %v782_v43 = vsub.f32 %v780_v38, %v781_v39 }
 0x139   : > { %v783_v44 = vmax.f32 %v782_v43, 0.0 }
 0x13b   : > { %v787_v45 = vadd.f32 1e-05, %v783_v44 }
 0x13d   : > { %1214 = vrsqrt.f32 %v787_v45 }
 0x147   : > { %v1215_v46 = vpop.eup %1214 }
 0x148   : > { %v789_v47 = vmul.f32 %v1215_v46, %v784_v40  ;;  %v790_v48 = vmul.f32 %v1215_v46, %v785_v41  ;;  %v791_v49 = vmul.f32 %v1215_v46, %v786_v42 }
 0x14a   : > { %v792_v50 = vmul.f32 0.2, %v789_v47  ;;  %v793_v51 = vmul.f32 0.2, %v790_v48  ;;  %v794_v52 = vmul.f32 0.2, %v791_v49 }
 0x14c   : > { %v795_v53 = vmax.f32 %v789_v47, %v792_v50  ;;  %v796_v54 = vmax.f32 %v790_v48, %v793_v51  ;;  %v797_v55 = vmax.f32 %v791_v49, %v794_v52 }
 0x14e   : > { %v1009_v56 = vpack.c.bf16 %v797_v55, %v797_v55  ;;  %v1013_v57 = vpack.c.bf16 %v796_v54, %v795_v53 }
 0x150   : > { %1014 = vst [vmem:[%s207_s24] sm:$0xff] %v1013_v57   ;;  %813 = vst [vmem:[%s207_s24 + $0x8] sm:$0xf] %v1009_v56 }
 0x151 PF: > { %s13_s14 = sadd.s32 1, %s1238_s14   ;;  %s1425_s12 = smov %s1234_s13 }
 0x152   : > { %p10_p5 = scmp.ge.s32.totalorder %s13_s14, 4   ;;  %s1426_s13 = smov %s1428_s15 }
 0x154   :  { %12 = sbr.rel (!%p10_p5) target bundleno = 2 (0x2), region = 68 }

// kernel: nlayer_res_discriminator_forward.18
= control target key start
LH: loop header
LB: loop body
LE: loop exit
PB: predicated region body
PF: predicated region fallthrough
CT: control target
= control target key end

     0   :  { %s1773_s12 = smov 0   ;;  %s1775_s13 = smov 0   ;;  %s2008_s0 = inlined_call_operand.vmem [shape: bf16[2,48,64], index: 0, kind: input, shape index: {}]   ;;  %s2009_s1 = inlined_call_operand.vmem [shape: bf16[9,64,128], index: 1, kind: input, shape index: {}]   ;;  %s2010_s2 = inlined_call_operand.vmem [shape: f32[24,1], index: 2, kind: input, shape index: {}]   ;;  %s2011_s3 = inlined_call_operand.vmem [shape: bf16[2,24,128], index: 3, kind: output, shape index: {}]  }
   0x1   :  { %s1777_s14 = smov 0  }
   0x2 LB: > { %s22_s15 = sadd.s32 1, %s1746_s13  ;;  %p1306_p0 = scmp.ge.s32.totalorder %s1750_s14, 1  ;;  %s1750_s14 = sphi %s1777_s14, %s13_s14   ;;  %s1746_s13 = sphi %s1775_s13, %s2013_s13   ;;  %s1742_s12 = sphi %s1773_s12, %s2012_s12  }
   0x3   : > { %p23_p1 = scmp.ge.s32.totalorder %s22_s15, 2  ;;  %p160_p2 = scmp.lt.s32.totalorder %s1750_s14, 3 }
   0x5   : > { %s2015_s15 = smov (%p23_p1, %s22_s15), 0  ;;  %p161_p3 = pnand %p1306_p0, %p160_p2 }
   0x6   : > { %v1676_v0 = vld [vmem:[%s2009_s1 + $0x20] sm:$0xff] (!%p161_p3)   ;;  %p191_p4 = scmp.lt.s32.totalorder (!%p161_p3), %s1742_s12, 1  ;;  %v1678_v2 = vld [vmem:[%s2009_s1 + $0x28] sm:$0xff] (!%p161_p3)   ;;  %v1680_v4 = vld [vmem:[%s2009_s1 + $0x30] sm:$0xff] (!%p161_p3)   ;;  %v1752_v7 = vmov (!%p161_p3), 0   ;;  %vm280_vm1 = vcmask (!%p161_p3), 523264  }
   0x7   : > { %164 = sbr.rel (%p161_p3) target bundleno = 360 (0x168), region = 32  ;;  %v1677_v1 = vld [vmem:[%s2009_s1 + $0x80] sm:$0xff] (!%p161_p3)   ;;  %1508 = vmatprep.subr.bf16.mxu1 (!%p161_p3), %v1676_v0  ;;  %v1679_v3 = vld [vmem:[%s2009_s1 + $0x88] sm:$0xff] (!%p161_p3)   ;;  %v1681_v5 = vld [vmem:[%s2009_s1 + $0x90] sm:$0xff] (!%p161_p3)   ;;  %1674 = vset.pattern.permute.xlu0 (!%p161_p3), %v1752_v7  ;;  %vm240_vm0 = vsmask.f32 (!%p161_p3), 7424 }
   0x8   : > { %1556 = vmatprep.subr.bf16.mxu0 (!%p161_p3), %v1677_v1  ;;  %1509 = vmatpush3.bf16.msra.mxu1 (!%p161_p3), %v1676_v0  ;;  %v1682_v6 = vld [vmem:[%s2009_s1 + $0x38] sm:$0xff] (!%p161_p3)   ;;  %v1686_v15 = vld [vmem:[%s2009_s1] sm:$0xff] (!%p161_p3)   ;;  %v1690_v38 = vld [vmem:[%s2009_s1 + $0x8] sm:$0xff] (!%p161_p3)   ;;  %vm426_vm2 = vcmask (!%p161_p3), 1046528  }
   0x9   : > { %1557 = vmatpush3.bf16.msra.mxu0 (!%p161_p3), %v1677_v1  ;;  %1510 = vmatprep.subr.bf16.mxu1 (!%p161_p3), %v1678_v2  ;;  %v1683_v8 = vld [vmem:[%s2009_s1 + $0x98] sm:$0xff] (!%p161_p3)   ;;  %v1689_v27 = vld [vmem:[%s2009_s1 + $0xa0] sm:$0xff] (!%p161_p3)   ;;  %v1691_v42 = vld [vmem:[%s2009_s1 + $0xa8] sm:$0xff] (!%p161_p3)  }
   0xa   : > { %1558 = vmatprep.subr.bf16.mxu0 (!%p161_p3), %v1679_v3  ;;  %1675 = vset.pattern.permute.xlu1 (!%p161_p3), %v1752_v7  ;;  %v1692_v43 = vld [vmem:[%s2009_s1 + $0x10] sm:$0xff] (!%p161_p3)   ;;  %v1694_v49 = vld [vmem:[%s2009_s1 + $0x18] sm:$0xff] (!%p161_p3)   ;;  %v1696_v53 = vld [vmem:[%s2009_s1 + $0x40] sm:$0xff] (!%p161_p3)  }
   0xb   : > { %v1693_v47 = vld [vmem:[%s2009_s1 + $0xb0] sm:$0xff] (!%p161_p3)   ;;  %v1695_v51 = vld [vmem:[%s2009_s1 + $0xb8] sm:$0xff] (!%p161_p3)   ;;  %v1698_v56 = vld [vmem:[%s2009_s1 + $0xc0] sm:$0xff] (!%p161_p3)  }
   0xc   : > { %1511 = vmatpush3.bf16.msra.mxu1 (!%p161_p3), %v1678_v2  ;;  %v1700_v59 = vld [vmem:[%s2009_s1 + $0x48] sm:$0xff] (!%p161_p3)   ;;  %v1702_v63 = vld [vmem:[%s2009_s1 + $0x50] sm:$0xff] (!%p161_p3)   ;;  %v1705_v7 = vld [vmem:[%s2009_s1 + $0xd8] sm:$0xff] (!%p161_p3)  }
   0xd   : > { %1559 = vmatpush3.bf16.msra.mxu0 (!%p161_p3), %v1679_v3  ;;  %1512 = vmatprep.subr.bf16.mxu1 (!%p161_p3), %v1680_v4  ;;  %v1701_v62 = vld [vmem:[%s2009_s1 + $0xc8] sm:$0xff] (!%p161_p3)   ;;  %v1703_v2 = vld [vmem:[%s2009_s1 + $0xd0] sm:$0xff] (!%p161_p3)  }
   0xe   : > { %s2017_s12 = smov (!%p191_p4, %s1742_s12), 1  ;;  %1560 = vmatprep.subr.bf16.mxu0 %v1681_v5 }
   0xf   : > { %s1647_s26 = smul.u32 24, %s2017_s12 }
  0x10   : > { %1513 = vmatpush3.bf16.msra.mxu1 %v1680_v4  ;;  %s1648_s30 = smul.u32 12, %s2017_s12 }
  0x11   : > { %s1818_s6 = scalar_lea.vmem %s2008_s0, %s1647_s26  ;;  %1561 = vmatpush3.bf16.msra.mxu0 %v1681_v5  ;;  %1514 = vmatprep.subr.bf16.mxu1 %v1682_v6  ;;  %v1704_v5 = vld [vmem:[%s2009_s1 + $0x58] sm:$0xff]  }
  0x12   : > { %v209_v9 = vld [vmem:[%s1818_s6] sm:$0xf]  ;;  %v1825_v10 = vld [vmem:[%s1818_s6 + $0x4] sm:$0xf]  ;;  %v1828_v11 = vld [vmem:[%s1818_s6 + $0x8] sm:$0xf]  ;;  %1562 = vmatprep.subr.bf16.mxu0 %v1683_v8  ;;  %s207_s7 = scalar_lea.vmem %s2011_s3, %s1648_s30 }
  0x13   : > { %v220_v12 = vld [vmem:[%s1818_s6 + $0xc] sm:$0x1]  ;;  %v1317_v13 = vcombine.low %v209_v9, %v1825_v10  ;;  %v606_v16 = vld [vmem:[%s1818_s6 + $0x4] sm:$0xf]  ;;  %v1840_v19 = vld [vmem:[%s1818_s6 + $0x8] sm:$0xf]  ;;  %v1325_v57 = vcombine.low %v1828_v11, %v1828_v11 }
  0x14   : > { %v1833_v14 = vcombine.low %v1828_v11, %v220_v12  ;;  %v1843_v20 = vld [vmem:[%s1818_s6 + $0xc] sm:$0xf]  ;;  %v609_v23 = vld [vmem:[%s1818_s6 + $0x10] sm:$0x1]  ;;  %v1371_v24 = vcombine.low %v606_v16, %v1840_v19  ;;  %1515 = vmatpush3.bf16.msra.mxu1 %v1682_v6  ;;  %v725_v44 = vld [vmem:[%s1818_s6 + $0x4] sm:$0xe] }
  0x15   : > { %v242_v17 = vshrl.u32 %v1317_v13, 16  ;;  %v244_v18 = vshll.u32 %v1317_v13, 16  ;;  %v1850_v26 = vcombine.low %v1843_v20, %v609_v23  ;;  %1563 = vmatpush3.bf16.msra.mxu0 %v1683_v8  ;;  %1520 = vmatprep.subr.bf16.mxu1 %v1686_v15  ;;  %v1387_v45 = vcombine.low %v725_v44, %v1840_v19  ;;  %v413_v52 = vld [vmem:[%s1818_s6] sm:$0xe]  ;;  %v917_v0 = vld [vmem:[%s1818_s6 + $0x8] sm:$0xf] }
  0x16   : > { %v249_v21 = vshll.u32 %v1833_v14, 16  ;;  %v253_v22 = vshrl.u32 %v1833_v14, 16  ;;  %v630_v29 = vshrl.u32 %v1371_v24, 16  ;;  %v632_v30 = vshll.u32 %v1371_v24, 16  ;;  %1568 = vmatprep.subr.bf16.mxu0 %v1689_v27  ;;  %v1915_v1 = vld [vmem:[%s1818_s6 + $0xc] sm:$0xf] }
  0x17   : > { %v246_v25 = vrot.slane %v244_v18, 1  ;;  %v637_v32 = vshll.u32 %v1850_v26, 16  ;;  %v641_v33 = vshrl.u32 %v1850_v26, 16  ;;  %v739_v46 = vrot.slane %v1850_v26, 1  ;;  %v1923_v4 = vld [vmem:[%s1818_s6 + $0x10] sm:$0x1f]  }
  0x18   : > { %v251_v28 = vrot.slane %v249_v21, 1  ;;  %v634_v35 = vrot.slane %v632_v30, 1  ;;  %v738_v48 = vrot.slane %v1387_v45, 1  ;;  %v1340_v54 = vcombine.low %v413_v52, %v1825_v10  ;;  %v1134_v16 = vld [vmem:[%s2010_s2 + $0x8] sm:$0xff] }
  0x19   : > { %v247_v31 = vor.u32 %v246_v25, %v242_v17  ;;  %v639_v37 = vrot.slane %v637_v32, 1  ;;  %v428_v55 = vrot.slane %v1833_v14, 1  ;;  %v1402_v61 = vcombine.low %v1840_v19, %v1843_v20  ;;  %v1133_v14 = vld [vmem:[%s2010_s2] sm:$0xff]  ;;  %v1711_v20 = vld [vmem:[%s2009_s1 + $0x68] sm:$0xff]   ;;  %v1713_v25 = vld [vmem:[%s2009_s1 + $0x70] sm:$0xff]  }
  0x1a   : > { %v255_v34 = vor.u32 %v253_v22, %v251_v28  ;;  %v635_v39 = vor.u32 %v634_v35, %v630_v29  ;;  %v740_v50 = vsel %vm426_vm2, %v738_v48, %v739_v46  ;;  %v427_v58 = vrot.slane %v1340_v54, 1  ;;  %1138 = vperm.xlu0 %1674, %v1133_v14   ;;  %v1709_v17 = vld [vmem:[%s2009_s1 + $0xe0] sm:$0xff]   ;;  %v1710_v22 = vld [vmem:[%s1818_s6 + $0x10] ss:$0 sps:$4 sm:$0xff]   ;;  %v1712_v23 = vld [vmem:[%s2009_s1 + $0xe8] sm:$0xff]  }
  0x1b   : > { %v252_v36 = vsel %vm240_vm0, %v247_v31, %v251_v28  ;;  %v643_v40 = vor.u32 %v641_v33, %v639_v37  ;;  %v1418_v3 = vcombine.low %v917_v0, %v1915_v1  ;;  %v948_v12 = vshll.u32 %v1923_v4, 16  ;;  %v1036_v26 = vld [vmem:[%s1818_s6 + $0x8] sm:$0xe]  ;;  %v1718_v30 = vld [vmem:[%s1818_s6 + $0xc] ss:$0 sps:$4 sm:$0xff]   ;;  %v1721_v31 = vld [vmem:[%s2009_s1 + $0x100] sm:$0xff]  }
  0x1c   : > { %1516 = vmatprep.mubr.msk.bf16.mxu1 %vm280_vm1, %v252_v36  ;;  %v640_v41 = vsel %vm240_vm0, %v635_v39, %v639_v37  ;;  %v429_v60 = vsel %vm426_vm2, %v427_v58, %v428_v55  ;;  %v1355_v21 = vcombine.low %v1825_v10, %v1828_v11  ;;  %v1714_v10 = vld [vmem:[%s2009_s1 + $0xf0] sm:$0xff]   ;;  %v1715_v11 = vld [vmem:[%s2009_s1 + $0x78] sm:$0xff]   ;;  %v1434_v28 = vcombine.low %v1036_v26, %v1915_v1  ;;  %v1722_v35 = vld [vmem:[%s2009_s1 + $0x108] sm:$0xff]  }
  0x1d   : > { %1517 = vmatmul.mubr.msk.bf16.vlgmr.msra.gmra.mrb[0].mxu1 %vm280_vm1, %v255_v34  ;;  %1564 = vmatprep.mubr.msk.bf16.mxu0 %vm280_vm1, %v640_v41  ;;  %v943_v6 = vshll.u32 %v1418_v3, 16  ;;  %v941_v8 = vshrl.u32 %v1418_v3, 16  ;;  %v950_v19 = vrot.slane %v948_v12, 1  ;;  %v952_v29 = vshrl.u32 %v1923_v4, 16  ;;  %v1723_v37 = vld [vmem:[%s2009_s1 + $0x110] sm:$0xff]  }
  0x1e   : > { %1521 = vmatpush3.bf16.msra.mxu1 %v1686_v15  ;;  %1528 = vmatprep.mubr.msk.bf16.mxu1 %vm280_vm1, %v1317_v13  ;;  %v1707_v13 = vld [vmem:[%s2009_s1 + $0x60] sm:$0xff]   ;;  %v1135_v15 = vld [vmem:[%s2010_s2 + $0x10] sm:$0xff]  ;;  %v1049_v32 = vrot.slane %v1434_v28, 1  ;;  %v1050_v33 = vrot.slane %v1923_v4, 1 }
  0x1f   : > { %1522 = vmatprep.subr.bf16.mxu1 %v1690_v38  ;;  %1565 = vmatmul.mubr.msk.bf16.vlgmr.msra.gmra.mrb[0].mxu0 %vm280_vm1, %v643_v40  ;;  %v945_v9 = vrot.slane %v943_v6, 1  ;;  %v954_v34 = vor.u32 %v952_v29, %v950_v19 }
  0x20   : > { %1569 = vmatpush3.bf16.msra.mxu0 %v1689_v27  ;;  %1576 = vmatprep.mubr.msk.bf16.mxu0 %vm280_vm1, %v740_v50  ;;  %v1716_v27 = vld [vmem:[%s2009_s1 + $0xf8] sm:$0xff]   ;;  %v1051_v36 = vsel %vm426_vm2, %v1049_v32, %v1050_v33 }
  0x21   : > { %1570 = vmatprep.subr.bf16.mxu0 %v1691_v42  ;;  %1148 = vperm.xlu1 %1675, %v1135_v15   ;;  %v946_v18 = vor.u32 %v945_v9, %v941_v8 }
  0x22   : > { %1523 = vmatpush3.bf16.msra.mxu1 %v1690_v38  ;;  %1143 = vperm.xlu0 %1674, %v1134_v16   ;;  %v1724_v38 = vld [vmem:[%s2009_s1 + $0x118] sm:$0xff]  }
  0x23   : > { %1524 = vmatprep.subr.bf16.mxu1 %v1692_v43  ;;  %v951_v24 = vsel %vm240_vm0, %v946_v18, %v950_v19 }
  0x24   : > { %1571 = vmatpush3.bf16.msra.mxu0 %v1691_v42 }
  0x25   : > { %1572 = vmatprep.subr.bf16.mxu0 %v1693_v47 }
  0x26   : > { %1525 = vmatpush3.bf16.msra.mxu1 %v1692_v43 }
  0x27   : > { %1526 = vmatprep.subr.bf16.mxu1 %v1694_v49 }
  0x28   : > { %1573 = vmatpush3.bf16.msra.mxu0 %v1693_v47 }
  0x29   : > { %1574 = vmatprep.subr.bf16.mxu0 %v1695_v51 }
  0x2a   : > { %1527 = vmatpush3.bf16.msra.mxu1 %v1694_v49 }
  0x2b   : > { %1532 = vmatprep.subr.bf16.mxu1 %v1696_v53 }
  0x2c   : > { %1575 = vmatpush3.bf16.msra.mxu0 %v1695_v51 }
  0x2d   : > { %1529 = vmatmul.mubr.msk.bf16.vlgmr.msra.gmra.mrb[0].mxu1 %vm280_vm1, %v1325_v57  ;;  %1580 = vmatprep.subr.bf16.mxu0 %v1698_v56 }
  0x2e   : > { %1533 = vmatpush3.bf16.msra.mxu1 %v1696_v53  ;;  %1540 = vmatprep.mubr.msk.bf16.mxu1 %vm280_vm1, %v429_v60 }
  0x2f   : > { %1534 = vmatprep.subr.bf16.mxu1 %v1700_v59  ;;  %1577 = vmatmul.mubr.msk.bf16.vlgmr.msra.gmra.mrb[0].mxu0 %vm280_vm1, %v739_v46 }
  0x30   : > { %1581 = vmatpush3.bf16.msra.mxu0 %v1698_v56  ;;  %1588 = vmatprep.mubr.msk.bf16.mxu0 %vm280_vm1, %v1402_v61 }
  0x31   : > { %1582 = vmatprep.subr.bf16.mxu0 %v1701_v62 }
  0x32   : > { %1535 = vmatpush3.bf16.msra.mxu1 %v1700_v59 }
  0x33   : > { %1536 = vmatprep.subr.bf16.mxu1 %v1702_v63 }
  0x34   : > { %1583 = vmatpush3.bf16.msra.mxu0 %v1701_v62 }
  0x35   : > { %1584 = vmatprep.subr.bf16.mxu0 %v1703_v2 }
  0x36   : > { %1537 = vmatpush3.bf16.msra.mxu1 %v1702_v63 }
  0x37   : > { %1538 = vmatprep.subr.bf16.mxu1 %v1704_v5 }
  0x38   : > { %1585 = vmatpush3.bf16.msra.mxu0 %v1703_v2 }
  0x39   : > { %1586 = vmatprep.subr.bf16.mxu0 %v1705_v7 }
  0x3a   : > { %1539 = vmatpush3.bf16.msra.mxu1 %v1704_v5 }
  0x3b   : > { %1544 = vmatprep.subr.bf16.mxu1 %v1707_v13 }
  0x3c   : > { %1587 = vmatpush3.bf16.msra.mxu0 %v1705_v7 }
  0x3d   : > { %1541 = vmatmul.mubr.msk.bf16.vlgmr.msra.gmra.mrb[0].mxu1 %vm280_vm1, %v428_v55  ;;  %1592 = vmatprep.subr.bf16.mxu0 %v1709_v17 }
  0x3e   : > { %1545 = vmatpush3.bf16.msra.mxu1 %v1707_v13  ;;  %1552 = vmatprep.mubr.msk.bf16.mxu1 %vm280_vm1, %v1355_v21 }
  0x3f   : > { %1546 = vmatprep.subr.bf16.mxu1 %v1711_v20  ;;  %1589 = vmatmul.mubr.msk.bf16.vlgmr.msra.gmra.mrb[0].mxu0 %vm280_vm1, %v1710_v22 }
  0x40   : > { %1593 = vmatpush3.bf16.msra.mxu0 %v1709_v17  ;;  %1600 = vmatprep.mubr.msk.bf16.mxu0 %vm280_vm1, %v951_v24 }
  0x41   : > { %1594 = vmatprep.subr.bf16.mxu0 %v1712_v23 }
  0x42   : > { %1547 = vmatpush3.bf16.msra.mxu1 %v1711_v20 }
  0x43   : > { %1548 = vmatprep.subr.bf16.mxu1 %v1713_v25 }
  0x44   : > { %1595 = vmatpush3.bf16.msra.mxu0 %v1712_v23 }
  0x45   : > { %1596 = vmatprep.subr.bf16.mxu0 %v1714_v10 }
  0x46   : > { %1549 = vmatpush3.bf16.msra.mxu1 %v1713_v25 }
  0x47   : > { %1550 = vmatprep.subr.bf16.mxu1 %v1715_v11 }
  0x48   : > { %1597 = vmatpush3.bf16.msra.mxu0 %v1714_v10 }
  0x49   : > { %1598 = vmatprep.subr.bf16.mxu0 %v1716_v27 }
  0x4a   : > { %1551 = vmatpush3.bf16.msra.mxu1 %v1715_v11 }
  0x4c   : > { %1599 = vmatpush3.bf16.msra.mxu0 %v1716_v27 }
  0x4d   : > { %1553 = vmatmul.mubr.msk.bf16.vlgmr.msra.gmra.mrb[0].mxu1 %vm280_vm1, %v1718_v30  ;;  %1604 = vmatprep.subr.bf16.mxu0 %v1721_v31 }
  0x4f   : > { %1601 = vmatmul.mubr.msk.bf16.vlgmr.msra.gmra.mrb[0].mxu0 %vm280_vm1, %v954_v34 }
  0x50   : > { %1605 = vmatpush3.bf16.msra.mxu0 %v1721_v31  ;;  %1612 = vmatprep.mubr.msk.bf16.mxu0 %vm280_vm1, %v1051_v36 }
  0x51   : > { %1606 = vmatprep.subr.bf16.mxu0 %v1722_v35 }
  0x54   : > { %1607 = vmatpush3.bf16.msra.mxu0 %v1722_v35 }
  0x55   : > { %1608 = vmatprep.subr.bf16.mxu0 %v1723_v37 }
  0x58   : > { %1609 = vmatpush3.bf16.msra.mxu0 %v1723_v37 }
  0x59   : > { %1610 = vmatprep.subr.bf16.mxu0 %v1724_v38 }
  0x5c   : > { %1611 = vmatpush3.bf16.msra.mxu0 %v1724_v38 }
  0x5f   : > { %1613 = vmatmul.mubr.msk.bf16.vlgmr.msra.gmra.mrb[0].mxu0 %vm280_vm1, %v1050_v33 }
  0x99   : > { %v1139_v43 = vpop.permute.xlu0 %1138 }
  0xa0   : > { %v1149_v49 = vpop.permute.xlu1 %1148 }
  0xa1   : > { %v1144_v53 = vpop.permute.xlu0 %1143 }
 0x120   : > { %v1554_v39 = vpop.f32.mrb[0].mxu1 }
 0x121   : > { %v589_v40 = vpop.f32.mrb[1].mxu1 }
 0x122   : > { %v1555_v41 = vpop.f32.mrb[2].mxu1 }
 0x123   : > { %v592_v42 = vpop.f32.mrb[3].mxu1 }
 0x132   : > { %v1614_v44 = vpop.f32.mrb[0].mxu0 }
 0x133   : > { %v1616_v45 = vadd.f32 %v1614_v44, %v1554_v39  ;;  %v1116_v46 = vpop.f32.mrb[1].mxu0 }
 0x134   : > { %v1617_v47 = vadd.f32 %v1116_v46, %v589_v40  ;;  %v1615_v48 = vpop.f32.mrb[2].mxu0 }
 0x135   : > { %v1119_v50 = vpop.f32.mrb[3].mxu0  ;;  %v1153_v54 = vmul.f32 %v1616_v45, %v1149_v49 }
 0x136   : > { %v1151_v51 = vmul.f32 %v1617_v47, %v1139_v43  ;;  %v1618_v52 = vadd.f32 %v1119_v50, %v592_v42 }
 0x137   : > { %v1164_v59 = vmul.f32 %v1616_v45, %v1153_v54 }
 0x138   : > { %v1152_v55 = vmul.f32 %v1618_v52, %v1144_v53  ;;  %v1162_v56 = vmul.f32 %v1617_v47, %v1151_v51 }
 0x13a   : > { %v1154_v57 = vadd.f32 %v1152_v55, %v1151_v51  ;;  %v1163_v58 = vmul.f32 %v1618_v52, %v1152_v55 }
 0x13c   : > { %v1155_v60 = vadd.f32 %v1154_v57, %v1153_v54  ;;  %v1165_v61 = vadd.f32 %v1163_v58, %v1162_v56 }
 0x13e   : > { %v1156_v62 = vrot.slane %v1155_v60, 4  ;;  %v1166_v63 = vadd.f32 %v1165_v61, %v1164_v59 }
 0x140   : > { %v1157_v0 = vadd.f32 %v1156_v62, %v1155_v60  ;;  %v1167_v1 = vrot.slane %v1166_v63, 4 }
 0x142   : > { %v1158_v2 = vrot.slane %v1157_v0, 2  ;;  %v1168_v3 = vadd.f32 %v1167_v1, %v1166_v63 }
 0x144   : > { %v1159_v4 = vadd.f32 %v1158_v2, %v1157_v0  ;;  %v1169_v5 = vrot.slane %v1168_v3, 2 }
 0x146   : > { %v1160_v6 = vrot.slane %v1159_v4, 1  ;;  %v1170_v7 = vadd.f32 %v1169_v5, %v1168_v3 }
 0x148   : > { %v1161_v8 = vadd.f32 %v1160_v6, %v1159_v4  ;;  %v1171_v9 = vrot.slane %v1170_v7, 1 }
 0x14a   : > { %v1172_v12 = vadd.f32 %v1171_v9, %v1170_v7  ;;  %v1173_v13 = vmul.f32 0.11111111, %v1161_v8 }
 0x14c   : > { %v1174_v14 = vmul.f32 0.11111111, %v1172_v12  ;;  %v1175_v15 = vmul.f32 %v1173_v13, %v1173_v13  ;;  %v1178_v16 = vsub.f32 %v1617_v47, %v1173_v13  ;;  %v1179_v17 = vsub.f32 %v1618_v52, %v1173_v13 }
 0x14d   : > { %v1180_v18 = vsub.f32 %v1616_v45, %v1173_v13 }
 0x14e   : > { %v1176_v19 = vsub.f32 %v1174_v14, %v1175_v15 }
 0x150   : > { %v1177_v20 = vmax.f32 %v1176_v19, 0.0 }
 0x152   : > { %v1181_v21 = vadd.f32 1e-05, %v1177_v20 }
 0x154   : > { %1726 = vrsqrt.f32 %v1181_v21 }
 0x15e   : > { %v1727_v22 = vpop.eup %1726 }
 0x15f   : > { %v1183_v23 = vmul.f32 %v1727_v22, %v1178_v16  ;;  %v1184_v24 = vmul.f32 %v1727_v22, %v1179_v17  ;;  %v1185_v25 = vmul.f32 %v1727_v22, %v1180_v18 }
 0x161   : > { %v1186_v10 = vmul.f32 0.2, %v1183_v23  ;;  %v1187_v11 = vmul.f32 0.2, %v1184_v24  ;;  %v1188_v26 = vmul.f32 0.2, %v1185_v25 }
 0x163   : > { %v1189_v27 = vmax.f32 %v1183_v23, %v1186_v10  ;;  %v1190_v28 = vmax.f32 %v1184_v24, %v1187_v11  ;;  %v1191_v29 = vmax.f32 %v1185_v25, %v1188_v26 }
 0x165   : > { %v1448_v30 = vpack.c.bf16 %v1191_v29, %v1191_v29  ;;  %v1452_v31 = vpack.c.bf16 %v1190_v28, %v1189_v27 }
 0x167   : > { %1453 = vst [vmem:[%s207_s7] sm:$0xff] %v1452_v31   ;;  %1207 = vst [vmem:[%s207_s7 + $0x8] sm:$0xf] %v1448_v30 }
 0x168 PF: > { %s13_s14 = sadd.s32 1, %s1750_s14   ;;  %s2012_s12 = smov %s1746_s13 }
 0x169   : > { %p10_p5 = scmp.ge.s32.totalorder %s13_s14, 4   ;;  %s2013_s13 = smov %s2015_s15 }
 0x16b   :  { %12 = sbr.rel (!%p10_p5) target bundleno = 2 (0x2), region = 73 }

// kernel: nlayer_res_discriminator_forward.19
= control target key start
LH: loop header
LB: loop body
LE: loop exit
PB: predicated region body
PF: predicated region fallthrough
CT: control target
= control target key end

     0   :  { %s1862_s15 = smov 0   ;;  %s1864_s16 = smov 0   ;;  %s2100_s0 = inlined_call_operand.vmem [shape: bf16[2,48,64], index: 0, kind: input, shape index: {}]   ;;  %s2101_s1 = inlined_call_operand.vmem [shape: bf16[9,64,128], index: 1, kind: input, shape index: {}]   ;;  %s2102_s2 = inlined_call_operand.vmem [shape: f32[24,1], index: 2, kind: input, shape index: {}]   ;;  %s2103_s3 = inlined_call_operand.vmem [shape: bf16[2,24,128], index: 3, kind: input, shape index: {}]   ;;  %s2104_s4 = inlined_call_operand.vmem [shape: bf16[2,24,128], index: 4, kind: output, shape index: {}]  }
   0x1   :  { %s1866_s17 = smov 0  }
   0x2 LB: > { %s23_s18 = sadd.s32 1, %s1830_s16  ;;  %p1385_p0 = scmp.ge.s32.totalorder %s1834_s17, 1  ;;  %s1834_s17 = sphi %s1866_s17, %s14_s17   ;;  %s1830_s16 = sphi %s1864_s16, %s2106_s16   ;;  %s1826_s15 = sphi %s1862_s15, %s2105_s15  }
   0x3   : > { %p24_p1 = scmp.ge.s32.totalorder %s23_s18, 2  ;;  %p200_p2 = scmp.lt.s32.totalorder %s1834_s17, 3 }
   0x5   : > { %s2108_s18 = smov (%p24_p1, %s23_s18), 0  ;;  %p201_p3 = pnand %p1385_p0, %p200_p2 }
   0x6   : > { %v1760_v0 = vld [vmem:[%s2101_s1 + $0x20] sm:$0xff] (!%p201_p3)   ;;  %p241_p4 = scmp.lt.s32.totalorder (!%p201_p3), %s1826_s15, 1  ;;  %v1762_v2 = vld [vmem:[%s2101_s1 + $0x28] sm:$0xff] (!%p201_p3)   ;;  %v1764_v4 = vld [vmem:[%s2101_s1 + $0x30] sm:$0xff] (!%p201_p3)   ;;  %v1836_v7 = vmov (!%p201_p3), 0   ;;  %vm338_vm1 = vcmask (!%p201_p3), 523264  }
   0x7   : > { %204 = sbr.rel (%p201_p3) target bundleno = 358 (0x166), region = 36  ;;  %v1761_v1 = vld [vmem:[%s2101_s1 + $0x80] sm:$0xff] (!%p201_p3)   ;;  %1592 = vmatprep.subr.bf16.mxu1 (!%p201_p3), %v1760_v0  ;;  %v1763_v3 = vld [vmem:[%s2101_s1 + $0x88] sm:$0xff] (!%p201_p3)   ;;  %v1765_v5 = vld [vmem:[%s2101_s1 + $0x90] sm:$0xff] (!%p201_p3)   ;;  %1758 = vset.pattern.permute.xlu0 (!%p201_p3), %v1836_v7  ;;  %vm298_vm0 = vsmask.f32 (!%p201_p3), 7424 }
   0x8   : > { %1640 = vmatprep.subr.bf16.mxu0 (!%p201_p3), %v1761_v1  ;;  %1593 = vmatpush3.bf16.msra.mxu1 (!%p201_p3), %v1760_v0  ;;  %v1766_v6 = vld [vmem:[%s2101_s1 + $0x38] sm:$0xff] (!%p201_p3)   ;;  %v1770_v15 = vld [vmem:[%s2101_s1] sm:$0xff] (!%p201_p3)   ;;  %v1774_v38 = vld [vmem:[%s2101_s1 + $0x8] sm:$0xff] (!%p201_p3)   ;;  %vm484_vm2 = vcmask (!%p201_p3), 1046528  }
   0x9   : > { %1641 = vmatpush3.bf16.msra.mxu0 (!%p201_p3), %v1761_v1  ;;  %1594 = vmatprep.subr.bf16.mxu1 (!%p201_p3), %v1762_v2  ;;  %v1767_v8 = vld [vmem:[%s2101_s1 + $0x98] sm:$0xff] (!%p201_p3)   ;;  %v1773_v27 = vld [vmem:[%s2101_s1 + $0xa0] sm:$0xff] (!%p201_p3)   ;;  %v1775_v42 = vld [vmem:[%s2101_s1 + $0xa8] sm:$0xff] (!%p201_p3)  }
   0xa   : > { %1642 = vmatprep.subr.bf16.mxu0 (!%p201_p3), %v1763_v3  ;;  %1759 = vset.pattern.permute.xlu1 (!%p201_p3), %v1836_v7  ;;  %v1776_v43 = vld [vmem:[%s2101_s1 + $0x10] sm:$0xff] (!%p201_p3)   ;;  %v1778_v49 = vld [vmem:[%s2101_s1 + $0x18] sm:$0xff] (!%p201_p3)   ;;  %v1780_v53 = vld [vmem:[%s2101_s1 + $0x40] sm:$0xff] (!%p201_p3)  }
   0xb   : > { %v1777_v47 = vld [vmem:[%s2101_s1 + $0xb0] sm:$0xff] (!%p201_p3)   ;;  %v1779_v51 = vld [vmem:[%s2101_s1 + $0xb8] sm:$0xff] (!%p201_p3)   ;;  %v1782_v56 = vld [vmem:[%s2101_s1 + $0xc0] sm:$0xff] (!%p201_p3)  }
   0xc   : > { %1595 = vmatpush3.bf16.msra.mxu1 (!%p201_p3), %v1762_v2  ;;  %v1784_v59 = vld [vmem:[%s2101_s1 + $0x48] sm:$0xff] (!%p201_p3)   ;;  %v1786_v63 = vld [vmem:[%s2101_s1 + $0x50] sm:$0xff] (!%p201_p3)   ;;  %v1789_v7 = vld [vmem:[%s2101_s1 + $0xd8] sm:$0xff] (!%p201_p3)  }
   0xd   : > { %1643 = vmatpush3.bf16.msra.mxu0 (!%p201_p3), %v1763_v3  ;;  %1596 = vmatprep.subr.bf16.mxu1 (!%p201_p3), %v1764_v4  ;;  %v1785_v62 = vld [vmem:[%s2101_s1 + $0xc8] sm:$0xff] (!%p201_p3)   ;;  %v1787_v2 = vld [vmem:[%s2101_s1 + $0xd0] sm:$0xff] (!%p201_p3)  }
   0xe   : > { %s2110_s15 = smov (!%p241_p4, %s1826_s15), 1  ;;  %1644 = vmatprep.subr.bf16.mxu0 %v1765_v5 }
   0xf   : > { %s1731_s29 = smul.u32 24, %s2110_s15 }
  0x10   : > { %1597 = vmatpush3.bf16.msra.mxu1 %v1764_v4  ;;  %s1732_s11 = smul.u32 12, %s2110_s15 }
  0x11   : > { %s1907_s10 = scalar_lea.vmem %s2100_s0, %s1731_s29  ;;  %1645 = vmatpush3.bf16.msra.mxu0 %v1765_v5  ;;  %1598 = vmatprep.subr.bf16.mxu1 %v1766_v6  ;;  %v1788_v5 = vld [vmem:[%s2101_s1 + $0x58] sm:$0xff]  }
  0x12   : > { %v267_v9 = vld [vmem:[%s1907_s10] sm:$0xf]  ;;  %v1914_v10 = vld [vmem:[%s1907_s10 + $0x4] sm:$0xf]  ;;  %v1917_v11 = vld [vmem:[%s1907_s10 + $0x8] sm:$0xf]  ;;  %1646 = vmatprep.subr.bf16.mxu0 %v1767_v8  ;;  %s257_s14 = scalar_lea.vmem %s2103_s3, %s1732_s11  ;;  %s265_s15 = scalar_lea.vmem %s2104_s4, %s1732_s11 }
  0x13   : > { %v278_v12 = vld [vmem:[%s1907_s10 + $0xc] sm:$0x1]  ;;  %v1397_v13 = vcombine.low %v267_v9, %v1914_v10  ;;  %v664_v16 = vld [vmem:[%s1907_s10 + $0x4] sm:$0xf]  ;;  %v1929_v19 = vld [vmem:[%s1907_s10 + $0x8] sm:$0xf]  ;;  %v1405_v57 = vcombine.low %v1917_v11, %v1917_v11 }
  0x14   : > { %v1922_v14 = vcombine.low %v1917_v11, %v278_v12  ;;  %v1932_v20 = vld [vmem:[%s1907_s10 + $0xc] sm:$0xf]  ;;  %v667_v23 = vld [vmem:[%s1907_s10 + $0x10] sm:$0x1]  ;;  %v1451_v24 = vcombine.low %v664_v16, %v1929_v19  ;;  %1599 = vmatpush3.bf16.msra.mxu1 %v1766_v6  ;;  %v783_v44 = vld [vmem:[%s1907_s10 + $0x4] sm:$0xe] }
  0x15   : > { %v300_v17 = vshrl.u32 %v1397_v13, 16  ;;  %v302_v18 = vshll.u32 %v1397_v13, 16  ;;  %v1939_v26 = vcombine.low %v1932_v20, %v667_v23  ;;  %1647 = vmatpush3.bf16.msra.mxu0 %v1767_v8  ;;  %1604 = vmatprep.subr.bf16.mxu1 %v1770_v15  ;;  %v1467_v45 = vcombine.low %v783_v44, %v1929_v19  ;;  %v471_v52 = vld [vmem:[%s1907_s10] sm:$0xe]  ;;  %v975_v0 = vld [vmem:[%s1907_s10 + $0x8] sm:$0xf] }
  0x16   : > { %v307_v21 = vshll.u32 %v1922_v14, 16  ;;  %v311_v22 = vshrl.u32 %v1922_v14, 16  ;;  %v688_v29 = vshrl.u32 %v1451_v24, 16  ;;  %v690_v30 = vshll.u32 %v1451_v24, 16  ;;  %1652 = vmatprep.subr.bf16.mxu0 %v1773_v27  ;;  %v2004_v1 = vld [vmem:[%s1907_s10 + $0xc] sm:$0xf] }
  0x17   : > { %v304_v25 = vrot.slane %v302_v18, 1  ;;  %v695_v32 = vshll.u32 %v1939_v26, 16  ;;  %v699_v33 = vshrl.u32 %v1939_v26, 16  ;;  %v797_v46 = vrot.slane %v1939_v26, 1  ;;  %v2012_v4 = vld [vmem:[%s1907_s10 + $0x10] sm:$0x1f]  }
  0x18   : > { %v309_v28 = vrot.slane %v307_v21, 1  ;;  %v692_v35 = vrot.slane %v690_v30, 1  ;;  %v796_v48 = vrot.slane %v1467_v45, 1  ;;  %v1420_v54 = vcombine.low %v471_v52, %v1914_v10  ;;  %v1192_v16 = vld [vmem:[%s2102_s2 + $0x8] sm:$0xff] }
  0x19   : > { %v305_v31 = vor.u32 %v304_v25, %v300_v17  ;;  %v697_v37 = vrot.slane %v695_v32, 1  ;;  %v486_v55 = vrot.slane %v1922_v14, 1  ;;  %v1482_v61 = vcombine.low %v1929_v19, %v1932_v20  ;;  %v1191_v14 = vld [vmem:[%s2102_s2] sm:$0xff]  ;;  %v1795_v20 = vld [vmem:[%s2101_s1 + $0x68] sm:$0xff]   ;;  %v1797_v25 = vld [vmem:[%s2101_s1 + $0x70] sm:$0xff]  }
  0x1a   : > { %v313_v34 = vor.u32 %v311_v22, %v309_v28  ;;  %v693_v39 = vor.u32 %v692_v35, %v688_v29  ;;  %v798_v50 = vsel %vm484_vm2, %v796_v48, %v797_v46  ;;  %v485_v58 = vrot.slane %v1420_v54, 1  ;;  %1196 = vperm.xlu0 %1758, %v1191_v14   ;;  %v1793_v17 = vld [vmem:[%s2101_s1 + $0xe0] sm:$0xff]   ;;  %v1794_v22 = vld [vmem:[%s1907_s10 + $0x10] ss:$0 sps:$4 sm:$0xff]   ;;  %v1796_v23 = vld [vmem:[%s2101_s1 + $0xe8] sm:$0xff]  }
  0x1b   : > { %v310_v36 = vsel %vm298_vm0, %v305_v31, %v309_v28  ;;  %v701_v40 = vor.u32 %v699_v33, %v697_v37  ;;  %v1498_v3 = vcombine.low %v975_v0, %v2004_v1  ;;  %v1006_v12 = vshll.u32 %v2012_v4, 16  ;;  %v1094_v26 = vld [vmem:[%s1907_s10 + $0x8] sm:$0xe]  ;;  %v1802_v30 = vld [vmem:[%s1907_s10 + $0xc] ss:$0 sps:$4 sm:$0xff]   ;;  %v1805_v31 = vld [vmem:[%s2101_s1 + $0x100] sm:$0xff]  }
  0x1c   : > { %1600 = vmatprep.mubr.msk.bf16.mxu1 %vm338_vm1, %v310_v36  ;;  %v698_v41 = vsel %vm298_vm0, %v693_v39, %v697_v37  ;;  %v487_v60 = vsel %vm484_vm2, %v485_v58, %v486_v55  ;;  %v1435_v21 = vcombine.low %v1914_v10, %v1917_v11  ;;  %v1798_v10 = vld [vmem:[%s2101_s1 + $0xf0] sm:$0xff]   ;;  %v1799_v11 = vld [vmem:[%s2101_s1 + $0x78] sm:$0xff]   ;;  %v1514_v28 = vcombine.low %v1094_v26, %v2004_v1  ;;  %v1806_v35 = vld [vmem:[%s2101_s1 + $0x108] sm:$0xff]  }
  0x1d   : > { %1601 = vmatmul.mubr.msk.bf16.vlgmr.msra.gmra.mrb[0].mxu1 %vm338_vm1, %v313_v34  ;;  %1648 = vmatprep.mubr.msk.bf16.mxu0 %vm338_vm1, %v698_v41  ;;  %v1001_v6 = vshll.u32 %v1498_v3, 16  ;;  %v999_v8 = vshrl.u32 %v1498_v3, 16  ;;  %v1008_v19 = vrot.slane %v1006_v12, 1  ;;  %v1010_v29 = vshrl.u32 %v2012_v4, 16  ;;  %v1807_v37 = vld [vmem:[%s2101_s1 + $0x110] sm:$0xff]  }
  0x1e   : > { %1605 = vmatpush3.bf16.msra.mxu1 %v1770_v15  ;;  %1612 = vmatprep.mubr.msk.bf16.mxu1 %vm338_vm1, %v1397_v13  ;;  %v1791_v13 = vld [vmem:[%s2101_s1 + $0x60] sm:$0xff]   ;;  %v1193_v15 = vld [vmem:[%s2102_s2 + $0x10] sm:$0xff]  ;;  %v1107_v32 = vrot.slane %v1514_v28, 1  ;;  %v1108_v33 = vrot.slane %v2012_v4, 1 }
  0x1f   : > { %1606 = vmatprep.subr.bf16.mxu1 %v1774_v38  ;;  %1649 = vmatmul.mubr.msk.bf16.vlgmr.msra.gmra.mrb[0].mxu0 %vm338_vm1, %v701_v40  ;;  %v1003_v9 = vrot.slane %v1001_v6, 1  ;;  %v1012_v34 = vor.u32 %v1010_v29, %v1008_v19 }
  0x20   : > { %1653 = vmatpush3.bf16.msra.mxu0 %v1773_v27  ;;  %1660 = vmatprep.mubr.msk.bf16.mxu0 %vm338_vm1, %v798_v50  ;;  %v1800_v27 = vld [vmem:[%s2101_s1 + $0xf8] sm:$0xff]   ;;  %v1109_v36 = vsel %vm484_vm2, %v1107_v32, %v1108_v33 }
  0x21   : > { %1654 = vmatprep.subr.bf16.mxu0 %v1775_v42  ;;  %1206 = vperm.xlu1 %1759, %v1193_v15   ;;  %v1004_v18 = vor.u32 %v1003_v9, %v999_v8 }
  0x22   : > { %1607 = vmatpush3.bf16.msra.mxu1 %v1774_v38  ;;  %1201 = vperm.xlu0 %1758, %v1192_v16   ;;  %v1808_v38 = vld [vmem:[%s2101_s1 + $0x118] sm:$0xff]  }
  0x23   : > { %1608 = vmatprep.subr.bf16.mxu1 %v1776_v43  ;;  %v1009_v24 = vsel %vm298_vm0, %v1004_v18, %v1008_v19 }
  0x24   : > { %1655 = vmatpush3.bf16.msra.mxu0 %v1775_v42 }
  0x25   : > { %1656 = vmatprep.subr.bf16.mxu0 %v1777_v47 }
  0x26   : > { %1609 = vmatpush3.bf16.msra.mxu1 %v1776_v43 }
  0x27   : > { %1610 = vmatprep.subr.bf16.mxu1 %v1778_v49 }
  0x28   : > { %1657 = vmatpush3.bf16.msra.mxu0 %v1777_v47 }
  0x29   : > { %1658 = vmatprep.subr.bf16.mxu0 %v1779_v51 }
  0x2a   : > { %1611 = vmatpush3.bf16.msra.mxu1 %v1778_v49 }
  0x2b   : > { %1616 = vmatprep.subr.bf16.mxu1 %v1780_v53 }
  0x2c   : > { %1659 = vmatpush3.bf16.msra.mxu0 %v1779_v51 }
  0x2d   : > { %1613 = vmatmul.mubr.msk.bf16.vlgmr.msra.gmra.mrb[0].mxu1 %vm338_vm1, %v1405_v57  ;;  %1664 = vmatprep.subr.bf16.mxu0 %v1782_v56 }
  0x2e   : > { %1617 = vmatpush3.bf16.msra.mxu1 %v1780_v53  ;;  %1624 = vmatprep.mubr.msk.bf16.mxu1 %vm338_vm1, %v487_v60 }
  0x2f   : > { %1618 = vmatprep.subr.bf16.mxu1 %v1784_v59  ;;  %1661 = vmatmul.mubr.msk.bf16.vlgmr.msra.gmra.mrb[0].mxu0 %vm338_vm1, %v797_v46 }
  0x30   : > { %1665 = vmatpush3.bf16.msra.mxu0 %v1782_v56  ;;  %1672 = vmatprep.mubr.msk.bf16.mxu0 %vm338_vm1, %v1482_v61 }
  0x31   : > { %1666 = vmatprep.subr.bf16.mxu0 %v1785_v62 }
  0x32   : > { %1619 = vmatpush3.bf16.msra.mxu1 %v1784_v59 }
  0x33   : > { %1620 = vmatprep.subr.bf16.mxu1 %v1786_v63 }
  0x34   : > { %1667 = vmatpush3.bf16.msra.mxu0 %v1785_v62 }
  0x35   : > { %1668 = vmatprep.subr.bf16.mxu0 %v1787_v2 }
  0x36   : > { %1621 = vmatpush3.bf16.msra.mxu1 %v1786_v63 }
  0x37   : > { %1622 = vmatprep.subr.bf16.mxu1 %v1788_v5 }
  0x38   : > { %1669 = vmatpush3.bf16.msra.mxu0 %v1787_v2 }
  0x39   : > { %1670 = vmatprep.subr.bf16.mxu0 %v1789_v7 }
  0x3a   : > { %1623 = vmatpush3.bf16.msra.mxu1 %v1788_v5 }
  0x3b   : > { %1628 = vmatprep.subr.bf16.mxu1 %v1791_v13 }
  0x3c   : > { %1671 = vmatpush3.bf16.msra.mxu0 %v1789_v7 }
  0x3d   : > { %1625 = vmatmul.mubr.msk.bf16.vlgmr.msra.gmra.mrb[0].mxu1 %vm338_vm1, %v486_v55  ;;  %1676 = vmatprep.subr.bf16.mxu0 %v1793_v17 }
  0x3e   : > { %1629 = vmatpush3.bf16.msra.mxu1 %v1791_v13  ;;  %1636 = vmatprep.mubr.msk.bf16.mxu1 %vm338_vm1, %v1435_v21 }
  0x3f   : > { %1630 = vmatprep.subr.bf16.mxu1 %v1795_v20  ;;  %1673 = vmatmul.mubr.msk.bf16.vlgmr.msra.gmra.mrb[0].mxu0 %vm338_vm1, %v1794_v22  ;;  %v1530_v22 = vld [vmem:[%s257_s14] sm:$0xff]  }
  0x40   : > { %1677 = vmatpush3.bf16.msra.mxu0 %v1793_v17  ;;  %1684 = vmatprep.mubr.msk.bf16.mxu0 %vm338_vm1, %v1009_v24  ;;  %v1531_v24 = vunpack.c.l.bf16 %v1530_v22 }
  0x41   : > { %1678 = vmatprep.subr.bf16.mxu0 %v1796_v23 }
  0x42   : > { %1631 = vmatpush3.bf16.msra.mxu1 %v1795_v20 }
  0x43   : > { %1632 = vmatprep.subr.bf16.mxu1 %v1797_v25 }
  0x44   : > { %1679 = vmatpush3.bf16.msra.mxu0 %v1796_v23  ;;  %v1246_v23 = vld [vmem:[%s257_s14 + $0x8] sm:$0xf] }
  0x45   : > { %1680 = vmatprep.subr.bf16.mxu0 %v1798_v10 }
  0x46   : > { %1633 = vmatpush3.bf16.msra.mxu1 %v1797_v25  ;;  %v1532_v25 = vunpack.c.h.bf16 %v1530_v22 }
  0x47   : > { %1634 = vmatprep.subr.bf16.mxu1 %v1799_v11 }
  0x48   : > { %1681 = vmatpush3.bf16.msra.mxu0 %v1798_v10  ;;  %v1249_v10 = vunpack.c.l.bf16 %v1246_v23 }
  0x49   : > { %1682 = vmatprep.subr.bf16.mxu0 %v1800_v27 }
  0x4a   : > { %1635 = vmatpush3.bf16.msra.mxu1 %v1799_v11 }
  0x4c   : > { %1683 = vmatpush3.bf16.msra.mxu0 %v1800_v27 }
  0x4d   : > { %1637 = vmatmul.mubr.msk.bf16.vlgmr.msra.gmra.mrb[0].mxu1 %vm338_vm1, %v1802_v30  ;;  %1688 = vmatprep.subr.bf16.mxu0 %v1805_v31 }
  0x4f   : > { %1685 = vmatmul.mubr.msk.bf16.vlgmr.msra.gmra.mrb[0].mxu0 %vm338_vm1, %v1012_v34 }
  0x50   : > { %1689 = vmatpush3.bf16.msra.mxu0 %v1805_v31  ;;  %1696 = vmatprep.mubr.msk.bf16.mxu0 %vm338_vm1, %v1109_v36 }
  0x51   : > { %1690 = vmatprep.subr.bf16.mxu0 %v1806_v35 }
  0x54   : > { %1691 = vmatpush3.bf16.msra.mxu0 %v1806_v35 }
  0x55   : > { %1692 = vmatprep.subr.bf16.mxu0 %v1807_v37 }
  0x58   : > { %1693 = vmatpush3.bf16.msra.mxu0 %v1807_v37 }
  0x59   : > { %1694 = vmatprep.subr.bf16.mxu0 %v1808_v38 }
  0x5c   : > { %1695 = vmatpush3.bf16.msra.mxu0 %v1808_v38 }
  0x5f   : > { %1697 = vmatmul.mubr.msk.bf16.vlgmr.msra.gmra.mrb[0].mxu0 %vm338_vm1, %v1108_v33 }
  0x99   : > { %v1197_v43 = vpop.permute.xlu0 %1196 }
  0xa0   : > { %v1207_v49 = vpop.permute.xlu1 %1206 }
  0xa1   : > { %v1202_v53 = vpop.permute.xlu0 %1201 }
 0x120   : > { %v1638_v39 = vpop.f32.mrb[0].mxu1 }
 0x121   : > { %v647_v40 = vpop.f32.mrb[1].mxu1 }
 0x122   : > { %v1639_v41 = vpop.f32.mrb[2].mxu1 }
 0x123   : > { %v650_v42 = vpop.f32.mrb[3].mxu1 }
 0x132   : > { %v1698_v44 = vpop.f32.mrb[0].mxu0 }
 0x133   : > { %v1700_v45 = vadd.f32 %v1698_v44, %v1638_v39  ;;  %v1174_v46 = vpop.f32.mrb[1].mxu0 }
 0x134   : > { %v1701_v47 = vadd.f32 %v1174_v46, %v647_v40  ;;  %v1699_v48 = vpop.f32.mrb[2].mxu0 }
 0x135   : > { %v1177_v50 = vpop.f32.mrb[3].mxu0  ;;  %v1211_v54 = vmul.f32 %v1700_v45, %v1207_v49 }
 0x136   : > { %v1209_v51 = vmul.f32 %v1701_v47, %v1197_v43  ;;  %v1702_v52 = vadd.f32 %v1177_v50, %v650_v42 }
 0x137   : > { %v1222_v59 = vmul.f32 %v1700_v45, %v1211_v54 }
 0x138   : > { %v1210_v55 = vmul.f32 %v1702_v52, %v1202_v53  ;;  %v1220_v56 = vmul.f32 %v1701_v47, %v1209_v51 }
 0x13a   : > { %v1212_v57 = vadd.f32 %v1210_v55, %v1209_v51  ;;  %v1221_v58 = vmul.f32 %v1702_v52, %v1210_v55 }
 0x13c   : > { %v1213_v60 = vadd.f32 %v1212_v57, %v1211_v54  ;;  %v1223_v61 = vadd.f32 %v1221_v58, %v1220_v56 }
 0x13e   : > { %v1214_v62 = vrot.slane %v1213_v60, 4  ;;  %v1224_v63 = vadd.f32 %v1223_v61, %v1222_v59 }
 0x140   : > { %v1215_v0 = vadd.f32 %v1214_v62, %v1213_v60  ;;  %v1225_v1 = vrot.slane %v1224_v63, 4 }
 0x142   : > { %v1216_v2 = vrot.slane %v1215_v0, 2  ;;  %v1226_v3 = vadd.f32 %v1225_v1, %v1224_v63 }
 0x144   : > { %v1217_v4 = vadd.f32 %v1216_v2, %v1215_v0  ;;  %v1227_v5 = vrot.slane %v1226_v3, 2 }
 0x146   : > { %v1218_v6 = vrot.slane %v1217_v4, 1  ;;  %v1228_v7 = vadd.f32 %v1227_v5, %v1226_v3 }
 0x148   : > { %v1219_v8 = vadd.f32 %v1218_v6, %v1217_v4  ;;  %v1229_v9 = vrot.slane %v1228_v7, 1 }
 0x14a   : > { %v1230_v12 = vadd.f32 %v1229_v9, %v1228_v7  ;;  %v1231_v13 = vmul.f32 0.11111111, %v1219_v8 }
 0x14c   : > { %v1232_v14 = vmul.f32 0.11111111, %v1230_v12  ;;  %v1233_v15 = vmul.f32 %v1231_v13, %v1231_v13  ;;  %v1236_v16 = vsub.f32 %v1701_v47, %v1231_v13  ;;  %v1237_v17 = vsub.f32 %v1702_v52, %v1231_v13 }
 0x14d   : > { %v1238_v18 = vsub.f32 %v1700_v45, %v1231_v13 }
 0x14e   : > { %v1234_v19 = vsub.f32 %v1232_v14, %v1233_v15 }
 0x150   : > { %v1235_v20 = vmax.f32 %v1234_v19, 0.0 }
 0x152   : > { %v1239_v21 = vadd.f32 1e-05, %v1235_v20 }
 0x154   : > { %1810 = vrsqrt.f32 %v1239_v21 }
 0x15e   : > { %v1811_v11 = vpop.eup %1810 }
 0x15f   : > { %v1241_v26 = vmul.f32 %v1811_v11, %v1236_v16  ;;  %v1242_v27 = vmul.f32 %v1811_v11, %v1237_v17  ;;  %v1243_v28 = vmul.f32 %v1811_v11, %v1238_v18 }
 0x161   : > { %v1250_v29 = vadd.f32 %v1531_v24, %v1241_v26  ;;  %v1251_v30 = vadd.f32 %v1532_v25, %v1242_v27  ;;  %v1252_v31 = vadd.f32 %v1249_v10, %v1243_v28 }
 0x163   : > { %v1528_v32 = vpack.c.bf16 %v1252_v31, %v1252_v31  ;;  %v1536_v33 = vpack.c.bf16 %v1251_v30, %v1250_v29 }
 0x165   : > { %1537 = vst [vmem:[%s265_s15] sm:$0xff] %v1536_v33   ;;  %1268 = vst [vmem:[%s265_s15 + $0x8] sm:$0xf] %v1528_v32 }
 0x166 PF: > { %s14_s17 = sadd.s32 1, %s1834_s17   ;;  %s2105_s15 = smov %s1830_s16 }
 0x167   : > { %p11_p5 = scmp.ge.s32.totalorder %s14_s17, 4   ;;  %s2106_s16 = smov %s2108_s18 }
 0x169   :  { %13 = sbr.rel (!%p11_p5) target bundleno = 2 (0x2), region = 80 }

// kernel: nlayer_res_discriminator_forward.20
= control target key start
LH: loop header
LB: loop body
LE: loop exit
PB: predicated region body
PF: predicated region fallthrough
CT: control target
= control target key end

     0   :  { %s2950_s12 = smov 0   ;;  %s2952_s13 = smov 0   ;;  %s3402_s0 = inlined_call_operand.vmem [shape: bf16[2,64,64], index: 0, kind: input, shape index: {}]   ;;  %s3403_s1 = inlined_call_operand.vmem [shape: bf16[16,64,128], index: 1, kind: input, shape index: {}]   ;;  %s3404_s2 = inlined_call_operand.vmem [shape: f32[32,1], index: 2, kind: input, shape index: {}]   ;;  %s3405_s3 = inlined_call_operand.vmem [shape: bf16[2,32,128], index: 3, kind: output, shape index: {}]  }
   0x1   :  { %s2954_s14 = smov 0  }
   0x2 LB: > { %s22_s15 = sadd.s32 1, %s2923_s13  ;;  %p2168_p0 = scmp.ge.s32.totalorder %s2927_s14, 1  ;;  %s2927_s14 = sphi %s2954_s14, %s13_s14   ;;  %s2923_s13 = sphi %s2952_s13, %s3407_s13   ;;  %s2919_s12 = sphi %s2950_s12, %s3406_s12  }
   0x3   : > { %p23_p1 = scmp.ge.s32.totalorder %s22_s15, 2  ;;  %p160_p2 = scmp.lt.s32.totalorder %s2927_s14, 3 }
   0x5   : > { %s3409_s15 = smov (%p23_p1, %s22_s15), 0  ;;  %p161_p3 = pnand %p2168_p0, %p160_p2 }
   0x6   : > { %v2813_v0 = vld [vmem:[%s3403_s1 + $0x20] sm:$0xff] (!%p161_p3)   ;;  %p191_p4 = scmp.lt.s32.totalorder (!%p161_p3), %s2919_s12, 1  ;;  %v2815_v2 = vld [vmem:[%s3403_s1 + $0x28] sm:$0xff] (!%p161_p3)   ;;  %v2817_v4 = vld [vmem:[%s3403_s1 + $0x30] sm:$0xff] (!%p161_p3)   ;;  %vm289_vm0 = vcmask (!%p161_p3), 523264   ;;  %v2929_v13 = vmov (!%p161_p3), 0  }
   0x7   : > { %164 = sbr.rel (%p161_p3) target bundleno = 408 (0x198), region = 32  ;;  %v2814_v1 = vld [vmem:[%s3403_s1 + $0x100] sm:$0xff] (!%p161_p3)   ;;  %2534 = vmatprep.subr.bf16.mxu1 (!%p161_p3), %v2813_v0  ;;  %v2816_v3 = vld [vmem:[%s3403_s1 + $0x108] sm:$0xff] (!%p161_p3)   ;;  %v2818_v5 = vld [vmem:[%s3403_s1 + $0x110] sm:$0xff] (!%p161_p3)   ;;  %2811 = vset.pattern.permute.xlu0 (!%p161_p3), %v2929_v13  ;;  %vm244_vm1 = vsmask.f32 (!%p161_p3), 7424 }
   0x8   : > { %2630 = vmatprep.subr.bf16.mxu0 (!%p161_p3), %v2814_v1  ;;  %2535 = vmatpush3.bf16.msra.mxu1 (!%p161_p3), %v2813_v0  ;;  %v2819_v6 = vld [vmem:[%s3403_s1 + $0x38] sm:$0xff] (!%p161_p3)   ;;  %v2823_v22 = vld [vmem:[%s3403_s1] sm:$0xff] (!%p161_p3)   ;;  %v2832_v42 = vld [vmem:[%s3403_s1 + $0x128] sm:$0xff] (!%p161_p3)   ;;  %vm435_vm2 = vcmask (!%p161_p3), 1046528   ;;  %vm537_vm3 = vsmask.f32 (!%p161_p3), 6400 }
   0x9   : > { %2631 = vmatpush3.bf16.msra.mxu0 (!%p161_p3), %v2814_v1  ;;  %2536 = vmatprep.subr.bf16.mxu1 (!%p161_p3), %v2815_v2  ;;  %v2820_v10 = vld [vmem:[%s3403_s1 + $0x118] sm:$0xff] (!%p161_p3)   ;;  %v2829_v29 = vld [vmem:[%s3403_s1 + $0x120] sm:$0xff] (!%p161_p3)   ;;  %v2831_v45 = vld [vmem:[%s3403_s1 + $0x8] sm:$0xff] (!%p161_p3)  }
   0xa   : > { %2632 = vmatprep.subr.bf16.mxu0 (!%p161_p3), %v2816_v3  ;;  %2812 = vset.pattern.permute.xlu1 (!%p161_p3), %v2929_v13  ;;  %v2834_v47 = vld [vmem:[%s3403_s1 + $0x130] sm:$0xff] (!%p161_p3)   ;;  %v2836_v58 = vld [vmem:[%s3403_s1 + $0x138] sm:$0xff] (!%p161_p3)  }
   0xb   : > { %v2833_v50 = vld [vmem:[%s3403_s1 + $0x10] sm:$0xff] (!%p161_p3)  }
   0xc   : > { %2537 = vmatpush3.bf16.msra.mxu1 (!%p161_p3), %v2815_v2 }
   0xd   : > { %2633 = vmatpush3.bf16.msra.mxu0 (!%p161_p3), %v2816_v3  ;;  %2538 = vmatprep.subr.bf16.mxu1 (!%p161_p3), %v2817_v4 }
   0xe   : > { %s3411_s12 = smov (!%p191_p4, %s2919_s12), 1  ;;  %2634 = vmatprep.subr.bf16.mxu0 %v2818_v5 }
   0xf   : > { %s2421_s26 = sshll.u32 %s3411_s12, 5  ;;  %s2422_s22 = sshll.u32 %s3411_s12, 4 }
  0x10   : > { %s2992_s4 = scalar_lea.vmem %s3402_s0, %s2421_s26  ;;  %2539 = vmatpush3.bf16.msra.mxu1 %v2817_v4  ;;  %s207_s25 = scalar_lea.vmem %s3405_s3, %s2422_s22 }
  0x11   : > { %v209_v7 = vld [vmem:[%s2992_s4] sm:$0xf]  ;;  %v2999_v8 = vld [vmem:[%s2992_s4 + $0x4] sm:$0xf]  ;;  %v3002_v9 = vld [vmem:[%s2992_s4 + $0x8] sm:$0xf]  ;;  %2635 = vmatpush3.bf16.msra.mxu0 %v2818_v5  ;;  %2540 = vmatprep.subr.bf16.mxu1 %v2819_v6 }
  0x12   : > { %v3008_v11 = vld [vmem:[%s2992_s4 + $0xc] sm:$0xf]  ;;  %v3011_v12 = vcombine.low %v209_v7, %v2999_v8  ;;  %v739_v15 = vld [vmem:[%s2992_s4 + $0x4] sm:$0xf]  ;;  %v740_v18 = vld [vmem:[%s2992_s4 + $0x8] sm:$0xf]  ;;  %2636 = vmatprep.subr.bf16.mxu0 %v2820_v10 }
  0x13   : > { %v3015_v14 = vcombine.low %v3002_v9, %v3008_v11  ;;  %v741_v19 = vld [vmem:[%s2992_s4 + $0xc] sm:$0xf]  ;;  %v742_v23 = vld [vmem:[%s2992_s4 + $0x10] sm:$0xf]  ;;  %v2250_v24 = vcombine.low %v739_v15, %v740_v18  ;;  %v1087_v28 = vld [vmem:[%s2992_s4 + $0x14] sm:$0xf] }
  0x14   : > { %v246_v16 = vshrl.u32 %v3011_v12, 16  ;;  %v248_v17 = vshll.u32 %v3011_v12, 16  ;;  %v2297_v25 = vcombine.low %v740_v18, %v741_v19  ;;  %v3028_v27 = vcombine.low %v741_v19, %v742_v23  ;;  %v869_v32 = vld [vmem:[%s2992_s4 + $0x4] sm:$0xe]  ;;  %2541 = vmatpush3.bf16.msra.mxu1 %v2819_v6  ;;  %v1184_v51 = vld [vmem:[%s2992_s4 + $0x8] sm:$0xf] }
  0x15   : > { %v253_v20 = vshll.u32 %v3015_v14, 16  ;;  %v257_v21 = vshrl.u32 %v3015_v14, 16  ;;  %v769_v31 = vshll.u32 %v2250_v24, 16  ;;  %v767_v34 = vshrl.u32 %v2250_v24, 16  ;;  %2637 = vmatpush3.bf16.msra.mxu0 %v2820_v10  ;;  %2546 = vmatprep.subr.bf16.mxu1 %v2823_v22  ;;  %v3070_v52 = vld [vmem:[%s2992_s4 + $0xc] sm:$0xf] }
  0x16   : > { %v250_v26 = vrot.slane %v248_v17, 1  ;;  %2638 = vmatprep.mubr.msk.bf16.mxu0 %vm289_vm0, %v2297_v25  ;;  %v2298_v35 = vcombine.low %v742_v23, %v1087_v28  ;;  %v3039_v37 = vld [vmem:[%s2992_s4 + $0x10] ss:$0 sps:$4 sm:$0x11]   ;;  %v774_v39 = vshll.u32 %v3028_v27, 16  ;;  %2642 = vmatprep.subr.bf16.mxu0 %v2829_v29  ;;  %v3050_v43 = vcombine.low %v869_v32, %v740_v18  ;;  %v2835_v5 = vld [vmem:[%s3403_s1 + $0x18] sm:$0xff]  }
  0x17   : > { %v255_v30 = vrot.slane %v253_v20, 1  ;;  %v771_v36 = vrot.slane %v769_v31, 1  ;;  %v261_v41 = vshll.u32 %v3039_v37, 16  ;;  %v3074_v54 = vld [vmem:[%s2992_s4 + $0x10] sm:$0xf]  ;;  %v2313_v56 = vcombine.low %v1184_v51, %v3070_v52  ;;  %v2840_v10 = vld [vmem:[%s3403_s1 + $0x140] sm:$0xff]  }
  0x18   : > { %v251_v33 = vor.u32 %v250_v26, %v246_v16  ;;  %2639 = vmatmul.mubr.msk.bf16.vlgmr.msra.gmra.mrb[0].mxu0 %vm289_vm0, %v2298_v35  ;;  %v3062_v49 = vrot.slane %v774_v39, 1  ;;  %v882_v53 = vrot.slane %v3050_v43, 1  ;;  %v3077_v55 = vld [vmem:[%s2992_s4 + $0x14] sm:$0xf]  ;;  %v883_v60 = vrot.slane %v3028_v27, 1  ;;  %v2837_v15 = vld [vmem:[%s3403_s1 + $0x40] sm:$0xff]  }
  0x19   : > { %v259_v40 = vor.u32 %v257_v21, %v255_v30  ;;  %v263_v44 = vrot.slane %v261_v41, 1  ;;  %2643 = vmatpush3.bf16.msra.mxu0 %v2829_v29  ;;  %v772_v46 = vor.u32 %v771_v36, %v767_v34  ;;  %v3089_v59 = vcombine.low %v3074_v54, %v3077_v55  ;;  %v3095_v63 = vld [vmem:[%s2992_s4 + $0x18] ss:$0 sps:$4 sm:$0x11]   ;;  %v2843_v18 = vld [vmem:[%s3403_s1 + $0x148] sm:$0xff]   ;;  %v2844_v35 = vld [vmem:[%s3403_s1 + $0x50] sm:$0xff]  }
  0x1a   : > { %v256_v38 = vsel %vm244_vm1, %v251_v33, %v255_v30  ;;  %2644 = vmatprep.subr.bf16.mxu0 %v2832_v42  ;;  %v1212_v61 = vshrl.u32 %v2313_v56, 16  ;;  %v1214_v62 = vshll.u32 %v2313_v56, 16  ;;  %v3102_v2 = vsel %vm435_vm2, %v882_v53, %v883_v60  ;;  %v422_v19 = vld [vmem:[%s2992_s4] sm:$0xe]  ;;  %v1314_v23 = vld [vmem:[%s2992_s4 + $0x8] sm:$0xe] }
  0x1b   : > { %2542 = vmatprep.mubr.msk.bf16.mxu1 %vm289_vm0, %v256_v38  ;;  %v264_v48 = vsel %vm244_vm1, %v259_v40, %v263_v44  ;;  %v3082_v57 = vsel %vm244_vm1, %v772_v46, %v3062_v49  ;;  %v1219_v0 = vshll.u32 %v3089_v59, 16  ;;  %v1223_v1 = vshrl.u32 %v3089_v59, 16  ;;  %v2842_v28 = vld [vmem:[%s3403_s1 + $0x48] sm:$0xff]   ;;  %v2845_v30 = vld [vmem:[%s3403_s1 + $0x150] sm:$0xff]   ;;  %v2847_v36 = vld [vmem:[%s3403_s1 + $0x158] sm:$0xff]  }
  0x1c   : > { %2543 = vmatmul.mubr.msk.bf16.vlgmr.msra.gmra.mrb[0].mxu1 %vm289_vm0, %v264_v48  ;;  %v1216_v3 = vrot.slane %v1214_v62, 1  ;;  %v1227_v4 = vshll.u32 %v3095_v63, 16  ;;  %v437_v24 = vrot.slane %v3015_v14, 1  ;;  %v2330_v25 = vcombine.low %v1314_v23, %v3070_v52  ;;  %v2846_v46 = vld [vmem:[%s3403_s1 + $0x58] sm:$0xff]  }
  0x1d   : > { %2547 = vmatpush3.bf16.msra.mxu1 %v2823_v22  ;;  %2645 = vmatpush3.bf16.msra.mxu0 %v2832_v42  ;;  %v1221_v6 = vrot.slane %v1219_v0, 1  ;;  %v2204_v22 = vcombine.low %v422_v19, %v2999_v8  ;;  %v1328_v26 = vrot.slane %v3089_v59, 1  ;;  %v547_v34 = vrot.slane %v253_v20, 2  ;;  %v2861_v56 = vld [vmem:[%s2992_s4 + $0x18] ss:$0 sps:$4 sm:$0x33]  }
  0x1e   : > { %2548 = vmatprep.subr.bf16.mxu1 %v2831_v45  ;;  %2646 = vmatprep.subr.bf16.mxu0 %v2834_v47  ;;  %v1217_v7 = vor.u32 %v1216_v3, %v1212_v61  ;;  %v1327_v31 = vrot.slane %v2330_v25, 1  ;;  %v1330_v38 = vrot.slane %v3095_v63, 1  ;;  %v1436_v40 = vrot.slane %v1223_v1, 1  ;;  %v2849_v59 = vld [vmem:[%s3403_s1 + $0x60] sm:$0xff]  }
  0x1f   : > { %2554 = vmatprep.mubr.msk.bf16.mxu1 %vm289_vm0, %v3011_v12  ;;  %v1229_v12 = vrot.slane %v1227_v4, 1  ;;  %v1225_v13 = vor.u32 %v1223_v1, %v1221_v6  ;;  %v436_v29 = vrot.slane %v2204_v22, 1  ;;  %v1437_v20 = vrot.slane %v1219_v0, 2  ;;  %v2860_v1 = vld [vmem:[%s2992_s4 + $0x10] ss:$0 sps:$4 sm:$0x33]  }
  0x20   : > { %v1222_v16 = vsel %vm244_vm1, %v1217_v7, %v1221_v6  ;;  %v1329_v33 = vsel %vm435_vm2, %v1327_v31, %v1328_v26  ;;  %v539_v41 = vshrl.u32 %v2204_v22, 16  ;;  %v542_v42 = vshll.u32 %v2204_v22, 16  ;;  %v2856_v31 = vld [vmem:[%s3403_s1 + $0x78] sm:$0xff]  }
  0x21   : > { %2549 = vmatpush3.bf16.msra.mxu1 %v2831_v45  ;;  %2647 = vmatpush3.bf16.msra.mxu0 %v2834_v47  ;;  %v1230_v17 = vsel %vm244_vm1, %v1225_v13, %v1229_v12  ;;  %v438_v32 = vsel %vm435_vm2, %v436_v29, %v437_v24  ;;  %v1429_v44 = vshrl.u32 %v2330_v25, 16  ;;  %v1432_v45 = vshll.u32 %v2330_v25, 16  ;;  %v2851_v47 = vld [vmem:[%s3403_s1 + $0x160] sm:$0xff]   ;;  %v2857_v29 = vld [vmem:[%s3403_s1 + $0x178] sm:$0xff]  }
  0x22   : > { %2550 = vmatprep.subr.bf16.mxu1 %v2833_v50  ;;  %2648 = vmatprep.subr.bf16.mxu0 %v2836_v58  ;;  %v439_v48 = vrot.slane %v3039_v37, 1  ;;  %v541_v61 = vrot.slane %v539_v41, 1  ;;  %v544_v62 = vrot.slane %v542_v42, 2  ;;  %v1438_v0 = vor.u32 %v1437_v20, %v1436_v40  ;;  %v3212_v41 = vld [vmem:[%s2992_s4 + $0x10] sm:$0xf]  ;;  %v2863_v42 = vld [vmem:[%s3403_s1 + $0x188] sm:$0xff]  }
  0x23   : > { %2650 = vmatprep.mubr.msk.bf16.mxu0 %vm289_vm0, %v1222_v16  ;;  %v1431_v51 = vrot.slane %v1429_v44, 1  ;;  %v1434_v53 = vrot.slane %v1432_v45, 2  ;;  %v1331_v37 = vsel %vm435_vm2, %v1328_v26, %v1330_v38  ;;  %v778_v3 = vshrl.u32 %v3028_v27, 16  ;;  %v1629_v38 = vld [vmem:[%s2992_s4 + $0xc] sm:$0xf]  ;;  %v2871_v27 = vld [vmem:[%s3403_s1 + $0x1a0] sm:$0xff]  }
  0x24   : > { %v545_v6 = vor.u32 %v544_v62, %v541_v61  ;;  %v1444_v12 = vshll.u32 %v2861_v56, 16  ;;  %v440_v13 = vsel %vm435_vm2, %v437_v24, %v439_v48  ;;  %v987_v16 = vshll.u32 %v3050_v43, 16  ;;  %v2884_v44 = vld [vmem:[%s2992_s4 + $0x14] ss:$0 sps:$4 sm:$0x11]  }
  0x25   : > { %2551 = vmatpush3.bf16.msra.mxu1 %v2833_v50  ;;  %2649 = vmatpush3.bf16.msra.mxu0 %v2836_v58  ;;  %v546_v50 = vrot.slane %v257_v21, 1  ;;  %v984_v58 = vshrl.u32 %v3050_v43, 16  ;;  %v1435_v63 = vor.u32 %v1434_v53, %v1431_v51  ;;  %v2853_v21 = vld [vmem:[%s3403_s1 + $0x168] sm:$0xff]   ;;  %v991_v19 = vrot.slane %v778_v3, 1  ;;  %v3235_v53 = vld [vmem:[%s2992_s4 + $0x14] sm:$0xff]  }
  0x26   : > { %2552 = vmatprep.subr.bf16.mxu1 %v2835_v5  ;;  %2654 = vmatprep.subr.bf16.mxu0 %v2840_v10  ;;  %v551_v23 = vshrl.u32 %v2860_v1, 16  ;;  %v554_v43 = vshll.u32 %v2860_v1, 16  ;;  %v1446_v25 = vrot.slane %v1444_v12, 2  ;;  %v2360_v45 = vcombine.low %v3070_v52, %v3074_v54  ;;  %v2862_v51 = vld [vmem:[%s3403_s1 + $0x88] sm:$0xff]   ;;  %v2865_v52 = vld [vmem:[%s3403_s1 + $0x190] sm:$0xff]  }
  0x27   : > { %v548_v4 = vor.u32 %v547_v34, %v546_v50  ;;  %v1439_v7 = vsel %vm537_vm3, %v1435_v63, %v1438_v0  ;;  %v782_v48 = vshll.u32 %v2884_v44, 16  ;;  %v885_v61 = vrot.slane %v2884_v44, 1  ;;  %v2866_v63 = vld [vmem:[%s3403_s1 + $0x98] sm:$0xff]   ;;  %v2889_v44 = vld [vmem:[%s3403_s1 + $0x1d0] sm:$0xff]  }
  0x28   : > { %2651 = vmatmul.mubr.msk.bf16.vlgmr.msra.gmra.mrb[0].mxu0 %vm289_vm0, %v1230_v17  ;;  %v2855_v17 = vld [vmem:[%s3403_s1 + $0x170] sm:$0xff]   ;;  %v3275_v12 = vld [vmem:[%s2992_s4 + $0x1c] ss:$0 sps:$4 sm:$0x11]  }
  0x29   : > { %2553 = vmatpush3.bf16.msra.mxu1 %v2835_v5  ;;  %2655 = vmatpush3.bf16.msra.mxu0 %v2840_v10  ;;  %v2852_v5 = vld [vmem:[%s3403_s1 + $0x68] sm:$0xff]   ;;  %v1441_v10 = vshrl.u32 %v2861_v56, 16  ;;  %v549_v22 = vsel %vm537_vm3, %v545_v6, %v548_v4  ;;  %v784_v54 = vrot.slane %v782_v48, 1  ;;  %v3250_v62 = vsel %vm435_vm2, %v883_v60, %v885_v61  ;;  %v2869_v60 = vld [vmem:[%s3403_s1 + $0xa0] sm:$0xff]   ;;  %v2891_v48 = vld [vmem:[%s3403_s1 + $0x1d8] sm:$0xff]  }
  0x2a   : > { %2558 = vmatprep.subr.bf16.mxu1 %v2837_v15  ;;  %2656 = vmatprep.subr.bf16.mxu0 %v2843_v18  ;;  %v2875_v6 = vld [vmem:[%s3403_s1 + $0x1a8] sm:$0xff]   ;;  %v2902_v61 = vld [vmem:[%s2992_s4 + $0x1c] ss:$0 sps:$4 sm:$0x33]  }
  0x2b   : > { %2662 = vmatprep.mubr.msk.bf16.mxu0 %vm289_vm0, %v1329_v33  ;;  %v1443_v24 = vrot.slane %v1441_v10, 1 }
  0x2c   : > { %2555 = vmatmul.mubr.msk.bf16.vlgmr.msra.gmra.mrb[0].mxu1 %vm289_vm0, %v3015_v14  ;;  %v2854_v14 = vld [vmem:[%s3403_s1 + $0x70] sm:$0xff]  }
  0x2d   : > { %2559 = vmatpush3.bf16.msra.mxu1 %v2837_v15  ;;  %2657 = vmatpush3.bf16.msra.mxu0 %v2843_v18  ;;  %v986_v15 = vrot.slane %v984_v58, 1  ;;  %v989_v18 = vrot.slane %v987_v16, 2  ;;  %v1447_v33 = vor.u32 %v1446_v25, %v1443_v24  ;;  %v2877_v16 = vld [vmem:[%s3403_s1 + $0x1b0] sm:$0xff]   ;;  %v1759_v24 = vld [vmem:[%s2992_s4 + $0xc] sm:$0xe]  ;;  %v1980_v25 = vld [vmem:[%s3404_s2 + $0x18] sm:$0xff] }
  0x2e   : > { %2560 = vmatprep.subr.bf16.mxu1 %v2842_v28  ;;  %2658 = vmatprep.subr.bf16.mxu0 %v2845_v30 }
  0x2f   : > { %2566 = vmatprep.mubr.msk.bf16.mxu1 %vm289_vm0, %v438_v32  ;;  %v990_v26 = vor.u32 %v989_v18, %v986_v15  ;;  %v553_v32 = vrot.slane %v551_v23, 1  ;;  %v1448_v20 = vsel %vm537_vm3, %v1438_v0, %v1447_v33  ;;  %v1979_v15 = vld [vmem:[%s3404_s2 + $0x10] sm:$0xff]  ;;  %v1668_v23 = vshrl.u32 %v3235_v53, 16 }
  0x30   : > { %1993 = vperm.xlu1 %2812, %v1979_v15  }
  0x31   : > { %2561 = vmatpush3.bf16.msra.mxu1 %v2842_v28  ;;  %2659 = vmatpush3.bf16.msra.mxu0 %v2845_v30  ;;  %v992_v28 = vrot.slane %v774_v39, 2  ;;  %v556_v39 = vrot.slane %v554_v43, 2  ;;  %v1672_v43 = vshll.u32 %v3275_v12, 16 }
  0x32   : > { %2562 = vmatprep.subr.bf16.mxu1 %v2844_v35  ;;  %2660 = vmatprep.subr.bf16.mxu0 %v2847_v36 }
  0x33   : > { %v3194_v30 = vor.u32 %v992_v28, %v991_v19  ;;  %v557_v40 = vor.u32 %v556_v39, %v553_v32  ;;  %v2879_v28 = vld [vmem:[%s3403_s1 + $0x1b8] sm:$0xff]   ;;  %v1674_v33 = vrot.slane %v1672_v43, 1 }
  0x34   : > { %1998 = vperm.xlu1 %2812, %v1980_v25  }
  0x35   : > { %2563 = vmatpush3.bf16.msra.mxu1 %v2844_v35  ;;  %2661 = vmatpush3.bf16.msra.mxu0 %v2847_v36  ;;  %v3201_v34 = vsel %vm537_vm3, %v990_v26, %v3194_v30  ;;  %v2859_v35 = vld [vmem:[%s3403_s1 + $0x180] sm:$0xff]   ;;  %v558_v50 = vsel %vm537_vm3, %v548_v4, %v557_v40  ;;  %v2876_v26 = vld [vmem:[%s3403_s1 + $0xb0] sm:$0xff]  }
  0x36   : > { %2564 = vmatprep.subr.bf16.mxu1 %v2846_v46  ;;  %2666 = vmatprep.subr.bf16.mxu0 %v2851_v47  ;;  %v2858_v36 = vld [vmem:[%s3403_s1 + $0x80] sm:$0xff]  }
  0x37   : > { %v2880_v40 = vld [vmem:[%s3403_s1 + $0xc0] sm:$0xff]  }
  0x38   : > { %2663 = vmatmul.mubr.msk.bf16.vlgmr.msra.gmra.mrb[0].mxu0 %vm289_vm0, %v1331_v37  ;;  %v1664_v37 = vshll.u32 %v3235_v53, 16 }
  0x39   : > { %2565 = vmatpush3.bf16.msra.mxu1 %v2846_v46  ;;  %2667 = vmatpush3.bf16.msra.mxu0 %v2851_v47  ;;  %v780_v46 = vor.u32 %v778_v3, %v3062_v49  ;;  %v2376_v47 = vcombine.low %v1629_v38, %v3212_v41  ;;  %v2234_v49 = vcombine.low %v2999_v8, %v3002_v9  ;;  %v2867_v8 = vld [vmem:[%s3403_s1 + $0x198] sm:$0xff]   ;;  %v1773_v38 = vrot.slane %v3235_v53, 1 }
  0x3a   : > { %2570 = vmatprep.subr.bf16.mxu1 %v2849_v59  ;;  %2668 = vmatprep.subr.bf16.mxu0 %v2853_v21  ;;  %v1666_v4 = vrot.slane %v1664_v37, 1 }
  0x3b   : > { %2674 = vmatprep.mubr.msk.bf16.mxu0 %vm289_vm0, %v1439_v7  ;;  %v1659_v56 = vshll.u32 %v2376_v47, 16  ;;  %v3238_v58 = vsel %vm244_vm1, %v780_v46, %v784_v54  ;;  %v1657_v9 = vshrl.u32 %v2376_v47, 16  ;;  %v2888_v47 = vld [vmem:[%s3403_s1 + $0xd0] sm:$0xff]   ;;  %v1882_v54 = vrot.slane %v1664_v37, 2 }
  0x3c   : > { %2567 = vmatmul.mubr.msk.bf16.vlgmr.msra.gmra.mrb[0].mxu1 %vm289_vm0, %v440_v13  ;;  %v1977_v13 = vld [vmem:[%s3404_s2] sm:$0xff]  ;;  %v1670_v39 = vor.u32 %v1668_v23, %v1666_v4  ;;  %v1889_v37 = vshll.u32 %v2902_v61, 16 }
  0x3d   : > { %2571 = vmatpush3.bf16.msra.mxu1 %v2849_v59  ;;  %2669 = vmatpush3.bf16.msra.mxu0 %v2853_v21  ;;  %v2864_v59 = vld [vmem:[%s3403_s1 + $0x90] sm:$0xff]   ;;  %v1661_v0 = vrot.slane %v1659_v56, 1  ;;  %v1532_v21 = vld [vmem:[%s2992_s4 + $0x18] sm:$0xf] }
  0x3e   : > { %2572 = vmatprep.subr.bf16.mxu1 %v2852_v5  ;;  %2670 = vmatprep.subr.bf16.mxu0 %v2855_v17  ;;  %v2361_v1 = vcombine.low %v3077_v55, %v1532_v21  ;;  %v2901_v55 = vld [vmem:[%s2992_s4 + $0x14] ss:$0 sps:$4 sm:$0x33]   ;;  %v2890_v56 = vld [vmem:[%s3403_s1 + $0xd8] sm:$0xff]   ;;  %v2895_v21 = vld [vmem:[%s3403_s1 + $0xe8] sm:$0xff]  }
  0x3f   : > { %2578 = vmatprep.mubr.msk.bf16.mxu1 %vm289_vm0, %v549_v22  ;;  %v1662_v3 = vor.u32 %v1661_v0, %v1657_v9  ;;  %v999_v18 = vshll.u32 %v2901_v55, 16  ;;  %1983 = vperm.xlu0 %2811, %v1977_v13   ;;  %v1978_v22 = vld [vmem:[%s3404_s2 + $0x8] sm:$0xff]  ;;  %v1886_v0 = vshrl.u32 %v2902_v61, 16 }
  0x40   : > { %v2896_v9 = vld [vmem:[%s3403_s1 + $0x1e8] sm:$0xff]  }
  0x41   : > { %2573 = vmatpush3.bf16.msra.mxu1 %v2852_v5  ;;  %2671 = vmatpush3.bf16.msra.mxu0 %v2855_v17  ;;  %v642_v5 = vld [vmem:[%s2992_s4 + $0x10] sm:$0xf]  ;;  %v1667_v10 = vsel %vm244_vm1, %v1662_v3, %v1666_v4  ;;  %v996_v17 = vshrl.u32 %v2901_v55, 16  ;;  %v2900_v4 = vld [vmem:[%s3403_s1 + $0x1f8] sm:$0xff]  }
  0x42   : > { %2574 = vmatprep.subr.bf16.mxu1 %v2854_v14  ;;  %2672 = vmatprep.subr.bf16.mxu0 %v2857_v29  ;;  %v2235_v7 = vcombine.low %v3008_v11, %v642_v5  ;;  %v2874_v11 = vld [vmem:[%s3403_s1 + $0xa8] sm:$0xff]   ;;  %v2897_v3 = vld [vmem:[%s3403_s1 + $0xf0] sm:$0xff]   ;;  %v2899_v5 = vld [vmem:[%s3403_s1 + $0xf8] sm:$0xff]  }
  0x43   : > { %v998_v19 = vrot.slane %v996_v17, 1  ;;  %1988 = vperm.xlu0 %2811, %v1978_v22  }
  0x45   : > { %2575 = vmatpush3.bf16.msra.mxu1 %v2854_v14  ;;  %2673 = vmatpush3.bf16.msra.mxu0 %v2857_v29  ;;  %v1001_v14 = vrot.slane %v999_v18, 2 }
  0x46   : > { %2576 = vmatprep.subr.bf16.mxu1 %v2856_v31  ;;  %2678 = vmatprep.subr.bf16.mxu0 %v2859_v35 }
  0x47   : > { %v1002_v29 = vor.u32 %v1001_v14, %v998_v19 }
  0x48   : > { %2675 = vmatmul.mubr.msk.bf16.vlgmr.msra.gmra.mrb[0].mxu0 %vm289_vm0, %v1448_v20  ;;  %v2887_v20 = vld [vmem:[%s3403_s1 + $0x1c8] sm:$0xff]  }
  0x49   : > { %2577 = vmatpush3.bf16.msra.mxu1 %v2856_v31  ;;  %2679 = vmatpush3.bf16.msra.mxu0 %v2859_v35  ;;  %v2393_v31 = vcombine.low %v1759_v24, %v3212_v41  ;;  %v3311_v32 = vsel %vm537_vm3, %v3194_v30, %v1002_v29  ;;  %v2878_v35 = vld [vmem:[%s3403_s1 + $0xb8] sm:$0xff]   ;;  %v1675_v30 = vsel %vm244_vm1, %v1670_v39, %v1674_v33 }
  0x4a   : > { %2582 = vmatprep.subr.bf16.mxu1 %v2858_v36  ;;  %2680 = vmatprep.subr.bf16.mxu0 %v2863_v42 }
  0x4b   : > { %2686 = vmatprep.mubr.msk.bf16.mxu0 %vm289_vm0, %v2360_v45  ;;  %v1874_v45 = vshrl.u32 %v2393_v31, 16  ;;  %v1877_v46 = vshll.u32 %v2393_v31, 16 }
  0x4c   : > { %2579 = vmatmul.mubr.msk.bf16.vlgmr.msra.gmra.mrb[0].mxu1 %vm289_vm0, %v558_v50 }
  0x4d   : > { %2583 = vmatpush3.bf16.msra.mxu1 %v2858_v36  ;;  %2681 = vmatpush3.bf16.msra.mxu0 %v2863_v42  ;;  %v1772_v36 = vrot.slane %v2393_v31, 1  ;;  %v2886_v42 = vld [vmem:[%s3403_s1 + $0xc8] sm:$0xff]   ;;  %v1876_v50 = vrot.slane %v1874_v45, 1 }
  0x4e   : > { %2584 = vmatprep.subr.bf16.mxu1 %v2862_v51  ;;  %2682 = vmatprep.subr.bf16.mxu0 %v2865_v52 }
  0x4f   : > { %2590 = vmatprep.mubr.msk.bf16.mxu1 %vm289_vm0, %v2234_v49  ;;  %v1774_v41 = vsel %vm435_vm2, %v1772_v36, %v1773_v38  ;;  %v1775_v49 = vrot.slane %v3275_v12, 1 }
  0x51   : > { %2585 = vmatpush3.bf16.msra.mxu1 %v2862_v51  ;;  %2683 = vmatpush3.bf16.msra.mxu0 %v2865_v52  ;;  %v1879_v51 = vrot.slane %v1877_v46, 2  ;;  %v1881_v52 = vrot.slane %v1668_v23, 1  ;;  %v1776_v53 = vsel %vm435_vm2, %v1773_v38, %v1775_v49 }
  0x52   : > { %2586 = vmatprep.subr.bf16.mxu1 %v2864_v59  ;;  %2684 = vmatprep.subr.bf16.mxu0 %v2867_v8 }
  0x55   : > { %2587 = vmatpush3.bf16.msra.mxu1 %v2864_v59  ;;  %2685 = vmatpush3.bf16.msra.mxu0 %v2867_v8  ;;  %v1883_v59 = vor.u32 %v1882_v54, %v1881_v52  ;;  %v2892_v8 = vld [vmem:[%s3403_s1 + $0xe0] sm:$0xff]  }
  0x56   : > { %2588 = vmatprep.subr.bf16.mxu1 %v2866_v63  ;;  %2690 = vmatprep.subr.bf16.mxu0 %v2871_v27 }
  0x58   : > { %2687 = vmatmul.mubr.msk.bf16.vlgmr.msra.gmra.mrb[0].mxu0 %vm289_vm0, %v2361_v1  ;;  %v1891_v1 = vrot.slane %v1889_v37, 2 }
  0x59   : > { %2589 = vmatpush3.bf16.msra.mxu1 %v2866_v63  ;;  %2691 = vmatpush3.bf16.msra.mxu0 %v2871_v27  ;;  %v2898_v27 = vld [vmem:[%s3403_s1 + $0x1f0] sm:$0xff]  }
  0x5a   : > { %2594 = vmatprep.subr.bf16.mxu1 %v2869_v60  ;;  %2692 = vmatprep.subr.bf16.mxu0 %v2875_v6 }
  0x5b   : > { %2698 = vmatprep.mubr.msk.bf16.mxu0 %vm289_vm0, %v1667_v10 }
  0x5c   : > { %2591 = vmatmul.mubr.msk.bf16.vlgmr.msra.gmra.mrb[0].mxu1 %vm289_vm0, %v2235_v7 }
  0x5d   : > { %2595 = vmatpush3.bf16.msra.mxu1 %v2869_v60  ;;  %2693 = vmatpush3.bf16.msra.mxu0 %v2875_v6  ;;  %v1888_v60 = vrot.slane %v1886_v0, 1 }
  0x5e   : > { %2596 = vmatprep.subr.bf16.mxu1 %v2874_v11  ;;  %2694 = vmatprep.subr.bf16.mxu0 %v2877_v16 }
  0x5f   : > { %2602 = vmatprep.mubr.msk.bf16.mxu1 %vm289_vm0, %v3082_v57  ;;  %v2883_v57 = vld [vmem:[%s3403_s1 + $0x1c0] sm:$0xff]  }
  0x61   : > { %2597 = vmatpush3.bf16.msra.mxu1 %v2874_v11  ;;  %2695 = vmatpush3.bf16.msra.mxu0 %v2877_v16 }
  0x62   : > { %2598 = vmatprep.subr.bf16.mxu1 %v2876_v26  ;;  %2696 = vmatprep.subr.bf16.mxu0 %v2879_v28 }
  0x65   : > { %2599 = vmatpush3.bf16.msra.mxu1 %v2876_v26  ;;  %2697 = vmatpush3.bf16.msra.mxu0 %v2879_v28 }
  0x66   : > { %2600 = vmatprep.subr.bf16.mxu1 %v2878_v35  ;;  %2702 = vmatprep.subr.bf16.mxu0 %v2883_v57 }
  0x68   : > { %2699 = vmatmul.mubr.msk.bf16.vlgmr.msra.gmra.mrb[0].mxu0 %vm289_vm0, %v1675_v30 }
  0x69   : > { %2601 = vmatpush3.bf16.msra.mxu1 %v2878_v35  ;;  %2703 = vmatpush3.bf16.msra.mxu0 %v2883_v57 }
  0x6a   : > { %2606 = vmatprep.subr.bf16.mxu1 %v2880_v40  ;;  %2704 = vmatprep.subr.bf16.mxu0 %v2887_v20 }
  0x6b   : > { %2710 = vmatprep.mubr.msk.bf16.mxu0 %vm289_vm0, %v1774_v41 }
  0x6c   : > { %2603 = vmatmul.mubr.msk.bf16.vlgmr.msra.gmra.mrb[0].mxu1 %vm289_vm0, %v3238_v58  ;;  %v1880_v58 = vor.u32 %v1879_v51, %v1876_v50 }
  0x6d   : > { %2607 = vmatpush3.bf16.msra.mxu1 %v2880_v40  ;;  %2705 = vmatpush3.bf16.msra.mxu0 %v2887_v20 }
  0x6e   : > { %2608 = vmatprep.subr.bf16.mxu1 %v2886_v42  ;;  %2706 = vmatprep.subr.bf16.mxu0 %v2889_v44  ;;  %v1884_v63 = vsel %vm537_vm3, %v1880_v58, %v1883_v59 }
  0x6f   : > { %2614 = vmatprep.mubr.msk.bf16.mxu1 %vm289_vm0, %v3102_v2  ;;  %v2894_v2 = vld [vmem:[%s3403_s1 + $0x1e0] sm:$0xff]  }
  0x71   : > { %2609 = vmatpush3.bf16.msra.mxu1 %v2886_v42  ;;  %2707 = vmatpush3.bf16.msra.mxu0 %v2889_v44 }
  0x72   : > { %2610 = vmatprep.subr.bf16.mxu1 %v2888_v47  ;;  %2708 = vmatprep.subr.bf16.mxu0 %v2891_v48 }
  0x75   : > { %2611 = vmatpush3.bf16.msra.mxu1 %v2888_v47  ;;  %2709 = vmatpush3.bf16.msra.mxu0 %v2891_v48 }
  0x76   : > { %2612 = vmatprep.subr.bf16.mxu1 %v2890_v56  ;;  %2714 = vmatprep.subr.bf16.mxu0 %v2894_v2 }
  0x78   : > { %2711 = vmatmul.mubr.msk.bf16.vlgmr.msra.gmra.mrb[0].mxu0 %vm289_vm0, %v1776_v53 }
  0x79   : > { %2613 = vmatpush3.bf16.msra.mxu1 %v2890_v56  ;;  %2715 = vmatpush3.bf16.msra.mxu0 %v2894_v2 }
  0x7a   : > { %2618 = vmatprep.subr.bf16.mxu1 %v2892_v8  ;;  %2716 = vmatprep.subr.bf16.mxu0 %v2896_v9 }
  0x7b   : > { %2722 = vmatprep.mubr.msk.bf16.mxu0 %vm289_vm0, %v1884_v63 }
  0x7c   : > { %2615 = vmatmul.mubr.msk.bf16.vlgmr.msra.gmra.mrb[0].mxu1 %vm289_vm0, %v3250_v62  ;;  %v1892_v62 = vor.u32 %v1891_v1, %v1888_v60 }
  0x7d   : > { %2619 = vmatpush3.bf16.msra.mxu1 %v2892_v8  ;;  %2717 = vmatpush3.bf16.msra.mxu0 %v2896_v9 }
  0x7e   : > { %2620 = vmatprep.subr.bf16.mxu1 %v2895_v21  ;;  %2718 = vmatprep.subr.bf16.mxu0 %v2898_v27  ;;  %v1893_v6 = vsel %vm537_vm3, %v1883_v59, %v1892_v62 }
  0x7f   : > { %2626 = vmatprep.mubr.msk.bf16.mxu1 %vm289_vm0, %v3201_v34 }
  0x81   : > { %2621 = vmatpush3.bf16.msra.mxu1 %v2895_v21  ;;  %2719 = vmatpush3.bf16.msra.mxu0 %v2898_v27 }
  0x82   : > { %2622 = vmatprep.subr.bf16.mxu1 %v2897_v3  ;;  %2720 = vmatprep.subr.bf16.mxu0 %v2900_v4 }
  0x85   : > { %2623 = vmatpush3.bf16.msra.mxu1 %v2897_v3  ;;  %2721 = vmatpush3.bf16.msra.mxu0 %v2900_v4 }
  0x86   : > { %2624 = vmatprep.subr.bf16.mxu1 %v2899_v5 }
  0x88   : > { %2723 = vmatmul.mubr.msk.bf16.vlgmr.msra.gmra.mrb[0].mxu0 %vm289_vm0, %v1893_v6 }
  0x89   : > { %2625 = vmatpush3.bf16.msra.mxu1 %v2899_v5 }
  0x8c   : > { %2627 = vmatmul.mubr.msk.bf16.vlgmr.msra.gmra.mrb[0].mxu1 %vm289_vm0, %v3311_v32 }
  0xaf   : > { %v1994_v12 = vpop.permute.xlu1 %1993 }
  0xb3   : > { %v1999_v24 = vpop.permute.xlu1 %1998 }
  0xbe   : > { %v1984_v10 = vpop.permute.xlu0 %1983 }
  0xc2   : > { %v1989_v43 = vpop.permute.xlu0 %1988 }
 0x15b   : > { %v2724_v34 = vpop.f32.mrb[0].mxu0 }
 0x15c   : > { %v1958_v7 = vpop.f32.mrb[1].mxu0 }
 0x15d   : > { %v2725_v55 = vpop.f32.mrb[2].mxu0 }
 0x15e   : > { %v1961_v13 = vpop.f32.mrb[3].mxu0 }
 0x15f   : > { %v2628_v15 = vpop.f32.mrb[0].mxu1 }
 0x160   : > { %v2726_v11 = vadd.f32 %v2724_v34, %v2628_v15  ;;  %v1068_v16 = vpop.f32.mrb[1].mxu1 }
 0x161   : > { %v2727_v17 = vadd.f32 %v1958_v7, %v1068_v16  ;;  %v2629_v18 = vpop.f32.mrb[2].mxu1 }
 0x162   : > { %v2728_v19 = vadd.f32 %v2725_v55, %v2629_v18  ;;  %v1071_v14 = vpop.f32.mrb[3].mxu1  ;;  %v2003_v25 = vmul.f32 %v2726_v11, %v1994_v12 }
 0x163   : > { %v2001_v22 = vmul.f32 %v2727_v17, %v1984_v10  ;;  %v2729_v23 = vadd.f32 %v1961_v13, %v1071_v14 }
 0x164   : > { %v2004_v31 = vmul.f32 %v2728_v19, %v1999_v24  ;;  %v2016_v39 = vmul.f32 %v2726_v11, %v2003_v25 }
 0x165   : > { %v2002_v26 = vmul.f32 %v2729_v23, %v1989_v43  ;;  %v2014_v28 = vmul.f32 %v2727_v17, %v2001_v22 }
 0x166   : > { %v2017_v36 = vmul.f32 %v2728_v19, %v2004_v31 }
 0x167   : > { %v2015_v29 = vmul.f32 %v2729_v23, %v2002_v26  ;;  %v2005_v32 = vadd.f32 %v2002_v26, %v2001_v22 }
 0x169   : > { %v2018_v33 = vadd.f32 %v2015_v29, %v2014_v28  ;;  %v2006_v35 = vadd.f32 %v2005_v32, %v2003_v25 }
 0x16b   : > { %v2007_v57 = vadd.f32 %v2006_v35, %v2004_v31  ;;  %v2019_v38 = vadd.f32 %v2018_v33, %v2016_v39 }
 0x16d   : > { %v2008_v30 = vrot.slane %v2007_v57, 4  ;;  %v2020_v40 = vadd.f32 %v2019_v38, %v2017_v36 }
 0x16f   : > { %v2009_v20 = vadd.f32 %v2008_v30, %v2007_v57  ;;  %v2021_v41 = vrot.slane %v2020_v40, 4 }
 0x171   : > { %v2010_v42 = vrot.slane %v2009_v20, 2  ;;  %v2022_v44 = vadd.f32 %v2021_v41, %v2020_v40 }
 0x173   : > { %v2011_v45 = vadd.f32 %v2010_v42, %v2009_v20  ;;  %v2023_v46 = vrot.slane %v2022_v44, 2 }
 0x175   : > { %v2012_v47 = vrot.slane %v2011_v45, 1  ;;  %v2024_v48 = vadd.f32 %v2023_v46, %v2022_v44 }
 0x177   : > { %v2013_v50 = vadd.f32 %v2012_v47, %v2011_v45  ;;  %v2025_v51 = vrot.slane %v2024_v48, 1 }
 0x179   : > { %v2026_v52 = vadd.f32 %v2025_v51, %v2024_v48  ;;  %v2027_v54 = vmul.f32 0.0625, %v2013_v50 }
 0x17b   : > { %v2028_v49 = vmul.f32 0.0625, %v2026_v52  ;;  %v2029_v56 = vmul.f32 %v2027_v54, %v2027_v54  ;;  %v2032_v2 = vsub.f32 %v2727_v17, %v2027_v54  ;;  %v2033_v58 = vsub.f32 %v2729_v23, %v2027_v54 }
 0x17c   : > { %v2034_v59 = vsub.f32 %v2726_v11, %v2027_v54  ;;  %v2035_v53 = vsub.f32 %v2728_v19, %v2027_v54 }
 0x17d   : > { %v2030_v61 = vsub.f32 %v2028_v49, %v2029_v56 }
 0x17f   : > { %v2031_v8 = vmax.f32 %v2030_v61, 0.0 }
 0x181   : > { %v2036_v9 = vadd.f32 1e-05, %v2031_v8 }
 0x183   : > { %2903 = vrsqrt.f32 %v2036_v9 }
 0x18d   : > { %v2904_v63 = vpop.eup %2903 }
 0x18e   : > { %v2038_v0 = vmul.f32 %v2904_v63, %v2032_v2  ;;  %v2039_v37 = vmul.f32 %v2904_v63, %v2033_v58  ;;  %v2040_v21 = vmul.f32 %v2904_v63, %v2034_v59  ;;  %v2041_v27 = vmul.f32 %v2904_v63, %v2035_v53 }
 0x190   : > { %v2042_v60 = vmul.f32 0.2, %v2038_v0  ;;  %v2043_v1 = vmul.f32 0.2, %v2039_v37  ;;  %v2044_v3 = vmul.f32 0.2, %v2040_v21 }
 0x191   : > { %v2045_v4 = vmul.f32 0.2, %v2041_v27 }
 0x192   : > { %v2046_v62 = vmax.f32 %v2038_v0, %v2042_v60  ;;  %v2047_v5 = vmax.f32 %v2039_v37, %v2043_v1  ;;  %v2048_v6 = vmax.f32 %v2040_v21, %v2044_v3 }
 0x193   : > { %v2049_v34 = vmax.f32 %v2041_v27, %v2045_v4 }
 0x194   : > { %v2430_v7 = vpack.c.bf16 %v2047_v5, %v2046_v62 }
 0x195   : > { %v2435_v10 = vpack.c.bf16 %v2049_v34, %v2048_v6 }
 0x196   : > { %2431 = vst [vmem:[%s207_s25] sm:$0xff] %v2430_v7  }
 0x197   : > { %2437 = vst [vmem:[%s207_s25 + $0x8] sm:$0xff] %v2435_v10  }
 0x198 PF: > { %s13_s14 = sadd.s32 1, %s2927_s14   ;;  %s3406_s12 = smov %s2923_s13 }
 0x199   : > { %p10_p5 = scmp.ge.s32.totalorder %s13_s14, 4   ;;  %s3407_s13 = smov %s3409_s15 }
 0x19b   :  { %12 = sbr.rel (!%p10_p5) target bundleno = 2 (0x2), region = 80 }

// kernel: nlayer_res_discriminator_forward.21
= control target key start
LH: loop header
LB: loop body
LE: loop exit
PB: predicated region body
PF: predicated region fallthrough
CT: control target
= control target key end

     0   :  { %s3998_s12 = smov 0   ;;  %s4000_s13 = smov 0   ;;  %s4859_s0 = inlined_call_operand.vmem [shape: bf16[2,72,128], index: 0, kind: input, shape index: {}]   ;;  %s4860_s1 = inlined_call_operand.vmem [shape: bf16[16,128,128], index: 1, kind: input, shape index: {}]   ;;  %s4861_s2 = inlined_call_operand.vmem [shape: f32[1,128], index: 2, kind: input, shape index: {}]   ;;  %s4862_s3 = inlined_call_operand.vmem [shape: f32[2,40,128], index: 3, kind: output, shape index: {}]  }
   0x1   :  { %s4002_s14 = smov 0  }
   0x2 LB: > { %s22_s15 = sadd.s32 1, %s3970_s13  ;;  %p2738_p0 = scmp.ge.s32.totalorder %s3974_s14, 1  ;;  %s3974_s14 = sphi %s4002_s14, %s13_s14   ;;  %s3970_s13 = sphi %s4000_s13, %s4864_s13   ;;  %s3966_s12 = sphi %s3998_s12, %s4863_s12  }
   0x3   : > { %p23_p1 = scmp.ge.s32.totalorder %s22_s15, 2  ;;  %p168_p2 = scmp.lt.s32.totalorder %s3974_s14, 3 }
   0x5   : > { %s4866_s15 = smov (%p23_p1, %s22_s15), 0  ;;  %p169_p3 = pnand %p2738_p0, %p168_p2 }
   0x6   : > { %v3794_v0 = vld [vmem:[%s4860_s1 + $0x40] sm:$0xff] (!%p169_p3)   ;;  %v3976_v1 = vmov (!%p169_p3), 0.0   ;;  %v3796_v3 = vld [vmem:[%s4860_s1 + $0x48] sm:$0xff] (!%p169_p3)   ;;  %vm3977_vm0 = vmmov (!%p169_p3), 0   ;;  %p202_p4 = scmp.lt.s32.totalorder (!%p169_p3), %s3966_s12, 1  ;;  %v3798_v5 = vld [vmem:[%s4860_s1 + $0x50] sm:$0xff] (!%p169_p3)  }
   0x7   : > { %172 = sbr.rel (%p169_p3) target bundleno = 498 (0x1f2), region = 32  ;;  %3318 = vmatprep.subr.bf16.mxu0 (!%p169_p3), %v3976_v1  ;;  %3346 = vmatprep.subr.bf16.mxu1 (!%p169_p3), %v3976_v1  ;;  %v3795_v2 = vld [vmem:[%s4860_s1] sm:$0xff] (!%p169_p3)   ;;  %v3797_v4 = vld [vmem:[%s4860_s1 + $0x8] sm:$0xff] (!%p169_p3)   ;;  %v3799_v6 = vld [vmem:[%s4860_s1 + $0x10] sm:$0xff] (!%p169_p3)   ;;  %vm277_vm1 = vsmask.f32 (!%p169_p3), 7424 }
   0x8   : > { %3319 = vmatpush3.bf16.msra.mxu0 (!%p169_p3), %v3794_v0  ;;  %3334 = vmatprep.mubr.msk.bf16.mxu0 (!%p169_p3), %vm3977_vm0, %v3976_v1  ;;  %v3800_v7 = vld [vmem:[%s4860_s1 + $0x58] sm:$0xff] (!%p169_p3)   ;;  %v3802_v9 = vld [vmem:[%s4860_s1 + $0x60] sm:$0xff] (!%p169_p3)   ;;  %v3804_v17 = vld [vmem:[%s4860_s1 + $0x68] sm:$0xff] (!%p169_p3)   ;;  %vm537_vm2 = vcmask (!%p169_p3), 1046528   ;;  %vm676_vm3 = vsmask.f32 (!%p169_p3), 6400 }
   0x9   : > { %3347 = vmatpush3.bf16.msra.mxu1 (!%p169_p3), %v3795_v2  ;;  %3320 = vmatprep.subr.bf16.mxu0 (!%p169_p3), %v3976_v1  ;;  %v3801_v8 = vld [vmem:[%s4860_s1 + $0x18] sm:$0xff] (!%p169_p3)   ;;  %v3803_v10 = vld [vmem:[%s4860_s1 + $0x20] sm:$0xff] (!%p169_p3)   ;;  %v3805_v19 = vld [vmem:[%s4860_s1 + $0x28] sm:$0xff] (!%p169_p3)  }
   0xa   : > { %3348 = vmatprep.subr.bf16.mxu1 (!%p169_p3), %v3976_v1  ;;  %3362 = vmatprep.mubr.msk.bf16.mxu1 (!%p169_p3), %vm3977_vm0, %v3976_v1  ;;  %v3806_v21 = vld [vmem:[%s4860_s1 + $0x70] sm:$0xff] (!%p169_p3)   ;;  %v3808_v26 = vld [vmem:[%s4860_s1 + $0x78] sm:$0xff] (!%p169_p3)   ;;  %v3812_v34 = vld [vmem:[%s4860_s1 + $0x80] sm:$0xff] (!%p169_p3)  }
   0xb   : > { %v3807_v25 = vld [vmem:[%s4860_s1 + $0x30] sm:$0xff] (!%p169_p3)   ;;  %v3809_v27 = vld [vmem:[%s4860_s1 + $0x38] sm:$0xff] (!%p169_p3)   ;;  %v3813_v38 = vld [vmem:[%s4860_s1 + $0xc0] sm:$0xff] (!%p169_p3)  }
   0xc   : > { %3321 = vmatpush3.bf16.msra.mxu0 (!%p169_p3), %v3796_v3  ;;  %v3814_v39 = vld [vmem:[%s4860_s1 + $0x88] sm:$0xff] (!%p169_p3)   ;;  %v3816_v43 = vld [vmem:[%s4860_s1 + $0x90] sm:$0xff] (!%p169_p3)   ;;  %v3818_v47 = vld [vmem:[%s4860_s1 + $0x98] sm:$0xff] (!%p169_p3)  }
   0xd   : > { %3349 = vmatpush3.bf16.msra.mxu1 (!%p169_p3), %v3797_v4  ;;  %3322 = vmatprep.subr.bf16.mxu0 (!%p169_p3), %v3976_v1  ;;  %v3815_v42 = vld [vmem:[%s4860_s1 + $0xc8] sm:$0xff] (!%p169_p3)   ;;  %v3817_v45 = vld [vmem:[%s4860_s1 + $0xd0] sm:$0xff] (!%p169_p3)   ;;  %v3819_v48 = vld [vmem:[%s4860_s1 + $0xd8] sm:$0xff] (!%p169_p3)  }
   0xe   : > { %s4868_s12 = smov (!%p202_p4, %s3966_s12), 1  ;;  %3350 = vmatprep.subr.bf16.mxu1 %v3976_v1  ;;  %v3821_v51 = vld [vmem:[%s4860_s1 + $0xa0] sm:$0xff]   ;;  %v3823_v55 = vld [vmem:[%s4860_s1 + $0xa8] sm:$0xff]   ;;  %v3826_v0 = vld [vmem:[%s4860_s1 + $0xb0] sm:$0xff]  }
   0xf   : > { %s3766_s28 = smul.u32 36, %s4868_s12  ;;  %v3822_v52 = vld [vmem:[%s4860_s1 + $0xe0] sm:$0xff]   ;;  %v3824_v56 = vld [vmem:[%s4860_s1 + $0xe8] sm:$0xff]  }
  0x10   : > { %3323 = vmatpush3.bf16.msra.mxu0 %v3798_v5  ;;  %v3827_v5 = vld [vmem:[%s4860_s1 + $0xf0] sm:$0xff]   ;;  %s3767_s5 = smul.u32 40, %s4868_s12 }
  0x11   : > { %3351 = vmatpush3.bf16.msra.mxu1 %v3799_v6  ;;  %3324 = vmatprep.subr.bf16.mxu0 %v3976_v1  ;;  %s4058_s8 = scalar_lea.vmem %s4859_s0, %s3766_s28 }
  0x12   : > { %3352 = vmatprep.subr.bf16.mxu1 %v3976_v1  ;;  %v223_v11 = vld [vmem:[%s4058_s8] sm:$0xf]  ;;  %v4070_v12 = vld [vmem:[%s4058_s8 + $0x4] sm:$0xf]  ;;  %v4073_v13 = vld [vmem:[%s4058_s8 + $0x8] sm:$0xf]  ;;  %s4843_s11 = scalar_lea.vmem %s4862_s3, %s3767_s5 }
  0x13   : > { %v4076_v14 = vld [vmem:[%s4058_s8 + $0xc] sm:$0xf]  ;;  %v2757_v15 = vcombine.low %v223_v11, %v4070_v12  ;;  %v2843_v16 = vcombine.low %v4070_v12, %v4073_v13  ;;  %v4111_v30 = vld [vmem:[%s4058_s8 + $0x10] sm:$0xf]  ;;  %v244_v31 = vld [vmem:[%s4058_s8 + $0x14] sm:$0x1] }
  0x14   : > { %3325 = vmatpush3.bf16.msra.mxu0 %v3800_v7  ;;  %v4086_v18 = vcombine.low %v4073_v13, %v4076_v14  ;;  %v4116_v32 = vcombine.low %v4111_v30, %v244_v31  ;;  %v2844_v33 = vcombine.low %v4076_v14, %v4111_v30  ;;  %v516_v49 = vld [vmem:[%s4058_s8] sm:$0xe]  ;;  %v2768_v53 = vcombine.low %v4111_v30, %v4111_v30  ;;  %v655_v57 = vld [vmem:[%s4058_s8 + $0x14] sm:$0x3]  ;;  %v4198_v62 = vld [vmem:[%s4058_s8 + $0x8] sm:$0xf] }
  0x15   : > { %3353 = vmatpush3.bf16.msra.mxu1 %v3801_v8  ;;  %3326 = vmatprep.subr.bf16.mxu0 %v3976_v1  ;;  %v281_v20 = vshll.u32 %v2757_v15, 16  ;;  %v279_v23 = vshrl.u32 %v2757_v15, 16  ;;  %v2793_v54 = vcombine.low %v516_v49, %v4070_v12  ;;  %v2818_v61 = vcombine.low %v4111_v30, %v655_v57  ;;  %v4201_v63 = vld [vmem:[%s4058_s8 + $0xc] sm:$0xf]  ;;  %v3828_v8 = vld [vmem:[%s4860_s1 + $0xb8] sm:$0xff]   ;;  %v3845_v49 = vld [vmem:[%s4860_s1 + $0x170] sm:$0xff]  }
  0x16   : > { %3354 = vmatprep.subr.bf16.mxu1 %v3976_v1  ;;  %v286_v22 = vshll.u32 %v4086_v18, 16  ;;  %v290_v36 = vshrl.u32 %v4086_v18, 16  ;;  %v294_v37 = vshll.u32 %v4116_v32, 16  ;;  %v298_v46 = vshrl.u32 %v4116_v32, 16  ;;  %v3834_v31 = vld [vmem:[%s4860_s1 + $0x148] sm:$0xff]   ;;  %v3856_v12 = vld [vmem:[%s4860_s1 + $0x190] sm:$0xff]  }
  0x17   : > { %v283_v24 = vrot.slane %v281_v20, 1  ;;  %v678_v58 = vshrl.u32 %v2793_v54, 16  ;;  %v681_v59 = vshll.u32 %v2793_v54, 16  ;;  %v539_v2 = vrot.slane %v4086_v18, 1  ;;  %v4227_v20 = vld [vmem:[%s4058_s8 + $0x14] sm:$0xf] }
  0x18   : > { %3327 = vmatpush3.bf16.msra.mxu0 %v3802_v9  ;;  %v288_v28 = vrot.slane %v286_v22, 1  ;;  %v296_v41 = vrot.slane %v294_v37, 1  ;;  %v686_v60 = vrot.slane %v286_v22, 2  ;;  %v2947_v3 = vcombine.low %v4198_v62, %v4201_v63  ;;  %v4364_v13 = vld [vmem:[%s4058_s8 + $0x14] sm:$0xf]  ;;  %v3862_v30 = vld [vmem:[%s4860_s1 + $0x1a0] sm:$0xff]  }
  0x19   : > { %3355 = vmatpush3.bf16.msra.mxu1 %v3803_v10  ;;  %3328 = vmatprep.subr.bf16.mxu0 %v3976_v1  ;;  %v284_v29 = vor.u32 %v283_v24, %v279_v23  ;;  %v685_v4 = vrot.slane %v290_v36, 1  ;;  %v680_v6 = vrot.slane %v678_v58, 1  ;;  %v683_v7 = vrot.slane %v681_v59, 2  ;;  %v3829_v10 = vld [vmem:[%s4860_s1 + $0xf8] sm:$0xff]   ;;  %v3831_v23 = vld [vmem:[%s4860_s1 + $0x100] sm:$0xff]  }
  0x1a   : > { %3356 = vmatprep.subr.bf16.mxu1 %v3976_v1  ;;  %v292_v40 = vor.u32 %v290_v36, %v288_v28  ;;  %v300_v50 = vor.u32 %v298_v46, %v296_v41  ;;  %v538_v9 = vrot.slane %v2793_v54, 1  ;;  %v690_v11 = vshrl.u32 %v2818_v61, 16  ;;  %v3832_v24 = vld [vmem:[%s4860_s1 + $0x140] sm:$0xff]   ;;  %v3836_v36 = vld [vmem:[%s4860_s1 + $0x150] sm:$0xff]   ;;  %v3846_v54 = vld [vmem:[%s4860_s1 + $0x138] sm:$0xff]  }
  0x1b   : > { %v289_v35 = vsel %vm277_vm1, %v284_v29, %v288_v28  ;;  %v3833_v28 = vld [vmem:[%s4860_s1 + $0x108] sm:$0xff]   ;;  %v541_v29 = vrot.slane %v4116_v32, 1  ;;  %v3851_v59 = vld [vmem:[%s4860_s1 + $0x180] sm:$0xff]   ;;  %v3861_v14 = vld [vmem:[%s4058_s8 + $0x14] ss:$0 sps:$4 sm:$0xff]  }
  0x1c   : > { %3329 = vmatpush3.bf16.msra.mxu0 %v3804_v17  ;;  %v297_v44 = vsel %vm277_vm1, %v292_v40, %v296_v41  ;;  %v4223_v17 = vld [vmem:[%s4058_s8 + $0x10] sm:$0xf]  ;;  %v540_v22 = vsel %vm537_vm2, %v538_v9, %v539_v2  ;;  %v945_v40 = vld [vmem:[%s4058_s8 + $0x4] sm:$0xf] }
  0x1d   : > { %3357 = vmatpush3.bf16.msra.mxu1 %v3805_v19  ;;  %3330 = vmatprep.subr.bf16.mxu0 %v3976_v1  ;;  %v687_v19 = vor.u32 %v686_v60, %v685_v4  ;;  %v542_v32 = vsel %vm537_vm2, %v539_v2, %v541_v29  ;;  %v3840_v41 = vld [vmem:[%s4860_s1 + $0x120] sm:$0xff]  }
  0x1e   : > { %3358 = vmatprep.subr.bf16.mxu1 %v3976_v1  ;;  %v3852_v60 = vld [vmem:[%s4860_s1 + $0x1c0] sm:$0xff]  }
  0x20   : > { %3331 = vmatpush3.bf16.msra.mxu0 %v3806_v21  ;;  %v2948_v21 = vcombine.low %v4223_v17, %v4227_v20 }
  0x21   : > { %3359 = vmatpush3.bf16.msra.mxu1 %v3807_v25  ;;  %3332 = vmatprep.subr.bf16.mxu0 %v3976_v1 }
  0x22   : > { %3360 = vmatprep.subr.bf16.mxu1 %v3976_v1 }
  0x24   : > { %3333 = vmatpush3.bf16.msra.mxu0 %v3808_v26  ;;  %v692_v26 = vrot.slane %v690_v11, 1  ;;  %v3857_v11 = vld [vmem:[%s4860_s1 + $0x1d0] sm:$0xff]  }
  0x25   : > { %3361 = vmatpush3.bf16.msra.mxu1 %v3809_v27  ;;  %3374 = vmatprep.subr.bf16.mxu0 %v3976_v1 }
  0x26   : > { %3402 = vmatprep.subr.bf16.mxu1 %v3976_v1 }
  0x27   : > { %3335 = vmatmul.mubr.bf16.vlgmr.msra.gmra.mrb[0].mxu0 %v289_v35  ;;  %v3835_v35 = vld [vmem:[%s4860_s1 + $0x110] sm:$0xff]  }
  0x28   : > { %3363 = vmatmul.mubr.bf16.vlgmr.msra.gmra.mrb[0].mxu1 %v2757_v15  ;;  %3375 = vmatpush3.bf16.msra.mxu0 %v3812_v34  ;;  %v693_v15 = vshll.u32 %v2818_v61, 16  ;;  %v4333_v61 = vld [vmem:[%s4058_s8 + $0xc] sm:$0xf] }
  0x29   : > { %3403 = vmatpush3.bf16.msra.mxu1 %v3813_v38  ;;  %3376 = vmatprep.subr.bf16.mxu0 %v3976_v1  ;;  %v3838_v38 = vld [vmem:[%s4860_s1 + $0x118] sm:$0xff]  }
  0x2a   : > { %3404 = vmatprep.subr.bf16.mxu1 %v3976_v1  ;;  %3338 = vmatprep.mubr.msk.bf16.mxu0 %vm3977_vm0, %v3976_v1  ;;  %v695_v27 = vrot.slane %v693_v15, 2 }
  0x2b   : > { %3366 = vmatprep.mubr.msk.bf16.mxu1 %vm3977_vm0, %v3976_v1 }
  0x2c   : > { %3377 = vmatpush3.bf16.msra.mxu0 %v3814_v39  ;;  %v696_v34 = vor.u32 %v695_v27, %v692_v26  ;;  %v3839_v39 = vld [vmem:[%s4860_s1 + $0x158] sm:$0xff]   ;;  %v3863_v26 = vld [vmem:[%s4860_s1 + $0x1e0] sm:$0xff]   ;;  %v3864_v27 = vld [vmem:[%s4860_s1 + $0x1a8] sm:$0xff]  }
  0x2d   : > { %3405 = vmatpush3.bf16.msra.mxu1 %v3815_v42  ;;  %3378 = vmatprep.subr.bf16.mxu0 %v3976_v1  ;;  %v2870_v42 = vcombine.low %v945_v40, %v4198_v62 }
  0x2e   : > { %3406 = vmatprep.subr.bf16.mxu1 %v3976_v1  ;;  %v697_v37 = vsel %vm676_vm3, %v687_v19, %v696_v34 }
  0x2f   : > { %3339 = vmatmul.mubr.bf16.gmra.mrb[4].mxu0 %v297_v44  ;;  %v3842_v44 = vld [vmem:[%s4860_s1 + $0x128] sm:$0xff]   ;;  %v986_v46 = vshll.u32 %v2870_v42, 16 }
  0x30   : > { %3379 = vmatpush3.bf16.msra.mxu0 %v3816_v43  ;;  %3367 = vmatmul.mubr.bf16.gmra.mrb[4].mxu1 %v4086_v18  ;;  %v684_v18 = vor.u32 %v683_v7, %v680_v6  ;;  %v3841_v43 = vld [vmem:[%s4860_s1 + $0x160] sm:$0xff]   ;;  %v3853_v7 = vld [vmem:[%s4860_s1 + $0x188] sm:$0xff]  }
  0x31   : > { %3407 = vmatpush3.bf16.msra.mxu1 %v3817_v45  ;;  %3380 = vmatprep.subr.bf16.mxu0 %v3976_v1  ;;  %v3843_v45 = vld [vmem:[%s4860_s1 + $0x168] sm:$0xff]  }
  0x32   : > { %3408 = vmatprep.subr.bf16.mxu1 %v3976_v1  ;;  %3342 = vmatprep.mubr.msk.bf16.mxu0 %vm3977_vm0, %v3976_v1  ;;  %v688_v25 = vsel %vm676_vm3, %v684_v18, %v687_v19  ;;  %v3859_v19 = vld [vmem:[%s4860_s1 + $0x198] sm:$0xff]  }
  0x33   : > { %3370 = vmatprep.mubr.msk.bf16.mxu1 %vm3977_vm0, %v3976_v1 }
  0x34   : > { %3381 = vmatpush3.bf16.msra.mxu0 %v3818_v47  ;;  %v4296_v47 = vcombine.low %v4201_v63, %v4223_v17  ;;  %v3897_v63 = vld [vmem:[%s4860_s1 + $0x2d0] sm:$0xff]   ;;  %v1718_v17 = vld [vmem:[%s4058_s8 + $0x8] sm:$0xe] }
  0x35   : > { %3409 = vmatpush3.bf16.msra.mxu1 %v3819_v48  ;;  %3382 = vmatprep.subr.bf16.mxu0 %v3976_v1  ;;  %v3844_v48 = vld [vmem:[%s4860_s1 + $0x130] sm:$0xff]  }
  0x36   : > { %3410 = vmatprep.subr.bf16.mxu1 %v3976_v1  ;;  %v995_v4 = vshrl.u32 %v4296_v47, 16 }
  0x37   : > { %3343 = vmatmul.mubr.bf16.gmra.mrb[8].mxu0 %v300_v50  ;;  %v984_v50 = vshrl.u32 %v2870_v42, 16  ;;  %v1140_v42 = vrot.slane %v4296_v47, 1 }
  0x38   : > { %3383 = vmatpush3.bf16.msra.mxu0 %v3821_v51  ;;  %3371 = vmatmul.mubr.bf16.gmra.mrb[8].mxu1 %v2768_v53  ;;  %v988_v51 = vrot.slane %v986_v46, 1  ;;  %v950_v53 = vld [vmem:[%s4058_s8 + $0x18] sm:$0x1] }
  0x39   : > { %3411 = vmatpush3.bf16.msra.mxu1 %v3822_v52  ;;  %3384 = vmatprep.subr.bf16.mxu0 %v3976_v1  ;;  %v991_v52 = vshll.u32 %v4296_v47, 16  ;;  %v4323_v58 = vcombine.low %v4227_v20, %v950_v53  ;;  %v3871_v47 = vld [vmem:[%s4860_s1 + $0x200] sm:$0xff]  }
  0x3a   : > { %3412 = vmatprep.subr.bf16.mxu1 %v3976_v1  ;;  %3390 = vmatprep.mubr.msk.bf16.mxu0 %vm3977_vm0, %v3976_v1 }
  0x3b   : > { %3418 = vmatprep.mubr.msk.bf16.mxu1 %vm3977_vm0, %v3976_v1  ;;  %v993_v57 = vrot.slane %v991_v52, 1 }
  0x3c   : > { %3385 = vmatpush3.bf16.msra.mxu0 %v3823_v55  ;;  %v3847_v55 = vld [vmem:[%s4860_s1 + $0x178] sm:$0xff]  }
  0x3d   : > { %3413 = vmatpush3.bf16.msra.mxu1 %v3824_v56  ;;  %3386 = vmatprep.subr.bf16.mxu0 %v3976_v1  ;;  %v989_v56 = vor.u32 %v988_v51, %v984_v50  ;;  %v997_v9 = vor.u32 %v995_v4, %v993_v57 }
  0x3e   : > { %3414 = vmatprep.subr.bf16.mxu1 %v3976_v1 }
  0x3f   : > { %v994_v2 = vsel %vm277_vm1, %v989_v56, %v993_v57  ;;  %v1142_v56 = vrot.slane %v4323_v58, 1  ;;  %v3874_v57 = vld [vmem:[%s4860_s1 + $0x248] sm:$0xff]  }
  0x40   : > { %3387 = vmatpush3.bf16.msra.mxu0 %v3826_v0  ;;  %v4336_v0 = vld [vmem:[%s4058_s8 + $0x10] sm:$0xf] }
  0x41   : > { %3415 = vmatpush3.bf16.msra.mxu1 %v3827_v5  ;;  %3388 = vmatprep.subr.bf16.mxu0 %v3976_v1  ;;  %v999_v5 = vshll.u32 %v4323_v58, 16  ;;  %v3051_v6 = vcombine.low %v4333_v61, %v4336_v0 }
  0x42   : > { %3416 = vmatprep.subr.bf16.mxu1 %v3976_v1 }
  0x44   : > { %3389 = vmatpush3.bf16.msra.mxu0 %v3828_v8  ;;  %v3854_v8 = vld [vmem:[%s4860_s1 + $0x1c8] sm:$0xff]  }
  0x45   : > { %3417 = vmatpush3.bf16.msra.mxu1 %v3829_v10  ;;  %3430 = vmatprep.subr.bf16.mxu0 %v3976_v1  ;;  %v1001_v10 = vrot.slane %v999_v5, 1  ;;  %v3878_v5 = vld [vmem:[%s4860_s1 + $0x218] sm:$0xff]  }
  0x46   : > { %3458 = vmatprep.subr.bf16.mxu1 %v3976_v1 }
  0x47   : > { %3391 = vmatmul.mubr.bf16.vlgmr.msra.gmra.mrb[12].mxu0 %v540_v22  ;;  %v1002_v15 = vsel %vm277_vm1, %v997_v9, %v1001_v10  ;;  %v3860_v22 = vld [vmem:[%s4860_s1 + $0x1d8] sm:$0xff]   ;;  %v3880_v9 = vld [vmem:[%s4860_s1 + $0x220] sm:$0xff]  }
  0x48   : > { %3419 = vmatmul.mubr.bf16.vlgmr.msra.gmra.mrb[12].mxu1 %v688_v25  ;;  %3431 = vmatpush3.bf16.msra.mxu0 %v3831_v23  ;;  %v1003_v23 = vshrl.u32 %v4323_v58, 16  ;;  %v1143_v58 = vsel %vm537_vm2, %v1140_v42, %v1142_v56 }
  0x49   : > { %3459 = vmatpush3.bf16.msra.mxu1 %v3832_v24  ;;  %3432 = vmatprep.subr.bf16.mxu0 %v3976_v1  ;;  %v1118_v24 = vld [vmem:[%s4058_s8 + $0x4] sm:$0xe] }
  0x4a   : > { %3460 = vmatprep.subr.bf16.mxu1 %v3976_v1  ;;  %3394 = vmatprep.mubr.msk.bf16.mxu0 %vm3977_vm0, %v3976_v1  ;;  %v2897_v25 = vcombine.low %v1118_v24, %v4198_v62  ;;  %v3885_v24 = vld [vmem:[%s4860_s1 + $0x270] sm:$0xff]  }
  0x4b   : > { %3422 = vmatprep.mubr.msk.bf16.mxu1 %vm3977_vm0, %v3976_v1  ;;  %v3896_v62 = vld [vmem:[%s4860_s1 + $0x290] sm:$0xff]  }
  0x4c   : > { %3433 = vmatpush3.bf16.msra.mxu0 %v3833_v28  ;;  %v1278_v28 = vshrl.u32 %v2897_v25, 16 }
  0x4d   : > { %3461 = vmatpush3.bf16.msra.mxu1 %v3834_v31  ;;  %3434 = vmatprep.subr.bf16.mxu0 %v3976_v1  ;;  %v3865_v31 = vld [vmem:[%s4860_s1 + $0x1e8] sm:$0xff]  }
  0x4e   : > { %3462 = vmatprep.subr.bf16.mxu1 %v3976_v1 }
  0x4f   : > { %3395 = vmatmul.mubr.bf16.gmra.mrb[16].mxu0 %v542_v32  ;;  %v1285_v32 = vrot.slane %v995_v4, 1 }
  0x50   : > { %3435 = vmatpush3.bf16.msra.mxu0 %v3835_v35  ;;  %3423 = vmatmul.mubr.bf16.gmra.mrb[16].mxu1 %v697_v37  ;;  %v3866_v35 = vld [vmem:[%s4860_s1 + $0x1b0] sm:$0xff]   ;;  %v1280_v37 = vrot.slane %v1278_v28, 1 }
  0x51   : > { %3463 = vmatpush3.bf16.msra.mxu1 %v3836_v36  ;;  %3436 = vmatprep.subr.bf16.mxu0 %v3976_v1  ;;  %v3867_v36 = vld [vmem:[%s4860_s1 + $0x1f0] sm:$0xff]  }
  0x52   : > { %3464 = vmatprep.subr.bf16.mxu1 %v3976_v1  ;;  %3398 = vmatprep.mubr.msk.bf16.mxu0 %vm3977_vm0, %v3976_v1 }
  0x53   : > { %3426 = vmatprep.mubr.msk.bf16.mxu1 %vm3977_vm0, %v3976_v1 }
  0x54   : > { %3437 = vmatpush3.bf16.msra.mxu0 %v3838_v38 }
  0x55   : > { %3465 = vmatpush3.bf16.msra.mxu1 %v3839_v39  ;;  %3438 = vmatprep.subr.bf16.mxu0 %v3976_v1  ;;  %v1286_v39 = vrot.slane %v991_v52, 2  ;;  %v3872_v52 = vld [vmem:[%s4860_s1 + $0x240] sm:$0xff]  }
  0x56   : > { %3466 = vmatprep.subr.bf16.mxu1 %v3976_v1 }
  0x57   : > { %3399 = vmatmul.mubr.bf16.gmra.mrb[20].mxu0 %v541_v29  ;;  %v1281_v29 = vshll.u32 %v2897_v25, 16  ;;  %v1287_v46 = vor.u32 %v1286_v39, %v1285_v32  ;;  %v3894_v39 = vld [vmem:[%s4860_s1 + $0x2c8] sm:$0xff]  }
  0x58   : > { %3439 = vmatpush3.bf16.msra.mxu0 %v3840_v41  ;;  %3427 = vmatmul.mubr.bf16.gmra.mrb[20].mxu1 %v696_v34  ;;  %v1256_v34 = vld [vmem:[%s4058_s8 + $0x18] sm:$0x3] }
  0x59   : > { %3467 = vmatpush3.bf16.msra.mxu1 %v3841_v43  ;;  %3440 = vmatprep.subr.bf16.mxu0 %v3976_v1  ;;  %v1283_v38 = vrot.slane %v1281_v29, 2  ;;  %v2922_v40 = vcombine.low %v4227_v20, %v1256_v34  ;;  %v3868_v41 = vld [vmem:[%s4860_s1 + $0x1b8] sm:$0xff]   ;;  %v3891_v34 = vld [vmem:[%s4860_s1 + $0x280] sm:$0xff]  }
  0x5a   : > { %3468 = vmatprep.subr.bf16.mxu1 %v3976_v1  ;;  %3446 = vmatprep.mubr.msk.bf16.mxu0 %vm3977_vm0, %v3976_v1  ;;  %v3869_v43 = vld [vmem:[%s4860_s1 + $0x1f8] sm:$0xff]  }
  0x5b   : > { %3474 = vmatprep.mubr.msk.bf16.mxu1 %vm3977_vm0, %v3976_v1  ;;  %v3901_v20 = vld [vmem:[%s4058_s8 + $0x18] ss:$0 sps:$4 sm:$0xff]  }
  0x5c   : > { %3441 = vmatpush3.bf16.msra.mxu0 %v3842_v44  ;;  %v1139_v44 = vrot.slane %v2897_v25, 1  ;;  %v1550_v25 = vld [vmem:[%s4058_s8 + $0x1c] sm:$0x1] }
  0x5d   : > { %3469 = vmatpush3.bf16.msra.mxu1 %v3843_v45  ;;  %3442 = vmatprep.subr.bf16.mxu0 %v3976_v1  ;;  %v1284_v45 = vor.u32 %v1283_v38, %v1280_v37  ;;  %v3893_v38 = vld [vmem:[%s4860_s1 + $0x288] sm:$0xff]  }
  0x5e   : > { %3470 = vmatprep.subr.bf16.mxu1 %v3976_v1  ;;  %v1141_v50 = vsel %vm537_vm2, %v1139_v44, %v1140_v42  ;;  %v3899_v42 = vld [vmem:[%s4860_s1 + $0x298] sm:$0xff]  }
  0x5f   : > { %v1288_v51 = vsel %vm676_vm3, %v1284_v45, %v1287_v46  ;;  %v3900_v44 = vld [vmem:[%s4860_s1 + $0x2d8] sm:$0xff]  }
  0x60   : > { %3443 = vmatpush3.bf16.msra.mxu0 %v3844_v48  ;;  %v1290_v48 = vshrl.u32 %v2922_v40, 16 }
  0x61   : > { %3471 = vmatpush3.bf16.msra.mxu1 %v3845_v49  ;;  %3444 = vmatprep.subr.bf16.mxu0 %v3976_v1  ;;  %v1293_v49 = vshll.u32 %v2922_v40, 16 }
  0x62   : > { %3472 = vmatprep.subr.bf16.mxu1 %v3976_v1  ;;  %v1292_v53 = vrot.slane %v1290_v48, 1  ;;  %v3001_v48 = vcombine.low %v1718_v17, %v4333_v61  ;;  %v2150_v17 = vld [vmem:[%s4058_s8 + $0x20] sm:$0x1] }
  0x64   : > { %3445 = vmatpush3.bf16.msra.mxu0 %v3846_v54  ;;  %v1295_v54 = vrot.slane %v1293_v49, 2  ;;  %v3904_v49 = vld [vmem:[%s4860_s1 + $0x2a8] sm:$0xff]  }
  0x65   : > { %3473 = vmatpush3.bf16.msra.mxu1 %v3847_v55  ;;  %3486 = vmatprep.subr.bf16.mxu0 %v3976_v1  ;;  %v3873_v55 = vld [vmem:[%s4860_s1 + $0x208] sm:$0xff]  }
  0x66   : > { %3514 = vmatprep.subr.bf16.mxu1 %v3976_v1 }
  0x67   : > { %3447 = vmatmul.mubr.bf16.vlgmr.msra.gmra.mrb[24].mxu0 %v2843_v16  ;;  %v4367_v16 = vld [vmem:[%s4058_s8 + $0x18] sm:$0xf] }
  0x68   : > { %3475 = vmatmul.mubr.bf16.vlgmr.msra.gmra.mrb[24].mxu1 %v994_v2  ;;  %3487 = vmatpush3.bf16.msra.mxu0 %v3851_v59  ;;  %v3052_v18 = vcombine.low %v4364_v13, %v4367_v16  ;;  %v1296_v59 = vor.u32 %v1295_v54, %v1292_v53  ;;  %v3876_v2 = vld [vmem:[%s4860_s1 + $0x250] sm:$0xff]  }
  0x69   : > { %3515 = vmatpush3.bf16.msra.mxu1 %v3852_v60  ;;  %3488 = vmatprep.subr.bf16.mxu0 %v3976_v1  ;;  %v3875_v60 = vld [vmem:[%s4860_s1 + $0x210] sm:$0xff]  }
  0x6a   : > { %3516 = vmatprep.subr.bf16.mxu1 %v3976_v1  ;;  %3450 = vmatprep.mubr.msk.bf16.mxu0 %vm3977_vm0, %v3976_v1  ;;  %v1297_v4 = vsel %vm676_vm3, %v1287_v46, %v1296_v59  ;;  %v3903_v46 = vld [vmem:[%s4860_s1 + $0x2e0] sm:$0xff]   ;;  %v3906_v54 = vld [vmem:[%s4860_s1 + $0x2b0] sm:$0xff]  }
  0x6b   : > { %3478 = vmatprep.mubr.msk.bf16.mxu1 %vm3977_vm0, %v3976_v1 }
  0x6c   : > { %3489 = vmatpush3.bf16.msra.mxu0 %v3853_v7  ;;  %v3879_v7 = vld [vmem:[%s4860_s1 + $0x258] sm:$0xff]  }
  0x6d   : > { %3517 = vmatpush3.bf16.msra.mxu1 %v3854_v8  ;;  %3490 = vmatprep.subr.bf16.mxu0 %v3976_v1  ;;  %v1545_v8 = vld [vmem:[%s4058_s8 + $0x8] sm:$0xf] }
  0x6e   : > { %3518 = vmatprep.subr.bf16.mxu1 %v3976_v1 }
  0x6f   : > { %3451 = vmatmul.mubr.bf16.gmra.mrb[28].mxu0 %v2844_v33  ;;  %v1005_v33 = vor.u32 %v1003_v23, %v1001_v10  ;;  %v3881_v10 = vld [vmem:[%s4860_s1 + $0x260] sm:$0xff]   ;;  %v3884_v23 = vld [vmem:[%s4860_s1 + $0x230] sm:$0xff]  }
  0x70   : > { %3491 = vmatpush3.bf16.msra.mxu0 %v3856_v12  ;;  %3479 = vmatmul.mubr.bf16.gmra.mrb[28].mxu1 %v1002_v15  ;;  %v2974_v12 = vcombine.low %v1545_v8, %v4333_v61  ;;  %v3883_v15 = vld [vmem:[%s4860_s1 + $0x268] sm:$0xff]   ;;  %v3936_v61 = vld [vmem:[%s4860_s1 + $0x390] sm:$0xff]  }
  0x71   : > { %3519 = vmatpush3.bf16.msra.mxu1 %v3857_v11  ;;  %3492 = vmatprep.subr.bf16.mxu0 %v3976_v1  ;;  %v3882_v11 = vld [vmem:[%s4860_s1 + $0x228] sm:$0xff]  }
  0x72   : > { %3520 = vmatprep.subr.bf16.mxu1 %v3976_v1  ;;  %3454 = vmatprep.mubr.msk.bf16.mxu0 %vm3977_vm0, %v3976_v1 }
  0x73   : > { %3482 = vmatprep.mubr.msk.bf16.mxu1 %vm3977_vm0, %v3976_v1 }
  0x74   : > { %3493 = vmatpush3.bf16.msra.mxu0 %v3859_v19  ;;  %v4501_v19 = vcombine.low %v4336_v0, %v4364_v13  ;;  %v3937_v0 = vld [vmem:[%s4860_s1 + $0x3d0] sm:$0xff]   ;;  %v2318_v13 = vld [vmem:[%s4058_s8 + $0xc] sm:$0xe] }
  0x75   : > { %3521 = vmatpush3.bf16.msra.mxu1 %v3860_v22  ;;  %3494 = vmatprep.subr.bf16.mxu0 %v3976_v1  ;;  %v1586_v22 = vshll.u32 %v2974_v12, 16 }
  0x76   : > { %3522 = vmatprep.subr.bf16.mxu1 %v3976_v1 }
  0x77   : > { %3455 = vmatmul.mubr.bf16.gmra.mrb[32].mxu0 %v3861_v14  ;;  %v1584_v14 = vshrl.u32 %v2974_v12, 16 }
  0x78   : > { %3495 = vmatpush3.bf16.msra.mxu0 %v3862_v30  ;;  %3483 = vmatmul.mubr.bf16.gmra.mrb[32].mxu1 %v1005_v33  ;;  %v1588_v30 = vrot.slane %v1586_v22, 1  ;;  %v1591_v33 = vshll.u32 %v4501_v19, 16 }
  0x79   : > { %3523 = vmatpush3.bf16.msra.mxu1 %v3863_v26  ;;  %3496 = vmatprep.subr.bf16.mxu0 %v3976_v1  ;;  %v3886_v26 = vld [vmem:[%s4860_s1 + $0x238] sm:$0xff]  }
  0x7a   : > { %3524 = vmatprep.subr.bf16.mxu1 %v3976_v1  ;;  %3502 = vmatprep.mubr.msk.bf16.mxu0 %vm3977_vm0, %v3976_v1  ;;  %v1589_v28 = vor.u32 %v1588_v30, %v1584_v14  ;;  %v1593_v29 = vrot.slane %v1591_v33, 1  ;;  %v3914_v30 = vld [vmem:[%s4860_s1 + $0x348] sm:$0xff]  }
  0x7b   : > { %3530 = vmatprep.mubr.msk.bf16.mxu1 %vm3977_vm0, %v3976_v1 }
  0x7c   : > { %3497 = vmatpush3.bf16.msra.mxu0 %v3864_v27  ;;  %v3887_v27 = vld [vmem:[%s4860_s1 + $0x278] sm:$0xff]   ;;  %v1594_v32 = vsel %vm277_vm1, %v1589_v28, %v1593_v29 }
  0x7d   : > { %3525 = vmatpush3.bf16.msra.mxu1 %v3865_v31  ;;  %3498 = vmatprep.subr.bf16.mxu0 %v3976_v1  ;;  %v4528_v31 = vcombine.low %v4367_v16, %v1550_v25 }
  0x7e   : > { %3526 = vmatprep.subr.bf16.mxu1 %v3976_v1 }
  0x7f   : > { %v1599_v37 = vshll.u32 %v4528_v31, 16  ;;  %v1742_v14 = vrot.slane %v4528_v31, 1 }
  0x80   : > { %3499 = vmatpush3.bf16.msra.mxu0 %v3866_v35  ;;  %v3892_v35 = vld [vmem:[%s4860_s1 + $0x2c0] sm:$0xff]  }
  0x81   : > { %3527 = vmatpush3.bf16.msra.mxu1 %v3867_v36  ;;  %3500 = vmatprep.subr.bf16.mxu0 %v3976_v1  ;;  %v1595_v36 = vshrl.u32 %v4501_v19, 16 }
  0x82   : > { %3528 = vmatprep.subr.bf16.mxu1 %v3976_v1 }
  0x83   : > { %v1597_v40 = vor.u32 %v1595_v36, %v1593_v29  ;;  %v1885_v53 = vrot.slane %v1595_v36, 1  ;;  %v3918_v29 = vld [vmem:[%s4860_s1 + $0x318] sm:$0xff]   ;;  %v3921_v36 = vld [vmem:[%s4860_s1 + $0x360] sm:$0xff]  }
  0x84   : > { %3501 = vmatpush3.bf16.msra.mxu0 %v3868_v41  ;;  %v1601_v41 = vrot.slane %v1599_v37, 1 }
  0x85   : > { %3529 = vmatpush3.bf16.msra.mxu1 %v3869_v43  ;;  %3542 = vmatprep.subr.bf16.mxu0 %v3976_v1  ;;  %v1603_v43 = vshrl.u32 %v4528_v31, 16  ;;  %v3919_v31 = vld [vmem:[%s4860_s1 + $0x358] sm:$0xff]  }
  0x86   : > { %3570 = vmatprep.subr.bf16.mxu1 %v3976_v1 }
  0x87   : > { %3503 = vmatmul.mubr.bf16.vlgmr.msra.gmra.mrb[36].mxu0 %v1141_v50  ;;  %v1605_v45 = vor.u32 %v1603_v43, %v1601_v41  ;;  %v3905_v50 = vld [vmem:[%s4860_s1 + $0x2e8] sm:$0xff]  }
  0x88   : > { %3531 = vmatmul.mubr.bf16.vlgmr.msra.gmra.mrb[36].mxu1 %v1288_v51  ;;  %3543 = vmatpush3.bf16.msra.mxu0 %v3871_v47  ;;  %v1878_v47 = vshrl.u32 %v3001_v48, 16  ;;  %v1881_v51 = vshll.u32 %v3001_v48, 16 }
  0x89   : > { %3571 = vmatpush3.bf16.msra.mxu1 %v3872_v52  ;;  %3544 = vmatprep.subr.bf16.mxu0 %v3976_v1  ;;  %v1856_v52 = vld [vmem:[%s4058_s8 + $0x1c] sm:$0x3] }
  0x8a   : > { %3572 = vmatprep.subr.bf16.mxu1 %v3976_v1  ;;  %3506 = vmatprep.mubr.msk.bf16.mxu0 %vm3977_vm0, %v3976_v1 }
  0x8b   : > { %3534 = vmatprep.mubr.msk.bf16.mxu1 %vm3977_vm0, %v3976_v1 }
  0x8c   : > { %3545 = vmatpush3.bf16.msra.mxu0 %v3873_v55  ;;  %v3907_v55 = vld [vmem:[%s4860_s1 + $0x2f0] sm:$0xff]  }
  0x8d   : > { %3573 = vmatpush3.bf16.msra.mxu1 %v3874_v57  ;;  %3546 = vmatprep.subr.bf16.mxu0 %v3976_v1  ;;  %v1883_v57 = vrot.slane %v1881_v51, 2 }
  0x8e   : > { %3574 = vmatprep.subr.bf16.mxu1 %v3976_v1 }
  0x8f   : > { %3507 = vmatmul.mubr.bf16.gmra.mrb[40].mxu0 %v1143_v58  ;;  %v3026_v58 = vcombine.low %v4367_v16, %v1856_v52  ;;  %v3941_v16 = vld [vmem:[%s4058_s8 + $0x1c] ss:$0 sps:$4 sm:$0xff]  }
  0x90   : > { %3547 = vmatpush3.bf16.msra.mxu0 %v3875_v60  ;;  %3535 = vmatmul.mubr.bf16.gmra.mrb[40].mxu1 %v1297_v4  ;;  %v3908_v60 = vld [vmem:[%s4860_s1 + $0x2b8] sm:$0xff]   ;;  %v1740_v4 = vrot.slane %v4501_v19, 1  ;;  %v3912_v19 = vld [vmem:[%s4860_s1 + $0x340] sm:$0xff]  }
  0x91   : > { %3575 = vmatpush3.bf16.msra.mxu1 %v3876_v2  ;;  %3548 = vmatprep.subr.bf16.mxu0 %v3976_v1  ;;  %v1739_v2 = vrot.slane %v3001_v48, 1 }
  0x92   : > { %3576 = vmatprep.subr.bf16.mxu1 %v3976_v1  ;;  %3510 = vmatprep.mubr.msk.bf16.mxu0 %vm3977_vm0, %v3976_v1  ;;  %v1743_v25 = vsel %vm537_vm2, %v1740_v4, %v1742_v14 }
  0x93   : > { %3538 = vmatprep.mubr.msk.bf16.mxu1 %vm3977_vm0, %v3976_v1  ;;  %v1741_v12 = vsel %vm537_vm2, %v1739_v2, %v1740_v4  ;;  %v3943_v2 = vld [vmem:[%s4860_s1 + $0x3e0] sm:$0xff]  }
  0x94   : > { %3549 = vmatpush3.bf16.msra.mxu0 %v3878_v5  ;;  %v3909_v5 = vld [vmem:[%s4860_s1 + $0x2f8] sm:$0xff]  }
  0x95   : > { %3577 = vmatpush3.bf16.msra.mxu1 %v3879_v7  ;;  %3550 = vmatprep.subr.bf16.mxu0 %v3976_v1 }
  0x96   : > { %3578 = vmatprep.subr.bf16.mxu1 %v3976_v1 }
  0x97   : > { %3511 = vmatmul.mubr.bf16.gmra.mrb[44].mxu0 %v1142_v56  ;;  %v1880_v56 = vrot.slane %v1878_v47, 1  ;;  %v3932_v47 = vld [vmem:[%s4860_s1 + $0x3c0] sm:$0xff]  }
  0x98   : > { %3551 = vmatpush3.bf16.msra.mxu0 %v3880_v9  ;;  %3539 = vmatmul.mubr.bf16.gmra.mrb[44].mxu1 %v1296_v59  ;;  %v1886_v59 = vrot.slane %v1591_v33, 2  ;;  %v1890_v9 = vshrl.u32 %v3026_v58, 16 }
  0x99   : > { %3579 = vmatpush3.bf16.msra.mxu1 %v3881_v10  ;;  %3552 = vmatprep.subr.bf16.mxu0 %v3976_v1  ;;  %v1884_v7 = vor.u32 %v1883_v57, %v1880_v56  ;;  %v1893_v10 = vshll.u32 %v3026_v58, 16  ;;  %v3939_v57 = vld [vmem:[%s4860_s1 + $0x398] sm:$0xff]  }
  0x9a   : > { %3580 = vmatprep.subr.bf16.mxu1 %v3976_v1  ;;  %3558 = vmatprep.mubr.msk.bf16.mxu0 %vm3977_vm0, %v3976_v1  ;;  %v1887_v8 = vor.u32 %v1886_v59, %v1885_v53  ;;  %v1892_v22 = vrot.slane %v1890_v9, 1  ;;  %v3933_v53 = vld [vmem:[%s4860_s1 + $0x388] sm:$0xff]   ;;  %v3940_v58 = vld [vmem:[%s4860_s1 + $0x3d8] sm:$0xff]  }
  0x9b   : > { %3586 = vmatprep.mubr.msk.bf16.mxu1 %vm3977_vm0, %v3976_v1 }
  0x9c   : > { %3553 = vmatpush3.bf16.msra.mxu0 %v3882_v11  ;;  %v3911_v11 = vld [vmem:[%s4860_s1 + $0x300] sm:$0xff]  }
  0x9d   : > { %3581 = vmatpush3.bf16.msra.mxu1 %v3883_v15  ;;  %3554 = vmatprep.subr.bf16.mxu0 %v3976_v1  ;;  %v1888_v15 = vsel %vm676_vm3, %v1884_v7, %v1887_v8  ;;  %v3945_v7 = vld [vmem:[%s4860_s1 + $0x3e8] sm:$0xff]  }
  0x9e   : > { %3582 = vmatprep.subr.bf16.mxu1 %v3976_v1 }
  0xa0   : > { %3555 = vmatpush3.bf16.msra.mxu0 %v3884_v23  ;;  %v1895_v23 = vrot.slane %v1893_v10, 2 }
  0xa1   : > { %3583 = vmatpush3.bf16.msra.mxu1 %v3885_v24  ;;  %3556 = vmatprep.subr.bf16.mxu0 %v3976_v1  ;;  %v3913_v24 = vld [vmem:[%s4860_s1 + $0x308] sm:$0xff]  }
  0xa2   : > { %3584 = vmatprep.subr.bf16.mxu1 %v3976_v1  ;;  %v1896_v33 = vor.u32 %v1895_v23, %v1892_v22 }
  0xa4   : > { %3557 = vmatpush3.bf16.msra.mxu0 %v3886_v26  ;;  %v3915_v26 = vld [vmem:[%s4860_s1 + $0x310] sm:$0xff]   ;;  %v1897_v28 = vsel %vm676_vm3, %v1887_v8, %v1896_v33 }
  0xa5   : > { %3585 = vmatpush3.bf16.msra.mxu1 %v3887_v27  ;;  %3598 = vmatprep.subr.bf16.mxu0 %v3976_v1  ;;  %v3916_v27 = vld [vmem:[%s4860_s1 + $0x350] sm:$0xff]  }
  0xa6   : > { %3626 = vmatprep.subr.bf16.mxu1 %v3976_v1 }
  0xa7   : > { %3559 = vmatmul.mubr.bf16.vlgmr.msra.gmra.mrb[48].mxu0 %v2947_v3  ;;  %v1602_v3 = vsel %vm277_vm1, %v1597_v40, %v1601_v41  ;;  %v4692_v40 = vld [vmem:[%s4058_s8 + $0x14] sm:$0xff]  }
  0xa8   : > { %3587 = vmatmul.mubr.bf16.vlgmr.msra.gmra.mrb[48].mxu1 %v1594_v32  ;;  %3599 = vmatpush3.bf16.msra.mxu0 %v3891_v34  ;;  %v2145_v34 = vld [vmem:[%s4058_s8 + $0xc] sm:$0xf]  ;;  %v4671_v32 = vld [vmem:[%s4058_s8 + $0x10] sm:$0xf]  ;;  %v2191_v43 = vshll.u32 %v4692_v40, 16  ;;  %v2195_v51 = vshrl.u32 %v4692_v40, 16 }
  0xa9   : > { %3627 = vmatpush3.bf16.msra.mxu1 %v3892_v35  ;;  %3600 = vmatprep.subr.bf16.mxu0 %v3976_v1  ;;  %v3920_v35 = vld [vmem:[%s4860_s1 + $0x320] sm:$0xff]   ;;  %v3078_v37 = vcombine.low %v2145_v34, %v4671_v32  ;;  %v3105_v4 = vcombine.low %v2318_v13, %v4671_v32  ;;  %v3948_v32 = vld [vmem:[%s4860_s1 + $0x3b8] sm:$0xff]  }
  0xaa   : > { %3628 = vmatprep.subr.bf16.mxu1 %v3976_v1  ;;  %3562 = vmatprep.mubr.msk.bf16.mxu0 %vm3977_vm0, %v3976_v1 }
  0xab   : > { %3590 = vmatprep.mubr.msk.bf16.mxu1 %vm3977_vm0, %v3976_v1  ;;  %v2186_v41 = vshll.u32 %v3078_v37, 16  ;;  %v2478_v8 = vshrl.u32 %v3105_v4, 16  ;;  %v2481_v9 = vshll.u32 %v3105_v4, 16 }
  0xac   : > { %3601 = vmatpush3.bf16.msra.mxu0 %v3893_v38  ;;  %v3922_v38 = vld [vmem:[%s4860_s1 + $0x328] sm:$0xff]  }
  0xad   : > { %3629 = vmatpush3.bf16.msra.mxu1 %v3894_v39  ;;  %3602 = vmatprep.subr.bf16.mxu0 %v3976_v1  ;;  %v3923_v39 = vld [vmem:[%s4860_s1 + $0x368] sm:$0xff]  }
  0xae   : > { %3630 = vmatprep.subr.bf16.mxu1 %v3976_v1 }
  0xaf   : > { %3563 = vmatmul.mubr.bf16.gmra.mrb[52].mxu0 %v2948_v21  ;;  %v3902_v21 = vld [vmem:[%s4860_s1 + $0x2a0] sm:$0xff]  }
  0xb0   : > { %3603 = vmatpush3.bf16.msra.mxu0 %v3896_v62  ;;  %3591 = vmatmul.mubr.bf16.gmra.mrb[52].mxu1 %v1602_v3  ;;  %v3924_v62 = vld [vmem:[%s4860_s1 + $0x330] sm:$0xff]   ;;  %v2184_v3 = vshrl.u32 %v3078_v37, 16  ;;  %v3949_v37 = vld [vmem:[%s4860_s1 + $0x3f8] sm:$0xff]  }
  0xb1   : > { %3631 = vmatpush3.bf16.msra.mxu1 %v3897_v63  ;;  %3604 = vmatprep.subr.bf16.mxu0 %v3976_v1  ;;  %v3925_v63 = vld [vmem:[%s4860_s1 + $0x370] sm:$0xff]  }
  0xb2   : > { %3632 = vmatprep.subr.bf16.mxu1 %v3976_v1  ;;  %3566 = vmatprep.mubr.msk.bf16.mxu0 %vm3977_vm0, %v3976_v1 }
  0xb3   : > { %3594 = vmatprep.mubr.msk.bf16.mxu1 %vm3977_vm0, %v3976_v1 }
  0xb4   : > { %3605 = vmatpush3.bf16.msra.mxu0 %v3899_v42  ;;  %v2188_v42 = vrot.slane %v2186_v41, 1 }
  0xb5   : > { %3633 = vmatpush3.bf16.msra.mxu1 %v3900_v44  ;;  %3606 = vmatprep.subr.bf16.mxu0 %v3976_v1  ;;  %v4709_v44 = vld [vmem:[%s4058_s8 + $0x1c] sm:$0xf] }
  0xb6   : > { %3634 = vmatprep.subr.bf16.mxu1 %v3976_v1  ;;  %v4722_v48 = vcombine.low %v4709_v44, %v2150_v17 }
  0xb7   : > { %3567 = vmatmul.mubr.bf16.gmra.mrb[56].mxu0 %v3901_v20  ;;  %v3926_v20 = vld [vmem:[%s4860_s1 + $0x338] sm:$0xff]  }
  0xb8   : > { %3607 = vmatpush3.bf16.msra.mxu0 %v3902_v21  ;;  %3595 = vmatmul.mubr.bf16.gmra.mrb[56].mxu1 %v1605_v45  ;;  %v3927_v21 = vld [vmem:[%s4860_s1 + $0x378] sm:$0xff]   ;;  %v2189_v45 = vor.u32 %v2188_v42, %v2184_v3  ;;  %v2199_v52 = vshll.u32 %v4722_v48, 16  ;;  %v2203_v59 = vshrl.u32 %v4722_v48, 16 }
  0xb9   : > { %3635 = vmatpush3.bf16.msra.mxu1 %v3903_v46  ;;  %3608 = vmatprep.subr.bf16.mxu0 %v3976_v1  ;;  %v2193_v46 = vrot.slane %v2191_v43, 1 }
  0xba   : > { %3636 = vmatprep.subr.bf16.mxu1 %v3976_v1  ;;  %3614 = vmatprep.mubr.msk.bf16.mxu0 %vm3977_vm0, %v3976_v1  ;;  %v2201_v56 = vrot.slane %v2199_v52, 1 }
  0xbb   : > { %3642 = vmatprep.mubr.msk.bf16.mxu1 %vm3977_vm0, %v3976_v1 }
  0xbc   : > { %3609 = vmatpush3.bf16.msra.mxu0 %v3904_v49  ;;  %v3931_v49 = vld [vmem:[%s4860_s1 + $0x380] sm:$0xff]  }
  0xbd   : > { %3637 = vmatpush3.bf16.msra.mxu1 %v3905_v50  ;;  %3610 = vmatprep.subr.bf16.mxu0 %v3976_v1  ;;  %v2194_v50 = vsel %vm277_vm1, %v2189_v45, %v2193_v46 }
  0xbe   : > { %3638 = vmatprep.subr.bf16.mxu1 %v3976_v1 }
  0xc0   : > { %3611 = vmatpush3.bf16.msra.mxu0 %v3906_v54  ;;  %v3934_v54 = vld [vmem:[%s4860_s1 + $0x3c8] sm:$0xff]  }
  0xc1   : > { %3639 = vmatpush3.bf16.msra.mxu1 %v3907_v55  ;;  %3612 = vmatprep.subr.bf16.mxu0 %v3976_v1  ;;  %v2197_v55 = vor.u32 %v2195_v51, %v2193_v46 }
  0xc2   : > { %3640 = vmatprep.subr.bf16.mxu1 %v3976_v1 }
  0xc4   : > { %3613 = vmatpush3.bf16.msra.mxu0 %v3908_v60  ;;  %v2205_v60 = vor.u32 %v2203_v59, %v2201_v56 }
  0xc5   : > { %3641 = vmatpush3.bf16.msra.mxu1 %v3909_v5  ;;  %3654 = vmatprep.subr.bf16.mxu0 %v3976_v1  ;;  %v3944_v5 = vld [vmem:[%s4860_s1 + $0x3a8] sm:$0xff]  }
  0xc6   : > { %3682 = vmatprep.subr.bf16.mxu1 %v3976_v1 }
  0xc7   : > { %3615 = vmatmul.mubr.bf16.vlgmr.msra.gmra.mrb[60].mxu0 %v1741_v12  ;;  %v2456_v12 = vld [vmem:[%s4058_s8 + $0x20] sm:$0x3] }
  0xc8   : > { %3643 = vmatmul.mubr.bf16.vlgmr.msra.gmra.mrb[60].mxu1 %v1888_v15  ;;  %3655 = vmatpush3.bf16.msra.mxu0 %v3911_v11 }
  0xc9   : > { %3683 = vmatpush3.bf16.msra.mxu1 %v3912_v19  ;;  %3656 = vmatprep.subr.bf16.mxu0 %v3976_v1  ;;  %v2485_v19 = vrot.slane %v2195_v51, 1  ;;  %v2342_v51 = vrot.slane %v4722_v48, 1 }
  0xca   : > { %3684 = vmatprep.subr.bf16.mxu1 %v3976_v1  ;;  %3618 = vmatprep.mubr.msk.bf16.mxu0 %vm3977_vm0, %v3976_v1 }
  0xcb   : > { %3646 = vmatprep.mubr.msk.bf16.mxu1 %vm3977_vm0, %v3976_v1 }
  0xcc   : > { %3657 = vmatpush3.bf16.msra.mxu0 %v3913_v24 }
  0xcd   : > { %3685 = vmatpush3.bf16.msra.mxu1 %v3914_v30  ;;  %3658 = vmatprep.subr.bf16.mxu0 %v3976_v1 }
  0xce   : > { %3686 = vmatprep.subr.bf16.mxu1 %v3976_v1 }
  0xcf   : > { %3619 = vmatmul.mubr.bf16.gmra.mrb[64].mxu0 %v1743_v25  ;;  %v3947_v25 = vld [vmem:[%s4860_s1 + $0x3f0] sm:$0xff]  }
  0xd0   : > { %3659 = vmatpush3.bf16.msra.mxu0 %v3915_v26  ;;  %3647 = vmatmul.mubr.bf16.gmra.mrb[64].mxu1 %v1897_v28  ;;  %v2480_v26 = vrot.slane %v2478_v8, 1  ;;  %v2486_v28 = vrot.slane %v2191_v43, 2 }
  0xd1   : > { %3687 = vmatpush3.bf16.msra.mxu1 %v3916_v27  ;;  %3660 = vmatprep.subr.bf16.mxu0 %v3976_v1  ;;  %v2483_v27 = vrot.slane %v2481_v9, 2 }
  0xd2   : > { %3688 = vmatprep.subr.bf16.mxu1 %v3976_v1  ;;  %3622 = vmatprep.mubr.msk.bf16.mxu0 %vm3977_vm0, %v3976_v1 }
  0xd3   : > { %3650 = vmatprep.mubr.msk.bf16.mxu1 %vm3977_vm0, %v3976_v1 }
  0xd4   : > { %3661 = vmatpush3.bf16.msra.mxu0 %v3918_v29  ;;  %v3130_v29 = vcombine.low %v4709_v44, %v2456_v12 }
  0xd5   : > { %3689 = vmatpush3.bf16.msra.mxu1 %v3919_v31  ;;  %3662 = vmatprep.subr.bf16.mxu0 %v3976_v1 }
  0xd6   : > { %3690 = vmatprep.subr.bf16.mxu1 %v3976_v1  ;;  %v2490_v41 = vshrl.u32 %v3130_v29, 16 }
  0xd7   : > { %3623 = vmatmul.mubr.bf16.gmra.mrb[68].mxu0 %v1742_v14  ;;  %v3946_v14 = vld [vmem:[%s4860_s1 + $0x3b0] sm:$0xff]  }
  0xd8   : > { %3663 = vmatpush3.bf16.msra.mxu0 %v3920_v35  ;;  %3651 = vmatmul.mubr.bf16.gmra.mrb[68].mxu1 %v1896_v33  ;;  %v2339_v35 = vrot.slane %v3105_v4, 1  ;;  %v2492_v46 = vrot.slane %v2490_v41, 1 }
  0xd9   : > { %3691 = vmatpush3.bf16.msra.mxu1 %v3921_v36  ;;  %3664 = vmatprep.subr.bf16.mxu0 %v3976_v1  ;;  %v2340_v36 = vrot.slane %v4692_v40, 1 }
  0xda   : > { %3692 = vmatprep.subr.bf16.mxu1 %v3976_v1  ;;  %3670 = vmatprep.mubr.msk.bf16.mxu0 %vm3977_vm0, %v3976_v1 }
  0xdb   : > { %3698 = vmatprep.mubr.msk.bf16.mxu1 %vm3977_vm0, %v3976_v1  ;;  %v2341_v43 = vsel %vm537_vm2, %v2339_v35, %v2340_v36 }
  0xdc   : > { %3665 = vmatpush3.bf16.msra.mxu0 %v3922_v38  ;;  %v2484_v38 = vor.u32 %v2483_v27, %v2480_v26 }
  0xdd   : > { %3693 = vmatpush3.bf16.msra.mxu1 %v3923_v39  ;;  %3666 = vmatprep.subr.bf16.mxu0 %v3976_v1  ;;  %v2487_v39 = vor.u32 %v2486_v28, %v2485_v19 }
  0xde   : > { %3694 = vmatprep.subr.bf16.mxu1 %v3976_v1 }
  0xe0   : > { %3667 = vmatpush3.bf16.msra.mxu0 %v3924_v62  ;;  %v2493_v62 = vshll.u32 %v3130_v29, 16 }
  0xe1   : > { %3695 = vmatpush3.bf16.msra.mxu1 %v3925_v63  ;;  %3668 = vmatprep.subr.bf16.mxu0 %v3976_v1 }
  0xe2   : > { %3696 = vmatprep.subr.bf16.mxu1 %v3976_v1 }
  0xe4   : > { %3669 = vmatpush3.bf16.msra.mxu0 %v3926_v20  ;;  %v2488_v20 = vsel %vm676_vm3, %v2484_v38, %v2487_v39 }
  0xe5   : > { %3697 = vmatpush3.bf16.msra.mxu1 %v3927_v21  ;;  %3710 = vmatprep.subr.bf16.mxu0 %v3976_v1 }
  0xe6   : > { %3738 = vmatprep.subr.bf16.mxu1 %v3976_v1 }
  0xe7   : > { %3671 = vmatmul.mubr.bf16.vlgmr.msra.gmra.mrb[72].mxu0 %v3051_v6  ;;  %v2202_v6 = vsel %vm277_vm1, %v2197_v55, %v2201_v56  ;;  %v2343_v56 = vsel %vm537_vm2, %v2340_v36, %v2342_v51 }
  0xe8   : > { %3699 = vmatmul.mubr.bf16.vlgmr.msra.gmra.mrb[72].mxu1 %v2194_v50  ;;  %3711 = vmatpush3.bf16.msra.mxu0 %v3931_v49  ;;  %v2495_v49 = vrot.slane %v2493_v62, 2 }
  0xe9   : > { %3739 = vmatpush3.bf16.msra.mxu1 %v3932_v47  ;;  %3712 = vmatprep.subr.bf16.mxu0 %v3976_v1 }
  0xea   : > { %3740 = vmatprep.subr.bf16.mxu1 %v3976_v1  ;;  %3674 = vmatprep.mubr.msk.bf16.mxu0 %vm3977_vm0, %v3976_v1  ;;  %v2496_v52 = vor.u32 %v2495_v49, %v2492_v46 }
  0xeb   : > { %3702 = vmatprep.mubr.msk.bf16.mxu1 %vm3977_vm0, %v3976_v1 }
  0xec   : > { %3713 = vmatpush3.bf16.msra.mxu0 %v3933_v53 }
  0xed   : > { %3741 = vmatpush3.bf16.msra.mxu1 %v3934_v54  ;;  %3714 = vmatprep.subr.bf16.mxu0 %v3976_v1 }
  0xee   : > { %3742 = vmatprep.subr.bf16.mxu1 %v3976_v1 }
  0xef   : > { %3675 = vmatmul.mubr.bf16.gmra.mrb[76].mxu0 %v3052_v18  ;;  %v3942_v18 = vld [vmem:[%s4860_s1 + $0x3a0] sm:$0xff]  }
  0xf0   : > { %3715 = vmatpush3.bf16.msra.mxu0 %v3936_v61  ;;  %3703 = vmatmul.mubr.bf16.gmra.mrb[76].mxu1 %v2202_v6 }
  0xf1   : > { %3743 = vmatpush3.bf16.msra.mxu1 %v3937_v0  ;;  %3716 = vmatprep.subr.bf16.mxu0 %v3976_v1 }
  0xf2   : > { %3744 = vmatprep.subr.bf16.mxu1 %v3976_v1  ;;  %3678 = vmatprep.mubr.msk.bf16.mxu0 %vm3977_vm0, %v3976_v1 }
  0xf3   : > { %3706 = vmatprep.mubr.msk.bf16.mxu1 %vm3977_vm0, %v3976_v1 }
  0xf4   : > { %3717 = vmatpush3.bf16.msra.mxu0 %v3939_v57  ;;  %v2497_v57 = vsel %vm676_vm3, %v2487_v39, %v2496_v52 }
  0xf5   : > { %3745 = vmatpush3.bf16.msra.mxu1 %v3940_v58  ;;  %3718 = vmatprep.subr.bf16.mxu0 %v3976_v1 }
  0xf6   : > { %3746 = vmatprep.subr.bf16.mxu1 %v3976_v1 }
  0xf7   : > { %3679 = vmatmul.mubr.bf16.gmra.mrb[80].mxu0 %v3941_v16 }
  0xf8   : > { %3719 = vmatpush3.bf16.msra.mxu0 %v3942_v18  ;;  %3707 = vmatmul.mubr.bf16.gmra.mrb[80].mxu1 %v2205_v60 }
  0xf9   : > { %3747 = vmatpush3.bf16.msra.mxu1 %v3943_v2  ;;  %3720 = vmatprep.subr.bf16.mxu0 %v3976_v1 }
  0xfa   : > { %v386_v10 = vpop.f32.mrb[0].mxu0  ;;  %3748 = vmatprep.subr.bf16.mxu1 %v3976_v1  ;;  %3726 = vmatprep.mubr.msk.bf16.mxu0 %vm3977_vm0, %v3976_v1 }
  0xfb   : > { %v494_v11 = vpop.f32.mrb[0].mxu1  ;;  %v3336_v15 = vpop.f32.mrb[1].mxu0  ;;  %3754 = vmatprep.mubr.msk.bf16.mxu1 %vm3977_vm0, %v3976_v1 }
  0xfc   : > { %v4800_v22 = vadd.f32 %v494_v11, %v386_v10  ;;  %v3364_v23 = vpop.f32.mrb[1].mxu1  ;;  %v389_v24 = vpop.f32.mrb[2].mxu0  ;;  %3721 = vmatpush3.bf16.msra.mxu0 %v3944_v5 }
  0xfd   : > { %v497_v30 = vpop.f32.mrb[2].mxu1  ;;  %3749 = vmatpush3.bf16.msra.mxu1 %v3945_v7  ;;  %v3337_v33 = vpop.f32.mrb[3].mxu0  ;;  %3722 = vmatprep.subr.bf16.mxu0 %v3976_v1 }
  0xfe   : > { %v498_v31 = vadd.f32 %v497_v30, %v389_v24  ;;  %v3365_v34 = vpop.f32.mrb[3].mxu1  ;;  %3750 = vmatprep.subr.bf16.mxu1 %v3976_v1 }
 0x100   : > { %3723 = vmatpush3.bf16.msra.mxu0 %v3946_v14 }
 0x101   : > { %3751 = vmatpush3.bf16.msra.mxu1 %v3947_v25  ;;  %3724 = vmatprep.subr.bf16.mxu0 %v3976_v1 }
 0x102   : > { %3752 = vmatprep.subr.bf16.mxu1 %v3976_v1  ;;  %v394_v63 = vpop.f32.mrb[4].mxu0 }
 0x103   : > { %v3340_v3 = vpop.f32.mrb[5].mxu0  ;;  %v502_v42 = vpop.f32.mrb[4].mxu1 }
 0x104   : > { %3725 = vmatpush3.bf16.msra.mxu0 %v3948_v32  ;;  %v503_v40 = vadd.f32 %v502_v42, %v394_v63  ;;  %v397_v44 = vpop.f32.mrb[6].mxu0  ;;  %v3368_v17 = vpop.f32.mrb[5].mxu1 }
 0x105   : > { %3753 = vmatpush3.bf16.msra.mxu1 %v3949_v37  ;;  %v3341_v21 = vpop.f32.mrb[7].mxu0  ;;  %v505_v45 = vpop.f32.mrb[6].mxu1 }
 0x106   : > { %v506_v50 = vadd.f32 %v505_v45, %v397_v44  ;;  %v3369_v47 = vpop.f32.mrb[7].mxu1 }
 0x107   : > { %3727 = vmatmul.mubr.bf16.vlgmr.msra.gmra.mrb[84].mxu0 %v2341_v43 }
 0x108   : > { %3755 = vmatmul.mubr.bf16.vlgmr.msra.gmra.mrb[84].mxu1 %v2488_v20  ;;  %3730 = vmatprep.mubr.msk.bf16.mxu0 %vm3977_vm0, %v3976_v1 }
 0x109   : > { %3758 = vmatprep.mubr.msk.bf16.mxu1 %vm3977_vm0, %v3976_v1 }
 0x10a   : > { %v402_v53 = vpop.f32.mrb[8].mxu0 }
 0x10b   : > { %v3344_v54 = vpop.f32.mrb[9].mxu0  ;;  %v510_v55 = vpop.f32.mrb[8].mxu1 }
 0x10c   : > { %v405_v61 = vpop.f32.mrb[10].mxu0  ;;  %v511_v0 = vadd.f32 %v510_v55, %v402_v53  ;;  %v3372_v6 = vpop.f32.mrb[9].mxu1 }
 0x10d   : > { %v3345_v59 = vpop.f32.mrb[11].mxu0  ;;  %v513_v58 = vpop.f32.mrb[10].mxu1 }
 0x10e   : > { %v3373_v13 = vpop.f32.mrb[11].mxu1 }
 0x10f   : > { %3731 = vmatmul.mubr.bf16.gmra.mrb[88].mxu0 %v2343_v56 }
 0x110   : > { %3759 = vmatmul.mubr.bf16.gmra.mrb[88].mxu1 %v2497_v57  ;;  %3734 = vmatprep.mubr.msk.bf16.mxu0 %vm3977_vm0, %v3976_v1 }
 0x111   : > { %3762 = vmatprep.mubr.msk.bf16.mxu1 %vm3977_vm0, %v3976_v1 }
 0x117   : > { %3735 = vmatmul.mubr.bf16.gmra.mrb[92].mxu0 %v2342_v51 }
 0x118   : > { %3763 = vmatmul.mubr.bf16.gmra.mrb[92].mxu1 %v2496_v52 }
 0x11a   : > { %v628_v48 = vpop.f32.mrb[12].mxu0 }
 0x11b   : > { %v650_v16 = vadd.f32 %v628_v48, %v4800_v22  ;;  %v783_v18 = vpop.f32.mrb[12].mxu1  ;;  %v3392_v60 = vpop.f32.mrb[13].mxu0 }
 0x11c   : > { %v3420_v2 = vpop.f32.mrb[13].mxu1  ;;  %v631_v4 = vpop.f32.mrb[14].mxu0 }
 0x11d   : > { %v805_v5 = vadd.f32 %v783_v18, %v650_v16  ;;  %v651_v7 = vadd.f32 %v631_v4, %v498_v31  ;;  %v786_v8 = vpop.f32.mrb[14].mxu1  ;;  %v3393_v9 = vpop.f32.mrb[15].mxu0 }
 0x11e   : > { %v3421_v10 = vpop.f32.mrb[15].mxu1 }
 0x11f   : > { %v806_v12 = vadd.f32 %v786_v8, %v651_v7 }
 0x122   : > { %v636_v11 = vpop.f32.mrb[16].mxu0 }
 0x123   : > { %v652_v15 = vadd.f32 %v636_v11, %v503_v40  ;;  %v3396_v19 = vpop.f32.mrb[17].mxu0  ;;  %v791_v23 = vpop.f32.mrb[16].mxu1 }
 0x124   : > { %v639_v1 = vpop.f32.mrb[18].mxu0  ;;  %v3424_v24 = vpop.f32.mrb[17].mxu1 }
 0x125   : > { %v653_v14 = vadd.f32 %v639_v1, %v506_v50  ;;  %v807_v30 = vadd.f32 %v791_v23, %v652_v15  ;;  %v794_v33 = vpop.f32.mrb[18].mxu1  ;;  %v3397_v22 = vpop.f32.mrb[19].mxu0 }
 0x126   : > { %v3425_v25 = vpop.f32.mrb[19].mxu1 }
 0x127   : > { %v808_v26 = vadd.f32 %v794_v33, %v653_v14 }
 0x12a   : > { %v644_v27 = vpop.f32.mrb[20].mxu0 }
 0x12b   : > { %v654_v28 = vadd.f32 %v644_v27, %v511_v0  ;;  %v799_v29 = vpop.f32.mrb[20].mxu1  ;;  %v3400_v31 = vpop.f32.mrb[21].mxu0 }
 0x12c   : > { %v647_v34 = vpop.f32.mrb[22].mxu0  ;;  %v3428_v32 = vpop.f32.mrb[21].mxu1 }
 0x12d   : > { %v809_v35 = vadd.f32 %v799_v29, %v654_v28  ;;  %v3401_v36 = vpop.f32.mrb[23].mxu0  ;;  %v802_v37 = vpop.f32.mrb[22].mxu1 }
 0x12e   : > { %v3429_v38 = vpop.f32.mrb[23].mxu1 }
 0x13a   : > { %v918_v39 = vpop.f32.mrb[24].mxu0 }
 0x13b   : > { %v940_v41 = vadd.f32 %v918_v39, %v805_v5  ;;  %v1091_v62 = vpop.f32.mrb[24].mxu1  ;;  %v3448_v63 = vpop.f32.mrb[25].mxu0 }
 0x13c   : > { %v3476_v3 = vpop.f32.mrb[25].mxu1  ;;  %v921_v42 = vpop.f32.mrb[26].mxu0 }
 0x13d   : > { %v1113_v43 = vadd.f32 %v1091_v62, %v940_v41  ;;  %v941_v40 = vadd.f32 %v921_v42, %v806_v12  ;;  %v1094_v44 = vpop.f32.mrb[26].mxu1  ;;  %v3449_v17 = vpop.f32.mrb[27].mxu0 }
 0x13e   : > { %v3477_v20 = vpop.f32.mrb[27].mxu1 }
 0x13f   : > { %v1114_v21 = vadd.f32 %v1094_v44, %v941_v40 }
 0x142   : > { %v926_v45 = vpop.f32.mrb[28].mxu0 }
 0x143   : > { %v942_v46 = vadd.f32 %v926_v45, %v807_v30  ;;  %v3452_v49 = vpop.f32.mrb[29].mxu0  ;;  %v1099_v50 = vpop.f32.mrb[28].mxu1 }
 0x144   : > { %v929_v47 = vpop.f32.mrb[30].mxu0  ;;  %v3480_v51 = vpop.f32.mrb[29].mxu1 }
 0x145   : > { %v943_v52 = vadd.f32 %v929_v47, %v808_v26  ;;  %v1115_v53 = vadd.f32 %v1099_v50, %v942_v46  ;;  %v1102_v54 = vpop.f32.mrb[30].mxu1  ;;  %v3453_v55 = vpop.f32.mrb[31].mxu0 }
 0x146   : > { %v3481_v56 = vpop.f32.mrb[31].mxu1 }
 0x147   : > { %v1116_v61 = vadd.f32 %v1102_v54, %v943_v52 }
 0x14a   : > { %v934_v0 = vpop.f32.mrb[32].mxu0 }
 0x14b   : > { %v944_v6 = vadd.f32 %v934_v0, %v809_v35  ;;  %v1107_v57 = vpop.f32.mrb[32].mxu1  ;;  %v3456_v59 = vpop.f32.mrb[33].mxu0 }
 0x14c   : > { %v937_v58 = vpop.f32.mrb[34].mxu0  ;;  %v3484_v13 = vpop.f32.mrb[33].mxu1 }
 0x14d   : > { %v1117_v48 = vadd.f32 %v1107_v57, %v944_v6  ;;  %v3457_v16 = vpop.f32.mrb[35].mxu0  ;;  %v1110_v18 = vpop.f32.mrb[34].mxu1 }
 0x14e   : > { %v3485_v60 = vpop.f32.mrb[35].mxu1 }
 0x15a   : > { %v1229_v2 = vpop.f32.mrb[36].mxu0 }
 0x15b   : > { %v1251_v4 = vadd.f32 %v1229_v2, %v1113_v43  ;;  %v1383_v5 = vpop.f32.mrb[36].mxu1  ;;  %v3504_v7 = vpop.f32.mrb[37].mxu0 }
 0x15c   : > { %v3532_v8 = vpop.f32.mrb[37].mxu1  ;;  %v1232_v9 = vpop.f32.mrb[38].mxu0 }
 0x15d   : > { %v1405_v10 = vadd.f32 %v1383_v5, %v1251_v4  ;;  %v1252_v12 = vadd.f32 %v1232_v9, %v1114_v21  ;;  %v1386_v11 = vpop.f32.mrb[38].mxu1  ;;  %v3505_v15 = vpop.f32.mrb[39].mxu0 }
 0x15e   : > { %v3533_v19 = vpop.f32.mrb[39].mxu1 }
 0x15f   : > { %v1406_v23 = vadd.f32 %v1386_v11, %v1252_v12 }
 0x162   : > { %v1237_v1 = vpop.f32.mrb[40].mxu0 }
 0x163   : > { %v1253_v24 = vadd.f32 %v1237_v1, %v1115_v53  ;;  %v3508_v14 = vpop.f32.mrb[41].mxu0  ;;  %v1391_v30 = vpop.f32.mrb[40].mxu1 }
 0x164   : > { %v1240_v33 = vpop.f32.mrb[42].mxu0  ;;  %v3536_v22 = vpop.f32.mrb[41].mxu1 }
 0x165   : > { %v1254_v25 = vadd.f32 %v1240_v33, %v1116_v61  ;;  %v1407_v26 = vadd.f32 %v1391_v30, %v1253_v24  ;;  %v1394_v27 = vpop.f32.mrb[42].mxu1  ;;  %v3509_v28 = vpop.f32.mrb[43].mxu0 }
 0x166   : > { %v3537_v29 = vpop.f32.mrb[43].mxu1 }
 0x167   : > { %v1408_v31 = vadd.f32 %v1394_v27, %v1254_v25 }
 0x16a   : > { %v1245_v34 = vpop.f32.mrb[44].mxu0 }
 0x16b   : > { %v1255_v32 = vadd.f32 %v1245_v34, %v1117_v48  ;;  %v1399_v35 = vpop.f32.mrb[44].mxu1  ;;  %v3512_v36 = vpop.f32.mrb[45].mxu0 }
 0x16c   : > { %v1248_v37 = vpop.f32.mrb[46].mxu0  ;;  %v3540_v38 = vpop.f32.mrb[45].mxu1 }
 0x16d   : > { %v1409_v39 = vadd.f32 %v1399_v35, %v1255_v32  ;;  %v3513_v41 = vpop.f32.mrb[47].mxu0  ;;  %v1402_v62 = vpop.f32.mrb[46].mxu1 }
 0x16e   : > { %v3541_v63 = vpop.f32.mrb[47].mxu1 }
 0x17a   : > { %v1518_v3 = vpop.f32.mrb[48].mxu0 }
 0x17b   : > { %v1540_v42 = vadd.f32 %v1518_v3, %v1405_v10  ;;  %v1691_v43 = vpop.f32.mrb[48].mxu1  ;;  %v3560_v40 = vpop.f32.mrb[49].mxu0 }
 0x17c   : > { %v3588_v44 = vpop.f32.mrb[49].mxu1  ;;  %v1521_v17 = vpop.f32.mrb[50].mxu0 }
 0x17d   : > { %v1713_v20 = vadd.f32 %v1691_v43, %v1540_v42  ;;  %v1541_v21 = vadd.f32 %v1521_v17, %v1406_v23  ;;  %v1694_v45 = vpop.f32.mrb[50].mxu1  ;;  %v3561_v46 = vpop.f32.mrb[51].mxu0 }
 0x17e   : > { %v3589_v49 = vpop.f32.mrb[51].mxu1 }
 0x17f   : > { %v1714_v50 = vadd.f32 %v1694_v45, %v1541_v21 }
 0x182   : > { %v1526_v47 = vpop.f32.mrb[52].mxu0 }
 0x183   : > { %v1542_v51 = vadd.f32 %v1526_v47, %v1407_v26  ;;  %v3564_v52 = vpop.f32.mrb[53].mxu0  ;;  %v1699_v53 = vpop.f32.mrb[52].mxu1 }
 0x184   : > { %v1529_v54 = vpop.f32.mrb[54].mxu0  ;;  %v3592_v55 = vpop.f32.mrb[53].mxu1 }
 0x185   : > { %v1543_v56 = vadd.f32 %v1529_v54, %v1408_v31  ;;  %v1715_v61 = vadd.f32 %v1699_v53, %v1542_v51  ;;  %v1702_v0 = vpop.f32.mrb[54].mxu1  ;;  %v3565_v6 = vpop.f32.mrb[55].mxu0 }
 0x186   : > { %v3593_v57 = vpop.f32.mrb[55].mxu1 }
 0x187   : > { %v1716_v59 = vadd.f32 %v1702_v0, %v1543_v56 }
 0x18a   : > { %v1534_v58 = vpop.f32.mrb[56].mxu0 }
 0x18b   : > { %v1544_v13 = vadd.f32 %v1534_v58, %v1409_v39  ;;  %v1707_v48 = vpop.f32.mrb[56].mxu1  ;;  %v3568_v16 = vpop.f32.mrb[57].mxu0 }
 0x18c   : > { %v1537_v18 = vpop.f32.mrb[58].mxu0  ;;  %v3596_v60 = vpop.f32.mrb[57].mxu1 }
 0x18d   : > { %v1717_v2 = vadd.f32 %v1707_v48, %v1544_v13  ;;  %v3569_v4 = vpop.f32.mrb[59].mxu0  ;;  %v1710_v5 = vpop.f32.mrb[58].mxu1 }
 0x18e   : > { %v3597_v7 = vpop.f32.mrb[59].mxu1 }
 0x19a   : > { %v1829_v8 = vpop.f32.mrb[60].mxu0 }
 0x19b   : > { %v1851_v9 = vadd.f32 %v1829_v8, %v1713_v20  ;;  %v1983_v10 = vpop.f32.mrb[60].mxu1  ;;  %v3616_v12 = vpop.f32.mrb[61].mxu0 }
 0x19c   : > { %v3644_v11 = vpop.f32.mrb[61].mxu1  ;;  %v1832_v15 = vpop.f32.mrb[62].mxu0 }
 0x19d   : > { %v2005_v19 = vadd.f32 %v1983_v10, %v1851_v9  ;;  %v1852_v23 = vadd.f32 %v1832_v15, %v1714_v50  ;;  %v1986_v1 = vpop.f32.mrb[62].mxu1  ;;  %v3617_v24 = vpop.f32.mrb[63].mxu0 }
 0x19e   : > { %v3645_v14 = vpop.f32.mrb[63].mxu1 }
 0x19f   : > { %v2006_v30 = vadd.f32 %v1986_v1, %v1852_v23  ;;  %v3139_v1 = vld [vmem:[%s4861_s2] ss:$0 sm:$0xff] }
 0x1a2   : > { %v1837_v33 = vpop.f32.mrb[64].mxu0 }
 0x1a3   : > { %v1853_v22 = vadd.f32 %v1837_v33, %v1715_v61  ;;  %v3620_v25 = vpop.f32.mrb[65].mxu0  ;;  %v1991_v26 = vpop.f32.mrb[64].mxu1 }
 0x1a4   : > { %v1840_v27 = vpop.f32.mrb[66].mxu0  ;;  %v3648_v28 = vpop.f32.mrb[65].mxu1 }
 0x1a5   : > { %v1854_v29 = vadd.f32 %v1840_v27, %v1716_v59  ;;  %v2007_v31 = vadd.f32 %v1991_v26, %v1853_v22  ;;  %v1994_v34 = vpop.f32.mrb[66].mxu1  ;;  %v3621_v32 = vpop.f32.mrb[67].mxu0 }
 0x1a6   : > { %v3649_v35 = vpop.f32.mrb[67].mxu1 }
 0x1a7   : > { %v2008_v36 = vadd.f32 %v1994_v34, %v1854_v29 }
 0x1aa   : > { %v1845_v37 = vpop.f32.mrb[68].mxu0 }
 0x1ab   : > { %v1855_v38 = vadd.f32 %v1845_v37, %v1717_v2  ;;  %v1999_v39 = vpop.f32.mrb[68].mxu1  ;;  %v3624_v41 = vpop.f32.mrb[69].mxu0 }
 0x1ac   : > { %v1848_v62 = vpop.f32.mrb[70].mxu0  ;;  %v3652_v63 = vpop.f32.mrb[69].mxu1 }
 0x1ad   : > { %v2009_v3 = vadd.f32 %v1999_v39, %v1855_v38  ;;  %v3625_v42 = vpop.f32.mrb[71].mxu0  ;;  %v2002_v43 = vpop.f32.mrb[70].mxu1 }
 0x1ae   : > { %v3653_v40 = vpop.f32.mrb[71].mxu1 }
 0x1ba   : > { %v2118_v44 = vpop.f32.mrb[72].mxu0 }
 0x1bb   : > { %v2140_v17 = vadd.f32 %v2118_v44, %v2005_v19  ;;  %v2291_v20 = vpop.f32.mrb[72].mxu1  ;;  %v3672_v21 = vpop.f32.mrb[73].mxu0 }
 0x1bc   : > { %v3700_v45 = vpop.f32.mrb[73].mxu1  ;;  %v2121_v46 = vpop.f32.mrb[74].mxu0 }
 0x1bd   : > { %v2313_v49 = vadd.f32 %v2291_v20, %v2140_v17  ;;  %v2141_v50 = vadd.f32 %v2121_v46, %v2006_v30  ;;  %v2294_v47 = vpop.f32.mrb[74].mxu1  ;;  %v3673_v51 = vpop.f32.mrb[75].mxu0 }
 0x1be   : > { %v3701_v52 = vpop.f32.mrb[75].mxu1 }
 0x1bf   : > { %v2314_v53 = vadd.f32 %v2294_v47, %v2141_v50 }
 0x1c2   : > { %v2126_v54 = vpop.f32.mrb[76].mxu0 }
 0x1c3   : > { %v2142_v55 = vadd.f32 %v2126_v54, %v2007_v31  ;;  %v3676_v56 = vpop.f32.mrb[77].mxu0  ;;  %v2299_v61 = vpop.f32.mrb[76].mxu1 }
 0x1c4   : > { %v2129_v0 = vpop.f32.mrb[78].mxu0  ;;  %v3704_v6 = vpop.f32.mrb[77].mxu1 }
 0x1c5   : > { %v2143_v57 = vadd.f32 %v2129_v0, %v2008_v36  ;;  %v2315_v59 = vadd.f32 %v2299_v61, %v2142_v55  ;;  %v2302_v58 = vpop.f32.mrb[78].mxu1  ;;  %v3677_v13 = vpop.f32.mrb[79].mxu0 }
 0x1c6   : > { %v3705_v48 = vpop.f32.mrb[79].mxu1 }
 0x1c7   : > { %v2316_v16 = vadd.f32 %v2302_v58, %v2143_v57 }
 0x1ca   : > { %v2134_v18 = vpop.f32.mrb[80].mxu0 }
 0x1cb   : > { %v2144_v60 = vadd.f32 %v2134_v18, %v2009_v3  ;;  %v2307_v2 = vpop.f32.mrb[80].mxu1  ;;  %v3680_v4 = vpop.f32.mrb[81].mxu0 }
 0x1cc   : > { %v2137_v5 = vpop.f32.mrb[82].mxu0  ;;  %v3708_v7 = vpop.f32.mrb[81].mxu1 }
 0x1cd   : > { %v2317_v8 = vadd.f32 %v2307_v2, %v2144_v60  ;;  %v3681_v9 = vpop.f32.mrb[83].mxu0  ;;  %v2310_v10 = vpop.f32.mrb[82].mxu1 }
 0x1ce   : > { %v3709_v12 = vpop.f32.mrb[83].mxu1 }
 0x1da   : > { %v2429_v11 = vpop.f32.mrb[84].mxu0 }
 0x1db   : > { %v2451_v15 = vadd.f32 %v2429_v11, %v2313_v49  ;;  %v2583_v19 = vpop.f32.mrb[84].mxu1  ;;  %v3728_v23 = vpop.f32.mrb[85].mxu0 }
 0x1dc   : > { %v3756_v24 = vpop.f32.mrb[85].mxu1  ;;  %v2432_v14 = vpop.f32.mrb[86].mxu0 }
 0x1dd   : > { %v2605_v30 = vadd.f32 %v2583_v19, %v2451_v15  ;;  %v2452_v33 = vadd.f32 %v2432_v14, %v2314_v53  ;;  %v2586_v22 = vpop.f32.mrb[86].mxu1  ;;  %v3729_v25 = vpop.f32.mrb[87].mxu0 }
 0x1de   : > { %v3757_v26 = vpop.f32.mrb[87].mxu1 }
 0x1df   : > { %v2617_v27 = vadd.f32 %v3139_v1, %v2605_v30  ;;  %v2606_v28 = vadd.f32 %v2586_v22, %v2452_v33 }
 0x1e1   : > { %2622 = vst [vmem:[%s4843_s11] sm:$0xff] %v2617_v27  ;;  %v2618_v29 = vadd.f32 %v3139_v1, %v2606_v28 }
 0x1e2   : > { %v2437_v31 = vpop.f32.mrb[88].mxu0 }
 0x1e3   : > { %2623 = vst [vmem:[%s4843_s11 + $0x8] sm:$0xff] %v2618_v29  ;;  %v2453_v34 = vadd.f32 %v2437_v31, %v2315_v59  ;;  %v2591_v32 = vpop.f32.mrb[88].mxu1  ;;  %v3732_v35 = vpop.f32.mrb[89].mxu0 }
 0x1e4   : > { %v3760_v36 = vpop.f32.mrb[89].mxu1  ;;  %v2440_v37 = vpop.f32.mrb[90].mxu0 }
 0x1e5   : > { %v2607_v38 = vadd.f32 %v2591_v32, %v2453_v34  ;;  %v2454_v39 = vadd.f32 %v2440_v37, %v2316_v16  ;;  %v2594_v41 = vpop.f32.mrb[90].mxu1  ;;  %v3733_v62 = vpop.f32.mrb[91].mxu0 }
 0x1e6   : > { %v3761_v63 = vpop.f32.mrb[91].mxu1 }
 0x1e7   : > { %v2619_v3 = vadd.f32 %v3139_v1, %v2607_v38  ;;  %v2608_v42 = vadd.f32 %v2594_v41, %v2454_v39 }
 0x1e9   : > { %2624 = vst [vmem:[%s4843_s11 + $0x10] sm:$0xff] %v2619_v3  ;;  %v2620_v43 = vadd.f32 %v3139_v1, %v2608_v42 }
 0x1ea   : > { %v2445_v40 = vpop.f32.mrb[92].mxu0 }
 0x1eb   : > { %2625 = vst [vmem:[%s4843_s11 + $0x18] sm:$0xff] %v2620_v43  ;;  %v2455_v44 = vadd.f32 %v2445_v40, %v2317_v8  ;;  %v2599_v17 = vpop.f32.mrb[92].mxu1  ;;  %v3736_v20 = vpop.f32.mrb[93].mxu0 }
 0x1ec   : > { %v3764_v21 = vpop.f32.mrb[93].mxu1  ;;  %v2448_v45 = vpop.f32.mrb[94].mxu0 }
 0x1ed   : > { %v2609_v46 = vadd.f32 %v2599_v17, %v2455_v44  ;;  %v2602_v49 = vpop.f32.mrb[94].mxu1  ;;  %v3737_v50 = vpop.f32.mrb[95].mxu0 }
 0x1ee   : > { %v3765_v47 = vpop.f32.mrb[95].mxu1 }
 0x1ef   : > { %v2621_v51 = vadd.f32 %v3139_v1, %v2609_v46 }
 0x1f1   : > { %2626 = vst [vmem:[%s4843_s11 + $0x20] sm:$0xff] %v2621_v51 }
 0x1f2 PF: > { %s13_s14 = sadd.s32 1, %s3974_s14   ;;  %s4863_s12 = smov %s3970_s13 }
 0x1f3   : > { %p10_p5 = scmp.ge.s32.totalorder %s13_s14, 4   ;;  %s4864_s13 = smov %s4866_s15 }
 0x1f5   :  { %12 = sbr.rel (!%p10_p5) target bundleno = 2 (0x2), region = 83 }

</bundles_post_ra>
